<compile_context>
chip_gen: v7x
topology: tpu7x:2x2x1
jax: 0.10.0
libtpu: 0.0.40
codegen_flags: <defaults>
</compile_context>

<pallas_src>
import functools

import numpy as np
import jax
import jax.numpy as jnp
from jax.experimental import pallas as pl
from jax.experimental.pallas import tpu as pltpu

LANE = 128                        # every feature axis is padded to 128 lanes
MATMUL_DTYPE = jnp.bfloat16       # MXU operand dtype (accumulation stays f32)
VMEM_LIMIT = 32 * 1024 * 1024     # explicit scoped-VMEM budget (v5e/v6e/v7x safe)


def _round_up(n, m):
    return (n + m - 1) // m * m


def _pad2d(a, rows, cols):
    r, c = a.shape
    return jnp.pad(a, ((0, rows - r), (0, cols - c)))


def _concat_pad_lanes(parts):
    """Concatenate logical feature blocks and zero-pad to a 128-lane multiple."""
    cat = jnp.concatenate(parts, axis=-1)
    w = _round_up(cat.shape[1], LANE)
    return jnp.pad(cat, ((0, 0), (0, w - cat.shape[1]))).astype(MATMUL_DTYPE)


# --------------------------------------------------------------------------
# Host-side graph preprocessing: sort edges by target node and build the
# per-node-tile edge-block schedule that the kernel prefetches through SMEM.
# --------------------------------------------------------------------------
def prepare_graph(edge_index, num_nodes, *, max_node_tile=256,
                  max_edge_tile=1024):
    assert max_edge_tile % 128 == 0 and max_node_tile % 8 == 0
    ei = np.asarray(edge_index)
    src = ei[0].astype(np.int32)
    tgt = ei[1].astype(np.int32)
    E = int(src.shape[0])
    N = int(num_nodes)

    # node tiling: keep >= 2 tiles whenever possible (feeds both v7x TCs)
    if N > max_node_tile:
        tn = max_node_tile
    elif N > 8:
        tn = _round_up(max(-(-N // 2), 8), 8)
    else:
        tn = _round_up(max(N, 1), 8)
    n_pad = _round_up(N, tn)
    n_tiles = n_pad // tn

    # edge tiling
    te = max_edge_tile if E >= max_edge_tile else _round_up(max(E, 8), 8)
    e_pad = _round_up(E, te)
    n_eblocks = e_pad // te

    # sort edges by aggregation target -> contiguous segment per node tile
    perm = np.argsort(tgt, kind='stable').astype(np.int32)
    tgt_s = tgt[perm]
    src_s = src[perm]
    pad_e = e_pad - E
    tgt_pad = np.concatenate([tgt_s, np.full((pad_e,), n_pad, np.int32)])
    src_pad = np.concatenate([src_s, np.zeros((pad_e,), np.int32)])
    tgt_gather = np.concatenate([tgt_s, np.zeros((pad_e,), np.int32)])

    bounds = np.arange(n_tiles + 1, dtype=np.int64) * tn
    starts = np.searchsorted(tgt_pad, bounds[:-1], side='left')
    ends = np.searchsorted(tgt_pad, bounds[1:], side='left')
    blk_start = (starts // te).astype(np.int32)
    blk_last = (np.maximum(ends - 1, starts) // te).astype(np.int32)
    nblk = np.where(ends > starts, blk_last - blk_start + 1, 0).astype(np.int32)
    kmax = max(int(nblk.max()), 1)
    step = np.minimum(np.arange(kmax, dtype=np.int32)[None, :],
                      np.maximum(nblk - 1, 0)[:, None])
    blk_tbl = np.clip(blk_start[:, None] + step, 0, n_eblocks - 1).astype(np.int32)

    meta = dict(tn=tn, te=te, n_pad=n_pad, e_pad=e_pad,
                n_tiles=n_tiles, n_eblocks=n_eblocks, kmax=kmax)
    graph = dict(perm=jnp.asarray(perm),
                 src=jnp.asarray(src_pad),
                 tgt_gather=jnp.asarray(tgt_gather),
                 tgt_row=jnp.asarray(tgt_pad).reshape(1, e_pad),
                 blk_tbl=jnp.asarray(blk_tbl),
                 nblk=jnp.asarray(nblk))
    return meta, graph


# --------------------------------------------------------------------------
# Kernel 1: fused EGraphSage layer (edge_mode = 1, aggr = 'mean')
#   grid = (node tiles [parallel], per-tile edge blocks [arbitrary reduction])
#   accumulate:  m   = relu([x_j | e] @ Wm + bm)   (single K-stacked MXU dot)
#                m[:, deg_lane] = 1                 (degree rides the one-hot)
#                acc += onehot(tgt in tile) @ m     (MXU, bf16 -> f32 acc)
#   finalize:    aggr = acc / deg  (0 if deg == 0)
#                h = relu([aggr | x] @ Wa + ba)     (single K=256 stacked dot)
#                h = L2-normalize(h)                (rsqrt -> EUP)
#                [last layer] h = relu(h@W1+b1)@W2+b2   (fused post-MLP)
# --------------------------------------------------------------------------
def _egsage_layer_kernel(blk_tbl_ref, nblk_ref,          # scalar prefetch (SMEM)
                         tgt_ref, min_ref, x_ref,
                         wm_ref, bm_ref, wa_ref, ba_ref, *rest,
                         normalize, fuse_post, deg_lane):
    if fuse_post:
        w1_ref, b1_ref, w2_ref, b2_ref, o_ref, acc_ref = rest
    else:
        o_ref, acc_ref = rest

    i = pl.program_id(0)          # node-row tile     ("parallel")
    k = pl.program_id(1)          # edge-block walk   ("arbitrary")
    tn = acc_ref.shape[0]

    @pl.when(k == 0)
    def _init():
        acc_ref[...] = jnp.zeros_like(acc_ref)

    @pl.when(k < nblk_ref[i])
    def _accumulate():
        # fused message for this edge block (never written to HBM)
        m = jnp.dot(min_ref[...], wm_ref[...],
                    preferred_element_type=jnp.float32)
        m = jnp.maximum(m + bm_ref[...], 0.0)
        # plant an exact 1.0 in an otherwise-zero padded lane so the degree
        # count rides the same one-hot matmul (no second mask / reduce)
        lane = jax.lax.broadcasted_iota(jnp.int32, m.shape, 1)
        m = jnp.where(lane == deg_lane, 1.0, m)
        # on-the-fly one-hot adjacency tile (never materialized in HBM);
        # targets outside this node tile (incl. padded sentinel edges) -> 0
        node_ids = i * tn + jax.lax.broadcasted_iota(jnp.int32, (tn, 1), 0)
        onehot = (node_ids == tgt_ref[...]).astype(MATMUL_DTYPE)
        acc_ref[...] += jnp.dot(onehot, m.astype(MATMUL_DTYPE),
                                preferred_element_type=jnp.float32)

    @pl.when(k == pl.num_programs(1) - 1)
    def _finalize():
        acc = acc_ref[...]
        deg = acc[:, deg_lane:deg_lane + 1]
        inv = jnp.where(deg > 0.0, 1.0 / jnp.maximum(deg, 1.0), 0.0)
        aggr = acc * inv                                   # scatter-mean
        # K-stacked node update: one (tn,256) x (256,128) dot over [aggr | x]
        upd_in = jnp.concatenate([aggr.astype(MATMUL_DTYPE), x_ref[...]],
                                 axis=-1)
        h = jnp.dot(upd_in, wa_ref[...], preferred_element_type=jnp.float32)
        h = jnp.maximum(h + ba_ref[...], 0.0)
        if normalize:
            ssq = jnp.sum(h * h, axis=-1, keepdims=True)
            h = h * jax.lax.rsqrt(jnp.maximum(ssq, 1e-24))  # == F.normalize
        if fuse_post:
            h1 = jnp.dot(h.astype(MATMUL_DTYPE), w1_ref[...],
                         preferred_element_type=jnp.float32)
            h1 = jnp.maximum(h1 + b1_ref[...], 0.0)
            # TODO(synk): dropout is identity at inference; train-mode omitted.
            h = jnp.dot(h1.astype(MATMUL_DTYPE), w2_ref[...],
                        preferred_element_type=jnp.float32) + b2_ref[...]
        o_ref[...] = h.astype(o_ref.dtype)


def egsage_layer(blk_tbl, nblk, tgt_row, msg_in, xpad,
                 wm, bm, wa, ba, post, *,
                 normalize, deg_lane, tn, te, kmax, out_dtype):
    n_pad, d_x = xpad.shape
    e_pad, d_m = msg_in.shape
    d_out = wm.shape[1]
    n_tiles = n_pad // tn
    fuse_post = post is not None

    kern = functools.partial(_egsage_layer_kernel, normalize=normalize,
                             fuse_post=fuse_post, deg_lane=deg_lane)

    in_specs = [
        pl.BlockSpec((1, te), lambda i, k, tbl, nb: (0, tbl[i, k])),    # tgt ids
        pl.BlockSpec((te, d_m), lambda i, k, tbl, nb: (tbl[i, k], 0)),  # [x_j|e]
        pl.BlockSpec((tn, d_x), lambda i, k, tbl, nb: (i, 0)),          # x
        pl.BlockSpec(wm.shape, lambda i, k, tbl, nb: (0, 0)),           # Wm
        pl.BlockSpec(bm.shape, lambda i, k, tbl, nb: (0, 0)),           # bm
        pl.BlockSpec(wa.shape, lambda i, k, tbl, nb: (0, 0)),           # Wa (stacked)
        pl.BlockSpec(ba.shape, lambda i, k, tbl, nb: (0, 0)),           # ba
    ]
    args = [tgt_row, msg_in, xpad, wm, bm, wa, ba]
    if fuse_post:
        in_specs += [
            pl.BlockSpec(post['w1'].shape, lambda i, k, tbl, nb: (0, 0)),
            pl.BlockSpec(post['b1'].shape, lambda i, k, tbl, nb: (0, 0)),
            pl.BlockSpec(post['w2'].shape, lambda i, k, tbl, nb: (0, 0)),
            pl.BlockSpec(post['b2'].shape, lambda i, k, tbl, nb: (0, 0)),
        ]
        args += [post['w1'], post['b1'], post['w2'], post['b2']]

    return pl.pallas_call(
        kern,
        out_shape=jax.ShapeDtypeStruct((n_pad, d_out), out_dtype),
        grid_spec=pltpu.PrefetchScalarGridSpec(
            num_scalar_prefetch=2,
            grid=(n_tiles, kmax),
            in_specs=in_specs,
            out_specs=pl.BlockSpec((tn, d_out), lambda i, k, tbl, nb: (i, 0)),
            scratch_shapes=[pltpu.VMEM((tn, d_out), jnp.float32)],  # acc (+deg lane)
        ),
        compiler_params=pltpu.CompilerParams(
            dimension_semantics=("parallel", "arbitrary"),
            vmem_limit_bytes=VMEM_LIMIT,
        ),
    )(blk_tbl, nblk, *args)


# --------------------------------------------------------------------------
# Kernel 2: edge-attr update MLP   e' = relu([x_i | x_j | e] @ W + b)
#           (single K-stacked dot; bf16 output)
# --------------------------------------------------------------------------
def _edge_update_kernel(ein_ref, w_ref, b_ref, o_ref):
    e = jnp.dot(ein_ref[...], w_ref[...], preferred_element_type=jnp.float32)
    o_ref[...] = jnp.maximum(e + b_ref[...], 0.0).astype(o_ref.dtype)


def edge_update(ein, w, b, *, te):
    e_pad, d_in = ein.shape
    d_out = w.shape[1]
    return pl.pallas_call(
        _edge_update_kernel,
        out_shape=jax.ShapeDtypeStruct((e_pad, d_out), MATMUL_DTYPE),
        grid_spec=pltpu.PrefetchScalarGridSpec(
            num_scalar_prefetch=0,
            grid=(e_pad // te,),
            in_specs=[pl.BlockSpec((te, d_in), lambda i: (i, 0)),
                      pl.BlockSpec(w.shape, lambda i: (0, 0)),
                      pl.BlockSpec(b.shape, lambda i: (0, 0))],
            out_specs=pl.BlockSpec((te, d_out), lambda i: (i, 0)),
        ),
        compiler_params=pltpu.CompilerParams(
            dimension_semantics=("parallel",),
            vmem_limit_bytes=VMEM_LIMIT,
        ),
    )(ein, w, b)


# --------------------------------------------------------------------------
# Parameters (deterministic synthetic init — logical shapes match nn.Module)
# --------------------------------------------------------------------------
def init_params(key, node_input_dim, edge_input_dim, node_dim, edge_dim,
                n_layers, post_hidden):
    def lin(k, fan_in, fan_out):
        kw, kb = jax.random.split(k)
        w = jax.random.normal(kw, (fan_in, fan_out), jnp.float32) / jnp.sqrt(fan_in)
        b = jax.random.normal(kb, (1, fan_out), jnp.float32) * 0.01
        return w, b

    keys = jax.random.split(key, 3 * n_layers + 2)
    ki = iter(keys)
    convs, edge_mlps = [], []
    for l in range(n_layers):
        in_dim = node_input_dim if l == 0 else node_dim
        e_dim = edge_input_dim if l == 0 else edge_dim
        wm, bm = lin(next(ki), in_dim + e_dim, node_dim)      # message_lin([x_j|e])
        wa, ba = lin(next(ki), node_dim + in_dim, node_dim)   # agg_lin([aggr|x])
        convs.append(dict(wm=wm, bm=bm, wa=wa, ba=ba))
        we, be = lin(next(ki), 2 * node_dim + e_dim, edge_dim)  # mlp([x_i|x_j|e])
        edge_mlps.append(dict(w=we, b=be))
    w1, b1 = lin(next(ki), node_dim, post_hidden)
    w2, b2 = lin(next(ki), post_hidden, node_dim)
    return dict(convs=convs, edge_mlps=edge_mlps,
                post=dict(w1=w1, b1=b1, w2=w2, b2=b2),
                dims=dict(node_dim=node_dim, edge_dim=edge_dim))


def pad_params(params):
    """Pad weights for the lane-padded, K-stacked kernel layout (bf16/f32)."""
    node_dim = params['dims']['node_dim']
    assert node_dim < LANE

    def wpad(a, rows=None, cols=None):
        rows = _round_up(a.shape[0], LANE) if rows is None else rows
        cols = _round_up(a.shape[1], LANE) if cols is None else cols
        return _pad2d(a, rows, cols).astype(MATMUL_DTYPE)

    def bpad(a):
        return _pad2d(a, 1, _round_up(a.shape[1], LANE)).astype(jnp.float32)

    convs = []
    for p in params['convs']:
        # stacked agg weight: rows [0:128) hit the lane-padded aggr block,
        # rows [128:256) hit the lane-padded x block.
        wa_a = wpad(p['wa'][:node_dim], rows=LANE)
        wa_x = wpad(p['wa'][node_dim:], rows=LANE)
        convs.append(dict(wm=wpad(p['wm']), bm=bpad(p['bm']),
                          wa=jnp.concatenate([wa_a, wa_x], axis=0),
                          ba=bpad(p['ba'])))
    edge_mlps = [dict(w=wpad(q['w']), b=bpad(q['b']))
                 for q in params['edge_mlps']]
    pm = params['post']
    post = dict(w1=wpad(pm['w1']), b1=bpad(pm['b1']),
                w2=wpad(pm['w2']), b2=bpad(pm['b2']))
    return dict(convs=convs, edge_mlps=edge_mlps, post=post)


# --------------------------------------------------------------------------
# GNNStack.forward (concat_states=False)
# --------------------------------------------------------------------------
def gnn_stack_forward(padded_params, x, edge_attr, graph, *, meta,
                      node_dim, edge_dim, normalize_embs=None):
    N, d_in = x.shape
    E, d_e0 = edge_attr.shape
    tn, te = meta['tn'], meta['te']
    n_pad, e_pad, kmax = meta['n_pad'], meta['e_pad'], meta['kmax']
    n_layers = len(padded_params['convs'])
    if normalize_embs is None:
        normalize_embs = (True,) * n_layers

    perm = graph['perm']
    src = graph['src']
    tgtg = graph['tgt_gather']
    tgt_row = graph['tgt_row']
    blk_tbl = graph['blk_tbl']
    nblk = graph['nblk']

    x16 = x.astype(MATMUL_DTYPE)
    # node features: bf16, 128-lane padded, padded rows zero
    xpad = jnp.zeros((n_pad, LANE), MATMUL_DTYPE).at[:N, :d_in].set(x16)
    # edge attrs in sorted-edge order, logical lanes only, padded rows zero
    ea_log = jnp.zeros((e_pad, d_e0), MATMUL_DTYPE).at[:E].set(
        jnp.take(edge_attr.astype(MATMUL_DTYPE), perm, axis=0))
    # layer-0 x_j gather straight from the (logical, bf16) input features
    xj_log = jnp.take(x16, src, axis=0)                     # (e_pad, d_in)

    for l in range(n_layers):
        p = padded_params['convs'][l]
        fuse = (l == n_layers - 1)
        msg_in = _concat_pad_lanes([xj_log, ea_log])        # [x_j | e] -> 128 lanes
        post = padded_params['post'] if fuse else None
        x_new = egsage_layer(
            blk_tbl, nblk, tgt_row, msg_in, xpad,
            p['wm'], p['bm'], p['wa'], p['ba'], post,
            normalize=bool(normalize_embs[l]), deg_lane=node_dim,
            tn=tn, te=te, kmax=kmax,
            out_dtype=jnp.float32 if fuse else MATMUL_DTYPE)
        if fuse:
            # post-MLP already applied in the fused finalize of the last layer
            return x_new[:N, :node_dim]
        # edge-attr update (the one after the LAST conv is unused by forward()
        # and therefore skipped). x[src] gather is reused as next layer's x_j.
        q = padded_params['edge_mlps'][l]
        x_log = x_new[:, :node_dim]
        xr = jnp.take(x_log, src, axis=0)                   # x_i (edge upd) / x_j (next msg)
        xc = jnp.take(x_log, tgtg, axis=0)                  # x_j (edge upd)
        ea_full = edge_update(_concat_pad_lanes([xr, xc, ea_log]),
                              q['w'], q['b'], te=te)
        ea_log = ea_full[:, :edge_dim]
        xj_log = xr
        xpad = x_new


# --------------------------------------------------------------------------
# Pure-JAX reference with the same bf16-operand / f32-accumulate discipline.
# --------------------------------------------------------------------------
def reference_forward(params, x, edge_attr, edge_index, *, normalize_embs=None):
    src = edge_index[0]
    tgt = edge_index[1]
    N = x.shape[0]
    n_layers = len(params['convs'])
    if normalize_embs is None:
        normalize_embs = (True,) * n_layers

    def bdot(a, b):
        return jnp.dot(a.astype(MATMUL_DTYPE), b.astype(MATMUL_DTYPE),
                       preferred_element_type=jnp.float32)

    x = x.astype(MATMUL_DTYPE).astype(jnp.float32)
    edge_attr = edge_attr.astype(MATMUL_DTYPE).astype(jnp.float32)
    for l in range(n_layers):
        p = params['convs'][l]
        m_in = jnp.concatenate([x[src], edge_attr], axis=-1)
        m = jnp.maximum(bdot(m_in, p['wm']) + p['bm'], 0.0)
        m16 = m.astype(MATMUL_DTYPE).astype(jnp.float32)
        seg = jnp.zeros((N, m.shape[1]), jnp.float32).at[tgt].add(m16)
        deg = jnp.zeros((N, 1), jnp.float32).at[tgt].add(1.0)
        aggr = seg * jnp.where(deg > 0.0, 1.0 / jnp.maximum(deg, 1.0), 0.0)
        u_in = jnp.concatenate([aggr, x], axis=-1)
        h = jnp.maximum(bdot(u_in, p['wa']) + p['ba'], 0.0)
        if normalize_embs[l]:
            h = h * jax.lax.rsqrt(
                jnp.maximum(jnp.sum(h * h, axis=-1, keepdims=True), 1e-24))
        x = h.astype(MATMUL_DTYPE).astype(jnp.float32)
        if l < n_layers - 1:   # last edge update is unused by forward()
            q = params['edge_mlps'][l]
            e_in = jnp.concatenate([x[src], x[tgt], edge_attr], axis=-1)
            edge_attr = jnp.maximum(bdot(e_in, q['w']) + q['b'], 0.0)
            edge_attr = edge_attr.astype(MATMUL_DTYPE).astype(jnp.float32)
    pm = params['post']
    h = jnp.maximum(bdot(x, pm['w1']) + pm['b1'], 0.0)
    return bdot(h, pm['w2']) + pm['b2']


if __name__ == "__main__":
    # Small synthetic graph consistent with the module's forward signature.
    N = 200              # number of nodes
    E = 720              # number of edges
    NODE_IN = 8          # node_input_dim
    EDGE_IN = 1          # edge_input_dim (scalar edge value, as in GRAPE)
    NODE_DIM = 32        # node_dim
    EDGE_DIM = 32        # edge_dim
    N_LAYERS = 3         # model_types = ['EGSAGE'] * 3
    POST_HID = 32        # node_post_mlp_hiddens = [32]

    key = jax.random.PRNGKey(0)
    k_x, k_e, k_src, k_tgt, k_p = jax.random.split(key, 5)

    x = jax.random.normal(k_x, (N, NODE_IN), jnp.float32)
    edge_attr = jax.random.normal(k_e, (E, EDGE_IN), jnp.float32)
    edge_index = jnp.stack([
        jax.random.randint(k_src, (E,), 0, N),
        jax.random.randint(k_tgt, (E,), 0, N),
    ]).astype(jnp.int32)

    params = init_params(k_p, NODE_IN, EDGE_IN, NODE_DIM, EDGE_DIM,
                         N_LAYERS, POST_HID)
    padded = pad_params(params)

    # host-side: sort edges by target and build the prefetch block schedule
    meta, graph = prepare_graph(np.asarray(edge_index), N,
                                max_node_tile=256, max_edge_tile=1024)

    fwd = jax.jit(functools.partial(gnn_stack_forward, meta=meta,
                                    node_dim=NODE_DIM, edge_dim=EDGE_DIM))
    out = fwd(padded, x, edge_attr, graph)
    out = jax.block_until_ready(out)

    assert out.shape == (N, NODE_DIM)
    assert bool(jnp.all(jnp.isfinite(out)))

    ref = reference_forward(params, x, edge_attr, edge_index)
    assert bool(jnp.allclose(out, ref, atol=5e-2, rtol=5e-2)), (
        float(jnp.max(jnp.abs(out - ref))))

    print("KERNEL_OK")
</pallas_src>

<mosaic_0001>
module attributes {stable_mosaic.version = 11 : i64} {
  func.func @_egsage_layer_kernel(%arg0: i32, %arg1: i32, %arg2: memref<2x1xi32, #tpu.memory_space<smem>>, %arg3: memref<2xi32, #tpu.memory_space<smem>>, %arg4: memref<1x720xi32, #tpu.memory_space<vmem>>, %arg5: memref<720x128xbf16, #tpu.memory_space<vmem>>, %arg6: memref<104x128xbf16, #tpu.memory_space<vmem>>, %arg7: memref<128x128xbf16, #tpu.memory_space<vmem>>, %arg8: memref<1x128xf32, #tpu.memory_space<vmem>>, %arg9: memref<256x128xbf16, #tpu.memory_space<vmem>>, %arg10: memref<1x128xf32, #tpu.memory_space<vmem>>, %arg11: memref<104x128xbf16, #tpu.memory_space<vmem>>, %arg12: memref<104x128xf32, #tpu.memory_space<vmem>>) attributes {dimension_semantics = [#tpu.dimension_semantics<parallel>, #tpu.dimension_semantics<arbitrary>], iteration_bounds = array<i64: 2, 1>, scalar_prefetch = 2 : i64, scratch_operands = 1 : i64, tpu.core_type = #tpu.core_type<tc>, window_params = [{transform_indices = @transform_0, window_bounds = array<i64: 1, 720>}, {transform_indices = @transform_1, window_bounds = array<i64: 720, 128>}, {transform_indices = @transform_2, window_bounds = array<i64: 104, 128>}, {pipeline_mode = #tpu.pipeline_mode<synchronous>, transform_indices = @transform_3, window_bounds = array<i64: 128, 128>}, {pipeline_mode = #tpu.pipeline_mode<synchronous>, transform_indices = @transform_4, window_bounds = array<i64: 1, 128>}, {pipeline_mode = #tpu.pipeline_mode<synchronous>, transform_indices = @transform_5, window_bounds = array<i64: 256, 128>}, {pipeline_mode = #tpu.pipeline_mode<synchronous>, transform_indices = @transform_6, window_bounds = array<i64: 1, 128>}, {transform_indices = @transform_7, window_bounds = array<i64: 104, 128>}]} {
    %c0_i32 = arith.constant 0 : i32
    %0 = arith.cmpi eq, %arg1, %c0_i32 : i32
    %1 = arith.extui %0 : i1 to i32
    %c0_i32_0 = arith.constant 0 : i32
    %2 = arith.cmpi ne, %1, %c0_i32_0 : i32
    scf.if %2 {
      %cst = arith.constant 0.000000e+00 : f32
      %11 = vector.broadcast %cst : f32 to vector<104x128xf32>
      %c0 = arith.constant 0 : index
      %c0_4 = arith.constant 0 : index
      %12 = vector.load %arg12[%c0, %c0_4] : memref<104x128xf32, #tpu.memory_space<vmem>>, vector<104x128xf32>
      tpu.vector_store %arg12[%c0, %c0_4], %11 {strides = array<i32>} : memref<104x128xf32, #tpu.memory_space<vmem>>, vector<104x128xf32>,
    } else {
    }
    %3 = arith.index_cast %arg0 : i32 to index
    %4 = memref.load %arg3[%3] : memref<2xi32, #tpu.memory_space<smem>>
    %5 = arith.cmpi slt, %arg1, %4 : i32
    %6 = arith.extui %5 : i1 to i32
    %c0_i32_1 = arith.constant 0 : i32
    %7 = arith.cmpi ne, %6, %c0_i32_1 : i32
    scf.if %7 {
      %c0 = arith.constant 0 : index
      %c0_4 = arith.constant 0 : index
      %11 = vector.load %arg5[%c0, %c0_4] : memref<720x128xbf16, #tpu.memory_space<vmem>>, vector<720x128xbf16>
      %c0_5 = arith.constant 0 : index
      %c0_6 = arith.constant 0 : index
      %12 = vector.load %arg7[%c0_5, %c0_6] : memref<128x128xbf16, #tpu.memory_space<vmem>>, vector<128x128xbf16>
      %cst = arith.constant dense<0.000000e+00> : vector<720x128xf32>
      %13 = tpu.matmul %11, %12, %cst {dimension_numbers = #tpu.dot_dimension_numbers<[1], [0], [0], [1], [0, 0, 1, 1], [], []>} : vector<720x128xbf16>, vector<128x128xbf16>, vector<720x128xf32> -> vector<720x128xf32>
      %c0_7 = arith.constant 0 : index
      %c0_8 = arith.constant 0 : index
      %14 = vector.load %arg8[%c0_7, %c0_8] : memref<1x128xf32, #tpu.memory_space<vmem>>, vector<1x128xf32>
      %15 = vector.broadcast %14 : vector<1x128xf32> to vector<720x128xf32>
      %16 = arith.addf %13, %15 : vector<720x128xf32>
      %cst_9 = arith.constant 0.000000e+00 : f32
      %17 = vector.broadcast %cst_9 : f32 to vector<720x128xf32>
      %18 = arith.maximumf %16, %17 : vector<720x128xf32>
      %19 = tpu.iota {dimensions = array<i32: 1>} : vector<720x128xi32>
      %c32_i32 = arith.constant 32 : i32
      %20 = vector.broadcast %c32_i32 : i32 to vector<720x128xi32>
      %21 = arith.cmpi eq, %19, %20 : vector<720x128xi32>
      %cst_10 = arith.constant 1.000000e+00 : f32
      %22 = vector.broadcast %cst_10 : f32 to vector<720x128xf32>
      %23 = arith.select %21, %22, %18 : vector<720x128xi1>, vector<720x128xf32>
      %c104_i32 = arith.constant 104 : i32
      %24 = arith.muli %arg0, %c104_i32 : i32
      %25 = tpu.iota {dimensions = array<i32: 0>} : vector<104x1xi32>
      %26 = vector.broadcast %24 : i32 to vector<104x1xi32>
      %27 = arith.addi %26, %25 : vector<104x1xi32>
      %c0_11 = arith.constant 0 : index
      %c0_12 = arith.constant 0 : index
      %28 = vector.load %arg4[%c0_11, %c0_12] : memref<1x720xi32, #tpu.memory_space<vmem>>, vector<1x720xi32>
      %29 = vector.broadcast %27 : vector<104x1xi32> to vector<104x720xi32>
      %30 = vector.broadcast %28 : vector<1x720xi32> to vector<104x720xi32>
      %31 = arith.cmpi eq, %29, %30 : vector<104x720xi32>
      %32 = arith.extui %31 : vector<104x720xi1> to vector<104x720xi32>
      %33 = arith.sitofp %32 : vector<104x720xi32> to vector<104x720xf32>
      %34 = arith.truncf %33 : vector<104x720xf32> to vector<104x720xbf16>
      %c0_13 = arith.constant 0 : index
      %c0_14 = arith.constant 0 : index
      %35 = vector.load %arg12[%c0_13, %c0_14] : memref<104x128xf32, #tpu.memory_space<vmem>>, vector<104x128xf32>
      %36 = arith.truncf %23 : vector<720x128xf32> to vector<720x128xbf16>
      %cst_15 = arith.constant dense<0.000000e+00> : vector<104x128xf32>
      %37 = tpu.matmul %34, %36, %cst_15 {dimension_numbers = #tpu.dot_dimension_numbers<[1], [0], [0], [1], [0, 0, 1, 1], [], []>} : vector<104x720xbf16>, vector<720x128xbf16>, vector<104x128xf32> -> vector<104x128xf32>
      %38 = arith.addf %35, %37 : vector<104x128xf32>
      %c0_16 = arith.constant 0 : index
      %c0_17 = arith.constant 0 : index
      %39 = vector.load %arg12[%c0_16, %c0_17] : memref<104x128xf32, #tpu.memory_space<vmem>>, vector<104x128xf32>
      tpu.vector_store %arg12[%c0_16, %c0_17], %38 {strides = array<i32>} : memref<104x128xf32, #tpu.memory_space<vmem>>, vector<104x128xf32>,
    } else {
    }
    %c0_i32_2 = arith.constant 0 : i32
    %8 = arith.cmpi eq, %arg1, %c0_i32_2 : i32
    %9 = arith.extui %8 : i1 to i32
    %c0_i32_3 = arith.constant 0 : i32
    %10 = arith.cmpi ne, %9, %c0_i32_3 : i32
    scf.if %10 {
      %c0 = arith.constant 0 : index
      %c0_4 = arith.constant 0 : index
      %11 = vector.load %arg12[%c0, %c0_4] : memref<104x128xf32, #tpu.memory_space<vmem>>, vector<104x128xf32>
      %12 = vector.extract_strided_slice %11 {offsets = [0, 32], sizes = [104, 1], strides = [1, 1]} : vector<104x128xf32> to vector<104x1xf32>
      %cst = arith.constant 0.000000e+00 : f32
      %13 = vector.broadcast %cst : f32 to vector<104x1xf32>
      %14 = arith.cmpf ogt, %12, %13 : vector<104x1xf32>
      %cst_5 = arith.constant 1.000000e+00 : f32
      %15 = vector.broadcast %cst_5 : f32 to vector<104x1xf32>
      %16 = arith.maximumf %12, %15 : vector<104x1xf32>
      %cst_6 = arith.constant 1.000000e+00 : f32
      %17 = vector.broadcast %cst_6 : f32 to vector<104x1xf32>
      %18 = arith.divf %17, %16 : vector<104x1xf32>
      %cst_7 = arith.constant 0.000000e+00 : f32
      %19 = vector.broadcast %cst_7 : f32 to vector<104x1xf32>
      %20 = arith.select %14, %18, %19 : vector<104x1xi1>, vector<104x1xf32>
      %21 = vector.broadcast %20 : vector<104x1xf32> to vector<104x128xf32>
      %22 = arith.mulf %11, %21 : vector<104x128xf32>
      %23 = arith.truncf %22 : vector<104x128xf32> to vector<104x128xbf16>
      %c0_8 = arith.constant 0 : index
      %c0_9 = arith.constant 0 : index
      %24 = vector.load %arg6[%c0_8, %c0_9] : memref<104x128xbf16, #tpu.memory_space<vmem>>, vector<104x128xbf16>
      %25 = tpu.concatenate %23, %24 in 1 : vector<104x128xbf16>, vector<104x128xbf16> -> vector<104x256xbf16>
      %c0_10 = arith.constant 0 : index
      %c0_11 = arith.constant 0 : index
      %26 = vector.load %arg9[%c0_10, %c0_11] : memref<256x128xbf16, #tpu.memory_space<vmem>>, vector<256x128xbf16>
      %cst_12 = arith.constant dense<0.000000e+00> : vector<104x128xf32>
      %27 = tpu.matmul %25, %26, %cst_12 {dimension_numbers = #tpu.dot_dimension_numbers<[1], [0], [0], [1], [0, 0, 1, 1], [], []>} : vector<104x256xbf16>, vector<256x128xbf16>, vector<104x128xf32> -> vector<104x128xf32>
      %c0_13 = arith.constant 0 : index
      %c0_14 = arith.constant 0 : index
      %28 = vector.load %arg10[%c0_13, %c0_14] : memref<1x128xf32, #tpu.memory_space<vmem>>, vector<1x128xf32>
      %29 = vector.broadcast %28 : vector<1x128xf32> to vector<104x128xf32>
      %30 = arith.addf %27, %29 : vector<104x128xf32>
      %cst_15 = arith.constant 0.000000e+00 : f32
      %31 = vector.broadcast %cst_15 : f32 to vector<104x128xf32>
      %32 = arith.maximumf %30, %31 : vector<104x128xf32>
      %33 = arith.mulf %32, %32 : vector<104x128xf32>
      %cst_16 = arith.constant dense<0.000000e+00> : vector<104xf32>
      %34 = vector.multi_reduction <add>, %33, %cst_16 [1] : vector<104x128xf32> to vector<104xf32>
      %35 = vector.shape_cast %34 : vector<104xf32> to vector<104x1xf32>
      %cst_17 = arith.constant 1.000000e-24 : f32
      %36 = vector.broadcast %cst_17 : f32 to vector<104x1xf32>
      %37 = arith.maximumf %35, %36 : vector<104x1xf32>
      %38 = math.rsqrt %37 : vector<104x1xf32>
      %39 = vector.broadcast %38 : vector<104x1xf32> to vector<104x128xf32>
      %40 = arith.mulf %32, %39 : vector<104x128xf32>
      %41 = arith.truncf %40 : vector<104x128xf32> to vector<104x128xbf16>
      %c0_18 = arith.constant 0 : index
      %c0_19 = arith.constant 0 : index
      %42 = vector.load %arg11[%c0_18, %c0_19] : memref<104x128xbf16, #tpu.memory_space<vmem>>, vector<104x128xbf16>
      tpu.vector_store %arg11[%c0_18, %c0_19], %41 {strides = array<i32>} : memref<104x128xbf16, #tpu.memory_space<vmem>>, vector<104x128xbf16>,
    } else {
    }
    return
  }
  func.func @transform_0(%arg0: i32, %arg1: i32, %arg2: memref<2x1xi32, #tpu.memory_space<smem>>, %arg3: memref<2xi32, #tpu.memory_space<smem>>) -> (i32, i32) {
    %0 = arith.index_cast %arg0 : i32 to index
    %1 = arith.index_cast %arg1 : i32 to index
    %2 = memref.load %arg2[%0, %1] : memref<2x1xi32, #tpu.memory_space<smem>>
    %c0_i32 = arith.constant 0 : i32
    %c0_i32_0 = arith.constant 0 : i32
    return %c0_i32, %2 : i32, i32
  }
  func.func @transform_1(%arg0: i32, %arg1: i32, %arg2: memref<2x1xi32, #tpu.memory_space<smem>>, %arg3: memref<2xi32, #tpu.memory_space<smem>>) -> (i32, i32) {
    %0 = arith.index_cast %arg0 : i32 to index
    %1 = arith.index_cast %arg1 : i32 to index
    %2 = memref.load %arg2[%0, %1] : memref<2x1xi32, #tpu.memory_space<smem>>
    %c0_i32 = arith.constant 0 : i32
    %c0_i32_0 = arith.constant 0 : i32
    return %2, %c0_i32 : i32, i32
  }
  func.func @transform_2(%arg0: i32, %arg1: i32, %arg2: memref<2x1xi32, #tpu.memory_space<smem>>, %arg3: memref<2xi32, #tpu.memory_space<smem>>) -> (i32, i32) {
    %c0_i32 = arith.constant 0 : i32
    %c0_i32_0 = arith.constant 0 : i32
    return %arg0, %c0_i32 : i32, i32
  }
  func.func @transform_3(%arg0: i32, %arg1: i32, %arg2: memref<2x1xi32, #tpu.memory_space<smem>>, %arg3: memref<2xi32, #tpu.memory_space<smem>>) -> (i32, i32) {
    %c0_i32 = arith.constant 0 : i32
    %c0_i32_0 = arith.constant 0 : i32
    %c0_i32_1 = arith.constant 0 : i32
    return %c0_i32, %c0_i32_0 : i32, i32
  }
  func.func @transform_4(%arg0: i32, %arg1: i32, %arg2: memref<2x1xi32, #tpu.memory_space<smem>>, %arg3: memref<2xi32, #tpu.memory_space<smem>>) -> (i32, i32) {
    %c0_i32 = arith.constant 0 : i32
    %c0_i32_0 = arith.constant 0 : i32
    %c0_i32_1 = arith.constant 0 : i32
    return %c0_i32, %c0_i32_0 : i32, i32
  }
  func.func @transform_5(%arg0: i32, %arg1: i32, %arg2: memref<2x1xi32, #tpu.memory_space<smem>>, %arg3: memref<2xi32, #tpu.memory_space<smem>>) -> (i32, i32) {
    %c0_i32 = arith.constant 0 : i32
    %c0_i32_0 = arith.constant 0 : i32
    %c0_i32_1 = arith.constant 0 : i32
    return %c0_i32, %c0_i32_0 : i32, i32
  }
  func.func @transform_6(%arg0: i32, %arg1: i32, %arg2: memref<2x1xi32, #tpu.memory_space<smem>>, %arg3: memref<2xi32, #tpu.memory_space<smem>>) -> (i32, i32) {
    %c0_i32 = arith.constant 0 : i32
    %c0_i32_0 = arith.constant 0 : i32
    %c0_i32_1 = arith.constant 0 : i32
    return %c0_i32, %c0_i32_0 : i32, i32
  }
  func.func @transform_7(%arg0: i32, %arg1: i32, %arg2: memref<2x1xi32, #tpu.memory_space<smem>>, %arg3: memref<2xi32, #tpu.memory_space<smem>>) -> (i32, i32) {
    %c0_i32 = arith.constant 0 : i32
    %c0_i32_0 = arith.constant 0 : i32
    return %arg0, %c0_i32 : i32, i32
  }
}

module attributes {stable_mosaic.version = 11 : i64} {
  func.func @_edge_update_kernel(%arg0: i32, %arg1: memref<720x128xbf16, #tpu.memory_space<vmem>>, %arg2: memref<128x128xbf16, #tpu.memory_space<vmem>>, %arg3: memref<1x128xf32, #tpu.memory_space<vmem>>, %arg4: memref<720x128xbf16, #tpu.memory_space<vmem>>) attributes {dimension_semantics = [#tpu.dimension_semantics<parallel>], iteration_bounds = array<i64: 1>, scalar_prefetch = 0 : i64, scratch_operands = 0 : i64, tpu.core_type = #tpu.core_type<tc>, window_params = [{transform_indices = @transform_0, window_bounds = array<i64: 720, 128>}, {pipeline_mode = #tpu.pipeline_mode<synchronous>, transform_indices = @transform_1, window_bounds = array<i64: 128, 128>}, {pipeline_mode = #tpu.pipeline_mode<synchronous>, transform_indices = @transform_2, window_bounds = array<i64: 1, 128>}, {transform_indices = @transform_3, window_bounds = array<i64: 720, 128>}]} {
    %c0 = arith.constant 0 : index
    %c0_0 = arith.constant 0 : index
    %0 = vector.load %arg1[%c0, %c0_0] : memref<720x128xbf16, #tpu.memory_space<vmem>>, vector<720x128xbf16>
    %c0_1 = arith.constant 0 : index
    %c0_2 = arith.constant 0 : index
    %1 = vector.load %arg2[%c0_1, %c0_2] : memref<128x128xbf16, #tpu.memory_space<vmem>>, vector<128x128xbf16>
    %cst = arith.constant dense<0.000000e+00> : vector<720x128xf32>
    %2 = tpu.matmul %0, %1, %cst {dimension_numbers = #tpu.dot_dimension_numbers<[1], [0], [0], [1], [0, 0, 1, 1], [], []>} : vector<720x128xbf16>, vector<128x128xbf16>, vector<720x128xf32> -> vector<720x128xf32>
    %c0_3 = arith.constant 0 : index
    %c0_4 = arith.constant 0 : index
    %3 = vector.load %arg3[%c0_3, %c0_4] : memref<1x128xf32, #tpu.memory_space<vmem>>, vector<1x128xf32>
    %4 = vector.broadcast %3 : vector<1x128xf32> to vector<720x128xf32>
    %5 = arith.addf %2, %4 : vector<720x128xf32>
    %cst_5 = arith.constant 0.000000e+00 : f32
    %6 = vector.broadcast %cst_5 : f32 to vector<720x128xf32>
    %7 = arith.maximumf %5, %6 : vector<720x128xf32>
    %8 = arith.truncf %7 : vector<720x128xf32> to vector<720x128xbf16>
    %c0_6 = arith.constant 0 : index
    %c0_7 = arith.constant 0 : index
    %9 = vector.load %arg4[%c0_6, %c0_7] : memref<720x128xbf16, #tpu.memory_space<vmem>>, vector<720x128xbf16>
    tpu.vector_store %arg4[%c0_6, %c0_7], %8 {strides = array<i32>} : memref<720x128xbf16, #tpu.memory_space<vmem>>, vector<720x128xbf16>,
    return
  }
  func.func @transform_0(%arg0: i32) -> (i32, i32) {
    %c0_i32 = arith.constant 0 : i32
    %c0_i32_0 = arith.constant 0 : i32
    return %arg0, %c0_i32 : i32, i32
  }
  func.func @transform_1(%arg0: i32) -> (i32, i32) {
    %c0_i32 = arith.constant 0 : i32
    %c0_i32_0 = arith.constant 0 : i32
    %c0_i32_1 = arith.constant 0 : i32
    return %c0_i32, %c0_i32_0 : i32, i32
  }
  func.func @transform_2(%arg0: i32) -> (i32, i32) {
    %c0_i32 = arith.constant 0 : i32
    %c0_i32_0 = arith.constant 0 : i32
    %c0_i32_1 = arith.constant 0 : i32
    return %c0_i32, %c0_i32_0 : i32, i32
  }
  func.func @transform_3(%arg0: i32) -> (i32, i32) {
    %c0_i32 = arith.constant 0 : i32
    %c0_i32_0 = arith.constant 0 : i32
    return %arg0, %c0_i32 : i32, i32
  }
}

module attributes {stable_mosaic.version = 11 : i64} {
  func.func @_egsage_layer_kernel(%arg0: i32, %arg1: i32, %arg2: memref<2x1xi32, #tpu.memory_space<smem>>, %arg3: memref<2xi32, #tpu.memory_space<smem>>, %arg4: memref<1x720xi32, #tpu.memory_space<vmem>>, %arg5: memref<720x128xbf16, #tpu.memory_space<vmem>>, %arg6: memref<104x128xbf16, #tpu.memory_space<vmem>>, %arg7: memref<128x128xbf16, #tpu.memory_space<vmem>>, %arg8: memref<1x128xf32, #tpu.memory_space<vmem>>, %arg9: memref<256x128xbf16, #tpu.memory_space<vmem>>, %arg10: memref<1x128xf32, #tpu.memory_space<vmem>>, %arg11: memref<128x128xbf16, #tpu.memory_space<vmem>>, %arg12: memref<1x128xf32, #tpu.memory_space<vmem>>, %arg13: memref<128x128xbf16, #tpu.memory_space<vmem>>, %arg14: memref<1x128xf32, #tpu.memory_space<vmem>>, %arg15: memref<104x128xf32, #tpu.memory_space<vmem>>, %arg16: memref<104x128xf32, #tpu.memory_space<vmem>>) attributes {dimension_semantics = [#tpu.dimension_semantics<parallel>, #tpu.dimension_semantics<arbitrary>], iteration_bounds = array<i64: 2, 1>, scalar_prefetch = 2 : i64, scratch_operands = 1 : i64, tpu.core_type = #tpu.core_type<tc>, window_params = [{transform_indices = @transform_0, window_bounds = array<i64: 1, 720>}, {transform_indices = @transform_1, window_bounds = array<i64: 720, 128>}, {transform_indices = @transform_2, window_bounds = array<i64: 104, 128>}, {pipeline_mode = #tpu.pipeline_mode<synchronous>, transform_indices = @transform_3, window_bounds = array<i64: 128, 128>}, {pipeline_mode = #tpu.pipeline_mode<synchronous>, transform_indices = @transform_4, window_bounds = array<i64: 1, 128>}, {pipeline_mode = #tpu.pipeline_mode<synchronous>, transform_indices = @transform_5, window_bounds = array<i64: 256, 128>}, {pipeline_mode = #tpu.pipeline_mode<synchronous>, transform_indices = @transform_6, window_bounds = array<i64: 1, 128>}, {pipeline_mode = #tpu.pipeline_mode<synchronous>, transform_indices = @transform_7, window_bounds = array<i64: 128, 128>}, {pipeline_mode = #tpu.pipeline_mode<synchronous>, transform_indices = @transform_8, window_bounds = array<i64: 1, 128>}, {pipeline_mode = #tpu.pipeline_mode<synchronous>, transform_indices = @transform_9, window_bounds = array<i64: 128, 128>}, {pipeline_mode = #tpu.pipeline_mode<synchronous>, transform_indices = @transform_10, window_bounds = array<i64: 1, 128>}, {transform_indices = @transform_11, window_bounds = array<i64: 104, 128>}]} {
    %c0_i32 = arith.constant 0 : i32
    %0 = arith.cmpi eq, %arg1, %c0_i32 : i32
    %1 = arith.extui %0 : i1 to i32
    %c0_i32_0 = arith.constant 0 : i32
    %2 = arith.cmpi ne, %1, %c0_i32_0 : i32
    scf.if %2 {
      %cst = arith.constant 0.000000e+00 : f32
      %11 = vector.broadcast %cst : f32 to vector<104x128xf32>
      %c0 = arith.constant 0 : index
      %c0_4 = arith.constant 0 : index
      %12 = vector.load %arg16[%c0, %c0_4] : memref<104x128xf32, #tpu.memory_space<vmem>>, vector<104x128xf32>
      tpu.vector_store %arg16[%c0, %c0_4], %11 {strides = array<i32>} : memref<104x128xf32, #tpu.memory_space<vmem>>, vector<104x128xf32>,
    } else {
    }
    %3 = arith.index_cast %arg0 : i32 to index
    %4 = memref.load %arg3[%3] : memref<2xi32, #tpu.memory_space<smem>>
    %5 = arith.cmpi slt, %arg1, %4 : i32
    %6 = arith.extui %5 : i1 to i32
    %c0_i32_1 = arith.constant 0 : i32
    %7 = arith.cmpi ne, %6, %c0_i32_1 : i32
    scf.if %7 {
      %c0 = arith.constant 0 : index
      %c0_4 = arith.constant 0 : index
      %11 = vector.load %arg5[%c0, %c0_4] : memref<720x128xbf16, #tpu.memory_space<vmem>>, vector<720x128xbf16>
      %c0_5 = arith.constant 0 : index
      %c0_6 = arith.constant 0 : index
      %12 = vector.load %arg7[%c0_5, %c0_6] : memref<128x128xbf16, #tpu.memory_space<vmem>>, vector<128x128xbf16>
      %cst = arith.constant dense<0.000000e+00> : vector<720x128xf32>
      %13 = tpu.matmul %11, %12, %cst {dimension_numbers = #tpu.dot_dimension_numbers<[1], [0], [0], [1], [0, 0, 1, 1], [], []>} : vector<720x128xbf16>, vector<128x128xbf16>, vector<720x128xf32> -> vector<720x128xf32>
      %c0_7 = arith.constant 0 : index
      %c0_8 = arith.constant 0 : index
      %14 = vector.load %arg8[%c0_7, %c0_8] : memref<1x128xf32, #tpu.memory_space<vmem>>, vector<1x128xf32>
      %15 = vector.broadcast %14 : vector<1x128xf32> to vector<720x128xf32>
      %16 = arith.addf %13, %15 : vector<720x128xf32>
      %cst_9 = arith.constant 0.000000e+00 : f32
      %17 = vector.broadcast %cst_9 : f32 to vector<720x128xf32>
      %18 = arith.maximumf %16, %17 : vector<720x128xf32>
      %19 = tpu.iota {dimensions = array<i32: 1>} : vector<720x128xi32>
      %c32_i32 = arith.constant 32 : i32
      %20 = vector.broadcast %c32_i32 : i32 to vector<720x128xi32>
      %21 = arith.cmpi eq, %19, %20 : vector<720x128xi32>
      %cst_10 = arith.constant 1.000000e+00 : f32
      %22 = vector.broadcast %cst_10 : f32 to vector<720x128xf32>
      %23 = arith.select %21, %22, %18 : vector<720x128xi1>, vector<720x128xf32>
      %c104_i32 = arith.constant 104 : i32
      %24 = arith.muli %arg0, %c104_i32 : i32
      %25 = tpu.iota {dimensions = array<i32: 0>} : vector<104x1xi32>
      %26 = vector.broadcast %24 : i32 to vector<104x1xi32>
      %27 = arith.addi %26, %25 : vector<104x1xi32>
      %c0_11 = arith.constant 0 : index
      %c0_12 = arith.constant 0 : index
      %28 = vector.load %arg4[%c0_11, %c0_12] : memref<1x720xi32, #tpu.memory_space<vmem>>, vector<1x720xi32>
      %29 = vector.broadcast %27 : vector<104x1xi32> to vector<104x720xi32>
      %30 = vector.broadcast %28 : vector<1x720xi32> to vector<104x720xi32>
      %31 = arith.cmpi eq, %29, %30 : vector<104x720xi32>
      %32 = arith.extui %31 : vector<104x720xi1> to vector<104x720xi32>
      %33 = arith.sitofp %32 : vector<104x720xi32> to vector<104x720xf32>
      %34 = arith.truncf %33 : vector<104x720xf32> to vector<104x720xbf16>
      %c0_13 = arith.constant 0 : index
      %c0_14 = arith.constant 0 : index
      %35 = vector.load %arg16[%c0_13, %c0_14] : memref<104x128xf32, #tpu.memory_space<vmem>>, vector<104x128xf32>
      %36 = arith.truncf %23 : vector<720x128xf32> to vector<720x128xbf16>
      %cst_15 = arith.constant dense<0.000000e+00> : vector<104x128xf32>
      %37 = tpu.matmul %34, %36, %cst_15 {dimension_numbers = #tpu.dot_dimension_numbers<[1], [0], [0], [1], [0, 0, 1, 1], [], []>} : vector<104x720xbf16>, vector<720x128xbf16>, vector<104x128xf32> -> vector<104x128xf32>
      %38 = arith.addf %35, %37 : vector<104x128xf32>
      %c0_16 = arith.constant 0 : index
      %c0_17 = arith.constant 0 : index
      %39 = vector.load %arg16[%c0_16, %c0_17] : memref<104x128xf32, #tpu.memory_space<vmem>>, vector<104x128xf32>
      tpu.vector_store %arg16[%c0_16, %c0_17], %38 {strides = array<i32>} : memref<104x128xf32, #tpu.memory_space<vmem>>, vector<104x128xf32>,
    } else {
    }
    %c0_i32_2 = arith.constant 0 : i32
    %8 = arith.cmpi eq, %arg1, %c0_i32_2 : i32
    %9 = arith.extui %8 : i1 to i32
    %c0_i32_3 = arith.constant 0 : i32
    %10 = arith.cmpi ne, %9, %c0_i32_3 : i32
    scf.if %10 {
      %c0 = arith.constant 0 : index
      %c0_4 = arith.constant 0 : index
      %11 = vector.load %arg16[%c0, %c0_4] : memref<104x128xf32, #tpu.memory_space<vmem>>, vector<104x128xf32>
      %12 = vector.extract_strided_slice %11 {offsets = [0, 32], sizes = [104, 1], strides = [1, 1]} : vector<104x128xf32> to vector<104x1xf32>
      %cst = arith.constant 0.000000e+00 : f32
      %13 = vector.broadcast %cst : f32 to vector<104x1xf32>
      %14 = arith.cmpf ogt, %12, %13 : vector<104x1xf32>
      %cst_5 = arith.constant 1.000000e+00 : f32
      %15 = vector.broadcast %cst_5 : f32 to vector<104x1xf32>
      %16 = arith.maximumf %12, %15 : vector<104x1xf32>
      %cst_6 = arith.constant 1.000000e+00 : f32
      %17 = vector.broadcast %cst_6 : f32 to vector<104x1xf32>
      %18 = arith.divf %17, %16 : vector<104x1xf32>
      %cst_7 = arith.constant 0.000000e+00 : f32
      %19 = vector.broadcast %cst_7 : f32 to vector<104x1xf32>
      %20 = arith.select %14, %18, %19 : vector<104x1xi1>, vector<104x1xf32>
      %21 = vector.broadcast %20 : vector<104x1xf32> to vector<104x128xf32>
      %22 = arith.mulf %11, %21 : vector<104x128xf32>
      %23 = arith.truncf %22 : vector<104x128xf32> to vector<104x128xbf16>
      %c0_8 = arith.constant 0 : index
      %c0_9 = arith.constant 0 : index
      %24 = vector.load %arg6[%c0_8, %c0_9] : memref<104x128xbf16, #tpu.memory_space<vmem>>, vector<104x128xbf16>
      %25 = tpu.concatenate %23, %24 in 1 : vector<104x128xbf16>, vector<104x128xbf16> -> vector<104x256xbf16>
      %c0_10 = arith.constant 0 : index
      %c0_11 = arith.constant 0 : index
      %26 = vector.load %arg9[%c0_10, %c0_11] : memref<256x128xbf16, #tpu.memory_space<vmem>>, vector<256x128xbf16>
      %cst_12 = arith.constant dense<0.000000e+00> : vector<104x128xf32>
      %27 = tpu.matmul %25, %26, %cst_12 {dimension_numbers = #tpu.dot_dimension_numbers<[1], [0], [0], [1], [0, 0, 1, 1], [], []>} : vector<104x256xbf16>, vector<256x128xbf16>, vector<104x128xf32> -> vector<104x128xf32>
      %c0_13 = arith.constant 0 : index
      %c0_14 = arith.constant 0 : index
      %28 = vector.load %arg10[%c0_13, %c0_14] : memref<1x128xf32, #tpu.memory_space<vmem>>, vector<1x128xf32>
      %29 = vector.broadcast %28 : vector<1x128xf32> to vector<104x128xf32>
      %30 = arith.addf %27, %29 : vector<104x128xf32>
      %cst_15 = arith.constant 0.000000e+00 : f32
      %31 = vector.broadcast %cst_15 : f32 to vector<104x128xf32>
      %32 = arith.maximumf %30, %31 : vector<104x128xf32>
      %33 = arith.mulf %32, %32 : vector<104x128xf32>
      %cst_16 = arith.constant dense<0.000000e+00> : vector<104xf32>
      %34 = vector.multi_reduction <add>, %33, %cst_16 [1] : vector<104x128xf32> to vector<104xf32>
      %35 = vector.shape_cast %34 : vector<104xf32> to vector<104x1xf32>
      %cst_17 = arith.constant 1.000000e-24 : f32
      %36 = vector.broadcast %cst_17 : f32 to vector<104x1xf32>
      %37 = arith.maximumf %35, %36 : vector<104x1xf32>
      %38 = math.rsqrt %37 : vector<104x1xf32>
      %39 = vector.broadcast %38 : vector<104x1xf32> to vector<104x128xf32>
      %40 = arith.mulf %32, %39 : vector<104x128xf32>
      %41 = arith.truncf %40 : vector<104x128xf32> to vector<104x128xbf16>
      %c0_18 = arith.constant 0 : index
      %c0_19 = arith.constant 0 : index
      %42 = vector.load %arg11[%c0_18, %c0_19] : memref<128x128xbf16, #tpu.memory_space<vmem>>, vector<128x128xbf16>
      %cst_20 = arith.constant dense<0.000000e+00> : vector<104x128xf32>
      %43 = tpu.matmul %41, %42, %cst_20 {dimension_numbers = #tpu.dot_dimension_numbers<[1], [0], [0], [1], [0, 0, 1, 1], [], []>} : vector<104x128xbf16>, vector<128x128xbf16>, vector<104x128xf32> -> vector<104x128xf32>
      %c0_21 = arith.constant 0 : index
      %c0_22 = arith.constant 0 : index
      %44 = vector.load %arg12[%c0_21, %c0_22] : memref<1x128xf32, #tpu.memory_space<vmem>>, vector<1x128xf32>
      %45 = vector.broadcast %44 : vector<1x128xf32> to vector<104x128xf32>
      %46 = arith.addf %43, %45 : vector<104x128xf32>
      %cst_23 = arith.constant 0.000000e+00 : f32
      %47 = vector.broadcast %cst_23 : f32 to vector<104x128xf32>
      %48 = arith.maximumf %46, %47 : vector<104x128xf32>
      %49 = arith.truncf %48 : vector<104x128xf32> to vector<104x128xbf16>
      %c0_24 = arith.constant 0 : index
      %c0_25 = arith.constant 0 : index
      %50 = vector.load %arg13[%c0_24, %c0_25] : memref<128x128xbf16, #tpu.memory_space<vmem>>, vector<128x128xbf16>
      %cst_26 = arith.constant dense<0.000000e+00> : vector<104x128xf32>
      %51 = tpu.matmul %49, %50, %cst_26 {dimension_numbers = #tpu.dot_dimension_numbers<[1], [0], [0], [1], [0, 0, 1, 1], [], []>} : vector<104x128xbf16>, vector<128x128xbf16>, vector<104x128xf32> -> vector<104x128xf32>
      %c0_27 = arith.constant 0 : index
      %c0_28 = arith.constant 0 : index
      %52 = vector.load %arg14[%c0_27, %c0_28] : memref<1x128xf32, #tpu.memory_space<vmem>>, vector<1x128xf32>
      %53 = vector.broadcast %52 : vector<1x128xf32> to vector<104x128xf32>
      %54 = arith.addf %51, %53 : vector<104x128xf32>
      %c0_29 = arith.constant 0 : index
      %c0_30 = arith.constant 0 : index
      %55 = vector.load %arg15[%c0_29, %c0_30] : memref<104x128xf32, #tpu.memory_space<vmem>>, vector<104x128xf32>
      tpu.vector_store %arg15[%c0_29, %c0_30], %54 {strides = array<i32>} : memref<104x128xf32, #tpu.memory_space<vmem>>, vector<104x128xf32>,
    } else {
    }
    return
  }
  func.func @transform_0(%arg0: i32, %arg1: i32, %arg2: memref<2x1xi32, #tpu.memory_space<smem>>, %arg3: memref<2xi32, #tpu.memory_space<smem>>) -> (i32, i32) {
    %0 = arith.index_cast %arg0 : i32 to index
    %1 = arith.index_cast %arg1 : i32 to index
    %2 = memref.load %arg2[%0, %1] : memref<2x1xi32, #tpu.memory_space<smem>>
    %c0_i32 = arith.constant 0 : i32
    %c0_i32_0 = arith.constant 0 : i32
    return %c0_i32, %2 : i32, i32
  }
  func.func @transform_1(%arg0: i32, %arg1: i32, %arg2: memref<2x1xi32, #tpu.memory_space<smem>>, %arg3: memref<2xi32, #tpu.memory_space<smem>>) -> (i32, i32) {
    %0 = arith.index_cast %arg0 : i32 to index
    %1 = arith.index_cast %arg1 : i32 to index
    %2 = memref.load %arg2[%0, %1] : memref<2x1xi32, #tpu.memory_space<smem>>
    %c0_i32 = arith.constant 0 : i32
    %c0_i32_0 = arith.constant 0 : i32
    return %2, %c0_i32 : i32, i32
  }
  func.func @transform_2(%arg0: i32, %arg1: i32, %arg2: memref<2x1xi32, #tpu.memory_space<smem>>, %arg3: memref<2xi32, #tpu.memory_space<smem>>) -> (i32, i32) {
    %c0_i32 = arith.constant 0 : i32
    %c0_i32_0 = arith.constant 0 : i32
    return %arg0, %c0_i32 : i32, i32
  }
  func.func @transform_3(%arg0: i32, %arg1: i32, %arg2: memref<2x1xi32, #tpu.memory_space<smem>>, %arg3: memref<2xi32, #tpu.memory_space<smem>>) -> (i32, i32) {
    %c0_i32 = arith.constant 0 : i32
    %c0_i32_0 = arith.constant 0 : i32
    %c0_i32_1 = arith.constant 0 : i32
    return %c0_i32, %c0_i32_0 : i32, i32
  }
  func.func @transform_4(%arg0: i32, %arg1: i32, %arg2: memref<2x1xi32, #tpu.memory_space<smem>>, %arg3: memref<2xi32, #tpu.memory_space<smem>>) -> (i32, i32) {
    %c0_i32 = arith.constant 0 : i32
    %c0_i32_0 = arith.constant 0 : i32
    %c0_i32_1 = arith.constant 0 : i32
    return %c0_i32, %c0_i32_0 : i32, i32
  }
  func.func @transform_5(%arg0: i32, %arg1: i32, %arg2: memref<2x1xi32, #tpu.memory_space<smem>>, %arg3: memref<2xi32, #tpu.memory_space<smem>>) -> (i32, i32) {
    %c0_i32 = arith.constant 0 : i32
    %c0_i32_0 = arith.constant 0 : i32
    %c0_i32_1 = arith.constant 0 : i32
    return %c0_i32, %c0_i32_0 : i32, i32
  }
  func.func @transform_6(%arg0: i32, %arg1: i32, %arg2: memref<2x1xi32, #tpu.memory_space<smem>>, %arg3: memref<2xi32, #tpu.memory_space<smem>>) -> (i32, i32) {
    %c0_i32 = arith.constant 0 : i32
    %c0_i32_0 = arith.constant 0 : i32
    %c0_i32_1 = arith.constant 0 : i32
    return %c0_i32, %c0_i32_0 : i32, i32
  }
  func.func @transform_7(%arg0: i32, %arg1: i32, %arg2: memref<2x1xi32, #tpu.memory_space<smem>>, %arg3: memref<2xi32, #tpu.memory_space<smem>>) -> (i32, i32) {
    %c0_i32 = arith.constant 0 : i32
    %c0_i32_0 = arith.constant 0 : i32
    %c0_i32_1 = arith.constant 0 : i32
    return %c0_i32, %c0_i32_0 : i32, i32
  }
  func.func @transform_8(%arg0: i32, %arg1: i32, %arg2: memref<2x1xi32, #tpu.memory_space<smem>>, %arg3: memref<2xi32, #tpu.memory_space<smem>>) -> (i32, i32) {
    %c0_i32 = arith.constant 0 : i32
    %c0_i32_0 = arith.constant 0 : i32
    %c0_i32_1 = arith.constant 0 : i32
    return %c0_i32, %c0_i32_0 : i32, i32
  }
  func.func @transform_9(%arg0: i32, %arg1: i32, %arg2: memref<2x1xi32, #tpu.memory_space<smem>>, %arg3: memref<2xi32, #tpu.memory_space<smem>>) -> (i32, i32) {
    %c0_i32 = arith.constant 0 : i32
    %c0_i32_0 = arith.constant 0 : i32
    %c0_i32_1 = arith.constant 0 : i32
    return %c0_i32, %c0_i32_0 : i32, i32
  }
  func.func @transform_10(%arg0: i32, %arg1: i32, %arg2: memref<2x1xi32, #tpu.memory_space<smem>>, %arg3: memref<2xi32, #tpu.memory_space<smem>>) -> (i32, i32) {
    %c0_i32 = arith.constant 0 : i32
    %c0_i32_0 = arith.constant 0 : i32
    %c0_i32_1 = arith.constant 0 : i32
    return %c0_i32, %c0_i32_0 : i32, i32
  }
  func.func @transform_11(%arg0: i32, %arg1: i32, %arg2: memref<2x1xi32, #tpu.memory_space<smem>>, %arg3: memref<2xi32, #tpu.memory_space<smem>>) -> (i32, i32) {
    %c0_i32 = arith.constant 0 : i32
    %c0_i32_0 = arith.constant 0 : i32
    return %arg0, %c0_i32 : i32, i32
  }
}

</mosaic_0001>

<bundles_post_ra>
// kernel: gnn_stack_forward.5
= control target key start
LH: loop header
LB: loop body
LE: loop exit
PB: predicated region body
PF: predicated region fallthrough
CT: control target
= control target key end

     0   :  { %s5271_s0 = inlined_call_operand.vmem [shape: s32[2,1], index: 0, kind: input, shape index: {}]   ;;  %s5272_s2 = inlined_call_operand.vmem [shape: s32[1,720], index: 2, kind: input, shape index: {}]   ;;  %s5273_s3 = inlined_call_operand.vmem [shape: bf16[720,128], index: 3, kind: input, shape index: {}]   ;;  %s5274_s4 = inlined_call_operand.vmem [shape: bf16[208,128], index: 4, kind: input, shape index: {}]   ;;  %s5275_s5 = inlined_call_operand.vmem [shape: bf16[128,128], index: 5, kind: input, shape index: {}]   ;;  %s5276_s6 = inlined_call_operand.vmem [shape: f32[1,128], index: 6, kind: input, shape index: {}]   ;;  %s5277_s7 = inlined_call_operand.vmem [shape: bf16[256,128], index: 7, kind: input, shape index: {}]   ;;  %s5278_s8 = inlined_call_operand.vmem [shape: f32[1,128], index: 8, kind: input, shape index: {}]   ;;  %s5279_s9 = inlined_call_operand.vmem [shape: bf16[208,128], index: 9, kind: output, shape index: {}]   ;;  %s5280_s1 = inlined_call_operand.vmem [shape: s32[2], index: 1, kind: input, shape index: {}]  }
   0x1   :  { %s14_s11 = sshll.u32 %s5271_s0, 4  ;;  %s18_s14 = sshll.u32 %s5280_s1, 4  ;;  %s15_s11 = int_to_ptr.vmem [resolvable:$true] %s14_s11  ;;  %s19_s14 = int_to_ptr.vmem [resolvable:$true] %s18_s14 }
   0x2   :  { %s3805_s15 = scalar_lea.vmem %s15_s11, 32  ;;  %p3810_p1 = scmp.lt.s32.totalorder %s15_s11, %s15_s11 }
   0x3   :  { %p3806_p0 = scmp.ne.s32.totalorder %s15_s11, %s3805_s15  ;;  %p3811_p2 = scmp.lt.s32.totalorder %s3805_s15, %s3805_s15 }
   0x5   :  { %p3812_p3 = por %p3811_p2, %p3810_p1 }
   0x7   :  { %p3813_p4 = pnand %p3812_p3, %p3806_p0 }
   0x9   :  { %3816 = shalt.err (!%p3813_p4)  }
   0xa   :  { %s3855_s16 = smov [#allocation4]   ;;  %s3817_s17 = scalar_lea.vmem %s19_s14, 16 }
   0xb   :  { %17 = dma.vmem_to_smem %s15_s11, 32, %s3855_s16, [#allocation3] }
   0xc   :  { %p3818_p5 = scmp.ne.s32.totalorder %s19_s14, %s3817_s17  ;;  %p3822_p6 = scmp.lt.s32.totalorder %s19_s14, %s19_s14 }
   0xd   :  { %p3823_p7 = scmp.lt.s32.totalorder %s3817_s17, %s3817_s17 }
   0xf   :  { %p3824_p8 = por %p3823_p7, %p3822_p6 }
  0x11   :  { %p3825_p9 = pnand %p3824_p8, %p3818_p5 }
  0x13   :  { %3828 = shalt.err (!%p3825_p9)  }
  0x14   :  { %s3856_s0 = smov [#allocation5]  }
  0x15   :  { %21 = dma.vmem_to_smem %s19_s14, 16, %s3856_s0, [#allocation3] }
  0x16   :  { %3841 = dma.done.wait [#allocation3], 48 }
  0x17   :  { %3842 = vsyncadd [#allocation3], 4294967248 }
  0x18   :  { %23 = sfence }
  0x19   :  { %s3919_s1 = smov 0   ;;  %s3921_s18 = smov 0  }
  0x1a   :  { %s3923_s19 = smov 0  }
  0x1b LB: > { %s41_s20 = sadd.s32 1, %s3849_s18  ;;  %p2882_p10 = scmp.ge.s32.totalorder %s3853_s19, 1  ;;  %s3853_s19 = sphi %s3923_s19, %s29_s19   ;;  %s3849_s18 = sphi %s3921_s18, %s5338_s18   ;;  %s3845_s1 = sphi %s3919_s1, %s5337_s1  }
  0x1c   : > { %p43_p11 = scmp.ge.s32.totalorder %s41_s20, 2  ;;  %p347_p12 = scmp.lt.s32.totalorder %s3853_s19, 3 }
  0x1e   : > { %s5340_s20 = smov (%p43_p11, %s41_s20), 0  ;;  %p348_p13 = pnand %p2882_p10, %p347_p12 }
  0x1f   : > { %s2883_s21 = sshll.u32 (!%p348_p13), %s3845_s1, 7  ;;  %s447_s22 = smul.u32 (!%p348_p13), 13, %s3845_s1  ;;  %v3857_v0 = vmov (!%p348_p13), 0.0  }
  0x20   : > { %351 = sbr.rel (%p348_p13) target bundleno = 1442 (0x5a2), region = 48  ;;  %s411_s23 = sld [smem:[#allocation4 + %s2883_s21]] (!%p348_p13)  ;;  %464 = vst [vmem:[#allocation2] sm:$0xff] (!%p348_p13), %v3857_v0  ;;  %465 = vst [vmem:[#allocation2 + $0x8] sm:$0xff] (!%p348_p13), %v3857_v0 }
  0x21   : > { %s432_s24 = sld [smem:[#allocation4 + %s2883_s21]] (!%p348_p13)  ;;  %466 = vst [vmem:[#allocation2 + $0x10] sm:$0xff] (!%p348_p13), %v3857_v0  ;;  %467 = vst [vmem:[#allocation2 + $0x18] sm:$0xff] (!%p348_p13), %v3857_v0  ;;  %p448_p0 = scmp.lt.s32.totalorder (!%p348_p13), %s447_s22, 25 }
  0x22   : > { %468 = vst [vmem:[#allocation2 + $0x20] sm:$0xff] (!%p348_p13), %v3857_v0  ;;  %469 = vst [vmem:[#allocation2 + $0x28] sm:$0xff] (!%p348_p13), %v3857_v0  ;;  %s477_s25 = sld [smem:[#allocation5 + %s3845_s1]] (!%p348_p13) }
  0x23   : > { %470 = vst [vmem:[#allocation2 + $0x30] sm:$0xff] (!%p348_p13), %v3857_v0  ;;  %471 = vst [vmem:[#allocation2 + $0x38] sm:$0xff] (!%p348_p13), %v3857_v0 }
  0x24   : > { %472 = vst [vmem:[#allocation2 + $0x40] sm:$0xff] (!%p348_p13), %v3857_v0  ;;  %473 = vst [vmem:[#allocation2 + $0x48] sm:$0xff] (!%p348_p13), %v3857_v0 }
  0x25   : > { %474 = vst [vmem:[#allocation2 + $0x50] sm:$0xff] (!%p348_p13), %v3857_v0  ;;  %475 = vst [vmem:[#allocation2 + $0x58] sm:$0xff] (!%p348_p13), %v3857_v0 }
  0x26   : > { %476 = vst [vmem:[#allocation2 + $0x60] sm:$0xff] (!%p348_p13), %v3857_v0  ;;  %s412_s27 = smul.u32 (!%p348_p13), 6, %s411_s23 }
  0x27   : > { %s5342_s22 = smov (!%p448_p0, %s447_s22), 25  ;;  %s433_s10 = smul.u32 90, %s432_s24 }
  0x28   : > { %s2886_s26 = sshll.u32 %s5342_s22, 2  ;;  %p413_p1 = scmp.lt.s32.totalorder %s412_s27, 5 }
  0x29   : > { %s3945_s30 = scalar_lea.vmem %s5274_s4, %s2886_s26  ;;  %s3950_s13 = scalar_lea.vmem %s5279_s9, %s2886_s26 }
  0x2a   : > { %p434_p2 = scmp.lt.s32.totalorder %s433_s10, 89  ;;  %s5344_s27 = smov (!%p413_p1, %s412_s27), 5 }
  0x2b   : > { %s3955_s16 = scalar_lea.vmem %s5272_s2, %s5344_s27  ;;  %p2889_p3 = scmp.le.s32.totalorder %s477_s25, 0 }
  0x2c   : > { %s5346_s10 = smov (!%p434_p2, %s433_s10), 89 }
  0x2d   : > { %s2885_s17 = sshll.u32 %s5346_s10, 2  ;;  %481 = sbr.rel (%p2889_p3) target bundleno = 879 (0x36f), region = 56 }
  0x2e   : > { %s3960_s22 = scalar_lea.vmem %s5273_s3, %s2885_s17 }
  0x34   : > { %v3673_v1 = vld [vmem:[%s5275_s5] sm:$0xff]   ;;  %v5281_v2 = vmov 0.0   ;;  %v3674_v3 = vld [vmem:[%s5275_s5 + $0x8] sm:$0xff]   ;;  %vm3859_vm0 = vmmov 0   ;;  %v3675_v4 = vld [vmem:[%s5275_s5 + $0x10] sm:$0xff]   ;;  %v1396_v49 = vlaneseq }
  0x35   : > { %3413 = vmatprep.subr.bf16.mxu0 %v5281_v2  ;;  %3609 = vmatprep.subr.bf16.mxu1 %v5281_v2  ;;  %v3676_v5 = vld [vmem:[%s5275_s5 + $0x18] sm:$0xff]   ;;  %v3677_v6 = vld [vmem:[%s5275_s5 + $0x20] sm:$0xff]   ;;  %v3678_v7 = vld [vmem:[%s5275_s5 + $0x28] sm:$0xff]  }
  0x36   : > { %3414 = vmatpush3.bf16.msra.mxu0 %v3673_v1  ;;  %3429 = vmatprep.mubr.msk.bf16.mxu0 %vm3859_vm0, %v5281_v2  ;;  %v3679_v8 = vld [vmem:[%s5275_s5 + $0x30] sm:$0xff]   ;;  %v3680_v9 = vld [vmem:[%s5275_s5 + $0x38] sm:$0xff]   ;;  %v3681_v10 = vld [vmem:[%s3960_s22] sm:$0xff]   ;;  %v4127_v52 = vand.u32 127, %v1396_v49 }
  0x37   : > { %3415 = vmatprep.subr.bf16.mxu0 %v5281_v2  ;;  %3617 = vmatpush3.bf16.msra.mxu1 %v3673_v1  ;;  %v3682_v11 = vld [vmem:[%s3960_s22 + $0x8] sm:$0xff]   ;;  %v3683_v12 = vld [vmem:[%s3960_s22 + $0x10] sm:$0xff]   ;;  %v3684_v13 = vld [vmem:[%s3960_s22 + $0x18] sm:$0xff]  }
  0x38   : > { %3610 = vmatprep.subr.bf16.mxu1 %v5281_v2  ;;  %3561 = vmatprep.mubr.msk.bf16.mxu1 %vm3859_vm0, %v5281_v2  ;;  %v3685_v14 = vld [vmem:[%s3960_s22 + $0x20] sm:$0xff]   ;;  %v3686_v15 = vld [vmem:[%s3960_s22 + $0x28] sm:$0xff]   ;;  %v3687_v16 = vld [vmem:[%s3960_s22 + $0x30] sm:$0xff]   ;;  %vm1398_vm1 = vcmp.eq.s32.totalorder %v4127_v52, 32 }
  0x39   : > { %v3688_v17 = vld [vmem:[%s3960_s22 + $0x38] sm:$0xff]   ;;  %v3689_v18 = vld [vmem:[%s3960_s22 + $0x40] sm:$0xff]   ;;  %v3690_v19 = vld [vmem:[%s3960_s22 + $0x48] sm:$0xff]  }
  0x3a   : > { %3416 = vmatpush3.bf16.msra.mxu0 %v3674_v3  ;;  %v3691_v20 = vld [vmem:[%s3960_s22 + $0x50] sm:$0xff]   ;;  %v3692_v21 = vld [vmem:[%s3960_s22 + $0x58] sm:$0xff]   ;;  %v3709_v22 = vld [vmem:[%s3960_s22 + $0x108] sm:$0xff]  }
  0x3b   : > { %3417 = vmatprep.subr.bf16.mxu0 %v5281_v2  ;;  %3618 = vmatpush3.bf16.msra.mxu1 %v3674_v3  ;;  %v3693_v23 = vld [vmem:[%s3960_s22 + $0x60] sm:$0xff]   ;;  %v3711_v24 = vld [vmem:[%s3960_s22 + $0x110] sm:$0xff]   ;;  %v3694_v25 = vld [vmem:[%s3960_s22 + $0x68] sm:$0xff]  }
  0x3c   : > { %3611 = vmatprep.subr.bf16.mxu1 %v5281_v2  ;;  %v3713_v26 = vld [vmem:[%s3960_s22 + $0x118] sm:$0xff]   ;;  %v3695_v27 = vld [vmem:[%s3960_s22 + $0x70] sm:$0xff]   ;;  %v3715_v28 = vld [vmem:[%s3960_s22 + $0x120] sm:$0xff]  }
  0x3d   : > { %v3696_v29 = vld [vmem:[%s3960_s22 + $0x78] sm:$0xff]   ;;  %v3717_v30 = vld [vmem:[%s3960_s22 + $0x128] sm:$0xff]   ;;  %v3697_v31 = vld [vmem:[%s3960_s22 + $0x80] sm:$0xff]  }
  0x3e   : > { %3418 = vmatpush3.bf16.msra.mxu0 %v3675_v4  ;;  %v3719_v32 = vld [vmem:[%s3960_s22 + $0x130] sm:$0xff]   ;;  %v3698_v33 = vld [vmem:[%s3960_s22 + $0x88] sm:$0xff]   ;;  %v3720_v34 = vld [vmem:[%s3960_s22 + $0x138] sm:$0xff]  }
  0x3f   : > { %3419 = vmatprep.subr.bf16.mxu0 %v5281_v2  ;;  %3619 = vmatpush3.bf16.msra.mxu1 %v3675_v4  ;;  %v3699_v35 = vld [vmem:[%s3960_s22 + $0x90] sm:$0xff]   ;;  %v3721_v36 = vld [vmem:[%s3960_s22 + $0x140] sm:$0xff]   ;;  %v3700_v37 = vld [vmem:[%s3960_s22 + $0x98] sm:$0xff]  }
  0x40   : > { %3612 = vmatprep.subr.bf16.mxu1 %v5281_v2  ;;  %v3722_v38 = vld [vmem:[%s3960_s22 + $0x148] sm:$0xff]   ;;  %v3701_v39 = vld [vmem:[%s3960_s22 + $0xa0] sm:$0xff]   ;;  %v3723_v40 = vld [vmem:[%s3960_s22 + $0x150] sm:$0xff]  }
  0x41   : > { %v3702_v41 = vld [vmem:[%s3960_s22 + $0xa8] sm:$0xff]   ;;  %v3724_v42 = vld [vmem:[%s3960_s22 + $0x158] sm:$0xff]   ;;  %v3703_v43 = vld [vmem:[%s3960_s22 + $0xb0] sm:$0xff]  }
  0x42   : > { %3420 = vmatpush3.bf16.msra.mxu0 %v3676_v5  ;;  %v3725_v44 = vld [vmem:[%s3960_s22 + $0x160] sm:$0xff]   ;;  %v3704_v45 = vld [vmem:[%s3960_s22 + $0xb8] sm:$0xff]   ;;  %v3706_v47 = vld [vmem:[%s3960_s22 + $0xc8] sm:$0xff]  }
  0x43   : > { %3421 = vmatprep.subr.bf16.mxu0 %v5281_v2  ;;  %3620 = vmatpush3.bf16.msra.mxu1 %v3676_v5  ;;  %v3705_v46 = vld [vmem:[%s3960_s22 + $0xc0] sm:$0xff]   ;;  %v3707_v48 = vld [vmem:[%s3960_s22 + $0xd0] sm:$0xff]   ;;  %v3708_v55 = vld [vmem:[%s3960_s22 + $0xd8] sm:$0xff]  }
  0x44   : > { %3613 = vmatprep.subr.bf16.mxu1 %v5281_v2  ;;  %v4122_v50 = vld [vmem:[%s5276_s6] ss:$0 sm:$0xff] }
  0x45   : > { %v3710_v4 = vld [vmem:[%s3960_s22 + $0xe0] sm:$0xff]  }
  0x46   : > { %3422 = vmatpush3.bf16.msra.mxu0 %v3677_v6 }
  0x47   : > { %3423 = vmatprep.subr.bf16.mxu0 %v5281_v2  ;;  %3621 = vmatpush3.bf16.msra.mxu1 %v3677_v6 }
  0x48   : > { %3614 = vmatprep.subr.bf16.mxu1 %v5281_v2 }
  0x4a   : > { %3424 = vmatpush3.bf16.msra.mxu0 %v3678_v7 }
  0x4b   : > { %3425 = vmatprep.subr.bf16.mxu0 %v5281_v2  ;;  %3622 = vmatpush3.bf16.msra.mxu1 %v3678_v7 }
  0x4c   : > { %3615 = vmatprep.subr.bf16.mxu1 %v5281_v2 }
  0x4e   : > { %3426 = vmatpush3.bf16.msra.mxu0 %v3679_v8 }
  0x4f   : > { %3427 = vmatprep.subr.bf16.mxu0 %v5281_v2  ;;  %3623 = vmatpush3.bf16.msra.mxu1 %v3679_v8 }
  0x50   : > { %3616 = vmatprep.subr.bf16.mxu1 %v5281_v2 }
  0x52   : > { %3428 = vmatpush3.bf16.msra.mxu0 %v3680_v9 }
  0x53   : > { %3624 = vmatpush3.bf16.msra.mxu1 %v3680_v9 }
  0x55   : > { %3430 = vmatmul.mubr.bf16.vlgmr.msra.gmra.mrb[0].mxu0 %v3681_v10 }
  0x56   : > { %3433 = vmatprep.mubr.msk.bf16.mxu0 %vm3859_vm0, %v5281_v2  ;;  %3562 = vmatmul.mubr.bf16.vlgmr.msra.gmra.mrb[0].mxu1 %v3709_v22 }
  0x57   : > { %3565 = vmatprep.mubr.msk.bf16.mxu1 %vm3859_vm0, %v5281_v2 }
  0x5d   : > { %3434 = vmatmul.mubr.bf16.gmra.mrb[4].mxu0 %v3682_v11 }
  0x5e   : > { %3437 = vmatprep.mubr.msk.bf16.mxu0 %vm3859_vm0, %v5281_v2  ;;  %3566 = vmatmul.mubr.bf16.gmra.mrb[4].mxu1 %v3711_v24 }
  0x5f   : > { %3569 = vmatprep.mubr.msk.bf16.mxu1 %vm3859_vm0, %v5281_v2 }
  0x65   : > { %3438 = vmatmul.mubr.bf16.gmra.mrb[8].mxu0 %v3683_v12 }
  0x66   : > { %3441 = vmatprep.mubr.msk.bf16.mxu0 %vm3859_vm0, %v5281_v2  ;;  %3570 = vmatmul.mubr.bf16.gmra.mrb[8].mxu1 %v3713_v26 }
  0x67   : > { %3573 = vmatprep.mubr.msk.bf16.mxu1 %vm3859_vm0, %v5281_v2 }
  0x6d   : > { %3442 = vmatmul.mubr.bf16.gmra.mrb[12].mxu0 %v3684_v13 }
  0x6e   : > { %3445 = vmatprep.mubr.msk.bf16.mxu0 %vm3859_vm0, %v5281_v2  ;;  %3574 = vmatmul.mubr.bf16.gmra.mrb[12].mxu1 %v3715_v28  ;;  %v3714_v28 = vld [vmem:[%s3960_s22 + $0xf0] sm:$0xff]  }
  0x6f   : > { %3577 = vmatprep.mubr.msk.bf16.mxu1 %vm3859_vm0, %v5281_v2 }
  0x75   : > { %3446 = vmatmul.mubr.bf16.gmra.mrb[16].mxu0 %v3685_v14 }
  0x76   : > { %3449 = vmatprep.mubr.msk.bf16.mxu0 %vm3859_vm0, %v5281_v2  ;;  %3578 = vmatmul.mubr.bf16.gmra.mrb[16].mxu1 %v3717_v30 }
  0x77   : > { %3581 = vmatprep.mubr.msk.bf16.mxu1 %vm3859_vm0, %v5281_v2 }
  0x7d   : > { %3450 = vmatmul.mubr.bf16.gmra.mrb[20].mxu0 %v3686_v15 }
  0x7e   : > { %3453 = vmatprep.mubr.msk.bf16.mxu0 %vm3859_vm0, %v5281_v2  ;;  %3582 = vmatmul.mubr.bf16.gmra.mrb[20].mxu1 %v3719_v32 }
  0x7f   : > { %3585 = vmatprep.mubr.msk.bf16.mxu1 %vm3859_vm0, %v5281_v2 }
  0x85   : > { %3454 = vmatmul.mubr.bf16.gmra.mrb[24].mxu0 %v3687_v16  ;;  %v3712_v16 = vld [vmem:[%s3960_s22 + $0xe8] sm:$0xff]  }
  0x86   : > { %3457 = vmatprep.mubr.msk.bf16.mxu0 %vm3859_vm0, %v5281_v2  ;;  %3586 = vmatmul.mubr.bf16.gmra.mrb[24].mxu1 %v3720_v34 }
  0x87   : > { %3589 = vmatprep.mubr.msk.bf16.mxu1 %vm3859_vm0, %v5281_v2 }
  0x8d   : > { %3458 = vmatmul.mubr.bf16.gmra.mrb[28].mxu0 %v3688_v17 }
  0x8e   : > { %3461 = vmatprep.mubr.msk.bf16.mxu0 %vm3859_vm0, %v5281_v2  ;;  %3590 = vmatmul.mubr.bf16.gmra.mrb[28].mxu1 %v3721_v36 }
  0x8f   : > { %3593 = vmatprep.mubr.msk.bf16.mxu1 %vm3859_vm0, %v5281_v2 }
  0x95   : > { %3462 = vmatmul.mubr.bf16.gmra.mrb[32].mxu0 %v3689_v18 }
  0x96   : > { %3465 = vmatprep.mubr.msk.bf16.mxu0 %vm3859_vm0, %v5281_v2  ;;  %3594 = vmatmul.mubr.bf16.gmra.mrb[32].mxu1 %v3722_v38 }
  0x97   : > { %3597 = vmatprep.mubr.msk.bf16.mxu1 %vm3859_vm0, %v5281_v2 }
  0x9d   : > { %3466 = vmatmul.mubr.bf16.gmra.mrb[36].mxu0 %v3690_v19 }
  0x9e   : > { %3469 = vmatprep.mubr.msk.bf16.mxu0 %vm3859_vm0, %v5281_v2  ;;  %3598 = vmatmul.mubr.bf16.gmra.mrb[36].mxu1 %v3723_v40  ;;  %v3716_v40 = vld [vmem:[%s3960_s22 + $0xf8] sm:$0xff]  }
  0x9f   : > { %3601 = vmatprep.mubr.msk.bf16.mxu1 %vm3859_vm0, %v5281_v2 }
  0xa5   : > { %3470 = vmatmul.mubr.bf16.gmra.mrb[40].mxu0 %v3691_v20 }
  0xa6   : > { %3473 = vmatprep.mubr.msk.bf16.mxu0 %vm3859_vm0, %v5281_v2  ;;  %3602 = vmatmul.mubr.bf16.gmra.mrb[40].mxu1 %v3724_v42 }
  0xa7   : > { %3605 = vmatprep.mubr.msk.bf16.mxu1 %vm3859_vm0, %v5281_v2 }
  0xad   : > { %3474 = vmatmul.mubr.bf16.gmra.mrb[44].mxu0 %v3692_v21 }
  0xae   : > { %3477 = vmatprep.mubr.msk.bf16.mxu0 %vm3859_vm0, %v5281_v2  ;;  %3606 = vmatmul.mubr.bf16.gmra.mrb[44].mxu1 %v3725_v44 }
  0xb5   : > { %3478 = vmatmul.mubr.bf16.gmra.mrb[48].mxu0 %v3693_v23 }
  0xb6   : > { %3481 = vmatprep.mubr.msk.bf16.mxu0 %vm3859_vm0, %v5281_v2 }
  0xbd   : > { %3482 = vmatmul.mubr.bf16.gmra.mrb[52].mxu0 %v3694_v25 }
  0xbe   : > { %3485 = vmatprep.mubr.msk.bf16.mxu0 %vm3859_vm0, %v5281_v2 }
  0xc5   : > { %3486 = vmatmul.mubr.bf16.gmra.mrb[56].mxu0 %v3695_v27 }
  0xc6   : > { %3489 = vmatprep.mubr.msk.bf16.mxu0 %vm3859_vm0, %v5281_v2 }
  0xcd   : > { %3490 = vmatmul.mubr.bf16.gmra.mrb[60].mxu0 %v3696_v29 }
  0xce   : > { %3493 = vmatprep.mubr.msk.bf16.mxu0 %vm3859_vm0, %v5281_v2 }
  0xd5   : > { %3494 = vmatmul.mubr.bf16.gmra.mrb[64].mxu0 %v3697_v31 }
  0xd6   : > { %3497 = vmatprep.mubr.msk.bf16.mxu0 %vm3859_vm0, %v5281_v2 }
  0xdd   : > { %3498 = vmatmul.mubr.bf16.gmra.mrb[68].mxu0 %v3698_v33 }
  0xde   : > { %3501 = vmatprep.mubr.msk.bf16.mxu0 %vm3859_vm0, %v5281_v2 }
  0xe5   : > { %3502 = vmatmul.mubr.bf16.gmra.mrb[72].mxu0 %v3699_v35 }
  0xe6   : > { %3505 = vmatprep.mubr.msk.bf16.mxu0 %vm3859_vm0, %v5281_v2 }
  0xed   : > { %3506 = vmatmul.mubr.bf16.gmra.mrb[76].mxu0 %v3700_v37 }
  0xee   : > { %3509 = vmatprep.mubr.msk.bf16.mxu0 %vm3859_vm0, %v5281_v2 }
  0xf5   : > { %3510 = vmatmul.mubr.bf16.gmra.mrb[80].mxu0 %v3701_v39 }
  0xf6   : > { %3513 = vmatprep.mubr.msk.bf16.mxu0 %vm3859_vm0, %v5281_v2 }
  0xfd   : > { %3514 = vmatmul.mubr.bf16.gmra.mrb[84].mxu0 %v3702_v41 }
  0xfe   : > { %3517 = vmatprep.mubr.msk.bf16.mxu0 %vm3859_vm0, %v5281_v2 }
 0x105   : > { %3518 = vmatmul.mubr.bf16.gmra.mrb[88].mxu0 %v3703_v43 }
 0x106   : > { %3521 = vmatprep.mubr.msk.bf16.mxu0 %vm3859_vm0, %v5281_v2 }
 0x10d   : > { %3522 = vmatmul.mubr.bf16.gmra.mrb[92].mxu0 %v3704_v45 }
 0x10e   : > { %3525 = vmatprep.mubr.msk.bf16.mxu0 %vm3859_vm0, %v5281_v2 }
 0x115   : > { %3526 = vmatmul.mubr.bf16.gmra.mrb[96].mxu0 %v3705_v46 }
 0x116   : > { %3529 = vmatprep.mubr.msk.bf16.mxu0 %vm3859_vm0, %v5281_v2 }
 0x11d   : > { %3530 = vmatmul.mubr.bf16.gmra.mrb[100].mxu0 %v3706_v47 }
 0x11e   : > { %3533 = vmatprep.mubr.msk.bf16.mxu0 %vm3859_vm0, %v5281_v2 }
 0x125   : > { %3534 = vmatmul.mubr.bf16.gmra.mrb[104].mxu0 %v3707_v48 }
 0x126   : > { %3537 = vmatprep.mubr.msk.bf16.mxu0 %vm3859_vm0, %v5281_v2 }
 0x128   : > { %v947_v51 = vpop.f32.mrb[0].mxu0 }
 0x129   : > { %v948_v53 = vadd.f32 %v4122_v50, %v947_v51  ;;  %v3431_v54 = vpop.f32.mrb[1].mxu0 }
 0x12a   : > { %v950_v56 = vpop.f32.mrb[2].mxu0 }
 0x12b   : > { %v1306_v57 = vmax.f32 %v948_v53, 0.0  ;;  %v951_v58 = vadd.f32 %v4122_v50, %v950_v56  ;;  %v3432_v59 = vpop.f32.mrb[3].mxu0 }
 0x12d   : > { %v1307_v60 = vmax.f32 %v951_v58, 0.0  ;;  %3538 = vmatmul.mubr.bf16.gmra.mrb[108].mxu0 %v3708_v55  ;;  %v4137_v61 = vsel %vm1398_vm1, 1.0, %v1306_v57  ;;  %v3718_v55 = vld [vmem:[%s3960_s22 + $0x100] sm:$0xff]   ;;  %s1489_s22 = smul.u32 104, %s3845_s1 }
 0x12e   : > { %3541 = vmatprep.mubr.msk.bf16.mxu0 %vm3859_vm0, %v5281_v2 }
 0x12f   : > { %v4141_v62 = vsel %vm1398_vm1, 1.0, %v1307_v60 }
 0x130   : > { %v1832_v63 = vpack.c.bf16 %v4141_v62, %v4137_v61  ;;  %v955_v0 = vpop.f32.mrb[4].mxu0  ;;  %v1211_v62 = vpop.f32.mrb[0].mxu1 }
 0x131   : > { %v956_v1 = vadd.f32 %v4122_v50, %v955_v0  ;;  %v3435_v3 = vpop.f32.mrb[5].mxu0 }
 0x132   : > { %v958_v5 = vpop.f32.mrb[6].mxu0 }
 0x133   : > { %v1308_v6 = vmax.f32 %v956_v1, 0.0  ;;  %v959_v7 = vadd.f32 %v4122_v50, %v958_v5  ;;  %v3436_v8 = vpop.f32.mrb[7].mxu0 }
 0x135   : > { %v1309_v9 = vmax.f32 %v959_v7, 0.0  ;;  %3542 = vmatmul.mubr.bf16.gmra.mrb[112].mxu0 %v3710_v4  ;;  %v4152_v10 = vsel %vm1398_vm1, 1.0, %v1308_v6 }
 0x136   : > { %3545 = vmatprep.mubr.msk.bf16.mxu0 %vm3859_vm0, %v5281_v2 }
 0x137   : > { %v4156_v11 = vsel %vm1398_vm1, 1.0, %v1309_v9 }
 0x138   : > { %v1833_v12 = vpack.c.bf16 %v4156_v11, %v4152_v10  ;;  %v963_v13 = vpop.f32.mrb[8].mxu0  ;;  %v1212_v10 = vadd.f32 %v4122_v50, %v1211_v62 }
 0x139   : > { %v964_v14 = vadd.f32 %v4122_v50, %v963_v13  ;;  %v3439_v15 = vpop.f32.mrb[9].mxu0 }
 0x13a   : > { %v966_v17 = vpop.f32.mrb[10].mxu0 }
 0x13b   : > { %v1310_v18 = vmax.f32 %v964_v14, 0.0  ;;  %v967_v19 = vadd.f32 %v4122_v50, %v966_v17  ;;  %v3440_v20 = vpop.f32.mrb[11].mxu0 }
 0x13d   : > { %v1311_v21 = vmax.f32 %v967_v19, 0.0  ;;  %3546 = vmatmul.mubr.bf16.gmra.mrb[116].mxu0 %v3712_v16  ;;  %v4167_v22 = vsel %vm1398_vm1, 1.0, %v1310_v18 }
 0x13e   : > { %3549 = vmatprep.mubr.msk.bf16.mxu0 %vm3859_vm0, %v5281_v2 }
 0x13f   : > { %v4171_v23 = vsel %vm1398_vm1, 1.0, %v1311_v21 }
 0x140   : > { %v1834_v24 = vpack.c.bf16 %v4171_v23, %v4167_v22  ;;  %v971_v25 = vpop.f32.mrb[12].mxu0 }
 0x141   : > { %v972_v26 = vadd.f32 %v4122_v50, %v971_v25  ;;  %v3443_v27 = vpop.f32.mrb[13].mxu0 }
 0x142   : > { %v974_v29 = vpop.f32.mrb[14].mxu0 }
 0x143   : > { %v1312_v30 = vmax.f32 %v972_v26, 0.0  ;;  %v975_v31 = vadd.f32 %v4122_v50, %v974_v29  ;;  %v3444_v32 = vpop.f32.mrb[15].mxu0 }
 0x145   : > { %v1313_v33 = vmax.f32 %v975_v31, 0.0  ;;  %3550 = vmatmul.mubr.bf16.gmra.mrb[120].mxu0 %v3714_v28  ;;  %v4182_v34 = vsel %vm1398_vm1, 1.0, %v1312_v30 }
 0x146   : > { %3553 = vmatprep.mubr.msk.bf16.mxu0 %vm3859_vm0, %v5281_v2 }
 0x147   : > { %v4186_v35 = vsel %vm1398_vm1, 1.0, %v1313_v33 }
 0x148   : > { %v1835_v36 = vpack.c.bf16 %v4186_v35, %v4182_v34  ;;  %v979_v37 = vpop.f32.mrb[16].mxu0 }
 0x149   : > { %v980_v38 = vadd.f32 %v4122_v50, %v979_v37  ;;  %v3447_v39 = vpop.f32.mrb[17].mxu0 }
 0x14a   : > { %v982_v41 = vpop.f32.mrb[18].mxu0  ;;  %v4244_v39 = vshrl.u32 %v1396_v49, 7 }
 0x14b   : > { %v1314_v42 = vmax.f32 %v980_v38, 0.0  ;;  %v983_v43 = vadd.f32 %v4122_v50, %v982_v41  ;;  %v3448_v44 = vpop.f32.mrb[19].mxu0 }
 0x14c   : > { %v1525_v44 = vsub.s32 1, %v4244_v39 }
 0x14d   : > { %v1315_v45 = vmax.f32 %v983_v43, 0.0  ;;  %3554 = vmatmul.mubr.bf16.gmra.mrb[124].mxu0 %v3716_v40  ;;  %v4197_v46 = vsel %vm1398_vm1, 1.0, %v1314_v42  ;;  %v1492_v43 = vadd.s32 8, %v4244_v39 }
 0x14e   : > { %3557 = vmatprep.mubr.msk.bf16.mxu0 %vm3859_vm0, %v5281_v2 }
 0x14f   : > { %v4201_v47 = vsel %vm1398_vm1, 1.0, %v1315_v45 }
 0x150   : > { %v1836_v48 = vpack.c.bf16 %v4201_v47, %v4197_v46  ;;  %v987_v51 = vpop.f32.mrb[20].mxu0 }
 0x151   : > { %v988_v53 = vadd.f32 %v4122_v50, %v987_v51  ;;  %v3451_v54 = vpop.f32.mrb[21].mxu0  ;;  %v4250_v51 = vstv %s1489_s22 }
 0x152   : > { %v990_v56 = vpop.f32.mrb[22].mxu0  ;;  %v4257_v54 = vadd.s32 %v4250_v51, %v4244_v39  ;;  %v4260_v49 = vadd.s32 %v4250_v51, %v1492_v43 }
 0x153   : > { %v1316_v57 = vmax.f32 %v988_v53, 0.0  ;;  %v991_v58 = vadd.f32 %v4122_v50, %v990_v56  ;;  %v3452_v59 = vpop.f32.mrb[23].mxu0  ;;  %v4253_v53 = vld [vmem:[%s3955_s16] sm:$0x3f] }
 0x155   : > { %v1317_v60 = vmax.f32 %v991_v58, 0.0  ;;  %3558 = vmatmul.mubr.bf16.gmra.mrb[128].mxu0 %v3718_v55  ;;  %v4210_v0 = vsel %vm1398_vm1, 1.0, %v1316_v57  ;;  %v4263_v55 = vrot.slane %v4253_v53, %v1525_v44 }
 0x157   : > { %v4214_v1 = vsel %vm1398_vm1, 1.0, %v1317_v60  ;;  %vm1544_vm2 = vcmp.eq.s32.totalorder %v4257_v54, %v4263_v55  ;;  %vm1550_vm3 = vcmp.eq.s32.totalorder %v4260_v49, %v4263_v55 }
 0x158   : > { %v1837_v3 = vpack.c.bf16 %v4214_v1, %v4210_v0  ;;  %v995_v4 = vpop.f32.mrb[24].mxu0  ;;  %vm3022_vm4 = vmpackc.low %vm1550_vm3, %vm1544_vm2 }
 0x159   : > { %v996_v5 = vadd.f32 %v4122_v50, %v995_v4  ;;  %v3455_v6 = vpop.f32.mrb[25].mxu0 }
 0x15a   : > { %v998_v7 = vpop.f32.mrb[26].mxu0  ;;  %v5283_v6 = vmov 1.0|1.0  }
 0x15b   : > { %v1318_v8 = vmax.f32 %v996_v5, 0.0  ;;  %v999_v9 = vadd.f32 %v4122_v50, %v998_v7  ;;  %v3456_v13 = vpop.f32.mrb[27].mxu0  ;;  %3023 = vmatprep.mubr.msk.bf16.mxu1 %vm3022_vm4, %v5283_v6 }
 0x15d   : > { %v1319_v14 = vmax.f32 %v999_v9, 0.0  ;;  %v4222_v15 = vsel %vm1398_vm1, 1.0, %v1318_v8 }
 0x15f   : > { %v4226_v16 = vsel %vm1398_vm1, 1.0, %v1319_v14 }
 0x160   : > { %v1838_v17 = vpack.c.bf16 %v4226_v16, %v4222_v15  ;;  %v1003_v18 = vpop.f32.mrb[28].mxu0 }
 0x161   : > { %v1004_v19 = vadd.f32 %v4122_v50, %v1003_v18  ;;  %v3459_v20 = vpop.f32.mrb[29].mxu0 }
 0x162   : > { %v1006_v21 = vpop.f32.mrb[30].mxu0 }
 0x163   : > { %v1320_v25 = vmax.f32 %v1004_v19, 0.0  ;;  %v1007_v26 = vadd.f32 %v4122_v50, %v1006_v21  ;;  %v3460_v27 = vpop.f32.mrb[31].mxu0 }
 0x165   : > { %v1321_v28 = vmax.f32 %v1007_v26, 0.0  ;;  %v4234_v29 = vsel %vm1398_vm1, 1.0, %v1320_v25 }
 0x167   : > { %v4238_v30 = vsel %vm1398_vm1, 1.0, %v1321_v28 }
 0x168   : > { %v1839_v31 = vpack.c.bf16 %v4238_v30, %v4234_v29  ;;  %v1011_v32 = vpop.f32.mrb[32].mxu0 }
 0x169   : > { %v1012_v33 = vadd.f32 %v4122_v50, %v1011_v32  ;;  %v3463_v37 = vpop.f32.mrb[33].mxu0 }
 0x16a   : > { %v1014_v38 = vpop.f32.mrb[34].mxu0  ;;  %v3563_v37 = vpop.f32.mrb[1].mxu1 }
 0x16b   : > { %v1322_v40 = vmax.f32 %v1012_v33, 0.0  ;;  %v1015_v41 = vadd.f32 %v4122_v50, %v1014_v38  ;;  %v3464_v42 = vpop.f32.mrb[35].mxu0 }
 0x16d   : > { %v1323_v45 = vmax.f32 %v1015_v41, 0.0  ;;  %v1415_v56 = vsel %vm1398_vm1, 1.0, %v1322_v40  ;;  %v1214_v41 = vpop.f32.mrb[2].mxu1 }
 0x16e   : > { %v3564_v44 = vpop.f32.mrb[3].mxu1  ;;  %v1215_v11 = vadd.f32 %v4122_v50, %v1214_v41 }
 0x16f   : > { %v1416_v57 = vsel %vm1398_vm1, 1.0, %v1323_v45 }
 0x170   : > { %v1019_v58 = vpop.f32.mrb[36].mxu0  ;;  %v1840_v59 = vpack.c.bf16 %v1416_v57, %v1415_v56 }
 0x171   : > { %v1020_v60 = vadd.f32 %v4122_v50, %v1019_v58  ;;  %v3467_v4 = vpop.f32.mrb[37].mxu0  ;;  %v1372_v58 = vmax.f32 %v1212_v10, 0.0 }
 0x172   : > { %v1022_v5 = vpop.f32.mrb[38].mxu0  ;;  %3239 = vmatprep.subr.bf16.mxu1 %v1840_v59  ;;  %v1373_v59 = vmax.f32 %v1215_v11, 0.0 }
 0x173   : > { %v1324_v7 = vmax.f32 %v1020_v60, 0.0  ;;  %v1023_v8 = vadd.f32 %v4122_v50, %v1022_v5  ;;  %v3468_v9 = vpop.f32.mrb[39].mxu0  ;;  %3240 = vmatpush3.bf16.msra.mxu1 %v1832_v63  ;;  %v4301_v4 = vsel %vm1398_vm1, 1.0, %v1372_v58 }
 0x174   : > { %v4305_v5 = vsel %vm1398_vm1, 1.0, %v1373_v59 }
 0x175   : > { %v1325_v13 = vmax.f32 %v1023_v8, 0.0  ;;  %v1417_v14 = vsel %vm1398_vm1, 1.0, %v1324_v7  ;;  %v1219_v7 = vpop.f32.mrb[4].mxu1  ;;  %v5314_v52 = vpack.c.bf16 %v4305_v5, %v4301_v4 }
 0x176   : > { %v3567_v23 = vpop.f32.mrb[5].mxu1 }
 0x177   : > { %v1418_v18 = vsel %vm1398_vm1, 1.0, %v1325_v13 }
 0x178   : > { %v1027_v19 = vpop.f32.mrb[40].mxu0  ;;  %v1841_v20 = vpack.c.bf16 %v1418_v18, %v1417_v14  ;;  %v1222_v14 = vpop.f32.mrb[6].mxu1 }
 0x179   : > { %v1028_v21 = vadd.f32 %v4122_v50, %v1027_v19  ;;  %v3471_v25 = vpop.f32.mrb[41].mxu0 }
 0x17a   : > { %v1030_v26 = vpop.f32.mrb[42].mxu0  ;;  %3241 = vmatprep.subr.bf16.mxu1 %v1841_v20  ;;  %v3568_v20 = vpop.f32.mrb[7].mxu1  ;;  %v1220_v25 = vadd.f32 %v4122_v50, %v1219_v7 }
 0x17b   : > { %v1326_v27 = vmax.f32 %v1028_v21, 0.0  ;;  %v1031_v28 = vadd.f32 %v4122_v50, %v1030_v26  ;;  %v3472_v32 = vpop.f32.mrb[43].mxu0  ;;  %3242 = vmatpush3.bf16.msra.mxu1 %v1833_v12  ;;  %v1223_v26 = vadd.f32 %v4122_v50, %v1222_v14 }
 0x17d   : > { %v1327_v61 = vmax.f32 %v1031_v28, 0.0  ;;  %v1419_v63 = vsel %vm1398_vm1, 1.0, %v1326_v27  ;;  %v1375_v62 = vmax.f32 %v1223_v26, 0.0 }
 0x17f   : > { %v1420_v33 = vsel %vm1398_vm1, 1.0, %v1327_v61  ;;  %v1374_v61 = vmax.f32 %v1220_v25, 0.0  ;;  %v4326_v37 = vsel %vm1398_vm1, 1.0, %v1375_v62 }
 0x180   : > { %v1035_v38 = vpop.f32.mrb[44].mxu0  ;;  %v1842_v40 = vpack.c.bf16 %v1420_v33, %v1419_v63 }
 0x181   : > { %v1036_v42 = vadd.f32 %v4122_v50, %v1035_v38  ;;  %v3475_v43 = vpop.f32.mrb[45].mxu0  ;;  %v4322_v33 = vsel %vm1398_vm1, 1.0, %v1374_v61  ;;  %v1227_v38 = vpop.f32.mrb[8].mxu1 }
 0x182   : > { %v1038_v45 = vpop.f32.mrb[46].mxu0  ;;  %3243 = vmatprep.subr.bf16.mxu1 %v1842_v40  ;;  %v3571_v35 = vpop.f32.mrb[9].mxu1  ;;  %v5315_v4 = vpack.c.bf16 %v4326_v37, %v4322_v33 }
 0x183   : > { %v1328_v12 = vmax.f32 %v1036_v42, 0.0  ;;  %v1039_v56 = vadd.f32 %v4122_v50, %v1038_v45  ;;  %v3476_v57 = vpop.f32.mrb[47].mxu0  ;;  %3244 = vmatpush3.bf16.msra.mxu1 %v1834_v24  ;;  %v1230_v43 = vpop.f32.mrb[10].mxu1 }
 0x184   : > { %v3572_v10 = vpop.f32.mrb[11].mxu1 }
 0x185   : > { %v1329_v60 = vmax.f32 %v1039_v56, 0.0  ;;  %v1421_v8 = vsel %vm1398_vm1, 1.0, %v1328_v12  ;;  %v1228_v12 = vadd.f32 %v4122_v50, %v1227_v38  ;;  %v1231_v56 = vadd.f32 %v4122_v50, %v1230_v43 }
 0x187   : > { %v1422_v9 = vsel %vm1398_vm1, 1.0, %v1329_v60  ;;  %v1376_v60 = vmax.f32 %v1228_v12, 0.0  ;;  %v1377_v7 = vmax.f32 %v1231_v56, 0.0  ;;  %v1493_v56 = vadd.s32 16, %v4244_v39 }
 0x188   : > { %v1043_v24 = vpop.f32.mrb[48].mxu0  ;;  %v1843_v13 = vpack.c.bf16 %v1422_v9, %v1421_v8 }
 0x189   : > { %v1044_v18 = vadd.f32 %v4122_v50, %v1043_v24  ;;  %v3479_v19 = vpop.f32.mrb[49].mxu0  ;;  %v4343_v9 = vsel %vm1398_vm1, 1.0, %v1376_v60  ;;  %v4347_v23 = vsel %vm1398_vm1, 1.0, %v1377_v7  ;;  %v1235_v24 = vpop.f32.mrb[12].mxu1 }
 0x18a   : > { %v1046_v21 = vpop.f32.mrb[50].mxu0  ;;  %3245 = vmatprep.subr.bf16.mxu1 %v1843_v13  ;;  %v3575_v47 = vpop.f32.mrb[13].mxu1  ;;  %v5316_v5 = vpack.c.bf16 %v4347_v23, %v4343_v9  ;;  %v1541_v23 = vsub.s32 5, %v4244_v39 }
 0x18b   : > { %v1330_v27 = vmax.f32 %v1044_v18, 0.0  ;;  %v1047_v28 = vadd.f32 %v4122_v50, %v1046_v21  ;;  %v3480_v32 = vpop.f32.mrb[51].mxu0  ;;  %3246 = vmatpush3.bf16.msra.mxu1 %v1835_v36  ;;  %v1238_v19 = vpop.f32.mrb[14].mxu1 }
 0x18c   : > { %v3576_v25 = vpop.f32.mrb[15].mxu1 }
 0x18d   : > { %v1331_v63 = vmax.f32 %v1047_v28, 0.0  ;;  %v1423_v40 = vsel %vm1398_vm1, 1.0, %v1330_v27  ;;  %v1236_v27 = vadd.f32 %v4122_v50, %v1235_v24  ;;  %v1239_v28 = vadd.f32 %v4122_v50, %v1238_v19 }
 0x18e   : > { %v4390_v19 = vadd.s32 %v4250_v51, %v1493_v56 }
 0x18f   : > { %v1424_v41 = vsel %vm1398_vm1, 1.0, %v1331_v63  ;;  %v1378_v63 = vmax.f32 %v1236_v27, 0.0  ;;  %v1379_v38 = vmax.f32 %v1239_v28, 0.0 }
 0x190   : > { %v1051_v36 = vpop.f32.mrb[52].mxu0  ;;  %v1844_v42 = vpack.c.bf16 %v1424_v41, %v1423_v40  ;;  %vm1556_vm7 = vcmp.eq.s32.totalorder %v4390_v19, %v4263_v55 }
 0x191   : > { %v1052_v44 = vadd.f32 %v4122_v50, %v1051_v36  ;;  %v3483_v45 = vpop.f32.mrb[53].mxu0  ;;  %v4364_v41 = vsel %vm1398_vm1, 1.0, %v1378_v63  ;;  %v4368_v35 = vsel %vm1398_vm1, 1.0, %v1379_v38  ;;  %v1243_v36 = vpop.f32.mrb[16].mxu1 }
 0x192   : > { %v1054_v11 = vpop.f32.mrb[54].mxu0  ;;  %3247 = vmatprep.subr.bf16.mxu1 %v1844_v42  ;;  %v3579_v1 = vpop.f32.mrb[17].mxu1  ;;  %v1521_v45 = vsub.s32 0, %v4244_v39  ;;  %v1244_v60 = vadd.f32 %v4122_v50, %v1243_v36  ;;  %v5317_v33 = vpack.c.bf16 %v4368_v35, %v4364_v41  ;;  %v3727_v35 = vld [vmem:[%s3955_s16] sm:$0x3f] }
 0x193   : > { %v1332_v57 = vmax.f32 %v1052_v44, 0.0  ;;  %v1055_v58 = vadd.f32 %v4122_v50, %v1054_v11  ;;  %v3484_v59 = vpop.f32.mrb[55].mxu0  ;;  %3248 = vmatpush3.bf16.msra.mxu1 %v1836_v48  ;;  %v1246_v10 = vpop.f32.mrb[18].mxu1 }
 0x194   : > { %v1247_v7 = vadd.f32 %v4122_v50, %v1246_v10  ;;  %v1380_v47 = vmax.f32 %v1244_v60, 0.0 }
 0x195   : > { %v1333_v8 = vmax.f32 %v1055_v58, 0.0  ;;  %v1425_v13 = vsel %vm1398_vm1, 1.0, %v1332_v57  ;;  %v1494_v57 = vadd.s32 24, %v4244_v39  ;;  %v3580_v58 = vpop.f32.mrb[19].mxu1 }
 0x196   : > { %v1251_v16 = vpop.f32.mrb[20].mxu1 }
 0x197   : > { %v1426_v14 = vsel %vm1398_vm1, 1.0, %v1333_v8  ;;  %v3583_v27 = vpop.f32.mrb[21].mxu1 }
 0x198   : > { %v1059_v48 = vpop.f32.mrb[56].mxu0  ;;  %v1845_v18 = vpack.c.bf16 %v1426_v14, %v1425_v13  ;;  %v4387_v14 = vrot.slane %v4253_v53, %v1521_v45 }
 0x199   : > { %v1060_v20 = vadd.f32 %v4122_v50, %v1059_v48  ;;  %v3487_v21 = vpop.f32.mrb[57].mxu0  ;;  %v1381_v48 = vmax.f32 %v1247_v7, 0.0 }
 0x19a   : > { %v1062_v26 = vpop.f32.mrb[58].mxu0  ;;  %3249 = vmatprep.subr.bf16.mxu1 %v1845_v18  ;;  %v4397_v21 = vsel %vm1398_vm1, 1.0, %v1380_v47  ;;  %vm1543_vm5 = vcmp.eq.s32.totalorder %v4257_v54, %v4387_v14  ;;  %vm1549_vm6 = vcmp.eq.s32.totalorder %v4260_v49, %v4387_v14  ;;  %vm1555_vm11 = vcmp.eq.s32.totalorder %v4390_v19, %v4387_v14 }
 0x19b   : > { %v1334_v32 = vmax.f32 %v1060_v20, 0.0  ;;  %v1063_v61 = vadd.f32 %v4122_v50, %v1062_v26  ;;  %v3488_v62 = vpop.f32.mrb[59].mxu0  ;;  %3250 = vmatpush3.bf16.msra.mxu1 %v1837_v3  ;;  %v4393_v20 = vadd.s32 %v4250_v51, %v1494_v57  ;;  %v4401_v15 = vsel %vm1398_vm1, 1.0, %v1381_v48  ;;  %vm3024_vm9 = vmpackc.low %vm1549_vm6, %vm1543_vm5 }
 0x19c   : > { %v1254_v62 = vpop.f32.mrb[22].mxu1  ;;  %v5318_v37 = vpack.c.bf16 %v4401_v15, %v4397_v21  ;;  %v4912_v21 = vrot.slane %v3727_v35, %v1541_v23 }
 0x19d   : > { %v1335_v40 = vmax.f32 %v1063_v61, 0.0  ;;  %v1427_v42 = vsel %vm1398_vm1, 1.0, %v1334_v32  ;;  %v1495_v61 = vadd.s32 32, %v4244_v39  ;;  %vm1562_vm8 = vcmp.eq.s32.totalorder %v4393_v20, %v4263_v55  ;;  %v3584_v36 = vpop.f32.mrb[23].mxu1 }
 0x19e   : > { %v1255_v1 = vadd.f32 %v4122_v50, %v1254_v62  ;;  %vm3026_vm10 = vmpackc.low %vm1562_vm8, %vm1556_vm7  ;;  %vm1561_vm12 = vcmp.eq.s32.totalorder %v4393_v20, %v4387_v14 }
 0x19f   : > { %v1428_v43 = vsel %vm1398_vm1, 1.0, %v1335_v40  ;;  %v1496_v40 = vadd.s32 40, %v4244_v39  ;;  %v4433_v10 = vadd.s32 %v4250_v51, %v1495_v61  ;;  %vm3028_vm15 = vmpackc.low %vm1561_vm12, %vm1555_vm11 }
 0x1a0   : > { %v1067_v3 = vpop.f32.mrb[60].mxu0  ;;  %v1846_v44 = vpack.c.bf16 %v1428_v43, %v1427_v42  ;;  %v1252_v43 = vadd.f32 %v4122_v50, %v1251_v16  ;;  %v1497_v16 = vadd.s32 48, %v4244_v39 }
 0x1a1   : > { %v1068_v11 = vadd.f32 %v4122_v50, %v1067_v3  ;;  %v3491_v12 = vpop.f32.mrb[61].mxu0  ;;  %v4436_v57 = vadd.s32 %v4250_v51, %v1496_v40  ;;  %vm1568_vm13 = vcmp.eq.s32.totalorder %v4433_v10, %v4263_v55  ;;  %vm1567_vm2 = vcmp.eq.s32.totalorder %v4433_v10, %v4387_v14 }
 0x1a2   : > { %v1070_v59 = vpop.f32.mrb[62].mxu0  ;;  %3251 = vmatprep.subr.bf16.mxu1 %v1846_v44  ;;  %v1383_v12 = vmax.f32 %v1255_v1, 0.0 }
 0x1a3   : > { %v1336_v8 = vmax.f32 %v1068_v11, 0.0  ;;  %v1071_v24 = vadd.f32 %v4122_v50, %v1070_v59  ;;  %v3492_v13 = vpop.f32.mrb[63].mxu0  ;;  %3252 = vmatpush3.bf16.msra.mxu1 %v1838_v17  ;;  %v1382_v11 = vmax.f32 %v1252_v43, 0.0  ;;  %vm1574_vm14 = vcmp.eq.s32.totalorder %v4436_v57, %v4263_v55 }
 0x1a4   : > { %v4445_v30 = vsel %vm1398_vm1, 1.0, %v1383_v12  ;;  %vm3030_vm0 = vmpackc.low %vm1574_vm14, %vm1568_vm13  ;;  %vm1573_vm3 = vcmp.eq.s32.totalorder %v4436_v57, %v4387_v14 }
 0x1a5   : > { %v1337_v18 = vmax.f32 %v1071_v24, 0.0  ;;  %v1429_v17 = vsel %vm1398_vm1, 1.0, %v1336_v8  ;;  %v4441_v29 = vsel %vm1398_vm1, 1.0, %v1382_v11  ;;  %vm3032_vm6 = vmpackc.low %vm1573_vm3, %vm1567_vm2 }
 0x1a6   : > { %v5319_v9 = vpack.c.bf16 %v4445_v30, %v4441_v29 }
 0x1a7   : > { %v1430_v25 = vsel %vm1398_vm1, 1.0, %v1337_v18 }
 0x1a8   : > { %v1075_v28 = vpop.f32.mrb[64].mxu0  ;;  %v1847_v32 = vpack.c.bf16 %v1430_v25, %v1429_v17  ;;  %v1498_v17 = vadd.s32 56, %v4244_v39 }
 0x1a9   : > { %v1076_v63 = vadd.f32 %v4122_v50, %v1075_v28  ;;  %v3495_v38 = vpop.f32.mrb[65].mxu0 }
 0x1aa   : > { %v1078_v42 = vpop.f32.mrb[66].mxu0  ;;  %3253 = vmatprep.subr.bf16.mxu1 %v1847_v32  ;;  %v4491_v43 = vadd.s32 %v4250_v51, %v1498_v17 }
 0x1ab   : > { %v1338_v3 = vmax.f32 %v1076_v63, 0.0  ;;  %v1079_v44 = vadd.f32 %v4122_v50, %v1078_v42  ;;  %v3496_v45 = vpop.f32.mrb[67].mxu0  ;;  %3254 = vmatpush3.bf16.msra.mxu1 %v1839_v31  ;;  %v1259_v31 = vpop.f32.mrb[24].mxu1  ;;  %v4488_v42 = vadd.s32 %v4250_v51, %v1497_v16 }
 0x1ac   : > { %v3587_v7 = vpop.f32.mrb[25].mxu1  ;;  %v1260_v13 = vadd.f32 %v4122_v50, %v1259_v31  ;;  %v1499_v31 = vadd.s32 64, %v4244_v39  ;;  %vm1586_vm5 = vcmp.eq.s32.totalorder %v4491_v43, %v4263_v55 }
 0x1ad   : > { %v1339_v56 = vmax.f32 %v1079_v44, 0.0  ;;  %v4449_v58 = vsel %vm1398_vm1, 1.0, %v1338_v3  ;;  %v1262_v47 = vpop.f32.mrb[26].mxu1  ;;  %vm1580_vm4 = vcmp.eq.s32.totalorder %v4488_v42, %v4263_v55  ;;  %vm1579_vm8 = vcmp.eq.s32.totalorder %v4488_v42, %v4387_v14 }
 0x1ae   : > { %3025 = vmatmul.mubr.msk.bf16.vlgmr.msra.gmra.mrb[48].mxu1 %vm3024_vm9, %v5283_v6  ;;  %v3588_v25 = vpop.f32.mrb[27].mxu1  ;;  %v1384_v28 = vmax.f32 %v1260_v13, 0.0  ;;  %v1263_v32 = vadd.f32 %v4122_v50, %v1262_v47  ;;  %vm3034_vm7 = vmpackc.low %vm1586_vm5, %vm1580_vm4  ;;  %vm1585_vm9 = vcmp.eq.s32.totalorder %v4491_v43, %v4387_v14 }
 0x1af   : > { %v4453_v59 = vsel %vm1398_vm1, 1.0, %v1339_v56  ;;  %3027 = vmatprep.mubr.msk.bf16.mxu1 %vm3026_vm10, %v5283_v6  ;;  %v1267_v11 = vpop.f32.mrb[28].mxu1  ;;  %vm3036_vm12 = vmpackc.low %vm1585_vm9, %vm1579_vm8 }
 0x1b0   : > { %v1083_v24 = vpop.f32.mrb[68].mxu0  ;;  %v4485_v38 = vsel %vm1398_vm1, 1.0, %v1384_v28  ;;  %v1385_v40 = vmax.f32 %v1263_v32, 0.0  ;;  %v1268_v7 = vadd.f32 %v4122_v50, %v1267_v11 }
 0x1b1   : > { %v1084_v48 = vadd.f32 %v4122_v50, %v1083_v24  ;;  %v3499_v18 = vpop.f32.mrb[69].mxu0  ;;  %v3591_v24 = vpop.f32.mrb[29].mxu1 }
 0x1b2   : > { %v1086_v27 = vpop.f32.mrb[70].mxu0  ;;  %v4496_v1 = vsel %vm1398_vm1, 1.0, %v1385_v40  ;;  %v1270_v18 = vpop.f32.mrb[30].mxu1  ;;  %v1386_v17 = vmax.f32 %v1268_v7, 0.0 }
 0x1b3   : > { %v1340_v61 = vmax.f32 %v1084_v48, 0.0  ;;  %v1087_v62 = vadd.f32 %v4122_v50, %v1086_v27  ;;  %v3500_v63 = vpop.f32.mrb[71].mxu0  ;;  %v1500_v48 = vadd.s32 72, %v4244_v39  ;;  %v3592_v25 = vpop.f32.mrb[31].mxu1  ;;  %v5320_v41 = vpack.c.bf16 %v4496_v1, %v4485_v38 }
 0x1b4   : > { %v1275_v24 = vpop.f32.mrb[32].mxu1 }
 0x1b5   : > { %v1341_v36 = vmax.f32 %v1087_v62, 0.0  ;;  %v4500_v3 = vsel %vm1398_vm1, 1.0, %v1340_v61  ;;  %v1271_v61 = vadd.f32 %v4122_v50, %v1270_v18  ;;  %v4532_v62 = vadd.s32 %v4250_v51, %v1499_v31 }
 0x1b6   : > { %3029 = vmatmul.mubr.msk.bf16.gmra.mrb[52].mxu1 %vm3028_vm15, %v5283_v6  ;;  %v4535_v40 = vadd.s32 %v4250_v51, %v1500_v48  ;;  %v1501_v48 = vadd.s32 80, %v4244_v39 }
 0x1b7   : > { %v4504_v44 = vsel %vm1398_vm1, 1.0, %v1341_v36  ;;  %3031 = vmatprep.mubr.msk.bf16.mxu1 %vm3030_vm0, %v5283_v6  ;;  %v4539_v36 = vsel %vm1398_vm1, 1.0, %v1386_v17  ;;  %v1387_v11 = vmax.f32 %v1271_v61, 0.0  ;;  %v3595_v17 = vpop.f32.mrb[33].mxu1  ;;  %vm1592_vm10 = vcmp.eq.s32.totalorder %v4532_v62, %v4263_v55 }
 0x1b8   : > { %v1091_v56 = vpop.f32.mrb[72].mxu0  ;;  %5295 = vst [vmem:[#allocation7_spill] sm:$0xff] %v4539_v36  ;;  %vm1598_vm11 = vcmp.eq.s32.totalorder %v4535_v40, %v4263_v55  ;;  %v4580_v17 = vadd.s32 %v4250_v51, %v1501_v48  ;;  %vm1591_vm14 = vcmp.eq.s32.totalorder %v4532_v62, %v4387_v14  ;;  %vm1597_vm15 = vcmp.eq.s32.totalorder %v4535_v40, %v4387_v14 }
 0x1b9   : > { %v1092_v13 = vadd.f32 %v4122_v50, %v1091_v56  ;;  %v3503_v47 = vpop.f32.mrb[73].mxu0  ;;  %v4557_v7 = vsel %vm1398_vm1, 1.0, %v1387_v11  ;;  %vm3038_vm13 = vmpackc.low %vm1598_vm11, %vm1592_vm10 }
 0x1ba   : > { %v1094_v16 = vpop.f32.mrb[74].mxu0  ;;  %5296 = vst [vmem:[#allocation8_spill] sm:$0xff] %v4557_v7  ;;  %vm1604_vm0 = vcmp.eq.s32.totalorder %v4580_v17, %v4263_v55  ;;  %vm3040_vm3 = vmpackc.low %vm1597_vm15, %vm1591_vm14  ;;  %vm1603_vm5 = vcmp.eq.s32.totalorder %v4580_v17, %v4387_v14 }
 0x1bb   : > { %v1342_v27 = vmax.f32 %v1092_v13, 0.0  ;;  %v1095_v28 = vadd.f32 %v4122_v50, %v1094_v16  ;;  %v3504_v32 = vpop.f32.mrb[75].mxu0  ;;  %v1276_v16 = vadd.f32 %v4122_v50, %v1275_v24 }
 0x1bc   : > { %v1278_v32 = vpop.f32.mrb[34].mxu1 }
 0x1bd   : > { %v1343_v63 = vmax.f32 %v1095_v28, 0.0  ;;  %v4546_v56 = vsel %vm1398_vm1, 1.0, %v1342_v27  ;;  %v1502_v28 = vadd.s32 88, %v4244_v39  ;;  %v3596_v11 = vpop.f32.mrb[35].mxu1 }
 0x1be   : > { %3033 = vmatmul.mubr.msk.bf16.gmra.mrb[56].mxu1 %vm3032_vm6, %v5283_v6 }
 0x1bf   : > { %v4550_v31 = vsel %vm1398_vm1, 1.0, %v1343_v63  ;;  %3035 = vmatprep.mubr.msk.bf16.mxu1 %vm3034_vm7, %v5283_v6  ;;  %v1388_v63 = vmax.f32 %v1276_v16, 0.0  ;;  %v4583_v16 = vadd.s32 %v4250_v51, %v1502_v28  ;;  %v5322_v29 = vld [vmem:[#allocation7_spill] sm:$0xff] }
 0x1c0   : > { %v1099_v47 = vpop.f32.mrb[76].mxu0 }
 0x1c1   : > { %v1100_v25 = vadd.f32 %v4122_v50, %v1099_v47  ;;  %v3507_v27 = vpop.f32.mrb[77].mxu0  ;;  %v1279_v47 = vadd.f32 %v4122_v50, %v1278_v32  ;;  %vm1610_vm2 = vcmp.eq.s32.totalorder %v4583_v16, %v4263_v55  ;;  %vm1609_vm6 = vcmp.eq.s32.totalorder %v4583_v16, %v4387_v14  ;;  %v5321_v15 = vld [vmem:[#allocation8_spill] sm:$0xff] }
 0x1c2   : > { %v1102_v61 = vpop.f32.mrb[78].mxu0  ;;  %vm3042_vm4 = vmpackc.low %vm1610_vm2, %vm1604_vm0  ;;  %v5323_v30 = vpack.c.bf16 %v5321_v15, %v5322_v29 }
 0x1c3   : > { %v1344_v2 = vmax.f32 %v1100_v25, 0.0  ;;  %v1103_v18 = vadd.f32 %v4122_v50, %v1102_v61  ;;  %v3508_v24 = vpop.f32.mrb[79].mxu0  ;;  %v4587_v25 = vsel %vm1398_vm1, 1.0, %v1388_v63  ;;  %v1389_v61 = vmax.f32 %v1279_v47, 0.0  ;;  %vm3044_vm8 = vmpackc.low %vm1609_vm6, %vm1603_vm5 }
 0x1c4   : > { %5297 = vst [vmem:[#allocation9_spill] sm:$0xff] %v4587_v25 }
 0x1c5   : > { %v1345_v27 = vmax.f32 %v1103_v18, 0.0  ;;  %v4592_v11 = vsel %vm1398_vm1, 1.0, %v1344_v2  ;;  %v4603_v48 = vsel %vm1398_vm1, 1.0, %v1389_v61  ;;  %v1283_v18 = vpop.f32.mrb[36].mxu1  ;;  %v1503_v61 = vadd.s32 96, %v4244_v39 }
 0x1c6   : > { %3037 = vmatmul.mubr.msk.bf16.gmra.mrb[60].mxu1 %vm3036_vm12, %v5283_v6  ;;  %5298 = vst [vmem:[#allocation10_spill] sm:$0xff] %v4603_v48  ;;  %v1284_v24 = vadd.f32 %v4122_v50, %v1283_v18  ;;  %v3599_v47 = vpop.f32.mrb[37].mxu1 }
 0x1c7   : > { %v4596_v32 = vsel %vm1398_vm1, 1.0, %v1345_v27  ;;  %3039 = vmatprep.mubr.msk.bf16.mxu1 %vm3038_vm13, %v5283_v6  ;;  %v1286_v60 = vpop.f32.mrb[38].mxu1  ;;  %v4627_v47 = vadd.s32 %v4250_v51, %v1503_v61 }
 0x1c8   : > { %v1107_v63 = vpop.f32.mrb[80].mxu0  ;;  %v1390_v0 = vmax.f32 %v1284_v24, 0.0  ;;  %v3600_v46 = vpop.f32.mrb[39].mxu1 }
 0x1c9   : > { %v1108_v27 = vadd.f32 %v4122_v50, %v1107_v63  ;;  %v3511_v45 = vpop.f32.mrb[81].mxu0  ;;  %vm1616_vm7 = vcmp.eq.s32.totalorder %v4627_v47, %v4263_v55  ;;  %vm1615_vm10 = vcmp.eq.s32.totalorder %v4627_v47, %v4387_v14 }
 0x1ca   : > { %v1110_v26 = vpop.f32.mrb[82].mxu0  ;;  %v1287_v45 = vadd.f32 %v4122_v50, %v1286_v60  ;;  %v4631_v46 = vsel %vm1398_vm1, 1.0, %v1390_v0  ;;  %v1291_v0 = vpop.f32.mrb[40].mxu1  ;;  %vm3046_vm9 = vmpackc.low %vm1616_vm7, %vm1616_vm7 }
 0x1cb   : > { %v1346_v34 = vmax.f32 %v1108_v27, 0.0  ;;  %v1111_v2 = vadd.f32 %v4122_v50, %v1110_v26  ;;  %v3512_v18 = vpop.f32.mrb[83].mxu0  ;;  %5299 = vst [vmem:[#allocation11_spill] sm:$0xff] %v4631_v46  ;;  %v1292_v61 = vadd.f32 %v4122_v50, %v1291_v0  ;;  %vm3048_vm13 = vmpackc.low %vm1615_vm10, %vm1615_vm10  ;;  %v5325_v1 = vld [vmem:[#allocation9_spill] sm:$0xff] }
 0x1cc   : > { %v1391_v26 = vmax.f32 %v1287_v45, 0.0  ;;  %v3603_v18 = vpop.f32.mrb[41].mxu1 }
 0x1cd   : > { %v1347_v63 = vmax.f32 %v1111_v2, 0.0  ;;  %v4636_v24 = vsel %vm1398_vm1, 1.0, %v1346_v34  ;;  %v1294_v22 = vpop.f32.mrb[42].mxu1  ;;  %v1392_v28 = vmax.f32 %v1292_v61, 0.0  ;;  %v5324_v38 = vld [vmem:[#allocation10_spill] sm:$0xff] }
 0x1ce   : > { %3041 = vmatmul.mubr.msk.bf16.gmra.mrb[64].mxu1 %vm3040_vm3, %v5283_v6  ;;  %v4647_v51 = vsel %vm1398_vm1, 1.0, %v1391_v26  ;;  %v1533_v26 = vsub.s32 3, %v4244_v39  ;;  %v3604_v13 = vpop.f32.mrb[43].mxu1  ;;  %v1295_v0 = vadd.f32 %v4122_v50, %v1294_v22 }
 0x1cf   : > { %v4640_v27 = vsel %vm1398_vm1, 1.0, %v1347_v63  ;;  %3043 = vmatprep.mubr.msk.bf16.mxu1 %vm3042_vm4, %v5283_v6  ;;  %5300 = vst [vmem:[#allocation12_spill] sm:$0xff] %v4647_v51  ;;  %v4673_v13 = vsel %vm1398_vm1, 1.0, %v1392_v28 }
 0x1d0   : > { %v1115_v2 = vpop.f32.mrb[84].mxu0  ;;  %5301 = vst [vmem:[#allocation13_spill] sm:$0xff] %v4673_v13 }
 0x1d1   : > { %v1116_v45 = vadd.f32 %v4122_v50, %v1115_v2  ;;  %v3515_v63 = vpop.f32.mrb[85].mxu0  ;;  %v4669_v2 = vrot.slane %v4253_v53, %v1533_v26 }
 0x1d2   : > { %v1118_v60 = vpop.f32.mrb[86].mxu0 }
 0x1d3   : > { %v1348_v12 = vmax.f32 %v1116_v45, 0.0  ;;  %v1119_v8 = vadd.f32 %v4122_v50, %v1118_v60  ;;  %v3516_v6 = vpop.f32.mrb[87].mxu0  ;;  %v1393_v60 = vmax.f32 %v1295_v0, 0.0  ;;  %vm1546_vm11 = vcmp.eq.s32.totalorder %v4257_v54, %v4669_v2 }
 0x1d4   : > { %v5302_v6 = vmov 1.0|1.0   ;;  %vm1552_vm12 = vcmp.eq.s32.totalorder %v4260_v49, %v4669_v2  ;;  %vm1558_vm2 = vcmp.eq.s32.totalorder %v4390_v19, %v4669_v2  ;;  %vm1564_vm3 = vcmp.eq.s32.totalorder %v4393_v20, %v4669_v2 }
 0x1d5   : > { %v1349_v55 = vmax.f32 %v1119_v8, 0.0  ;;  %v4678_v61 = vsel %vm1398_vm1, 1.0, %v1348_v12  ;;  %v4687_v22 = vsel %vm1398_vm1, 1.0, %v1393_v60  ;;  %v1299_v8 = vpop.f32.mrb[44].mxu1  ;;  %vm3050_vm14 = vmpackc.low %vm1552_vm12, %vm1546_vm11 }
 0x1d6   : > { %3045 = vmatmul.mubr.msk.bf16.gmra.mrb[68].mxu1 %vm3044_vm8, %v5302_v6  ;;  %5303 = vst [vmem:[#allocation14_spill] sm:$0xff] %v4687_v22  ;;  %v1300_v63 = vadd.f32 %v4122_v50, %v1299_v8  ;;  %v3607_v26 = vpop.f32.mrb[45].mxu1  ;;  %vm3054_vm5 = vmpackc.low %vm1564_vm3, %vm1558_vm2  ;;  %vm1570_vm8 = vcmp.eq.s32.totalorder %v4433_v10, %v4669_v2 }
 0x1d7   : > { %v4682_v18 = vsel %vm1398_vm1, 1.0, %v1349_v55  ;;  %3047 = vmatprep.mubr.msk.bf16.mxu1 %vm3046_vm9, %v5302_v6  ;;  %v1302_v60 = vpop.f32.mrb[46].mxu1  ;;  %vm1576_vm9 = vcmp.eq.s32.totalorder %v4436_v57, %v4669_v2 }
 0x1d8   : > { %v1123_v45 = vpop.f32.mrb[88].mxu0  ;;  %v1394_v28 = vmax.f32 %v1300_v63, 0.0  ;;  %v3608_v46 = vpop.f32.mrb[47].mxu1  ;;  %v1303_v8 = vadd.f32 %v4122_v50, %v1302_v60 }
 0x1d9   : > { %v1124_v0 = vadd.f32 %v4122_v50, %v1123_v45  ;;  %v3519_v55 = vpop.f32.mrb[89].mxu0 }
 0x1da   : > { %v1126_v34 = vpop.f32.mrb[90].mxu0  ;;  %v4705_v26 = vsel %vm1398_vm1, 1.0, %v1394_v28  ;;  %v1395_v55 = vmax.f32 %v1303_v8, 0.0 }
 0x1db   : > { %v1350_v14 = vmax.f32 %v1124_v0, 0.0  ;;  %v1127_v51 = vadd.f32 %v4122_v50, %v1126_v34  ;;  %v3520_v12 = vpop.f32.mrb[91].mxu0  ;;  %5304 = vst [vmem:[#allocation15_spill] sm:$0xff] %v4705_v26 }
 0x1dc   : > { %v4719_v50 = vsel %vm1398_vm1, 1.0, %v1395_v55  ;;  %v4728_v12 = vld [vmem:[%s5276_s6] ss:$0 sm:$0xff] }
 0x1dd   : > { %v1351_v45 = vmax.f32 %v1127_v51, 0.0  ;;  %v4710_v63 = vsel %vm1398_vm1, 1.0, %v1350_v14  ;;  %5305 = vst [vmem:[#allocation16_spill] sm:$0xff] %v4719_v50 }
 0x1de   : > { %3049 = vmatmul.mubr.msk.bf16.gmra.mrb[72].mxu1 %vm3048_vm13, %v5302_v6  ;;  %vm1582_vm13 = vcmp.eq.s32.totalorder %v4488_v42, %v4669_v2 }
 0x1df   : > { %v4714_v46 = vsel %vm1398_vm1, 1.0, %v1351_v45  ;;  %3051 = vmatprep.mubr.msk.bf16.mxu1 %vm3050_vm14, %v5302_v6  ;;  %vm1588_vm14 = vcmp.eq.s32.totalorder %v4491_v43, %v4669_v2 }
 0x1e0   : > { %v1131_v34 = vpop.f32.mrb[92].mxu0 }
 0x1e1   : > { %v1132_v0 = vadd.f32 %v4728_v12, %v1131_v34  ;;  %v3523_v60 = vpop.f32.mrb[93].mxu0 }
 0x1e2   : > { %v1134_v14 = vpop.f32.mrb[94].mxu0 }
 0x1e3   : > { %v1352_v8 = vmax.f32 %v1132_v0, 0.0  ;;  %v1135_v45 = vadd.f32 %v4728_v12, %v1134_v14  ;;  %v3524_v55 = vpop.f32.mrb[95].mxu0 }
 0x1e5   : > { %v1353_v13 = vmax.f32 %v1135_v45, 0.0  ;;  %v4734_v51 = vsel %vm1398_vm1, 1.0, %v1352_v8 }
 0x1e7   : > { %v4738_v28 = vsel %vm1398_vm1, 1.0, %v1353_v13 }
 0x1e8   : > { %v1139_v50 = vpop.f32.mrb[96].mxu0 }
 0x1e9   : > { %v1140_v34 = vadd.f32 %v4728_v12, %v1139_v50  ;;  %v3527_v60 = vpop.f32.mrb[97].mxu0 }
 0x1ea   : > { %v1142_v0 = vpop.f32.mrb[98].mxu0 }
 0x1eb   : > { %v1354_v22 = vmax.f32 %v1140_v34, 0.0  ;;  %v1143_v14 = vadd.f32 %v4728_v12, %v1142_v0  ;;  %v3528_v45 = vpop.f32.mrb[99].mxu0  ;;  %v5306_v0 = vpack.c.bf16 %v4453_v59, %v4449_v58  ;;  %v5307_v58 = vpack.c.bf16 %v4504_v44, %v4500_v3 }
 0x1ec   : > { %v5308_v3 = vpack.c.bf16 %v4550_v31, %v4546_v56  ;;  %v5309_v56 = vpack.c.bf16 %v4596_v32, %v4592_v11  ;;  %v5310_v11 = vpack.c.bf16 %v4640_v27, %v4636_v24  ;;  %v5311_v24 = vpack.c.bf16 %v4682_v18, %v4678_v61 }
 0x1ed   : > { %v1355_v55 = vmax.f32 %v1143_v14, 0.0  ;;  %v1447_v8 = vsel %vm1398_vm1, 1.0, %v1354_v22 }
 0x1ef   : > { %v1448_v13 = vsel %vm1398_vm1, 1.0, %v1355_v55 }
 0x1f0   : > { %v1147_v25 = vpop.f32.mrb[100].mxu0  ;;  %v1856_v48 = vpack.c.bf16 %v1448_v13, %v1447_v8 }
 0x1f1   : > { %v1148_v26 = vadd.f32 %v4728_v12, %v1147_v25  ;;  %v3531_v36 = vpop.f32.mrb[101].mxu0 }
 0x1f2   : > { %v1150_v7 = vpop.f32.mrb[102].mxu0  ;;  %3297 = vmatprep.subr.bf16.mxu1 %v1856_v48 }
 0x1f3   : > { %v1356_v50 = vmax.f32 %v1148_v26, 0.0  ;;  %v1151_v34 = vadd.f32 %v4728_v12, %v1150_v7  ;;  %v3532_v60 = vpop.f32.mrb[103].mxu0  ;;  %3298 = vmatpush3.bf16.msra.mxu1 %v5306_v0 }
 0x1f5   : > { %v1357_v14 = vmax.f32 %v1151_v34, 0.0  ;;  %v1449_v22 = vsel %vm1398_vm1, 1.0, %v1356_v50 }
 0x1f7   : > { %v1450_v45 = vsel %vm1398_vm1, 1.0, %v1357_v14 }
 0x1f8   : > { %v1155_v55 = vpop.f32.mrb[104].mxu0  ;;  %v1857_v25 = vpack.c.bf16 %v1450_v45, %v1449_v22 }
 0x1f9   : > { %v1156_v36 = vadd.f32 %v4728_v12, %v1155_v55  ;;  %v3535_v48 = vpop.f32.mrb[105].mxu0 }
 0x1fa   : > { %v1158_v26 = vpop.f32.mrb[106].mxu0  ;;  %3299 = vmatprep.subr.bf16.mxu1 %v1857_v25 }
 0x1fb   : > { %v1358_v7 = vmax.f32 %v1156_v36, 0.0  ;;  %v1159_v8 = vadd.f32 %v4728_v12, %v1158_v26  ;;  %v3536_v13 = vpop.f32.mrb[107].mxu0  ;;  %3300 = vmatpush3.bf16.msra.mxu1 %v5307_v58 }
 0x1fd   : > { %v1359_v59 = vmax.f32 %v1159_v8, 0.0  ;;  %v1451_v50 = vsel %vm1398_vm1, 1.0, %v1358_v7 }
 0x1ff   : > { %v1452_v34 = vsel %vm1398_vm1, 1.0, %v1359_v59 }
 0x200   : > { %v1163_v60 = vpop.f32.mrb[108].mxu0  ;;  %v1858_v0 = vpack.c.bf16 %v1452_v34, %v1451_v50 }
 0x201   : > { %v1164_v14 = vadd.f32 %v4728_v12, %v1163_v60  ;;  %v3539_v22 = vpop.f32.mrb[109].mxu0 }
 0x202   : > { %v1166_v45 = vpop.f32.mrb[110].mxu0  ;;  %3301 = vmatprep.subr.bf16.mxu1 %v1858_v0 }
 0x203   : > { %v1360_v55 = vmax.f32 %v1164_v14, 0.0  ;;  %v1167_v25 = vadd.f32 %v4728_v12, %v1166_v45  ;;  %v3540_v36 = vpop.f32.mrb[111].mxu0  ;;  %3302 = vmatpush3.bf16.msra.mxu1 %v5308_v3 }
 0x205   : > { %v1361_v44 = vmax.f32 %v1167_v25, 0.0  ;;  %v1453_v48 = vsel %vm1398_vm1, 1.0, %v1360_v55 }
 0x207   : > { %v1454_v26 = vsel %vm1398_vm1, 1.0, %v1361_v44 }
 0x208   : > { %v1171_v7 = vpop.f32.mrb[112].mxu0  ;;  %v1859_v8 = vpack.c.bf16 %v1454_v26, %v1453_v48 }
 0x209   : > { %v1172_v13 = vadd.f32 %v4728_v12, %v1171_v7  ;;  %v3543_v58 = vpop.f32.mrb[113].mxu0 }
 0x20a   : > { %v1174_v59 = vpop.f32.mrb[114].mxu0  ;;  %3303 = vmatprep.subr.bf16.mxu1 %v1859_v8 }
 0x20b   : > { %v1362_v50 = vmax.f32 %v1172_v13, 0.0  ;;  %v1175_v34 = vadd.f32 %v4728_v12, %v1174_v59  ;;  %v3544_v60 = vpop.f32.mrb[115].mxu0  ;;  %3304 = vmatpush3.bf16.msra.mxu1 %v5309_v56 }
 0x20d   : > { %v1363_v31 = vmax.f32 %v1175_v34, 0.0  ;;  %v1455_v0 = vsel %vm1398_vm1, 1.0, %v1362_v50 }
 0x20f   : > { %v1456_v14 = vsel %vm1398_vm1, 1.0, %v1363_v31 }
 0x210   : > { %v1179_v22 = vpop.f32.mrb[116].mxu0  ;;  %v1860_v45 = vpack.c.bf16 %v1456_v14, %v1455_v0 }
 0x211   : > { %v1180_v55 = vadd.f32 %v4728_v12, %v1179_v22  ;;  %v3547_v25 = vpop.f32.mrb[117].mxu0 }
 0x212   : > { %v1182_v36 = vpop.f32.mrb[118].mxu0  ;;  %3305 = vmatprep.subr.bf16.mxu1 %v1860_v45  ;;  %v1529_v45 = vsub.s32 2, %v4244_v39 }
 0x213   : > { %v1364_v3 = vmax.f32 %v1180_v55, 0.0  ;;  %v1183_v44 = vadd.f32 %v4728_v12, %v1182_v36  ;;  %v3548_v48 = vpop.f32.mrb[119].mxu0  ;;  %3306 = vmatpush3.bf16.msra.mxu1 %v5310_v11 }
 0x214   : > { %v4809_v48 = vrot.slane %v4253_v53, %v1529_v45 }
 0x215   : > { %v1365_v32 = vmax.f32 %v1183_v44, 0.0  ;;  %v1457_v26 = vsel %vm1398_vm1, 1.0, %v1364_v3  ;;  %v5312_v44 = vpack.c.bf16 %v4714_v46, %v4710_v63 }
 0x216   : > { %vm1545_vm15 = vcmp.eq.s32.totalorder %v4257_v54, %v4809_v48  ;;  %vm1551_vm0 = vcmp.eq.s32.totalorder %v4260_v49, %v4809_v48  ;;  %vm1557_vm6 = vcmp.eq.s32.totalorder %v4390_v19, %v4809_v48  ;;  %vm1563_vm7 = vcmp.eq.s32.totalorder %v4393_v20, %v4809_v48 }
 0x217   : > { %v1458_v7 = vsel %vm1398_vm1, 1.0, %v1365_v32  ;;  %vm3052_vm4 = vmpackc.low %vm1551_vm0, %vm1545_vm15  ;;  %vm1569_vm11 = vcmp.eq.s32.totalorder %v4433_v10, %v4809_v48  ;;  %vm1575_vm12 = vcmp.eq.s32.totalorder %v4436_v57, %v4809_v48  ;;  %vm1581_vm2 = vcmp.eq.s32.totalorder %v4488_v42, %v4809_v48 }
 0x218   : > { %v1187_v8 = vpop.f32.mrb[120].mxu0  ;;  %v1861_v13 = vpack.c.bf16 %v1458_v7, %v1457_v26  ;;  %vm3056_vm10 = vmpackc.low %vm1563_vm7, %vm1557_vm6  ;;  %vm1587_vm3 = vcmp.eq.s32.totalorder %v4491_v43, %v4809_v48 }
 0x219   : > { %v1188_v58 = vadd.f32 %v4728_v12, %v1187_v8  ;;  %v3551_v59 = vpop.f32.mrb[121].mxu0  ;;  %vm3060_vm15 = vmpackc.low %vm1575_vm12, %vm1569_vm11 }
 0x21a   : > { %v1190_v50 = vpop.f32.mrb[122].mxu0  ;;  %3307 = vmatprep.subr.bf16.mxu1 %v1861_v13  ;;  %vm3062_vm0 = vmpackc.low %vm1588_vm14, %vm1582_vm13  ;;  %vm1605_vm13 = vcmp.eq.s32.totalorder %v4580_v17, %v4809_v48  ;;  %vm1611_vm14 = vcmp.eq.s32.totalorder %v4583_v16, %v4809_v48 }
 0x21b   : > { %v1366_v34 = vmax.f32 %v1188_v58, 0.0  ;;  %v1191_v60 = vadd.f32 %v4728_v12, %v1190_v50  ;;  %v3552_v56 = vpop.f32.mrb[123].mxu0  ;;  %3308 = vmatpush3.bf16.msra.mxu1 %v5311_v24  ;;  %v5313_v50 = vpack.c.bf16 %v4738_v28, %v4734_v51  ;;  %vm3064_vm6 = vmpackc.low %vm1587_vm3, %vm1581_vm2  ;;  %vm1548_vm3 = vcmp.eq.s32.totalorder %v4257_v54, %v4912_v21 }
 0x21c   : > { %v5327_v51 = vmov 0.0  }
 0x21d   : > { %v1367_v27 = vmax.f32 %v1191_v60, 0.0  ;;  %v1459_v31 = vsel %vm1398_vm1, 1.0, %v1366_v34  ;;  %v3861_v34 = vmov 0   ;;  %v2949_v28 = vsel %vm1548_vm3, 1.0, %v5327_v51 }
 0x21e   : > { %vm1590_vm3 = vcmp.eq.s32.totalorder %v4491_v43, %v4912_v21 }
 0x21f   : > { %v1460_v0 = vsel %vm1398_vm1, 1.0, %v1367_v27 }
 0x220   : > { %v1195_v14 = vpop.f32.mrb[124].mxu0  ;;  %v1862_v22 = vpack.c.bf16 %v1460_v0, %v1459_v31  ;;  %v1537_v31 = vsub.s32 4, %v4244_v39  ;;  %v5328_v0 = vld [vmem:[#allocation12_spill] sm:$0xff]  ;;  %v5331_v39 = vld [vmem:[#allocation14_spill] sm:$0xff] }
 0x221   : > { %v1196_v55 = vadd.f32 %v4728_v12, %v1195_v14  ;;  %v3555_v25 = vpop.f32.mrb[125].mxu0  ;;  %v5329_v14 = vld [vmem:[#allocation11_spill] sm:$0xff] }
 0x222   : > { %v1198_v36 = vpop.f32.mrb[126].mxu0  ;;  %3309 = vmatprep.subr.bf16.mxu1 %v1862_v22  ;;  %v5330_v22 = vpack.c.bf16 %v5328_v0, %v5329_v14  ;;  %v5332_v25 = vld [vmem:[#allocation13_spill] sm:$0xff] }
 0x223   : > { %v1368_v3 = vmax.f32 %v1196_v55, 0.0  ;;  %v1199_v61 = vadd.f32 %v4728_v12, %v1198_v36  ;;  %v3556_v18 = vpop.f32.mrb[127].mxu0  ;;  %3310 = vmatpush3.bf16.msra.mxu1 %v5312_v44  ;;  %v4937_v55 = vrot.slane %v3727_v35, %v1537_v31  ;;  %v5333_v36 = vpack.c.bf16 %v5331_v39, %v5332_v25  ;;  %v5335_v44 = vld [vmem:[#allocation15_spill] sm:$0xff] }
 0x224   : > { %v5334_v18 = vld [vmem:[#allocation16_spill] sm:$0xff] }
 0x225   : > { %v1369_v11 = vmax.f32 %v1199_v61, 0.0  ;;  %v1461_v32 = vsel %vm1398_vm1, 1.0, %v1368_v3 }
 0x227   : > { %v1462_v26 = vsel %vm1398_vm1, 1.0, %v1369_v11 }
 0x228   : > { %v1203_v7 = vpop.f32.mrb[128].mxu0  ;;  %v1863_v8 = vpack.c.bf16 %v1462_v26, %v1461_v32 }
 0x229   : > { %v1204_v63 = vadd.f32 %v4728_v12, %v1203_v7  ;;  %v3559_v46 = vpop.f32.mrb[129].mxu0 }
 0x22a   : > { %v1206_v53 = vpop.f32.mrb[130].mxu0  ;;  %3311 = vmatprep.subr.bf16.mxu1 %v1863_v8 }
 0x22b   : > { %v1370_v13 = vmax.f32 %v1204_v63, 0.0  ;;  %v1207_v58 = vadd.f32 %v4728_v12, %v1206_v53  ;;  %v3560_v59 = vpop.f32.mrb[131].mxu0  ;;  %3312 = vmatpush3.bf16.msra.mxu1 %v5313_v50 }
 0x22c   : > { %2075 = vmatprep.subr.bf16.mxu1 %v3861_v34 }
 0x22d   : > { %v1463_v60 = vsel %vm1398_vm1, 1.0, %v1370_v13  ;;  %v1371_v56 = vmax.f32 %v1207_v58, 0.0 }
 0x22e   : > { %3053 = vmatmul.mubr.msk.bf16.vlgmr.msra.gmra.mrb[76].mxu1 %vm3052_vm4, %v5302_v6  ;;  %vm1594_vm4 = vcmp.eq.s32.totalorder %v4532_v62, %v4669_v2 }
 0x22f   : > { %v1464_v24 = vsel %vm1398_vm1, 1.0, %v1371_v56  ;;  %3055 = vmatprep.mubr.msk.bf16.mxu1 %vm3054_vm5, %v5302_v6  ;;  %vm3058_vm1 = vmpackc.low %vm1576_vm9, %vm1570_vm8  ;;  %vm1600_vm5 = vcmp.eq.s32.totalorder %v4535_v40, %v4669_v2  ;;  %vm1593_vm8 = vcmp.eq.s32.totalorder %v4532_v62, %v4809_v48  ;;  %vm1599_vm9 = vcmp.eq.s32.totalorder %v4535_v40, %v4809_v48 }
 0x230   : > { %v1864_v12 = vpack.c.bf16 %v1464_v24, %v1463_v60  ;;  %vm3066_vm7 = vmpackc.low %vm1600_vm5, %vm1594_vm4  ;;  %vm1554_vm4 = vcmp.eq.s32.totalorder %v4260_v49, %v4912_v21  ;;  %vm1617_vm5 = vcmp.eq.s32.totalorder %v4627_v47, %v4809_v48  ;;  %v5336_v48 = vpack.c.bf16 %v5334_v18, %v5335_v44 }
 0x231   : > { %vm3068_vm11 = vmpackc.low %vm1599_vm9, %vm1593_vm8  ;;  %v2955_v27 = vsel %vm1554_vm4, 1.0, %v5327_v51  ;;  %vm1560_vm8 = vcmp.eq.s32.totalorder %v4390_v19, %v4912_v21  ;;  %vm1566_vm9 = vcmp.eq.s32.totalorder %v4393_v20, %v4912_v21  ;;  %vm1571_vm4 = vcmp.eq.s32.totalorder %v4433_v10, %v4937_v55 }
 0x232   : > { %2076 = vmatpush1.bf16.msra.mxu1 %v1864_v12  ;;  %v1782_v45 = vpack.c.bf16 %v2955_v27, %v2949_v28  ;;  %v2961_v3 = vsel %vm1560_vm8, 1.0, %v5327_v51  ;;  %v2967_v61 = vsel %vm1566_vm9, 1.0, %v5327_v51  ;;  %vm1596_vm8 = vcmp.eq.s32.totalorder %v4532_v62, %v4912_v21 }
 0x233   : > { %2077 = vmatprep.subr.bf16.mxu1 %v3861_v34  ;;  %v1788_v11 = vpack.c.bf16 %v2967_v61, %v2961_v3  ;;  %vm1602_vm9 = vcmp.eq.s32.totalorder %v4535_v40, %v4912_v21 }
 0x236   : > { %3057 = vmatmul.mubr.msk.bf16.gmra.mrb[80].mxu1 %vm3056_vm10, %v5302_v6  ;;  %vm1606_vm10 = vcmp.eq.s32.totalorder %v4580_v17, %v4669_v2 }
 0x237   : > { %2078 = vmatpush1.bf16.msra.mxu1 %v5314_v52  ;;  %3059 = vmatprep.mubr.msk.bf16.mxu1 %vm3058_vm1, %v5302_v6  ;;  %vm1612_vm1 = vcmp.eq.s32.totalorder %v4583_v16, %v4669_v2 }
 0x238   : > { %2079 = vmatprep.subr.bf16.mxu1 %v3861_v34  ;;  %vm3070_vm12 = vmpackc.low %vm1612_vm1, %vm1606_vm10  ;;  %vm1547_vm10 = vcmp.eq.s32.totalorder %v4257_v54, %v4937_v55  ;;  %vm1553_vm1 = vcmp.eq.s32.totalorder %v4260_v49, %v4937_v55 }
 0x23b   : > { %2080 = vmatpush1.bf16.msra.mxu1 %v5315_v4 }
 0x23c   : > { %2081 = vmatprep.subr.bf16.mxu1 %v3861_v34 }
 0x23e   : > { %3061 = vmatmul.mubr.msk.bf16.gmra.mrb[84].mxu1 %vm3060_vm15, %v5302_v6  ;;  %vm1618_vm15 = vcmp.eq.s32.totalorder %v4627_v47, %v4669_v2  ;;  %v5326_v2 = vpack.c.bf16 %v5324_v38, %v5325_v1 }
 0x23f   : > { %2082 = vmatpush1.bf16.msra.mxu1 %v5316_v5  ;;  %3063 = vmatprep.mubr.msk.bf16.mxu1 %vm3062_vm0, %v5302_v6  ;;  %vm3072_vm0 = vmpackc.low %vm1611_vm14, %vm1605_vm13  ;;  %vm1578_vm13 = vcmp.eq.s32.totalorder %v4436_v57, %v4912_v21  ;;  %vm1559_vm14 = vcmp.eq.s32.totalorder %v4390_v19, %v4937_v55 }
 0x240   : > { %2083 = vmatprep.subr.bf16.mxu1 %v3861_v34  ;;  %vm3074_vm2 = vmpackc.low %vm1618_vm15, %vm1618_vm15  ;;  %vm1565_vm15 = vcmp.eq.s32.totalorder %v4393_v20, %v4937_v55  ;;  %v2979_v49 = vsel %vm1578_vm13, 1.0, %v5327_v51  ;;  %v2991_v20 = vsel %vm1590_vm3, 1.0, %v5327_v51  ;;  %vm1614_vm13 = vcmp.eq.s32.totalorder %v4583_v16, %v4912_v21 }
 0x241   : > { %vm1607_vm3 = vcmp.eq.s32.totalorder %v4580_v17, %v4937_v55 }
 0x243   : > { %2084 = vmatpush1.bf16.msra.mxu1 %v5317_v33 }
 0x244   : > { %2085 = vmatprep.subr.bf16.mxu1 %v3861_v34 }
 0x246   : > { %3065 = vmatmul.mubr.msk.bf16.gmra.mrb[88].mxu1 %vm3064_vm6, %v5302_v6  ;;  %vm3076_vm6 = vmpackc.low %vm1617_vm5, %vm1617_vm5  ;;  %vm1577_vm5 = vcmp.eq.s32.totalorder %v4436_v57, %v4937_v55  ;;  %v3003_v57 = vsel %vm1602_vm9, 1.0, %v5327_v51 }
 0x247   : > { %2086 = vmatpush1.bf16.msra.mxu1 %v5318_v37  ;;  %3067 = vmatprep.mubr.msk.bf16.mxu1 %vm3066_vm7, %v5302_v6  ;;  %vm1877_vm7 = vcmask 654336  }
 0x248   : > { %2087 = vmatprep.subr.bf16.mxu1 %v3861_v34 }
 0x24b   : > { %2088 = vmatpush1.bf16.msra.mxu1 %v5319_v9 }
 0x24c   : > { %2089 = vmatprep.subr.bf16.mxu1 %v3861_v34 }
 0x24e   : > { %3069 = vmatmul.mubr.msk.bf16.gmra.mrb[92].mxu1 %vm3068_vm11, %v5302_v6  ;;  %vm3079_vm11 = vmpackc.low %vm1553_vm1, %vm1547_vm10  ;;  %vm1583_vm10 = vcmp.eq.s32.totalorder %v4488_v42, %v4937_v55  ;;  %vm1589_vm1 = vcmp.eq.s32.totalorder %v4491_v43, %v4937_v55  ;;  %v3015_v43 = vsel %vm1614_vm13, 1.0, %v5327_v51 }
 0x24f   : > { %2090 = vmatpush1.bf16.msra.mxu1 %v5320_v41  ;;  %3071 = vmatprep.mubr.msk.bf16.mxu1 %vm3070_vm12, %v5302_v6  ;;  %vm1572_vm12 = vcmp.eq.s32.totalorder %v4433_v10, %v4912_v21  ;;  %v2997_v10 = vsel %vm1596_vm8, 1.0, %v5327_v51 }
 0x250   : > { %2091 = vmatprep.subr.bf16.mxu1 %v3861_v34  ;;  %v2973_v54 = vsel %vm1572_vm12, 1.0, %v5327_v51  ;;  %v1806_v7 = vpack.c.bf16 %v3003_v57, %v2997_v10  ;;  %vm1608_vm12 = vcmp.eq.s32.totalorder %v4580_v17, %v4912_v21 }
 0x251   : > { %v1794_v32 = vpack.c.bf16 %v2979_v49, %v2973_v54 }
 0x253   : > { %2092 = vmatpush1.bf16.msra.mxu1 %v5323_v30 }
 0x254   : > { %2093 = vmatprep.subr.bf16.mxu1 %v3861_v34 }
 0x256   : > { %3073 = vmatmul.mubr.msk.bf16.gmra.mrb[96].mxu1 %vm3072_vm0, %v5302_v6  ;;  %vm3082_vm0 = vmpackc.low %vm1565_vm15, %vm1559_vm14  ;;  %vm1595_vm14 = vcmp.eq.s32.totalorder %v4532_v62, %v4937_v55  ;;  %vm1601_vm15 = vcmp.eq.s32.totalorder %v4535_v40, %v4937_v55 }
 0x257   : > { %2094 = vmatpush1.bf16.msra.mxu1 %v5326_v2  ;;  %3075 = vmatprep.mubr.msk.bf16.mxu1 %vm3074_vm2, %v5302_v6  ;;  %vm1584_vm2 = vcmp.eq.s32.totalorder %v4488_v42, %v4912_v21  ;;  %v3009_v42 = vsel %vm1608_vm12, 1.0, %v5327_v51 }
 0x258   : > { %2095 = vmatprep.subr.bf16.mxu1 %v3861_v34  ;;  %v2985_v19 = vsel %vm1584_vm2, 1.0, %v5327_v51  ;;  %v1812_v46 = vpack.c.bf16 %v3015_v43, %v3009_v42  ;;  %vm1620_vm2 = vcmp.eq.s32.totalorder %v4627_v47, %v4912_v21 }
 0x259   : > { %v1800_v26 = vpack.c.bf16 %v2991_v20, %v2985_v19  ;;  %v3021_v62 = vsel %vm1620_vm2, 1.0, %v5327_v51 }
 0x25b   : > { %2096 = vmatpush1.bf16.msra.mxu1 %v5330_v22 }
 0x25c   : > { %2097 = vmatprep.subr.bf16.mxu1 %v3861_v34 }
 0x25e   : > { %3077 = vmatmul.mubr.msk.bf16.gmra.mrb[100].mxu1 %vm3076_vm6, %v5302_v6  ;;  %vm3085_vm6 = vmpackc.low %vm1577_vm5, %vm1571_vm4  ;;  %vm1613_vm4 = vcmp.eq.s32.totalorder %v4583_v16, %v4937_v55 }
 0x25f   : > { %2098 = vmatpush1.bf16.msra.mxu1 %v5333_v36  ;;  %3078 = vmatprep.mubr.msk.bf16.mxu1 %vm1877_vm7, %v1782_v45  ;;  %vm3094_vm5 = vmpackc.low %vm1613_vm4, %vm1607_vm3 }
 0x260   : > { %2099 = vmatprep.subr.bf16.mxu1 %v3861_v34  ;;  %v1818_v34 = vpack.c.bf16 %v3021_v62, %v3021_v62 }
 0x263   : > { %2100 = vmatpush1.bf16.msra.mxu1 %v5336_v48 }
 0x266   : > { %3080 = vmatmul.mubr.msk.bf16.vlgmr.msra.gmra.mrb[104].mxu1 %vm3079_vm11, %v5302_v6  ;;  %vm3088_vm11 = vmpackc.low %vm1589_vm1, %vm1583_vm10 }
 0x267   : > { %3081 = vmatprep.mubr.msk.bf16.mxu1 %vm1877_vm7, %v1788_v11 }
 0x26e   : > { %3083 = vmatmul.mubr.msk.bf16.gmra.mrb[108].mxu1 %vm3082_vm0, %v5302_v6  ;;  %vm3091_vm0 = vmpackc.low %vm1601_vm15, %vm1595_vm14 }
 0x26f   : > { %3084 = vmatprep.mubr.msk.bf16.mxu1 %vm1877_vm7, %v1794_v32 }
 0x276   : > { %3086 = vmatmul.mubr.msk.bf16.gmra.mrb[112].mxu1 %vm3085_vm6, %v5302_v6  ;;  %vm1619_vm6 = vcmp.eq.s32.totalorder %v4627_v47, %v4937_v55 }
 0x277   : > { %3087 = vmatprep.mubr.msk.bf16.mxu1 %vm1877_vm7, %v1800_v26  ;;  %vm3097_vm8 = vmpackc.low %vm1619_vm6, %vm1619_vm6 }
 0x27e   : > { %3089 = vmatmul.mubr.msk.bf16.gmra.mrb[116].mxu1 %vm3088_vm11, %v5302_v6 }
 0x27f   : > { %3090 = vmatprep.mubr.msk.bf16.mxu1 %vm1877_vm7, %v1806_v7 }
 0x281   : > { %v3255_v8 = vpop.f32.mrb[48].mxu1 }
 0x282   : > { %v3256_v63 = vpop.f32.mrb[49].mxu1 }
 0x283   : > { %v3257_v53 = vadd.f32 %v3256_v63, %v3255_v8  ;;  %v3258_v13 = vpop.f32.mrb[50].mxu1 }
 0x284   : > { %v3259_v58 = vpop.f32.mrb[51].mxu1 }
 0x285   : > { %v3260_v59 = vadd.f32 %v3259_v58, %v3258_v13 }
 0x286   : > { %3092 = vmatmul.mubr.msk.bf16.gmra.mrb[120].mxu1 %vm3091_vm0, %v5302_v6 }
 0x287   : > { %3093 = vmatprep.mubr.msk.bf16.mxu1 %vm1877_vm7, %v1812_v46 }
 0x289   : > { %v3261_v40 = vpop.f32.mrb[52].mxu1 }
 0x28a   : > { %v3262_v50 = vpop.f32.mrb[53].mxu1 }
 0x28b   : > { %v3263_v60 = vadd.f32 %v3262_v50, %v3261_v40  ;;  %v3264_v56 = vpop.f32.mrb[54].mxu1 }
 0x28c   : > { %v3265_v24 = vpop.f32.mrb[55].mxu1 }
 0x28d   : > { %v3266_v12 = vadd.f32 %v3265_v24, %v3264_v56 }
 0x28e   : > { %3095 = vmatmul.mubr.msk.bf16.gmra.mrb[124].mxu1 %vm3094_vm5, %v5302_v6 }
 0x28f   : > { %3096 = vmatprep.mubr.msk.bf16.mxu1 %vm1877_vm7, %v1818_v34 }
 0x291   : > { %v3267_v17 = vpop.f32.mrb[56].mxu1 }
 0x292   : > { %v3268_v52 = vpop.f32.mrb[57].mxu1 }
 0x293   : > { %v3269_v16 = vadd.f32 %v3268_v52, %v3267_v17  ;;  %v3270_v4 = vpop.f32.mrb[58].mxu1 }
 0x294   : > { %v3271_v5 = vpop.f32.mrb[59].mxu1 }
 0x295   : > { %v3272_v33 = vadd.f32 %v3271_v5, %v3270_v4 }
 0x296   : > { %3098 = vmatmul.mubr.msk.bf16.gmra.mrb[128].mxu1 %vm3097_vm8, %v5302_v6 }
 0x299   : > { %v3273_v37 = vpop.f32.mrb[60].mxu1 }
 0x29a   : > { %v3274_v9 = vpop.f32.mrb[61].mxu1 }
 0x29b   : > { %v3275_v23 = vadd.f32 %v3274_v9, %v3273_v37  ;;  %v3276_v41 = vpop.f32.mrb[62].mxu1 }
 0x29c   : > { %v3277_v35 = vpop.f32.mrb[63].mxu1 }
 0x29d   : > { %v3278_v21 = vadd.f32 %v3277_v35, %v3276_v41 }
 0x2a1   : > { %v3279_v15 = vpop.f32.mrb[64].mxu1 }
 0x2a2   : > { %v3280_v29 = vpop.f32.mrb[65].mxu1 }
 0x2a3   : > { %v3281_v30 = vadd.f32 %v3280_v29, %v3279_v15  ;;  %v3282_v38 = vpop.f32.mrb[66].mxu1 }
 0x2a4   : > { %v3283_v47 = vpop.f32.mrb[67].mxu1 }
 0x2a5   : > { %v3284_v1 = vadd.f32 %v3283_v47, %v3282_v38 }
 0x2a9   : > { %v3285_v2 = vpop.f32.mrb[68].mxu1 }
 0x2aa   : > { %v3286_v51 = vpop.f32.mrb[69].mxu1 }
 0x2ab   : > { %v3287_v28 = vadd.f32 %v3286_v51, %v3285_v2  ;;  %v3288_v27 = vpop.f32.mrb[70].mxu1 }
 0x2ac   : > { %v3289_v31 = vpop.f32.mrb[71].mxu1 }
 0x2ad   : > { %v3290_v0 = vadd.f32 %v3289_v31, %v3288_v27 }
 0x2b1   : > { %v3291_v14 = vpop.f32.mrb[72].mxu1 }
 0x2b2   : > { %v3292_v6 = vpop.f32.mrb[73].mxu1 }
 0x2b3   : > { %v3293_v22 = vadd.f32 %v3292_v6, %v3291_v14  ;;  %v3294_v45 = vpop.f32.mrb[74].mxu1  ;;  %v1820_v6 = vld [vmem:[#allocation2 + $0x8] sm:$0xff] }
 0x2b4   : > { %v3295_v55 = vpop.f32.mrb[75].mxu1 }
 0x301   : > { %v3313_v39 = vpop.f32.mrb[76].mxu1 }
 0x302   : > { %v3314_v25 = vpop.f32.mrb[77].mxu1 }
 0x303   : > { %v3315_v36 = vadd.f32 %v3314_v25, %v3313_v39  ;;  %v3316_v3 = vpop.f32.mrb[78].mxu1 }
 0x304   : > { %v3317_v61 = vpop.f32.mrb[79].mxu1 }
 0x305   : > { %v3318_v18 = vadd.f32 %v3317_v61, %v3316_v3  ;;  %v2022_v44 = vadd.f32 %v3315_v36, %v3257_v53 }
 0x307   : > { %v2025_v48 = vadd.f32 %v3318_v18, %v3260_v59  ;;  %v1822_v18 = vld [vmem:[#allocation2 + $0x18] sm:$0xff] }
 0x309   : > { %v3319_v11 = vpop.f32.mrb[80].mxu1 }
 0x30a   : > { %v3320_v54 = vpop.f32.mrb[81].mxu1 }
 0x30b   : > { %v3321_v49 = vadd.f32 %v3320_v54, %v3319_v11  ;;  %v3322_v32 = vpop.f32.mrb[82].mxu1 }
 0x30c   : > { %v3323_v19 = vpop.f32.mrb[83].mxu1 }
 0x30d   : > { %v3324_v20 = vadd.f32 %v3323_v19, %v3322_v32  ;;  %v2030_v26 = vadd.f32 %v3321_v49, %v3263_v60  ;;  %v1823_v32 = vld [vmem:[#allocation2 + $0x20] sm:$0xff] }
 0x30f   : > { %v2033_v10 = vadd.f32 %v3324_v20, %v3266_v12 }
 0x311   : > { %v3325_v57 = vpop.f32.mrb[84].mxu1 }
 0x312   : > { %v3326_v7 = vpop.f32.mrb[85].mxu1 }
 0x313   : > { %v3327_v42 = vadd.f32 %v3326_v7, %v3325_v57  ;;  %v3328_v43 = vpop.f32.mrb[86].mxu1  ;;  %v1824_v57 = vld [vmem:[#allocation2 + $0x28] sm:$0xff] }
 0x314   : > { %v3329_v8 = vpop.f32.mrb[87].mxu1 }
 0x315   : > { %v3330_v63 = vadd.f32 %v3329_v8, %v3328_v43  ;;  %v2038_v46 = vadd.f32 %v3327_v42, %v3269_v16 }
 0x317   : > { %v2041_v13 = vadd.f32 %v3330_v63, %v3272_v33  ;;  %v1825_v63 = vld [vmem:[#allocation2 + $0x30] sm:$0xff] }
 0x319   : > { %v3331_v58 = vpop.f32.mrb[88].mxu1 }
 0x31a   : > { %v3332_v62 = vpop.f32.mrb[89].mxu1 }
 0x31b   : > { %v3333_v53 = vadd.f32 %v3332_v62, %v3331_v58  ;;  %v3334_v59 = vpop.f32.mrb[90].mxu1 }
 0x31c   : > { %v3335_v40 = vpop.f32.mrb[91].mxu1 }
 0x31d   : > { %v3336_v50 = vadd.f32 %v3335_v40, %v3334_v59  ;;  %v2046_v34 = vadd.f32 %v3333_v53, %v3275_v23  ;;  %v1826_v53 = vld [vmem:[#allocation2 + $0x38] sm:$0xff] }
 0x31f   : > { %v5020_v56 = vadd.f32 %v3336_v50, %v3278_v21 }
 0x321   : > { %v3337_v24 = vpop.f32.mrb[92].mxu1 }
 0x322   : > { %v3338_v60 = vpop.f32.mrb[93].mxu1 }
 0x323   : > { %v3339_v12 = vadd.f32 %v3338_v60, %v3337_v24  ;;  %v3340_v17 = vpop.f32.mrb[94].mxu1  ;;  %v1827_v60 = vld [vmem:[#allocation2 + $0x40] sm:$0xff] }
 0x324   : > { %v3341_v52 = vpop.f32.mrb[95].mxu1 }
 0x325   : > { %v3342_v4 = vadd.f32 %v3341_v52, %v3340_v17  ;;  %v5022_v5 = vadd.f32 %v3339_v12, %v3281_v30  ;;  %v1819_v30 = vld [vmem:[#allocation2] sm:$0xff]  ;;  %v1828_v52 = vld [vmem:[#allocation2 + $0x48] sm:$0xff] }
 0x327   : > { %v5024_v37 = vadd.f32 %v3342_v4, %v3284_v1 }
 0x329   : > { %v3343_v16 = vpop.f32.mrb[96].mxu1 }
 0x32a   : > { %v3344_v33 = vpop.f32.mrb[97].mxu1 }
 0x32b   : > { %v3345_v9 = vadd.f32 %v3344_v33, %v3343_v16  ;;  %v3346_v41 = vpop.f32.mrb[98].mxu1 }
 0x32c   : > { %v3347_v35 = vpop.f32.mrb[99].mxu1 }
 0x32d   : > { %v3348_v15 = vadd.f32 %v3347_v35, %v3346_v41  ;;  %v5026_v29 = vadd.f32 %v3345_v9, %v3287_v28  ;;  %v1829_v41 = vld [vmem:[#allocation2 + $0x50] sm:$0xff] }
 0x32f   : > { %v5028_v23 = vadd.f32 %v3348_v15, %v3290_v0  ;;  %v1821_v0 = vld [vmem:[#allocation2 + $0x10] sm:$0xff] }
 0x331   : > { %v3349_v21 = vpop.f32.mrb[100].mxu1 }
 0x332   : > { %v3350_v38 = vpop.f32.mrb[101].mxu1 }
 0x333   : > { %v3351_v47 = vadd.f32 %v3350_v38, %v3349_v21  ;;  %v3352_v2 = vpop.f32.mrb[102].mxu1  ;;  %v1830_v21 = vld [vmem:[#allocation2 + $0x58] sm:$0xff] }
 0x334   : > { %v3353_v51 = vpop.f32.mrb[103].mxu1 }
 0x335   : > { %v5030_v27 = vadd.f32 %v3351_v47, %v3293_v22 }
 0x339   : > { %v2109_v1 = vpop.f32.mrb[104].mxu1 }
 0x33a   : > { %v2110_v31 = vadd.f32 %v2109_v1, %v2022_v44  ;;  %v2111_v14 = vpop.f32.mrb[105].mxu1 }
 0x33b   : > { %v2112_v45 = vpop.f32.mrb[106].mxu1 }
 0x33c   : > { %v2163_v55 = vadd.f32 %v2110_v31, %v1819_v30  ;;  %v2113_v39 = vadd.f32 %v2112_v45, %v2025_v48  ;;  %v2114_v25 = vpop.f32.mrb[107].mxu1  ;;  %v1831_v30 = vld [vmem:[#allocation2 + $0x60] sm:$0xff] }
 0x33e   : > { %2176 = vst [vmem:[#allocation2] sm:$0xff] %v2163_v55  ;;  %v2164_v28 = vadd.f32 %v2113_v39, %v1820_v6 }
 0x340   : > { %2177 = vst [vmem:[#allocation2 + $0x8] sm:$0xff] %v2164_v28 }
 0x341   : > { %v2117_v36 = vpop.f32.mrb[108].mxu1 }
 0x342   : > { %v2118_v3 = vadd.f32 %v2117_v36, %v2030_v26  ;;  %v2119_v61 = vpop.f32.mrb[109].mxu1 }
 0x343   : > { %v2120_v11 = vpop.f32.mrb[110].mxu1 }
 0x344   : > { %v2165_v22 = vadd.f32 %v2118_v3, %v1821_v0  ;;  %v2121_v54 = vadd.f32 %v2120_v11, %v2033_v10  ;;  %v2122_v49 = vpop.f32.mrb[111].mxu1 }
 0x346   : > { %2178 = vst [vmem:[#allocation2 + $0x10] sm:$0xff] %v2165_v22  ;;  %v2166_v44 = vadd.f32 %v2121_v54, %v1822_v18 }
 0x348   : > { %2179 = vst [vmem:[#allocation2 + $0x18] sm:$0xff] %v2166_v44 }
 0x349   : > { %v2125_v19 = vpop.f32.mrb[112].mxu1 }
 0x34a   : > { %v2126_v20 = vadd.f32 %v2125_v19, %v2038_v46  ;;  %v2127_v48 = vpop.f32.mrb[113].mxu1 }
 0x34b   : > { %v2128_v7 = vpop.f32.mrb[114].mxu1 }
 0x34c   : > { %v2167_v42 = vadd.f32 %v2126_v20, %v1823_v32  ;;  %v2129_v43 = vadd.f32 %v2128_v7, %v2041_v13  ;;  %v2130_v8 = vpop.f32.mrb[115].mxu1 }
 0x34e   : > { %2180 = vst [vmem:[#allocation2 + $0x20] sm:$0xff] %v2167_v42  ;;  %v2168_v26 = vadd.f32 %v2129_v43, %v1824_v57 }
 0x350   : > { %2181 = vst [vmem:[#allocation2 + $0x28] sm:$0xff] %v2168_v26 }
 0x351   : > { %v2133_v58 = vpop.f32.mrb[116].mxu1 }
 0x352   : > { %v2134_v62 = vadd.f32 %v2133_v58, %v2046_v34  ;;  %v2135_v10 = vpop.f32.mrb[117].mxu1 }
 0x353   : > { %v2136_v59 = vpop.f32.mrb[118].mxu1 }
 0x354   : > { %v2169_v40 = vadd.f32 %v2134_v62, %v1825_v63  ;;  %v2137_v50 = vadd.f32 %v2136_v59, %v5020_v56  ;;  %v2138_v24 = vpop.f32.mrb[119].mxu1 }
 0x356   : > { %2182 = vst [vmem:[#allocation2 + $0x30] sm:$0xff] %v2169_v40  ;;  %v2170_v46 = vadd.f32 %v2137_v50, %v1826_v53 }
 0x358   : > { %2183 = vst [vmem:[#allocation2 + $0x38] sm:$0xff] %v2170_v46 }
 0x359   : > { %v2141_v12 = vpop.f32.mrb[120].mxu1 }
 0x35a   : > { %v2142_v13 = vadd.f32 %v2141_v12, %v5022_v5  ;;  %v2143_v17 = vpop.f32.mrb[121].mxu1 }
 0x35b   : > { %v2144_v4 = vpop.f32.mrb[122].mxu1 }
 0x35c   : > { %v2171_v16 = vadd.f32 %v2142_v13, %v1827_v60  ;;  %v2145_v34 = vadd.f32 %v2144_v4, %v5024_v37  ;;  %v2146_v33 = vpop.f32.mrb[123].mxu1 }
 0x35e   : > { %2184 = vst [vmem:[#allocation2 + $0x40] sm:$0xff] %v2171_v16  ;;  %v2172_v9 = vadd.f32 %v2145_v34, %v1828_v52 }
 0x360   : > { %2185 = vst [vmem:[#allocation2 + $0x48] sm:$0xff] %v2172_v9 }
 0x361   : > { %v2149_v56 = vpop.f32.mrb[124].mxu1 }
 0x362   : > { %v2150_v35 = vadd.f32 %v2149_v56, %v5026_v29  ;;  %v2151_v15 = vpop.f32.mrb[125].mxu1 }
 0x363   : > { %v2152_v38 = vpop.f32.mrb[126].mxu1 }
 0x364   : > { %v2173_v47 = vadd.f32 %v2150_v35, %v1829_v41  ;;  %v2153_v5 = vadd.f32 %v2152_v38, %v5028_v23  ;;  %v2154_v2 = vpop.f32.mrb[127].mxu1 }
 0x366   : > { %2186 = vst [vmem:[#allocation2 + $0x50] sm:$0xff] %v2173_v47  ;;  %v2174_v51 = vadd.f32 %v2153_v5, %v1830_v21 }
 0x368   : > { %2187 = vst [vmem:[#allocation2 + $0x58] sm:$0xff] %v2174_v51 }
 0x369   : > { %v2157_v37 = vpop.f32.mrb[128].mxu1 }
 0x36a   : > { %v2158_v1 = vadd.f32 %v2157_v37, %v5030_v27  ;;  %v2159_v31 = vpop.f32.mrb[129].mxu1 }
 0x36b   : > { %v2160_v14 = vpop.f32.mrb[130].mxu1 }
 0x36c   : > { %v2175_v6 = vadd.f32 %v2158_v1, %v1831_v30  ;;  %v2161_v45 = vpop.f32.mrb[131].mxu1 }
 0x36e   : > { %2188 = vst [vmem:[#allocation2 + $0x60] sm:$0xff] %v2175_v6 }
 0x36f PF: > { %v5038_v29 = vld [vmem:[#allocation2 + $0x10] sm:$0xff]  ;;  %v5040_v55 = vld [vmem:[#allocation2] sm:$0xff]  ;;  %v5042_v39 = vld [vmem:[#allocation2 + $0x18] sm:$0xff]  ;;  %v3862_v23 = vmov 32  }
 0x370   : > { %3729 = vset.pattern.permute.xlu1 %v3862_v23  ;;  %3728 = vset.pattern.permute.xlu0 %v3862_v23  ;;  %v2220_v25 = vmax.f32 %v5038_v29, 1.0  ;;  %v2218_v28 = vmax.f32 %v5040_v55, 1.0  ;;  %v5046_v27 = vld [vmem:[#allocation2 + $0x8] sm:$0xff]  ;;  %v2221_v36 = vmax.f32 %v5042_v39, 1.0  ;;  %v5052_v61 = vld [vmem:[#allocation2 + $0x40] sm:$0xff]  ;;  %vm2207_vm7 = vcmp.gt.f32.partialorder %v5038_v29, 0.0 }
 0x371   : > { %v5048_v0 = vld [vmem:[#allocation2 + $0x48] sm:$0xff]  ;;  %v2219_v3 = vmax.f32 %v5046_v27, 1.0  ;;  %v2226_v11 = vmax.f32 %v5052_v61, 1.0  ;;  %v5058_v54 = vld [vmem:[#allocation2 + $0x20] sm:$0xff]  ;;  %vm2205_vm9 = vcmp.gt.f32.partialorder %v5040_v55, 0.0  ;;  %vm2208_vm10 = vcmp.gt.f32.partialorder %v5042_v39, 0.0 }
 0x372   : > { %3753 = vrcp.f32 %v2220_v25  ;;  %v2227_v18 = vmax.f32 %v5048_v0, 1.0  ;;  %v5056_v22 = vld [vmem:[#allocation2 + $0x28] sm:$0xff]  ;;  %v3730_v49 = vld [vmem:[%s5277_s7 + $0x40] sm:$0xff]   ;;  %v5070_v19 = vld [vmem:[#allocation2 + $0x58] sm:$0xff]  ;;  %vm2206_vm1 = vcmp.gt.f32.partialorder %v5046_v27, 0.0  ;;  %v2222_v48 = vmax.f32 %v5058_v54, 1.0 }
 0x373   : > { %3755 = vrcp.f32 %v2218_v28  ;;  %v3731_v44 = vld [vmem:[%s5277_s7] sm:$0xff]   ;;  %v2223_v32 = vmax.f32 %v5056_v22, 1.0  ;;  %3355 = vmatprep.subr.bf16.mxu0 %v3730_v49  ;;  %3625 = vmatprep.subr.bf16.mxu1 %v3730_v49  ;;  %v3732_v20 = vld [vmem:[%s5277_s7 + $0x48] sm:$0xff]   ;;  %v5077_v57 = vld [vmem:[#allocation2 + $0x50] sm:$0xff]  ;;  %v2229_v8 = vmax.f32 %v5070_v19, 1.0  ;;  %vm2214_vm11 = vcmp.gt.f32.partialorder %v5048_v0, 0.0 }
 0x374   : > { %3757 = vrcp.f32 %v2221_v36  ;;  %3356 = vmatpush3.bf16.msra.mxu0 %v3731_v44  ;;  %3633 = vmatpush3.bf16.msra.mxu1 %v3731_v44  ;;  %v3733_v7 = vld [vmem:[%s5277_s7 + $0x8] sm:$0xff]   ;;  %v5082_v42 = vld [vmem:[#allocation2 + $0x38] sm:$0xff]  ;;  %v5084_v43 = vld [vmem:[#allocation2 + $0x30] sm:$0xff]  ;;  %v2228_v63 = vmax.f32 %v5077_v57, 1.0  ;;  %vm2213_vm12 = vcmp.gt.f32.partialorder %v5052_v61, 0.0  ;;  %vm2210_vm13 = vcmp.gt.f32.partialorder %v5056_v22, 0.0 }
 0x375   : > { %3759 = vrcp.f32 %v2219_v3  ;;  %3357 = vmatprep.subr.bf16.mxu0 %v3732_v20  ;;  %3626 = vmatprep.subr.bf16.mxu1 %v3732_v20  ;;  %v3734_v26 = vld [vmem:[%s5277_s7 + $0x50] sm:$0xff]   ;;  %v3736_v10 = vld [vmem:[%s5277_s7 + $0x58] sm:$0xff]   ;;  %v2225_v40 = vmax.f32 %v5082_v42, 1.0  ;;  %v5101_v50 = vld [vmem:[#allocation2 + $0x60] sm:$0xff]  ;;  %v2224_v60 = vmax.f32 %v5084_v43, 1.0  ;;  %vm2209_vm14 = vcmp.gt.f32.partialorder %v5058_v54, 0.0 }
 0x376   : > { %3761 = vrcp.f32 %v2227_v18  ;;  %v3735_v58 = vld [vmem:[%s5277_s7 + $0x10] sm:$0xff]   ;;  %v3737_v17 = vld [vmem:[%s5277_s7 + $0x18] sm:$0xff]   ;;  %v3738_v16 = vld [vmem:[%s5277_s7 + $0x60] sm:$0xff]   ;;  %v2230_v33 = vmax.f32 %v5101_v50, 1.0  ;;  %vm2216_vm15 = vcmp.gt.f32.partialorder %v5070_v19, 0.0  ;;  %vm2215_vm0 = vcmp.gt.f32.partialorder %v5077_v57, 0.0 }
 0x377   : > { %3763 = vrcp.f32 %v2226_v11  ;;  %v3739_v41 = vld [vmem:[%s5277_s7 + $0x20] sm:$0xff]   ;;  %v3740_v15 = vld [vmem:[%s5277_s7 + $0x68] sm:$0xff]   ;;  %v3742_v2 = vld [vmem:[%s5277_s7 + $0x70] sm:$0xff]   ;;  %vm2212_vm2 = vcmp.gt.f32.partialorder %v5082_v42, 0.0  ;;  %vm2211_vm3 = vcmp.gt.f32.partialorder %v5084_v43, 0.0  ;;  %vm2217_vm4 = vcmp.gt.f32.partialorder %v5101_v50, 0.0 }
 0x378   : > { %3765 = vrcp.f32 %v2223_v32  ;;  %3358 = vmatpush3.bf16.msra.mxu0 %v3733_v7  ;;  %3634 = vmatpush3.bf16.msra.mxu1 %v3733_v7  ;;  %v3741_v38 = vld [vmem:[%s5277_s7 + $0x28] sm:$0xff]   ;;  %v3746_v47 = vld [vmem:[%s3945_s30] sm:$0xff]   ;;  %v3743_v14 = vld [vmem:[%s5277_s7 + $0x30] sm:$0xff]  }
 0x379   : > { %3767 = vrcp.f32 %v2222_v48  ;;  %3359 = vmatprep.subr.bf16.mxu0 %v3734_v26  ;;  %3627 = vmatprep.subr.bf16.mxu1 %v3734_v26  ;;  %v3747_v37 = vld [vmem:[%s3945_s30 + $0x20] sm:$0xff]   ;;  %v3744_v23 = vld [vmem:[%s5277_s7 + $0x78] sm:$0xff]  }
 0x37a   : > { %3769 = vrcp.f32 %v2229_v8  ;;  %2575 = vmatprep.mubr.bf16.mxu0 %v3746_v47  ;;  %2607 = vmatprep.mubr.bf16.mxu1 %v3747_v37  ;;  %v3745_v36 = vld [vmem:[%s5277_s7 + $0x38] sm:$0xff]   ;;  %v3748_v8 = vld [vmem:[%s3945_s30 + $0x8] sm:$0xff]  }
 0x37b   : > { %3771 = vrcp.f32 %v2228_v63 }
 0x37c   : > { %v3754_v62 = vpop.eup %3753  ;;  %3360 = vmatpush3.bf16.msra.mxu0 %v3735_v58  ;;  %3635 = vmatpush3.bf16.msra.mxu1 %v3735_v58  ;;  %3773 = vrcp.f32 %v2225_v40 }
 0x37d   : > { %v3756_v53 = vpop.eup %3755  ;;  %v2259_v59 = vsel %vm2207_vm7, %v3754_v62, 0.0  ;;  %3361 = vmatprep.subr.bf16.mxu0 %v3736_v10  ;;  %3628 = vmatprep.subr.bf16.mxu1 %v3736_v10  ;;  %3775 = vrcp.f32 %v2224_v60 }
 0x37e   : > { %v3758_v24 = vpop.eup %3757  ;;  %2282 = vperm.xlu1 %3729, %v2259_v59   ;;  %v2257_v46 = vsel %vm2205_vm9, %v3756_v53, 0.0  ;;  %3777 = vrcp.f32 %v2230_v33  ;;  %v3749_v53 = vld [vmem:[%s3945_s30 + $0x28] sm:$0xff]  }
 0x37f   : > { %v3760_v12 = vpop.eup %3759  ;;  %2272 = vperm.xlu0 %3728, %v2257_v46   ;;  %v2260_v13 = vsel %vm2208_vm10, %v3758_v24, 0.0  ;;  %v3750_v46 = vld [vmem:[%s3945_s30 + $0x10] sm:$0xff]  }
 0x380   : > { %v3762_v52 = vpop.eup %3761  ;;  %v2258_v4 = vsel %vm2206_vm1, %v3760_v12, 0.0  ;;  %3362 = vmatpush3.bf16.msra.mxu0 %v3737_v17  ;;  %3636 = vmatpush3.bf16.msra.mxu1 %v3737_v17  ;;  %v3751_v17 = vld [vmem:[%s3945_s30 + $0x30] ss:$0 sps:$4 sm:$0xff]  }
 0x381   : > { %v3764_v34 = vpop.eup %3763  ;;  %v2266_v9 = vsel %vm2214_vm11, %v3762_v52, 0.0  ;;  %3363 = vmatprep.subr.bf16.mxu0 %v3738_v16  ;;  %3629 = vmatprep.subr.bf16.mxu1 %v3738_v16  ;;  %v3752_v16 = vld [vmem:[%s3945_s30 + $0x18] sm:$0xff]  }
 0x382   : > { %2287 = vperm.xlu1 %3729, %v2260_v13   ;;  %v3766_v56 = vpop.eup %3765  ;;  %v2265_v35 = vsel %vm2213_vm12, %v3764_v34, 0.0 }
 0x383   : > { %2277 = vperm.xlu0 %3728, %v2258_v4   ;;  %v3768_v21 = vpop.eup %3767  ;;  %v2262_v5 = vsel %vm2210_vm13, %v3766_v56, 0.0 }
 0x384   : > { %3364 = vmatpush3.bf16.msra.mxu0 %v3739_v41  ;;  %v3770_v51 = vpop.eup %3769  ;;  %v2261_v30 = vsel %vm2209_vm14, %v3768_v21, 0.0  ;;  %3637 = vmatpush3.bf16.msra.mxu1 %v3739_v41 }
 0x385   : > { %3365 = vmatprep.subr.bf16.mxu0 %v3740_v15  ;;  %v3772_v1 = vpop.eup %3771  ;;  %3630 = vmatprep.subr.bf16.mxu1 %v3740_v15  ;;  %v2268_v31 = vsel %vm2216_vm15, %v3770_v51, 0.0 }
 0x386   : > { %2317 = vperm.xlu1 %3729, %v2266_v9   ;;  %v3774_v6 = vpop.eup %3773  ;;  %v2267_v45 = vsel %vm2215_vm0, %v3772_v1, 0.0 }
 0x387   : > { %2312 = vperm.xlu0 %3728, %v2265_v35   ;;  %v3776_v25 = vpop.eup %3775  ;;  %v2264_v28 = vsel %vm2212_vm2, %v3774_v6, 0.0  ;;  %v5175_v35 = vld [vmem:[%s5278_s8] ss:$0 sm:$0xff] }
 0x388   : > { %3366 = vmatpush3.bf16.msra.mxu0 %v3741_v38  ;;  %3638 = vmatpush3.bf16.msra.mxu1 %v3741_v38  ;;  %v2263_v3 = vsel %vm2211_vm3, %v3776_v25, 0.0  ;;  %v3778_v18 = vpop.eup %3777 }
 0x389   : > { %3367 = vmatprep.subr.bf16.mxu0 %v3742_v2  ;;  %3631 = vmatprep.subr.bf16.mxu1 %v3742_v2  ;;  %v2269_v11 = vsel %vm2217_vm4, %v3778_v18, 0.0 }
 0x38a   : > { %2297 = vperm.xlu1 %3729, %v2262_v5  }
 0x38b   : > { %2292 = vperm.xlu0 %3728, %v2261_v30  }
 0x38c   : > { %3368 = vmatpush3.bf16.msra.mxu0 %v3743_v14  ;;  %3639 = vmatpush3.bf16.msra.mxu1 %v3743_v14 }
 0x38d   : > { %3369 = vmatprep.subr.bf16.mxu0 %v3744_v23  ;;  %3632 = vmatprep.subr.bf16.mxu1 %v3744_v23 }
 0x38e   : > { %2327 = vperm.xlu1 %3729, %v2268_v31  }
 0x38f   : > { %2322 = vperm.xlu0 %3728, %v2267_v45  }
 0x390   : > { %3370 = vmatpush3.bf16.msra.mxu0 %v3745_v36  ;;  %3640 = vmatpush3.bf16.msra.mxu1 %v3745_v36 }
 0x392   : > { %2307 = vperm.xlu1 %3729, %v2264_v28  }
 0x393   : > { %2302 = vperm.xlu0 %3728, %v2263_v3  }
 0x397   : > { %2332 = vperm.xlu0 %3728, %v2269_v11  }
 0x3fd   : > { %v2283_v49 = vpop.permute.xlu1 %2282 }
 0x3fe   : > { %v2273_v44 = vpop.permute.xlu0 %2272 }
 0x3ff   : > { %v2335_v48 = vmul.f32 %v2273_v44, %v5040_v55 }
 0x401   : > { %v2288_v32 = vpop.permute.xlu1 %2287 }
 0x402   : > { %v2278_v20 = vpop.permute.xlu0 %2277  ;;  %v2338_v59 = vmul.f32 %v2288_v32, %v5042_v39 }
 0x403   : > { %v2336_v7 = vmul.f32 %v2278_v20, %v5046_v27  ;;  %v2337_v27 = vmul.f32 %v2283_v49, %v5038_v29 }
 0x405   : > { %v2348_v26 = vpack.c.bf16 %v2336_v7, %v2335_v48  ;;  %v2318_v63 = vpop.permute.xlu1 %2317  ;;  %v2349_v60 = vpack.c.bf16 %v2338_v59, %v2337_v27 }
 0x406   : > { %v2344_v58 = vmul.f32 %v2318_v63, %v5048_v0  ;;  %v2313_v62 = vpop.permute.xlu0 %2312 }
 0x407   : > { %v2343_v10 = vmul.f32 %v2313_v62, %v5052_v61  ;;  %2576 = vmatmul.mubr.bf16.vlgmr.msra.gmra.mrb[0].mxu0 %v2348_v26 }
 0x408   : > { %2583 = vmatprep.mubr.bf16.mxu0 %v3748_v8 }
 0x409   : > { %v2352_v40 = vpack.c.bf16 %v2344_v58, %v2343_v10  ;;  %v2298_v24 = vpop.permute.xlu1 %2297 }
 0x40a   : > { %v2293_v55 = vpop.permute.xlu0 %2292  ;;  %v2340_v39 = vmul.f32 %v2298_v24, %v5056_v22 }
 0x40b   : > { %2608 = vmatmul.mubr.bf16.vlgmr.msra.gmra.mrb[0].mxu1 %v2352_v40  ;;  %v2339_v52 = vmul.f32 %v2293_v55, %v5058_v54 }
 0x40c   : > { %2615 = vmatprep.mubr.bf16.mxu1 %v3749_v53 }
 0x40d   : > { %v2328_v0 = vpop.permute.xlu1 %2327  ;;  %v2350_v34 = vpack.c.bf16 %v2340_v39, %v2339_v52 }
 0x40e   : > { %v2346_v12 = vmul.f32 %v2328_v0, %v5070_v19  ;;  %v2323_v61 = vpop.permute.xlu0 %2322 }
 0x40f   : > { %v2345_v13 = vmul.f32 %v2323_v61, %v5077_v57  ;;  %2584 = vmatmul.mubr.bf16.gmra.mrb[4].mxu0 %v2349_v60 }
 0x410   : > { %2591 = vmatprep.mubr.bf16.mxu0 %v3750_v46 }
 0x411   : > { %v2353_v4 = vpack.c.bf16 %v2346_v12, %v2345_v13  ;;  %v2308_v33 = vpop.permute.xlu1 %2307 }
 0x412   : > { %v2303_v29 = vpop.permute.xlu0 %2302  ;;  %v2342_v57 = vmul.f32 %v2308_v33, %v5082_v42 }
 0x413   : > { %2616 = vmatmul.mubr.bf16.gmra.mrb[4].mxu1 %v2353_v4  ;;  %v2341_v41 = vmul.f32 %v2303_v29, %v5084_v43 }
 0x414   : > { %2623 = vmatprep.mubr.bf16.mxu1 %v3751_v17 }
 0x415   : > { %v2351_v22 = vpack.c.bf16 %v2342_v57, %v2341_v41 }
 0x416   : > { %v2333_v9 = vpop.permute.xlu0 %2332 }
 0x417   : > { %v2347_v19 = vmul.f32 %v2333_v9, %v5101_v50  ;;  %2592 = vmatmul.mubr.bf16.gmra.mrb[8].mxu0 %v2350_v34 }
 0x418   : > { %2599 = vmatprep.mubr.bf16.mxu0 %v3752_v16 }
 0x419   : > { %v2354_v56 = vpack.c.bf16 %v2347_v19, %v2347_v19 }
 0x41b   : > { %2624 = vmatmul.mubr.bf16.gmra.mrb[8].mxu1 %v2354_v56 }
 0x41f   : > { %2600 = vmatmul.mubr.bf16.gmra.mrb[12].mxu0 %v2351_v22 }
 0x4da   : > { %v3371_v54 = vpop.f32.mrb[0].mxu0 }
 0x4db   : > { %v3372_v15 = vpop.f32.mrb[1].mxu0 }
 0x4dc   : > { %v3373_v21 = vadd.f32 %v3372_v15, %v3371_v54  ;;  %v3374_v38 = vpop.f32.mrb[2].mxu0 }
 0x4dd   : > { %v3375_v50 = vpop.f32.mrb[3].mxu0 }
 0x4de   : > { %v2578_v47 = vadd.f32 %v3373_v21, %v5175_v35  ;;  %v3376_v5 = vadd.f32 %v3375_v50, %v3374_v38  ;;  %v3395_v42 = vpop.f32.mrb[0].mxu1 }
 0x4df   : > { %v3396_v2 = vpop.f32.mrb[1].mxu1 }
 0x4e0   : > { %v5178_v43 = vmax.f32 %v2578_v47, 0.0  ;;  %v3397_v51 = vadd.f32 %v3396_v2, %v3395_v42  ;;  %v3398_v30 = vpop.f32.mrb[2].mxu1  ;;  %v2581_v37 = vadd.f32 %v3376_v5, %v5175_v35 }
 0x4e1   : > { %v3399_v1 = vpop.f32.mrb[3].mxu1 }
 0x4e2   : > { %v2610_v31 = vadd.f32 %v3397_v51, %v5175_v35  ;;  %v3400_v14 = vadd.f32 %v3399_v1, %v3398_v30  ;;  %v3377_v6 = vpop.f32.mrb[4].mxu0  ;;  %v2644_v45 = vmul.f32 %v5178_v43, %v5178_v43  ;;  %v5187_v18 = vmax.f32 %v2581_v37, 0.0 }
 0x4e3   : > { %v3378_v23 = vpop.f32.mrb[5].mxu0 }
 0x4e4   : > { %v5184_v25 = vmax.f32 %v2610_v31, 0.0  ;;  %v2613_v28 = vadd.f32 %v3400_v14, %v5175_v35  ;;  %v3379_v36 = vadd.f32 %v3378_v23, %v3377_v6  ;;  %v3380_v3 = vpop.f32.mrb[6].mxu0  ;;  %2657 = vadd.xlane.f32.xlu1 %v2644_v45  ;;  %v2645_v10 = vmul.f32 %v5187_v18, %v5187_v18 }
 0x4e5   : > { %v3381_v11 = vpop.f32.mrb[7].mxu0 }
 0x4e6   : > { %v5189_v49 = vmax.f32 %v2613_v28, 0.0  ;;  %v2586_v44 = vadd.f32 %v3379_v36, %v5175_v35  ;;  %v3382_v32 = vadd.f32 %v3381_v11, %v3380_v3  ;;  %v3401_v20 = vpop.f32.mrb[4].mxu1  ;;  %v2652_v48 = vmul.f32 %v5184_v25, %v5184_v25 }
 0x4e7   : > { %v3402_v7 = vpop.f32.mrb[5].mxu1 }
 0x4e8   : > { %v2589_v8 = vadd.f32 %v3382_v32, %v5175_v35  ;;  %v3403_v26 = vadd.f32 %v3402_v7, %v3401_v20  ;;  %2673 = vadd.xlane.f32.xlu0 %v2652_v48  ;;  %v3404_v63 = vpop.f32.mrb[6].mxu1  ;;  %v2653_v58 = vmul.f32 %v5189_v49, %v5189_v49  ;;  %v5199_v53 = vmax.f32 %v2586_v44, 0.0 }
 0x4e9   : > { %v3405_v62 = vpop.f32.mrb[7].mxu1 }
 0x4ea   : > { %v5201_v59 = vmax.f32 %v2589_v8, 0.0  ;;  %v2618_v40 = vadd.f32 %v3403_v26, %v5175_v35  ;;  %v3406_v24 = vadd.f32 %v3405_v62, %v3404_v63  ;;  %2675 = vadd.xlane.f32.xlu1 %v2653_v58  ;;  %v3383_v55 = vpop.f32.mrb[8].mxu0  ;;  %v2646_v52 = vmul.f32 %v5199_v53, %v5199_v53 }
 0x4eb   : > { %v3384_v27 = vpop.f32.mrb[9].mxu0 }
 0x4ec   : > { %v3385_v46 = vadd.f32 %v3384_v27, %v3383_v55  ;;  %2659 = vadd.xlane.f32.xlu0 %v2645_v10  ;;  %v3386_v60 = vpop.f32.mrb[10].mxu0  ;;  %v2647_v0 = vmul.f32 %v5201_v59, %v5201_v59  ;;  %v5206_v61 = vmax.f32 %v2618_v40, 0.0  ;;  %v2621_v42 = vadd.f32 %v3406_v24, %v5175_v35 }
 0x4ed   : > { %v3387_v12 = vpop.f32.mrb[11].mxu0 }
 0x4ee   : > { %v2594_v13 = vadd.f32 %v3385_v46, %v5175_v35  ;;  %v3388_v17 = vadd.f32 %v3387_v12, %v3386_v60  ;;  %2663 = vadd.xlane.f32.xlu1 %v2647_v0  ;;  %v3407_v39 = vpop.f32.mrb[8].mxu1  ;;  %v2654_v41 = vmul.f32 %v5206_v61, %v5206_v61  ;;  %v5234_v31 = vmax.f32 %v2621_v42, 0.0 }
 0x4ef   : > { %v3408_v4 = vpop.f32.mrb[9].mxu1 }
 0x4f0   : > { %v2597_v29 = vadd.f32 %v3388_v17, %v5175_v35  ;;  %v3409_v16 = vadd.f32 %v3408_v4, %v3407_v39  ;;  %2661 = vadd.xlane.f32.xlu0 %v2646_v52  ;;  %v3410_v34 = vpop.f32.mrb[10].mxu1  ;;  %v5212_v9 = vmax.f32 %v2594_v13, 0.0 }
 0x4f1   : > { %v3411_v33 = vpop.f32.mrb[11].mxu1 }
 0x4f2   : > { %v5214_v19 = vmax.f32 %v2597_v29, 0.0  ;;  %v3389_v57 = vpop.f32.mrb[12].mxu0  ;;  %v2626_v38 = vadd.f32 %v3409_v16, %v5175_v35  ;;  %v2648_v5 = vmul.f32 %v5212_v9, %v5212_v9 }
 0x4f3   : > { %v3390_v56 = vpop.f32.mrb[13].mxu0 }
 0x4f4   : > { %v3391_v22 = vadd.f32 %v3390_v56, %v3389_v57  ;;  %2677 = vadd.xlane.f32.xlu0 %v2654_v41  ;;  %v3392_v54 = vpop.f32.mrb[14].mxu0  ;;  %v2649_v15 = vmul.f32 %v5214_v19, %v5214_v19  ;;  %v5228_v30 = vmax.f32 %v2626_v38, 0.0 }
 0x4f5   : > { %v3393_v21 = vpop.f32.mrb[15].mxu0 }
 0x4f6   : > { %v2602_v50 = vadd.f32 %v3391_v22, %v5175_v35  ;;  %v3394_v47 = vadd.f32 %v3393_v21, %v3392_v54  ;;  %2667 = vadd.xlane.f32.xlu1 %v2649_v15  ;;  %v2656_v6 = vmul.f32 %v5228_v30, %v5228_v30 }
 0x4f8   : > { %v5225_v2 = vmax.f32 %v2602_v50, 0.0  ;;  %v2605_v51 = vadd.f32 %v3394_v47, %v5175_v35  ;;  %2665 = vadd.xlane.f32.xlu0 %v2648_v5  ;;  %v2655_v35 = vmul.f32 %v5234_v31, %v5234_v31 }
 0x4fa   : > { %v5230_v37 = vmax.f32 %v2605_v51, 0.0  ;;  %v2650_v1 = vmul.f32 %v5225_v2, %v5225_v2 }
 0x4fc   : > { %2669 = vadd.xlane.f32.xlu0 %v2650_v1  ;;  %v2651_v14 = vmul.f32 %v5230_v37, %v5230_v37 }
 0x4fe   : > { %2671 = vadd.xlane.f32.xlu1 %v2651_v14 }
 0x500   : > { %2681 = vadd.xlane.f32.xlu0 %v2656_v6 }
 0x502   : > { %2679 = vadd.xlane.f32.xlu1 %v2655_v35 }
 0x571   : > { %v2658_v45 = vpop.xlane.xlu1 %2657 }
 0x572   : > { %v2683_v23 = vmax.f32 %v2658_v45, 1e-24 }
 0x575   : > { %v2674_v28 = vpop.xlane.xlu0 %2673 }
 0x576   : > { %v2691_v36 = vmax.f32 %v2674_v28, 1e-24 }
 0x577   : > { %v2676_v3 = vpop.xlane.xlu1 %2675 }
 0x578   : > { %3779 = vrsqrt.f32 %v2691_v36  ;;  %v2692_v11 = vmax.f32 %v2676_v3, 1e-24 }
 0x579   : > { %3781 = vrsqrt.f32 %v2683_v23  ;;  %v2660_v44 = vpop.xlane.xlu0 %2659 }
 0x57a   : > { %3783 = vrsqrt.f32 %v2692_v11  ;;  %v2684_v32 = vmax.f32 %v2660_v44, 1e-24 }
 0x57b   : > { %v2664_v20 = vpop.xlane.xlu1 %2663 }
 0x57c   : > { %3785 = vrsqrt.f32 %v2684_v32  ;;  %v2686_v48 = vmax.f32 %v2664_v20, 1e-24 }
 0x57d   : > { %v2662_v7 = vpop.xlane.xlu0 %2661 }
 0x57e   : > { %3787 = vrsqrt.f32 %v2686_v48  ;;  %v2685_v8 = vmax.f32 %v2662_v7, 1e-24 }
 0x580   : > { %3789 = vrsqrt.f32 %v2685_v8 }
 0x581   : > { %v2678_v26 = vpop.xlane.xlu0 %2677 }
 0x582   : > { %v3780_v63 = vpop.eup %3779  ;;  %v2693_v16 = vmax.f32 %v2678_v26, 1e-24 }
 0x583   : > { %v3782_v58 = vpop.eup %3781  ;;  %v2668_v62 = vpop.xlane.xlu1 %2667  ;;  %v2717_v24 = vmul.f32 %v3780_v63, %v5184_v25 }
 0x584   : > { %v3784_v10 = vpop.eup %3783  ;;  %v2688_v40 = vmax.f32 %v2668_v62, 1e-24  ;;  %v2709_v0 = vmul.f32 %v3782_v58, %v5178_v43 }
 0x585   : > { %v2718_v55 = vmul.f32 %v3784_v10, %v5189_v49  ;;  %v2666_v27 = vpop.xlane.xlu0 %2665 }
 0x586   : > { %v3786_v46 = vpop.eup %3785  ;;  %3791 = vrsqrt.f32 %v2688_v40  ;;  %v2687_v60 = vmax.f32 %v2666_v27, 1e-24 }
 0x587   : > { %v3174_v12 = vpack.c.bf16 %v2718_v55, %v2717_v24  ;;  %v2710_v13 = vmul.f32 %v3786_v46, %v5187_v18 }
 0x588   : > { %v3788_v17 = vpop.eup %3787  ;;  %3793 = vrsqrt.f32 %v2687_v60 }
 0x589   : > { %3184 = vst [vmem:[%s3950_s13 + $0x20] sm:$0xff] %v3174_v12   ;;  %v3154_v39 = vpack.c.bf16 %v2710_v13, %v2709_v0  ;;  %v2670_v52 = vpop.xlane.xlu0 %2669  ;;  %v2712_v49 = vmul.f32 %v3788_v17, %v5201_v59 }
 0x58a   : > { %v3790_v4 = vpop.eup %3789  ;;  %v2689_v25 = vmax.f32 %v2670_v52, 1e-24 }
 0x58b   : > { %3155 = vst [vmem:[%s3950_s13] sm:$0xff] %v3154_v39   ;;  %v2711_v29 = vmul.f32 %v3790_v4, %v5199_v53  ;;  %v2672_v34 = vpop.xlane.xlu1 %2671 }
 0x58c   : > { %3795 = vrsqrt.f32 %v2689_v25  ;;  %v2690_v43 = vmax.f32 %v2672_v34, 1e-24 }
 0x58d   : > { %v3159_v33 = vpack.c.bf16 %v2712_v49, %v2711_v29  ;;  %v2682_v18 = vpop.xlane.xlu0 %2681 }
 0x58e   : > { %3797 = vrsqrt.f32 %v2690_v43  ;;  %v2695_v57 = vmax.f32 %v2682_v18, 1e-24 }
 0x58f   : > { %3181 = vst [vmem:[%s3950_s13 + $0x8] sm:$0xff] %v3159_v33   ;;  %3799 = vrsqrt.f32 %v2693_v16  ;;  %v2680_v41 = vpop.xlane.xlu1 %2679 }
 0x590   : > { %v3792_v56 = vpop.eup %3791  ;;  %3801 = vrsqrt.f32 %v2695_v57  ;;  %v2694_v22 = vmax.f32 %v2680_v41, 1e-24 }
 0x591   : > { %v2714_v53 = vmul.f32 %v3792_v56, %v5214_v19 }
 0x592   : > { %v3794_v54 = vpop.eup %3793  ;;  %3803 = vrsqrt.f32 %v2694_v22 }
 0x593   : > { %v2713_v59 = vmul.f32 %v3794_v54, %v5212_v9 }
 0x595   : > { %v3164_v15 = vpack.c.bf16 %v2714_v53, %v2713_v59 }
 0x596   : > { %v3796_v21 = vpop.eup %3795 }
 0x597   : > { %3182 = vst [vmem:[%s3950_s13 + $0x10] sm:$0xff] %v3164_v15   ;;  %v2715_v47 = vmul.f32 %v3796_v21, %v5225_v2 }
 0x598   : > { %v3798_v38 = vpop.eup %3797 }
 0x599   : > { %v3800_v50 = vpop.eup %3799  ;;  %v2716_v5 = vmul.f32 %v3798_v38, %v5230_v37 }
 0x59a   : > { %v3802_v42 = vpop.eup %3801  ;;  %v2719_v19 = vmul.f32 %v3800_v50, %v5206_v61 }
 0x59b   : > { %v3169_v51 = vpack.c.bf16 %v2716_v5, %v2715_v47  ;;  %v2721_v1 = vmul.f32 %v3802_v42, %v5228_v30 }
 0x59c   : > { %v3804_v14 = vpop.eup %3803 }
 0x59d   : > { %3183 = vst [vmem:[%s3950_s13 + $0x18] sm:$0xff] %v3169_v51   ;;  %v3150_v9 = vpack.c.bf16 %v2721_v1, %v2721_v1  ;;  %v2720_v6 = vmul.f32 %v3804_v14, %v5234_v31 }
 0x59f   : > { %2787 = vst [vmem:[%s3950_s13 + $0x30] sm:$0xf] %v3150_v9  ;;  %v3179_v35 = vpack.c.bf16 %v2720_v6, %v2719_v19 }
 0x5a1   : > { %3185 = vst [vmem:[%s3950_s13 + $0x28] sm:$0xff] %v3179_v35  }
 0x5a2 PF: > { %s29_s19 = sadd.s32 1, %s3853_s19   ;;  %s5337_s1 = smov %s3849_s18 }
 0x5a3   : > { %p26_p4 = scmp.ge.s32.totalorder %s29_s19, 4   ;;  %s5338_s18 = smov %s5340_s20 }
 0x5a5   :  { %28 = sbr.rel (!%p26_p4) target bundleno = 27 (0x1b), region = 96 }

// kernel: gnn_stack_forward.6
= control target key start
LH: loop header
LB: loop body
LE: loop exit
PB: predicated region body
PF: predicated region fallthrough
CT: control target
= control target key end

     0   :  { %v2206_v0 = vmov 0.0   ;;  %vm2207_vm0 = vmmov 0   ;;  %s2723_s1 = inlined_call_operand.vmem [shape: bf16[128,128], index: 1, kind: input, shape index: {}]   ;;  %s2724_s0 = inlined_call_operand.vmem [shape: bf16[720,128], index: 0, kind: input, shape index: {}]   ;;  %s2725_s2 = inlined_call_operand.vmem [shape: f32[1,128], index: 2, kind: input, shape index: {}]   ;;  %s2726_s3 = inlined_call_operand.vmem [shape: bf16[720,128], index: 3, kind: output, shape index: {}]  }
   0x1   :  { %1939 = vmatprep.subr.bf16.mxu0 %v2206_v0  ;;  %v2153_v1 = vld [vmem:[%s2723_s1] sm:$0xff]   ;;  %2135 = vmatprep.subr.bf16.mxu1 %v2206_v0  ;;  %v2154_v2 = vld [vmem:[%s2723_s1 + $0x8] sm:$0xff]   ;;  %v2155_v3 = vld [vmem:[%s2723_s1 + $0x10] sm:$0xff]  }
   0x2   :  { %1955 = vmatprep.mubr.msk.bf16.mxu0 %vm2207_vm0, %v2206_v0  ;;  %2047 = vmatprep.mubr.msk.bf16.mxu1 %vm2207_vm0, %v2206_v0  ;;  %v2156_v4 = vld [vmem:[%s2723_s1 + $0x18] sm:$0xff]   ;;  %v2157_v5 = vld [vmem:[%s2723_s1 + $0x20] sm:$0xff]   ;;  %v2158_v6 = vld [vmem:[%s2723_s1 + $0x28] sm:$0xff]  }
   0x3   :  { %1940 = vmatpush3.bf16.msra.mxu0 %v2153_v1  ;;  %2143 = vmatpush3.bf16.msra.mxu1 %v2153_v1  ;;  %v2159_v7 = vld [vmem:[%s2723_s1 + $0x30] sm:$0xff]   ;;  %v2160_v8 = vld [vmem:[%s2723_s1 + $0x38] sm:$0xff]   ;;  %v2161_v9 = vld [vmem:[%s2724_s0] sm:$0xff]  }
   0x4   :  { %1941 = vmatprep.subr.bf16.mxu0 %v2206_v0  ;;  %2136 = vmatprep.subr.bf16.mxu1 %v2206_v0  ;;  %v2162_v10 = vld [vmem:[%s2724_s0 + $0xb8] sm:$0xff]   ;;  %v2163_v11 = vld [vmem:[%s2724_s0 + $0x8] sm:$0xff]   ;;  %v2164_v12 = vld [vmem:[%s2724_s0 + $0xc0] sm:$0xff]  }
   0x5   :  { %v2165_v13 = vld [vmem:[%s2724_s0 + $0x10] sm:$0xff]   ;;  %v2166_v14 = vld [vmem:[%s2724_s0 + $0xc8] sm:$0xff]   ;;  %v2167_v15 = vld [vmem:[%s2724_s0 + $0x18] sm:$0xff]  }
   0x6   :  { %v2168_v16 = vld [vmem:[%s2724_s0 + $0xd0] sm:$0xff]   ;;  %v2169_v17 = vld [vmem:[%s2724_s0 + $0x20] sm:$0xff]   ;;  %v2170_v18 = vld [vmem:[%s2724_s0 + $0xd8] sm:$0xff]  }
   0x7   :  { %1942 = vmatpush3.bf16.msra.mxu0 %v2154_v2  ;;  %2144 = vmatpush3.bf16.msra.mxu1 %v2154_v2  ;;  %v2171_v19 = vld [vmem:[%s2724_s0 + $0x28] sm:$0xff]   ;;  %v2172_v20 = vld [vmem:[%s2724_s0 + $0xe0] sm:$0xff]   ;;  %v2173_v21 = vld [vmem:[%s2724_s0 + $0x30] sm:$0xff]  }
   0x8   :  { %1943 = vmatprep.subr.bf16.mxu0 %v2206_v0  ;;  %2137 = vmatprep.subr.bf16.mxu1 %v2206_v0  ;;  %v2174_v22 = vld [vmem:[%s2724_s0 + $0xe8] sm:$0xff]   ;;  %v2175_v23 = vld [vmem:[%s2724_s0 + $0x38] sm:$0xff]   ;;  %v2176_v24 = vld [vmem:[%s2724_s0 + $0xf0] sm:$0xff]  }
   0x9   :  { %v2177_v25 = vld [vmem:[%s2724_s0 + $0x40] sm:$0xff]   ;;  %v2178_v26 = vld [vmem:[%s2724_s0 + $0xf8] sm:$0xff]   ;;  %v2179_v27 = vld [vmem:[%s2724_s0 + $0x48] sm:$0xff]  }
   0xa   :  { %v2180_v28 = vld [vmem:[%s2724_s0 + $0x100] sm:$0xff]   ;;  %v2181_v29 = vld [vmem:[%s2724_s0 + $0x50] sm:$0xff]   ;;  %v2182_v30 = vld [vmem:[%s2724_s0 + $0x108] sm:$0xff]  }
   0xb   :  { %1944 = vmatpush3.bf16.msra.mxu0 %v2155_v3  ;;  %2145 = vmatpush3.bf16.msra.mxu1 %v2155_v3  ;;  %v2183_v31 = vld [vmem:[%s2724_s0 + $0x58] sm:$0xff]   ;;  %v2184_v32 = vld [vmem:[%s2724_s0 + $0x110] sm:$0xff]   ;;  %v2185_v33 = vld [vmem:[%s2724_s0 + $0x60] sm:$0xff]  }
   0xc   :  { %1945 = vmatprep.subr.bf16.mxu0 %v2206_v0  ;;  %2138 = vmatprep.subr.bf16.mxu1 %v2206_v0  ;;  %v2186_v34 = vld [vmem:[%s2724_s0 + $0x118] sm:$0xff]   ;;  %v2187_v35 = vld [vmem:[%s2724_s0 + $0x68] sm:$0xff]   ;;  %v2188_v36 = vld [vmem:[%s2724_s0 + $0x120] sm:$0xff]  }
   0xd   :  { %v2189_v37 = vld [vmem:[%s2724_s0 + $0x70] sm:$0xff]   ;;  %v2190_v38 = vld [vmem:[%s2724_s0 + $0x128] sm:$0xff]   ;;  %v2191_v39 = vld [vmem:[%s2724_s0 + $0x78] sm:$0xff]  }
   0xe   :  { %v2192_v40 = vld [vmem:[%s2724_s0 + $0x130] sm:$0xff]   ;;  %v2193_v41 = vld [vmem:[%s2724_s0 + $0x80] sm:$0xff]   ;;  %v2194_v42 = vld [vmem:[%s2724_s0 + $0x138] sm:$0xff]  }
   0xf   :  { %1946 = vmatpush3.bf16.msra.mxu0 %v2156_v4  ;;  %2146 = vmatpush3.bf16.msra.mxu1 %v2156_v4  ;;  %v2195_v43 = vld [vmem:[%s2724_s0 + $0x88] sm:$0xff]   ;;  %v2196_v44 = vld [vmem:[%s2724_s0 + $0x140] sm:$0xff]   ;;  %v2197_v45 = vld [vmem:[%s2724_s0 + $0x90] sm:$0xff]  }
  0x10   :  { %1947 = vmatprep.subr.bf16.mxu0 %v2206_v0  ;;  %2139 = vmatprep.subr.bf16.mxu1 %v2206_v0  ;;  %v2198_v46 = vld [vmem:[%s2724_s0 + $0x148] sm:$0xff]   ;;  %v2199_v47 = vld [vmem:[%s2724_s0 + $0x98] sm:$0xff]   ;;  %v2200_v48 = vld [vmem:[%s2724_s0 + $0x150] sm:$0xff]  }
  0x11   :  { %v2201_v49 = vld [vmem:[%s2724_s0 + $0xa0] sm:$0xff]   ;;  %v2202_v50 = vld [vmem:[%s2724_s0 + $0x158] sm:$0xff]   ;;  %v2203_v51 = vld [vmem:[%s2724_s0 + $0xa8] sm:$0xff]  }
  0x12   :  { %v2204_v52 = vld [vmem:[%s2724_s0 + $0x160] sm:$0xff]   ;;  %v2205_v53 = vld [vmem:[%s2724_s0 + $0xb0] sm:$0xff]  }
  0x13   :  { %1948 = vmatpush3.bf16.msra.mxu0 %v2157_v5  ;;  %2147 = vmatpush3.bf16.msra.mxu1 %v2157_v5  ;;  %v2496_v54 = vld [vmem:[%s2725_s2] ss:$0 sm:$0xff] }
  0x14   :  { %1949 = vmatprep.subr.bf16.mxu0 %v2206_v0  ;;  %2140 = vmatprep.subr.bf16.mxu1 %v2206_v0 }
  0x17   :  { %1950 = vmatpush3.bf16.msra.mxu0 %v2158_v6  ;;  %2148 = vmatpush3.bf16.msra.mxu1 %v2158_v6 }
  0x18   :  { %1951 = vmatprep.subr.bf16.mxu0 %v2206_v0  ;;  %2141 = vmatprep.subr.bf16.mxu1 %v2206_v0 }
  0x1b   :  { %1952 = vmatpush3.bf16.msra.mxu0 %v2159_v7  ;;  %2149 = vmatpush3.bf16.msra.mxu1 %v2159_v7 }
  0x1c   :  { %1953 = vmatprep.subr.bf16.mxu0 %v2206_v0  ;;  %2142 = vmatprep.subr.bf16.mxu1 %v2206_v0 }
  0x1f   :  { %1954 = vmatpush3.bf16.msra.mxu0 %v2160_v8  ;;  %2150 = vmatpush3.bf16.msra.mxu1 %v2160_v8 }
  0x22   :  { %1956 = vmatmul.mubr.bf16.vlgmr.msra.gmra.mrb[0].mxu0 %v2161_v9  ;;  %2048 = vmatmul.mubr.bf16.vlgmr.msra.gmra.mrb[0].mxu1 %v2162_v10 }
  0x23   :  { %1959 = vmatprep.mubr.msk.bf16.mxu0 %vm2207_vm0, %v2206_v0  ;;  %2051 = vmatprep.mubr.msk.bf16.mxu1 %vm2207_vm0, %v2206_v0 }
  0x2a   :  { %1960 = vmatmul.mubr.bf16.gmra.mrb[4].mxu0 %v2163_v11  ;;  %2052 = vmatmul.mubr.bf16.gmra.mrb[4].mxu1 %v2164_v12 }
  0x2b   :  { %1963 = vmatprep.mubr.msk.bf16.mxu0 %vm2207_vm0, %v2206_v0  ;;  %2055 = vmatprep.mubr.msk.bf16.mxu1 %vm2207_vm0, %v2206_v0 }
  0x32   :  { %1964 = vmatmul.mubr.bf16.gmra.mrb[8].mxu0 %v2165_v13  ;;  %2056 = vmatmul.mubr.bf16.gmra.mrb[8].mxu1 %v2166_v14 }
  0x33   :  { %1967 = vmatprep.mubr.msk.bf16.mxu0 %vm2207_vm0, %v2206_v0  ;;  %2059 = vmatprep.mubr.msk.bf16.mxu1 %vm2207_vm0, %v2206_v0 }
  0x3a   :  { %1968 = vmatmul.mubr.bf16.gmra.mrb[12].mxu0 %v2167_v15  ;;  %2060 = vmatmul.mubr.bf16.gmra.mrb[12].mxu1 %v2168_v16 }
  0x3b   :  { %1971 = vmatprep.mubr.msk.bf16.mxu0 %vm2207_vm0, %v2206_v0  ;;  %2063 = vmatprep.mubr.msk.bf16.mxu1 %vm2207_vm0, %v2206_v0 }
  0x42   :  { %1972 = vmatmul.mubr.bf16.gmra.mrb[16].mxu0 %v2169_v17  ;;  %2064 = vmatmul.mubr.bf16.gmra.mrb[16].mxu1 %v2170_v18 }
  0x43   :  { %1975 = vmatprep.mubr.msk.bf16.mxu0 %vm2207_vm0, %v2206_v0  ;;  %2067 = vmatprep.mubr.msk.bf16.mxu1 %vm2207_vm0, %v2206_v0 }
  0x4a   :  { %1976 = vmatmul.mubr.bf16.gmra.mrb[20].mxu0 %v2171_v19  ;;  %2068 = vmatmul.mubr.bf16.gmra.mrb[20].mxu1 %v2172_v20 }
  0x4b   :  { %1979 = vmatprep.mubr.msk.bf16.mxu0 %vm2207_vm0, %v2206_v0  ;;  %2071 = vmatprep.mubr.msk.bf16.mxu1 %vm2207_vm0, %v2206_v0 }
  0x52   :  { %1980 = vmatmul.mubr.bf16.gmra.mrb[24].mxu0 %v2173_v21  ;;  %2072 = vmatmul.mubr.bf16.gmra.mrb[24].mxu1 %v2174_v22 }
  0x53   :  { %1983 = vmatprep.mubr.msk.bf16.mxu0 %vm2207_vm0, %v2206_v0  ;;  %2075 = vmatprep.mubr.msk.bf16.mxu1 %vm2207_vm0, %v2206_v0 }
  0x5a   :  { %1984 = vmatmul.mubr.bf16.gmra.mrb[28].mxu0 %v2175_v23  ;;  %2076 = vmatmul.mubr.bf16.gmra.mrb[28].mxu1 %v2176_v24 }
  0x5b   :  { %1987 = vmatprep.mubr.msk.bf16.mxu0 %vm2207_vm0, %v2206_v0  ;;  %2079 = vmatprep.mubr.msk.bf16.mxu1 %vm2207_vm0, %v2206_v0 }
  0x62   :  { %1988 = vmatmul.mubr.bf16.gmra.mrb[32].mxu0 %v2177_v25  ;;  %2080 = vmatmul.mubr.bf16.gmra.mrb[32].mxu1 %v2178_v26 }
  0x63   :  { %1991 = vmatprep.mubr.msk.bf16.mxu0 %vm2207_vm0, %v2206_v0  ;;  %2083 = vmatprep.mubr.msk.bf16.mxu1 %vm2207_vm0, %v2206_v0 }
  0x6a   :  { %1992 = vmatmul.mubr.bf16.gmra.mrb[36].mxu0 %v2179_v27  ;;  %2084 = vmatmul.mubr.bf16.gmra.mrb[36].mxu1 %v2180_v28 }
  0x6b   :  { %1995 = vmatprep.mubr.msk.bf16.mxu0 %vm2207_vm0, %v2206_v0  ;;  %2087 = vmatprep.mubr.msk.bf16.mxu1 %vm2207_vm0, %v2206_v0 }
  0x72   :  { %1996 = vmatmul.mubr.bf16.gmra.mrb[40].mxu0 %v2181_v29  ;;  %2088 = vmatmul.mubr.bf16.gmra.mrb[40].mxu1 %v2182_v30 }
  0x73   :  { %1999 = vmatprep.mubr.msk.bf16.mxu0 %vm2207_vm0, %v2206_v0  ;;  %2091 = vmatprep.mubr.msk.bf16.mxu1 %vm2207_vm0, %v2206_v0 }
  0x7a   :  { %2000 = vmatmul.mubr.bf16.gmra.mrb[44].mxu0 %v2183_v31  ;;  %2092 = vmatmul.mubr.bf16.gmra.mrb[44].mxu1 %v2184_v32 }
  0x7b   :  { %2003 = vmatprep.mubr.msk.bf16.mxu0 %vm2207_vm0, %v2206_v0  ;;  %2095 = vmatprep.mubr.msk.bf16.mxu1 %vm2207_vm0, %v2206_v0 }
  0x82   :  { %2004 = vmatmul.mubr.bf16.gmra.mrb[48].mxu0 %v2185_v33  ;;  %2096 = vmatmul.mubr.bf16.gmra.mrb[48].mxu1 %v2186_v34 }
  0x83   :  { %2007 = vmatprep.mubr.msk.bf16.mxu0 %vm2207_vm0, %v2206_v0  ;;  %2099 = vmatprep.mubr.msk.bf16.mxu1 %vm2207_vm0, %v2206_v0 }
  0x8a   :  { %2008 = vmatmul.mubr.bf16.gmra.mrb[52].mxu0 %v2187_v35  ;;  %2100 = vmatmul.mubr.bf16.gmra.mrb[52].mxu1 %v2188_v36 }
  0x8b   :  { %2011 = vmatprep.mubr.msk.bf16.mxu0 %vm2207_vm0, %v2206_v0  ;;  %2103 = vmatprep.mubr.msk.bf16.mxu1 %vm2207_vm0, %v2206_v0 }
  0x92   :  { %2012 = vmatmul.mubr.bf16.gmra.mrb[56].mxu0 %v2189_v37  ;;  %2104 = vmatmul.mubr.bf16.gmra.mrb[56].mxu1 %v2190_v38 }
  0x93   :  { %2015 = vmatprep.mubr.msk.bf16.mxu0 %vm2207_vm0, %v2206_v0  ;;  %2107 = vmatprep.mubr.msk.bf16.mxu1 %vm2207_vm0, %v2206_v0 }
  0x9a   :  { %2016 = vmatmul.mubr.bf16.gmra.mrb[60].mxu0 %v2191_v39  ;;  %2108 = vmatmul.mubr.bf16.gmra.mrb[60].mxu1 %v2192_v40 }
  0x9b   :  { %2019 = vmatprep.mubr.msk.bf16.mxu0 %vm2207_vm0, %v2206_v0  ;;  %2111 = vmatprep.mubr.msk.bf16.mxu1 %vm2207_vm0, %v2206_v0 }
  0xa2   :  { %2020 = vmatmul.mubr.bf16.gmra.mrb[64].mxu0 %v2193_v41  ;;  %2112 = vmatmul.mubr.bf16.gmra.mrb[64].mxu1 %v2194_v42 }
  0xa3   :  { %2023 = vmatprep.mubr.msk.bf16.mxu0 %vm2207_vm0, %v2206_v0  ;;  %2115 = vmatprep.mubr.msk.bf16.mxu1 %vm2207_vm0, %v2206_v0 }
  0xaa   :  { %2024 = vmatmul.mubr.bf16.gmra.mrb[68].mxu0 %v2195_v43  ;;  %2116 = vmatmul.mubr.bf16.gmra.mrb[68].mxu1 %v2196_v44 }
  0xab   :  { %2027 = vmatprep.mubr.msk.bf16.mxu0 %vm2207_vm0, %v2206_v0  ;;  %2119 = vmatprep.mubr.msk.bf16.mxu1 %vm2207_vm0, %v2206_v0 }
  0xb2   :  { %2028 = vmatmul.mubr.bf16.gmra.mrb[72].mxu0 %v2197_v45  ;;  %2120 = vmatmul.mubr.bf16.gmra.mrb[72].mxu1 %v2198_v46 }
  0xb3   :  { %2031 = vmatprep.mubr.msk.bf16.mxu0 %vm2207_vm0, %v2206_v0  ;;  %2123 = vmatprep.mubr.msk.bf16.mxu1 %vm2207_vm0, %v2206_v0 }
  0xba   :  { %2032 = vmatmul.mubr.bf16.gmra.mrb[76].mxu0 %v2199_v47  ;;  %2124 = vmatmul.mubr.bf16.gmra.mrb[76].mxu1 %v2200_v48 }
  0xbb   :  { %2035 = vmatprep.mubr.msk.bf16.mxu0 %vm2207_vm0, %v2206_v0  ;;  %2127 = vmatprep.mubr.msk.bf16.mxu1 %vm2207_vm0, %v2206_v0 }
  0xc2   :  { %2036 = vmatmul.mubr.bf16.gmra.mrb[80].mxu0 %v2201_v49  ;;  %2128 = vmatmul.mubr.bf16.gmra.mrb[80].mxu1 %v2202_v50 }
  0xc3   :  { %2039 = vmatprep.mubr.msk.bf16.mxu0 %vm2207_vm0, %v2206_v0  ;;  %2131 = vmatprep.mubr.msk.bf16.mxu1 %vm2207_vm0, %v2206_v0 }
  0xca   :  { %2040 = vmatmul.mubr.bf16.gmra.mrb[84].mxu0 %v2203_v51  ;;  %2132 = vmatmul.mubr.bf16.gmra.mrb[84].mxu1 %v2204_v52 }
  0xcb   :  { %2043 = vmatprep.mubr.msk.bf16.mxu0 %vm2207_vm0, %v2206_v0 }
  0xd2   :  { %2044 = vmatmul.mubr.bf16.gmra.mrb[88].mxu0 %v2205_v53 }
  0xf5   :  { %v480_v55 = vpop.f32.mrb[0].mxu0  ;;  %v664_v56 = vpop.f32.mrb[0].mxu1 }
  0xf6   :  { %v481_v57 = vadd.f32 %v2496_v54, %v480_v55  ;;  %v1957_v58 = vpop.f32.mrb[1].mxu0  ;;  %v665_v59 = vadd.f32 %v2496_v54, %v664_v56  ;;  %v2049_v60 = vpop.f32.mrb[1].mxu1 }
  0xf7   :  { %v483_v61 = vpop.f32.mrb[2].mxu0  ;;  %v667_v62 = vpop.f32.mrb[2].mxu1 }
  0xf8   :  { %v484_v63 = vadd.f32 %v2496_v54, %v483_v61  ;;  %v1958_v0 = vpop.f32.mrb[3].mxu0  ;;  %v885_v1 = vmax.f32 %v665_v59, 0.0  ;;  %v668_v2 = vadd.f32 %v2496_v54, %v667_v62  ;;  %v2050_v3 = vpop.f32.mrb[3].mxu1  ;;  %v839_v4 = vmax.f32 %v481_v57, 0.0 }
  0xfa   :  { %v840_v5 = vmax.f32 %v484_v63, 0.0  ;;  %v886_v6 = vmax.f32 %v668_v2, 0.0 }
  0xfc   :  { %v1620_v7 = vpack.c.bf16 %v840_v5, %v839_v4  ;;  %v1735_v8 = vpack.c.bf16 %v886_v6, %v885_v1 }
  0xfd   :  { %v488_v9 = vpop.f32.mrb[4].mxu0  ;;  %v672_v10 = vpop.f32.mrb[4].mxu1 }
  0xfe   :  { %1621 = vst [vmem:[%s2726_s3] sm:$0xff] %v1620_v7   ;;  %1864 = vst [vmem:[%s2726_s3 + $0xb8] sm:$0xff] %v1735_v8   ;;  %v489_v11 = vadd.f32 %v2496_v54, %v488_v9  ;;  %v1961_v12 = vpop.f32.mrb[5].mxu0  ;;  %v673_v13 = vadd.f32 %v2496_v54, %v672_v10  ;;  %v2053_v14 = vpop.f32.mrb[5].mxu1 }
  0xff   :  { %v491_v15 = vpop.f32.mrb[6].mxu0  ;;  %v675_v16 = vpop.f32.mrb[6].mxu1 }
 0x100   :  { %v492_v17 = vadd.f32 %v2496_v54, %v491_v15  ;;  %v1962_v18 = vpop.f32.mrb[7].mxu0  ;;  %v887_v19 = vmax.f32 %v673_v13, 0.0  ;;  %v676_v20 = vadd.f32 %v2496_v54, %v675_v16  ;;  %v2054_v21 = vpop.f32.mrb[7].mxu1  ;;  %v841_v22 = vmax.f32 %v489_v11, 0.0 }
 0x102   :  { %v842_v23 = vmax.f32 %v492_v17, 0.0  ;;  %v888_v24 = vmax.f32 %v676_v20, 0.0 }
 0x104   :  { %v1625_v25 = vpack.c.bf16 %v842_v23, %v841_v22  ;;  %v1740_v26 = vpack.c.bf16 %v888_v24, %v887_v19 }
 0x105   :  { %v496_v27 = vpop.f32.mrb[8].mxu0  ;;  %v680_v28 = vpop.f32.mrb[8].mxu1 }
 0x106   :  { %1842 = vst [vmem:[%s2726_s3 + $0x8] sm:$0xff] %v1625_v25   ;;  %1865 = vst [vmem:[%s2726_s3 + $0xc0] sm:$0xff] %v1740_v26   ;;  %v497_v29 = vadd.f32 %v2496_v54, %v496_v27  ;;  %v1965_v30 = vpop.f32.mrb[9].mxu0  ;;  %v681_v31 = vadd.f32 %v2496_v54, %v680_v28  ;;  %v2057_v32 = vpop.f32.mrb[9].mxu1 }
 0x107   :  { %v499_v33 = vpop.f32.mrb[10].mxu0  ;;  %v683_v34 = vpop.f32.mrb[10].mxu1 }
 0x108   :  { %v500_v35 = vadd.f32 %v2496_v54, %v499_v33  ;;  %v1966_v36 = vpop.f32.mrb[11].mxu0  ;;  %v889_v37 = vmax.f32 %v681_v31, 0.0  ;;  %v684_v38 = vadd.f32 %v2496_v54, %v683_v34  ;;  %v2058_v39 = vpop.f32.mrb[11].mxu1  ;;  %v843_v40 = vmax.f32 %v497_v29, 0.0 }
 0x10a   :  { %v844_v41 = vmax.f32 %v500_v35, 0.0  ;;  %v890_v42 = vmax.f32 %v684_v38, 0.0 }
 0x10c   :  { %v1630_v43 = vpack.c.bf16 %v844_v41, %v843_v40  ;;  %v1745_v44 = vpack.c.bf16 %v890_v42, %v889_v37 }
 0x10d   :  { %v504_v45 = vpop.f32.mrb[12].mxu0  ;;  %v688_v46 = vpop.f32.mrb[12].mxu1 }
 0x10e   :  { %1843 = vst [vmem:[%s2726_s3 + $0x10] sm:$0xff] %v1630_v43   ;;  %1866 = vst [vmem:[%s2726_s3 + $0xc8] sm:$0xff] %v1745_v44   ;;  %v505_v47 = vadd.f32 %v2496_v54, %v504_v45  ;;  %v1969_v48 = vpop.f32.mrb[13].mxu0  ;;  %v689_v49 = vadd.f32 %v2496_v54, %v688_v46  ;;  %v2061_v50 = vpop.f32.mrb[13].mxu1 }
 0x10f   :  { %v507_v51 = vpop.f32.mrb[14].mxu0  ;;  %v691_v52 = vpop.f32.mrb[14].mxu1 }
 0x110   :  { %v508_v53 = vadd.f32 %v2496_v54, %v507_v51  ;;  %v1970_v55 = vpop.f32.mrb[15].mxu0  ;;  %v891_v56 = vmax.f32 %v689_v49, 0.0  ;;  %v692_v57 = vadd.f32 %v2496_v54, %v691_v52  ;;  %v2062_v58 = vpop.f32.mrb[15].mxu1  ;;  %v845_v59 = vmax.f32 %v505_v47, 0.0 }
 0x112   :  { %v846_v60 = vmax.f32 %v508_v53, 0.0  ;;  %v892_v61 = vmax.f32 %v692_v57, 0.0 }
 0x114   :  { %v1635_v62 = vpack.c.bf16 %v846_v60, %v845_v59  ;;  %v1750_v63 = vpack.c.bf16 %v892_v61, %v891_v56 }
 0x115   :  { %v512_v0 = vpop.f32.mrb[16].mxu0  ;;  %v696_v1 = vpop.f32.mrb[16].mxu1 }
 0x116   :  { %1844 = vst [vmem:[%s2726_s3 + $0x18] sm:$0xff] %v1635_v62   ;;  %1867 = vst [vmem:[%s2726_s3 + $0xd0] sm:$0xff] %v1750_v63   ;;  %v513_v2 = vadd.f32 %v2496_v54, %v512_v0  ;;  %v1973_v3 = vpop.f32.mrb[17].mxu0  ;;  %v697_v4 = vadd.f32 %v2496_v54, %v696_v1  ;;  %v2065_v5 = vpop.f32.mrb[17].mxu1 }
 0x117   :  { %v515_v6 = vpop.f32.mrb[18].mxu0  ;;  %v699_v7 = vpop.f32.mrb[18].mxu1 }
 0x118   :  { %v516_v8 = vadd.f32 %v2496_v54, %v515_v6  ;;  %v1974_v9 = vpop.f32.mrb[19].mxu0  ;;  %v893_v10 = vmax.f32 %v697_v4, 0.0  ;;  %v700_v11 = vadd.f32 %v2496_v54, %v699_v7  ;;  %v2066_v12 = vpop.f32.mrb[19].mxu1  ;;  %v847_v13 = vmax.f32 %v513_v2, 0.0 }
 0x11a   :  { %v848_v14 = vmax.f32 %v516_v8, 0.0  ;;  %v894_v15 = vmax.f32 %v700_v11, 0.0 }
 0x11c   :  { %v1640_v16 = vpack.c.bf16 %v848_v14, %v847_v13  ;;  %v1755_v17 = vpack.c.bf16 %v894_v15, %v893_v10 }
 0x11d   :  { %v520_v18 = vpop.f32.mrb[20].mxu0  ;;  %v704_v19 = vpop.f32.mrb[20].mxu1 }
 0x11e   :  { %1845 = vst [vmem:[%s2726_s3 + $0x20] sm:$0xff] %v1640_v16   ;;  %1868 = vst [vmem:[%s2726_s3 + $0xd8] sm:$0xff] %v1755_v17   ;;  %v521_v20 = vadd.f32 %v2496_v54, %v520_v18  ;;  %v1977_v21 = vpop.f32.mrb[21].mxu0  ;;  %v705_v22 = vadd.f32 %v2496_v54, %v704_v19  ;;  %v2069_v23 = vpop.f32.mrb[21].mxu1 }
 0x11f   :  { %v523_v24 = vpop.f32.mrb[22].mxu0  ;;  %v707_v25 = vpop.f32.mrb[22].mxu1 }
 0x120   :  { %v524_v26 = vadd.f32 %v2496_v54, %v523_v24  ;;  %v1978_v27 = vpop.f32.mrb[23].mxu0  ;;  %v895_v28 = vmax.f32 %v705_v22, 0.0  ;;  %v708_v29 = vadd.f32 %v2496_v54, %v707_v25  ;;  %v2070_v30 = vpop.f32.mrb[23].mxu1  ;;  %v849_v31 = vmax.f32 %v521_v20, 0.0 }
 0x122   :  { %v850_v32 = vmax.f32 %v524_v26, 0.0  ;;  %v896_v33 = vmax.f32 %v708_v29, 0.0 }
 0x124   :  { %v1645_v34 = vpack.c.bf16 %v850_v32, %v849_v31  ;;  %v1760_v35 = vpack.c.bf16 %v896_v33, %v895_v28 }
 0x125   :  { %v528_v36 = vpop.f32.mrb[24].mxu0  ;;  %v712_v37 = vpop.f32.mrb[24].mxu1 }
 0x126   :  { %1846 = vst [vmem:[%s2726_s3 + $0x28] sm:$0xff] %v1645_v34   ;;  %1869 = vst [vmem:[%s2726_s3 + $0xe0] sm:$0xff] %v1760_v35   ;;  %v529_v38 = vadd.f32 %v2496_v54, %v528_v36  ;;  %v1981_v39 = vpop.f32.mrb[25].mxu0  ;;  %v713_v40 = vadd.f32 %v2496_v54, %v712_v37  ;;  %v2073_v41 = vpop.f32.mrb[25].mxu1 }
 0x127   :  { %v531_v42 = vpop.f32.mrb[26].mxu0  ;;  %v715_v43 = vpop.f32.mrb[26].mxu1 }
 0x128   :  { %v532_v44 = vadd.f32 %v2496_v54, %v531_v42  ;;  %v1982_v45 = vpop.f32.mrb[27].mxu0  ;;  %v897_v46 = vmax.f32 %v713_v40, 0.0  ;;  %v716_v47 = vadd.f32 %v2496_v54, %v715_v43  ;;  %v2074_v48 = vpop.f32.mrb[27].mxu1  ;;  %v851_v49 = vmax.f32 %v529_v38, 0.0 }
 0x12a   :  { %v852_v50 = vmax.f32 %v532_v44, 0.0  ;;  %v898_v51 = vmax.f32 %v716_v47, 0.0 }
 0x12c   :  { %v1650_v52 = vpack.c.bf16 %v852_v50, %v851_v49  ;;  %v1765_v53 = vpack.c.bf16 %v898_v51, %v897_v46 }
 0x12d   :  { %v536_v55 = vpop.f32.mrb[28].mxu0  ;;  %v720_v56 = vpop.f32.mrb[28].mxu1 }
 0x12e   :  { %1847 = vst [vmem:[%s2726_s3 + $0x30] sm:$0xff] %v1650_v52   ;;  %1870 = vst [vmem:[%s2726_s3 + $0xe8] sm:$0xff] %v1765_v53   ;;  %v537_v57 = vadd.f32 %v2496_v54, %v536_v55  ;;  %v1985_v58 = vpop.f32.mrb[29].mxu0  ;;  %v721_v59 = vadd.f32 %v2496_v54, %v720_v56  ;;  %v2077_v60 = vpop.f32.mrb[29].mxu1 }
 0x12f   :  { %v539_v61 = vpop.f32.mrb[30].mxu0  ;;  %v723_v62 = vpop.f32.mrb[30].mxu1 }
 0x130   :  { %v540_v63 = vadd.f32 %v2496_v54, %v539_v61  ;;  %v1986_v0 = vpop.f32.mrb[31].mxu0  ;;  %v899_v1 = vmax.f32 %v721_v59, 0.0  ;;  %v724_v2 = vadd.f32 %v2496_v54, %v723_v62  ;;  %v2078_v3 = vpop.f32.mrb[31].mxu1  ;;  %v853_v4 = vmax.f32 %v537_v57, 0.0 }
 0x132   :  { %v854_v5 = vmax.f32 %v540_v63, 0.0  ;;  %v900_v6 = vmax.f32 %v724_v2, 0.0 }
 0x134   :  { %v1655_v7 = vpack.c.bf16 %v854_v5, %v853_v4  ;;  %v1770_v8 = vpack.c.bf16 %v900_v6, %v899_v1 }
 0x135   :  { %v544_v9 = vpop.f32.mrb[32].mxu0  ;;  %v728_v10 = vpop.f32.mrb[32].mxu1 }
 0x136   :  { %1848 = vst [vmem:[%s2726_s3 + $0x38] sm:$0xff] %v1655_v7   ;;  %1871 = vst [vmem:[%s2726_s3 + $0xf0] sm:$0xff] %v1770_v8   ;;  %v545_v11 = vadd.f32 %v2496_v54, %v544_v9  ;;  %v1989_v12 = vpop.f32.mrb[33].mxu0  ;;  %v729_v13 = vadd.f32 %v2496_v54, %v728_v10  ;;  %v2081_v14 = vpop.f32.mrb[33].mxu1 }
 0x137   :  { %v547_v15 = vpop.f32.mrb[34].mxu0  ;;  %v731_v16 = vpop.f32.mrb[34].mxu1 }
 0x138   :  { %v548_v17 = vadd.f32 %v2496_v54, %v547_v15  ;;  %v1990_v18 = vpop.f32.mrb[35].mxu0  ;;  %v901_v19 = vmax.f32 %v729_v13, 0.0  ;;  %v732_v20 = vadd.f32 %v2496_v54, %v731_v16  ;;  %v2082_v21 = vpop.f32.mrb[35].mxu1  ;;  %v855_v22 = vmax.f32 %v545_v11, 0.0 }
 0x13a   :  { %v856_v23 = vmax.f32 %v548_v17, 0.0  ;;  %v902_v24 = vmax.f32 %v732_v20, 0.0 }
 0x13c   :  { %v1660_v25 = vpack.c.bf16 %v856_v23, %v855_v22  ;;  %v1775_v26 = vpack.c.bf16 %v902_v24, %v901_v19 }
 0x13d   :  { %v552_v27 = vpop.f32.mrb[36].mxu0  ;;  %v736_v28 = vpop.f32.mrb[36].mxu1 }
 0x13e   :  { %1849 = vst [vmem:[%s2726_s3 + $0x40] sm:$0xff] %v1660_v25   ;;  %1872 = vst [vmem:[%s2726_s3 + $0xf8] sm:$0xff] %v1775_v26   ;;  %v553_v29 = vadd.f32 %v2496_v54, %v552_v27  ;;  %v1993_v30 = vpop.f32.mrb[37].mxu0  ;;  %v737_v31 = vadd.f32 %v2496_v54, %v736_v28  ;;  %v2085_v32 = vpop.f32.mrb[37].mxu1 }
 0x13f   :  { %v555_v33 = vpop.f32.mrb[38].mxu0  ;;  %v739_v34 = vpop.f32.mrb[38].mxu1 }
 0x140   :  { %v556_v35 = vadd.f32 %v2496_v54, %v555_v33  ;;  %v1994_v36 = vpop.f32.mrb[39].mxu0  ;;  %v903_v37 = vmax.f32 %v737_v31, 0.0  ;;  %v740_v38 = vadd.f32 %v2496_v54, %v739_v34  ;;  %v2086_v39 = vpop.f32.mrb[39].mxu1  ;;  %v857_v40 = vmax.f32 %v553_v29, 0.0 }
 0x142   :  { %v858_v41 = vmax.f32 %v556_v35, 0.0  ;;  %v904_v42 = vmax.f32 %v740_v38, 0.0 }
 0x144   :  { %v1665_v43 = vpack.c.bf16 %v858_v41, %v857_v40  ;;  %v1780_v44 = vpack.c.bf16 %v904_v42, %v903_v37 }
 0x145   :  { %v560_v45 = vpop.f32.mrb[40].mxu0  ;;  %v744_v46 = vpop.f32.mrb[40].mxu1 }
 0x146   :  { %1850 = vst [vmem:[%s2726_s3 + $0x48] sm:$0xff] %v1665_v43   ;;  %1873 = vst [vmem:[%s2726_s3 + $0x100] sm:$0xff] %v1780_v44   ;;  %v561_v47 = vadd.f32 %v2496_v54, %v560_v45  ;;  %v1997_v48 = vpop.f32.mrb[41].mxu0  ;;  %v745_v49 = vadd.f32 %v2496_v54, %v744_v46  ;;  %v2089_v50 = vpop.f32.mrb[41].mxu1 }
 0x147   :  { %v563_v51 = vpop.f32.mrb[42].mxu0  ;;  %v747_v52 = vpop.f32.mrb[42].mxu1 }
 0x148   :  { %v564_v53 = vadd.f32 %v2496_v54, %v563_v51  ;;  %v1998_v55 = vpop.f32.mrb[43].mxu0  ;;  %v905_v56 = vmax.f32 %v745_v49, 0.0  ;;  %v748_v57 = vadd.f32 %v2496_v54, %v747_v52  ;;  %v2090_v58 = vpop.f32.mrb[43].mxu1  ;;  %v859_v59 = vmax.f32 %v561_v47, 0.0 }
 0x14a   :  { %v860_v60 = vmax.f32 %v564_v53, 0.0  ;;  %v906_v61 = vmax.f32 %v748_v57, 0.0 }
 0x14c   :  { %v1670_v62 = vpack.c.bf16 %v860_v60, %v859_v59  ;;  %v1785_v63 = vpack.c.bf16 %v906_v61, %v905_v56 }
 0x14d   :  { %v568_v0 = vpop.f32.mrb[44].mxu0  ;;  %v752_v1 = vpop.f32.mrb[44].mxu1 }
 0x14e   :  { %1851 = vst [vmem:[%s2726_s3 + $0x50] sm:$0xff] %v1670_v62   ;;  %1874 = vst [vmem:[%s2726_s3 + $0x108] sm:$0xff] %v1785_v63   ;;  %v569_v2 = vadd.f32 %v2496_v54, %v568_v0  ;;  %v2001_v3 = vpop.f32.mrb[45].mxu0  ;;  %v753_v4 = vadd.f32 %v2496_v54, %v752_v1  ;;  %v2093_v5 = vpop.f32.mrb[45].mxu1 }
 0x14f   :  { %v571_v6 = vpop.f32.mrb[46].mxu0  ;;  %v755_v7 = vpop.f32.mrb[46].mxu1 }
 0x150   :  { %v572_v8 = vadd.f32 %v2496_v54, %v571_v6  ;;  %v2002_v9 = vpop.f32.mrb[47].mxu0  ;;  %v907_v10 = vmax.f32 %v753_v4, 0.0  ;;  %v756_v11 = vadd.f32 %v2496_v54, %v755_v7  ;;  %v2094_v12 = vpop.f32.mrb[47].mxu1  ;;  %v861_v13 = vmax.f32 %v569_v2, 0.0 }
 0x152   :  { %v862_v14 = vmax.f32 %v572_v8, 0.0  ;;  %v908_v15 = vmax.f32 %v756_v11, 0.0 }
 0x154   :  { %v1675_v16 = vpack.c.bf16 %v862_v14, %v861_v13  ;;  %v1790_v17 = vpack.c.bf16 %v908_v15, %v907_v10 }
 0x155   :  { %v576_v18 = vpop.f32.mrb[48].mxu0  ;;  %v760_v19 = vpop.f32.mrb[48].mxu1 }
 0x156   :  { %1852 = vst [vmem:[%s2726_s3 + $0x58] sm:$0xff] %v1675_v16   ;;  %1875 = vst [vmem:[%s2726_s3 + $0x110] sm:$0xff] %v1790_v17   ;;  %v577_v20 = vadd.f32 %v2496_v54, %v576_v18  ;;  %v2005_v21 = vpop.f32.mrb[49].mxu0  ;;  %v761_v22 = vadd.f32 %v2496_v54, %v760_v19  ;;  %v2097_v23 = vpop.f32.mrb[49].mxu1 }
 0x157   :  { %v579_v24 = vpop.f32.mrb[50].mxu0  ;;  %v763_v25 = vpop.f32.mrb[50].mxu1 }
 0x158   :  { %v580_v26 = vadd.f32 %v2496_v54, %v579_v24  ;;  %v2006_v27 = vpop.f32.mrb[51].mxu0  ;;  %v909_v28 = vmax.f32 %v761_v22, 0.0  ;;  %v764_v29 = vadd.f32 %v2496_v54, %v763_v25  ;;  %v2098_v30 = vpop.f32.mrb[51].mxu1  ;;  %v863_v31 = vmax.f32 %v577_v20, 0.0 }
 0x15a   :  { %v864_v32 = vmax.f32 %v580_v26, 0.0  ;;  %v910_v33 = vmax.f32 %v764_v29, 0.0 }
 0x15c   :  { %v1680_v34 = vpack.c.bf16 %v864_v32, %v863_v31  ;;  %v1795_v35 = vpack.c.bf16 %v910_v33, %v909_v28 }
 0x15d   :  { %v584_v36 = vpop.f32.mrb[52].mxu0  ;;  %v768_v37 = vpop.f32.mrb[52].mxu1 }
 0x15e   :  { %1853 = vst [vmem:[%s2726_s3 + $0x60] sm:$0xff] %v1680_v34   ;;  %1876 = vst [vmem:[%s2726_s3 + $0x118] sm:$0xff] %v1795_v35   ;;  %v585_v38 = vadd.f32 %v2496_v54, %v584_v36  ;;  %v2009_v39 = vpop.f32.mrb[53].mxu0  ;;  %v769_v40 = vadd.f32 %v2496_v54, %v768_v37  ;;  %v2101_v41 = vpop.f32.mrb[53].mxu1 }
 0x15f   :  { %v587_v42 = vpop.f32.mrb[54].mxu0  ;;  %v771_v43 = vpop.f32.mrb[54].mxu1 }
 0x160   :  { %v588_v44 = vadd.f32 %v2496_v54, %v587_v42  ;;  %v2010_v45 = vpop.f32.mrb[55].mxu0  ;;  %v911_v46 = vmax.f32 %v769_v40, 0.0  ;;  %v772_v47 = vadd.f32 %v2496_v54, %v771_v43  ;;  %v2102_v48 = vpop.f32.mrb[55].mxu1  ;;  %v865_v49 = vmax.f32 %v585_v38, 0.0 }
 0x162   :  { %v866_v50 = vmax.f32 %v588_v44, 0.0  ;;  %v912_v51 = vmax.f32 %v772_v47, 0.0 }
 0x164   :  { %v1685_v52 = vpack.c.bf16 %v866_v50, %v865_v49  ;;  %v1800_v53 = vpack.c.bf16 %v912_v51, %v911_v46 }
 0x165   :  { %v592_v55 = vpop.f32.mrb[56].mxu0  ;;  %v776_v56 = vpop.f32.mrb[56].mxu1 }
 0x166   :  { %1854 = vst [vmem:[%s2726_s3 + $0x68] sm:$0xff] %v1685_v52   ;;  %1877 = vst [vmem:[%s2726_s3 + $0x120] sm:$0xff] %v1800_v53   ;;  %v593_v57 = vadd.f32 %v2496_v54, %v592_v55  ;;  %v2013_v58 = vpop.f32.mrb[57].mxu0  ;;  %v777_v59 = vadd.f32 %v2496_v54, %v776_v56  ;;  %v2105_v60 = vpop.f32.mrb[57].mxu1 }
 0x167   :  { %v595_v61 = vpop.f32.mrb[58].mxu0  ;;  %v779_v62 = vpop.f32.mrb[58].mxu1 }
 0x168   :  { %v596_v63 = vadd.f32 %v2496_v54, %v595_v61  ;;  %v2014_v0 = vpop.f32.mrb[59].mxu0  ;;  %v913_v1 = vmax.f32 %v777_v59, 0.0  ;;  %v780_v2 = vadd.f32 %v2496_v54, %v779_v62  ;;  %v2106_v3 = vpop.f32.mrb[59].mxu1  ;;  %v867_v4 = vmax.f32 %v593_v57, 0.0 }
 0x16a   :  { %v868_v5 = vmax.f32 %v596_v63, 0.0  ;;  %v914_v6 = vmax.f32 %v780_v2, 0.0 }
 0x16c   :  { %v1690_v7 = vpack.c.bf16 %v868_v5, %v867_v4  ;;  %v1805_v8 = vpack.c.bf16 %v914_v6, %v913_v1 }
 0x16d   :  { %v600_v9 = vpop.f32.mrb[60].mxu0  ;;  %v784_v10 = vpop.f32.mrb[60].mxu1 }
 0x16e   :  { %1855 = vst [vmem:[%s2726_s3 + $0x70] sm:$0xff] %v1690_v7   ;;  %1878 = vst [vmem:[%s2726_s3 + $0x128] sm:$0xff] %v1805_v8   ;;  %v601_v11 = vadd.f32 %v2496_v54, %v600_v9  ;;  %v2017_v12 = vpop.f32.mrb[61].mxu0  ;;  %v785_v13 = vadd.f32 %v2496_v54, %v784_v10  ;;  %v2109_v14 = vpop.f32.mrb[61].mxu1 }
 0x16f   :  { %v603_v15 = vpop.f32.mrb[62].mxu0  ;;  %v787_v16 = vpop.f32.mrb[62].mxu1 }
 0x170   :  { %v604_v17 = vadd.f32 %v2496_v54, %v603_v15  ;;  %v2018_v18 = vpop.f32.mrb[63].mxu0  ;;  %v915_v19 = vmax.f32 %v785_v13, 0.0  ;;  %v788_v20 = vadd.f32 %v2496_v54, %v787_v16  ;;  %v2110_v21 = vpop.f32.mrb[63].mxu1  ;;  %v869_v22 = vmax.f32 %v601_v11, 0.0 }
 0x172   :  { %v870_v23 = vmax.f32 %v604_v17, 0.0  ;;  %v916_v24 = vmax.f32 %v788_v20, 0.0 }
 0x174   :  { %v1695_v25 = vpack.c.bf16 %v870_v23, %v869_v22  ;;  %v1810_v26 = vpack.c.bf16 %v916_v24, %v915_v19 }
 0x175   :  { %v608_v27 = vpop.f32.mrb[64].mxu0  ;;  %v792_v28 = vpop.f32.mrb[64].mxu1 }
 0x176   :  { %1856 = vst [vmem:[%s2726_s3 + $0x78] sm:$0xff] %v1695_v25   ;;  %1879 = vst [vmem:[%s2726_s3 + $0x130] sm:$0xff] %v1810_v26   ;;  %v609_v29 = vadd.f32 %v2496_v54, %v608_v27  ;;  %v2021_v30 = vpop.f32.mrb[65].mxu0  ;;  %v793_v31 = vadd.f32 %v2496_v54, %v792_v28  ;;  %v2113_v32 = vpop.f32.mrb[65].mxu1 }
 0x177   :  { %v611_v33 = vpop.f32.mrb[66].mxu0  ;;  %v795_v34 = vpop.f32.mrb[66].mxu1 }
 0x178   :  { %v612_v35 = vadd.f32 %v2496_v54, %v611_v33  ;;  %v2022_v36 = vpop.f32.mrb[67].mxu0  ;;  %v917_v37 = vmax.f32 %v793_v31, 0.0  ;;  %v796_v38 = vadd.f32 %v2496_v54, %v795_v34  ;;  %v2114_v39 = vpop.f32.mrb[67].mxu1  ;;  %v871_v40 = vmax.f32 %v609_v29, 0.0 }
 0x17a   :  { %v872_v41 = vmax.f32 %v612_v35, 0.0  ;;  %v918_v42 = vmax.f32 %v796_v38, 0.0 }
 0x17c   :  { %v1700_v43 = vpack.c.bf16 %v872_v41, %v871_v40  ;;  %v1815_v44 = vpack.c.bf16 %v918_v42, %v917_v37 }
 0x17d   :  { %v616_v45 = vpop.f32.mrb[68].mxu0  ;;  %v800_v46 = vpop.f32.mrb[68].mxu1 }
 0x17e   :  { %1857 = vst [vmem:[%s2726_s3 + $0x80] sm:$0xff] %v1700_v43   ;;  %1880 = vst [vmem:[%s2726_s3 + $0x138] sm:$0xff] %v1815_v44   ;;  %v617_v47 = vadd.f32 %v2496_v54, %v616_v45  ;;  %v2025_v48 = vpop.f32.mrb[69].mxu0  ;;  %v801_v49 = vadd.f32 %v2496_v54, %v800_v46  ;;  %v2117_v50 = vpop.f32.mrb[69].mxu1 }
 0x17f   :  { %v619_v51 = vpop.f32.mrb[70].mxu0  ;;  %v803_v52 = vpop.f32.mrb[70].mxu1 }
 0x180   :  { %v620_v53 = vadd.f32 %v2496_v54, %v619_v51  ;;  %v2026_v55 = vpop.f32.mrb[71].mxu0  ;;  %v919_v56 = vmax.f32 %v801_v49, 0.0  ;;  %v804_v57 = vadd.f32 %v2496_v54, %v803_v52  ;;  %v2118_v58 = vpop.f32.mrb[71].mxu1  ;;  %v873_v59 = vmax.f32 %v617_v47, 0.0 }
 0x182   :  { %v874_v60 = vmax.f32 %v620_v53, 0.0  ;;  %v920_v61 = vmax.f32 %v804_v57, 0.0 }
 0x184   :  { %v1705_v62 = vpack.c.bf16 %v874_v60, %v873_v59  ;;  %v1820_v63 = vpack.c.bf16 %v920_v61, %v919_v56 }
 0x185   :  { %v624_v0 = vpop.f32.mrb[72].mxu0  ;;  %v808_v1 = vpop.f32.mrb[72].mxu1 }
 0x186   :  { %1858 = vst [vmem:[%s2726_s3 + $0x88] sm:$0xff] %v1705_v62   ;;  %1881 = vst [vmem:[%s2726_s3 + $0x140] sm:$0xff] %v1820_v63   ;;  %v625_v2 = vadd.f32 %v2496_v54, %v624_v0  ;;  %v2029_v3 = vpop.f32.mrb[73].mxu0  ;;  %v809_v4 = vadd.f32 %v2496_v54, %v808_v1  ;;  %v2121_v5 = vpop.f32.mrb[73].mxu1 }
 0x187   :  { %v627_v6 = vpop.f32.mrb[74].mxu0  ;;  %v811_v7 = vpop.f32.mrb[74].mxu1 }
 0x188   :  { %v628_v8 = vadd.f32 %v2496_v54, %v627_v6  ;;  %v2030_v9 = vpop.f32.mrb[75].mxu0  ;;  %v921_v10 = vmax.f32 %v809_v4, 0.0  ;;  %v812_v11 = vadd.f32 %v2496_v54, %v811_v7  ;;  %v2122_v12 = vpop.f32.mrb[75].mxu1  ;;  %v875_v13 = vmax.f32 %v625_v2, 0.0 }
 0x18a   :  { %v876_v14 = vmax.f32 %v628_v8, 0.0  ;;  %v922_v15 = vmax.f32 %v812_v11, 0.0 }
 0x18c   :  { %v1710_v16 = vpack.c.bf16 %v876_v14, %v875_v13  ;;  %v1825_v17 = vpack.c.bf16 %v922_v15, %v921_v10 }
 0x18d   :  { %v632_v18 = vpop.f32.mrb[76].mxu0  ;;  %v816_v19 = vpop.f32.mrb[76].mxu1 }
 0x18e   :  { %1859 = vst [vmem:[%s2726_s3 + $0x90] sm:$0xff] %v1710_v16   ;;  %1882 = vst [vmem:[%s2726_s3 + $0x148] sm:$0xff] %v1825_v17   ;;  %v633_v20 = vadd.f32 %v2496_v54, %v632_v18  ;;  %v2033_v21 = vpop.f32.mrb[77].mxu0  ;;  %v817_v22 = vadd.f32 %v2496_v54, %v816_v19  ;;  %v2125_v23 = vpop.f32.mrb[77].mxu1 }
 0x18f   :  { %v635_v24 = vpop.f32.mrb[78].mxu0  ;;  %v819_v25 = vpop.f32.mrb[78].mxu1 }
 0x190   :  { %v636_v26 = vadd.f32 %v2496_v54, %v635_v24  ;;  %v2034_v27 = vpop.f32.mrb[79].mxu0  ;;  %v923_v28 = vmax.f32 %v817_v22, 0.0  ;;  %v820_v29 = vadd.f32 %v2496_v54, %v819_v25  ;;  %v2126_v30 = vpop.f32.mrb[79].mxu1  ;;  %v877_v31 = vmax.f32 %v633_v20, 0.0 }
 0x192   :  { %v878_v32 = vmax.f32 %v636_v26, 0.0  ;;  %v924_v33 = vmax.f32 %v820_v29, 0.0 }
 0x194   :  { %v1715_v34 = vpack.c.bf16 %v878_v32, %v877_v31  ;;  %v1830_v35 = vpack.c.bf16 %v924_v33, %v923_v28 }
 0x195   :  { %v640_v36 = vpop.f32.mrb[80].mxu0  ;;  %v824_v37 = vpop.f32.mrb[80].mxu1 }
 0x196   :  { %1860 = vst [vmem:[%s2726_s3 + $0x98] sm:$0xff] %v1715_v34   ;;  %1883 = vst [vmem:[%s2726_s3 + $0x150] sm:$0xff] %v1830_v35   ;;  %v641_v38 = vadd.f32 %v2496_v54, %v640_v36  ;;  %v2037_v39 = vpop.f32.mrb[81].mxu0  ;;  %v825_v40 = vadd.f32 %v2496_v54, %v824_v37  ;;  %v2129_v41 = vpop.f32.mrb[81].mxu1 }
 0x197   :  { %v643_v42 = vpop.f32.mrb[82].mxu0  ;;  %v827_v43 = vpop.f32.mrb[82].mxu1 }
 0x198   :  { %v644_v44 = vadd.f32 %v2496_v54, %v643_v42  ;;  %v2038_v45 = vpop.f32.mrb[83].mxu0  ;;  %v925_v46 = vmax.f32 %v825_v40, 0.0  ;;  %v828_v47 = vadd.f32 %v2496_v54, %v827_v43  ;;  %v2130_v48 = vpop.f32.mrb[83].mxu1  ;;  %v879_v49 = vmax.f32 %v641_v38, 0.0 }
 0x19a   :  { %v880_v50 = vmax.f32 %v644_v44, 0.0  ;;  %v926_v51 = vmax.f32 %v828_v47, 0.0 }
 0x19c   :  { %v1720_v52 = vpack.c.bf16 %v880_v50, %v879_v49  ;;  %v1835_v53 = vpack.c.bf16 %v926_v51, %v925_v46 }
 0x19d   :  { %v648_v55 = vpop.f32.mrb[84].mxu0  ;;  %v832_v56 = vpop.f32.mrb[84].mxu1 }
 0x19e   :  { %1861 = vst [vmem:[%s2726_s3 + $0xa0] sm:$0xff] %v1720_v52   ;;  %1884 = vst [vmem:[%s2726_s3 + $0x158] sm:$0xff] %v1835_v53   ;;  %v649_v57 = vadd.f32 %v2496_v54, %v648_v55  ;;  %v2041_v58 = vpop.f32.mrb[85].mxu0  ;;  %v833_v59 = vadd.f32 %v2496_v54, %v832_v56  ;;  %v2133_v60 = vpop.f32.mrb[85].mxu1 }
 0x19f   :  { %v651_v61 = vpop.f32.mrb[86].mxu0  ;;  %v835_v62 = vpop.f32.mrb[86].mxu1 }
 0x1a0   :  { %v652_v63 = vadd.f32 %v2496_v54, %v651_v61  ;;  %v2042_v0 = vpop.f32.mrb[87].mxu0  ;;  %v927_v1 = vmax.f32 %v833_v59, 0.0  ;;  %v836_v2 = vadd.f32 %v2496_v54, %v835_v62  ;;  %v2134_v3 = vpop.f32.mrb[87].mxu1  ;;  %v881_v4 = vmax.f32 %v649_v57, 0.0 }
 0x1a2   :  { %v882_v5 = vmax.f32 %v652_v63, 0.0  ;;  %v928_v6 = vmax.f32 %v836_v2, 0.0 }
 0x1a4   :  { %v1725_v7 = vpack.c.bf16 %v882_v5, %v881_v4  ;;  %v1840_v8 = vpack.c.bf16 %v928_v6, %v927_v1 }
 0x1a5   :  { %v656_v9 = vpop.f32.mrb[88].mxu0 }
 0x1a6   :  { %1862 = vst [vmem:[%s2726_s3 + $0xa8] sm:$0xff] %v1725_v7   ;;  %1885 = vst [vmem:[%s2726_s3 + $0x160] sm:$0xff] %v1840_v8   ;;  %v657_v10 = vadd.f32 %v2496_v54, %v656_v9  ;;  %v2045_v11 = vpop.f32.mrb[89].mxu0 }
 0x1a7   :  { %v659_v12 = vpop.f32.mrb[90].mxu0 }
 0x1a8   :  { %v660_v13 = vadd.f32 %v2496_v54, %v659_v12  ;;  %v2046_v14 = vpop.f32.mrb[91].mxu0  ;;  %v883_v15 = vmax.f32 %v657_v10, 0.0 }
 0x1aa   :  { %v884_v16 = vmax.f32 %v660_v13, 0.0 }
 0x1ac   :  { %v1730_v17 = vpack.c.bf16 %v884_v16, %v883_v15 }
 0x1ae   :  { %1863 = vst [vmem:[%s2726_s3 + $0xb0] sm:$0xff] %v1730_v17  }

// kernel: gnn_stack_forward.9
= control target key start
LH: loop header
LB: loop body
LE: loop exit
PB: predicated region body
PF: predicated region fallthrough
CT: control target
= control target key end

     0   :  { %s5928_s0 = inlined_call_operand.vmem [shape: s32[2,1], index: 0, kind: input, shape index: {}]   ;;  %s5929_s2 = inlined_call_operand.vmem [shape: s32[1,720], index: 2, kind: input, shape index: {}]   ;;  %s5930_s3 = inlined_call_operand.vmem [shape: bf16[720,128], index: 3, kind: input, shape index: {}]   ;;  %s5931_s4 = inlined_call_operand.vmem [shape: bf16[208,128], index: 4, kind: input, shape index: {}]   ;;  %s5932_s5 = inlined_call_operand.vmem [shape: bf16[128,128], index: 5, kind: input, shape index: {}]   ;;  %s5933_s6 = inlined_call_operand.vmem [shape: f32[1,128], index: 6, kind: input, shape index: {}]   ;;  %s5934_s7 = inlined_call_operand.vmem [shape: bf16[256,128], index: 7, kind: input, shape index: {}]   ;;  %s5935_s8 = inlined_call_operand.vmem [shape: f32[1,128], index: 8, kind: input, shape index: {}]   ;;  %s5936_s9 = inlined_call_operand.vmem [shape: bf16[128,128], index: 9, kind: input, shape index: {}]   ;;  %s5937_s10 = inlined_call_operand.vmem [shape: f32[1,128], index: 10, kind: input, shape index: {}]   ;;  %s5938_s11 = inlined_call_operand.vmem [shape: bf16[128,128], index: 11, kind: input, shape index: {}]   ;;  %s5939_s12 = inlined_call_operand.vmem [shape: f32[1,128], index: 12, kind: input, shape index: {}]   ;;  %s5940_s13 = inlined_call_operand.vmem [shape: f32[208,128], index: 13, kind: output, shape index: {}]   ;;  %s5941_s1 = inlined_call_operand.vmem [shape: s32[2], index: 1, kind: input, shape index: {}]  }
   0x1   :  { %s18_s27 = sshll.u32 %s5928_s0, 4  ;;  %s22_s30 = sshll.u32 %s5941_s1, 4  ;;  %s19_s27 = int_to_ptr.vmem [resolvable:$true] %s18_s27  ;;  %s23_s30 = int_to_ptr.vmem [resolvable:$true] %s22_s30 }
   0x2   :  { %s4297_s14 = scalar_lea.vmem %s19_s27, 32  ;;  %p4302_p1 = scmp.lt.s32.totalorder %s19_s27, %s19_s27 }
   0x3   :  { %p4298_p0 = scmp.ne.s32.totalorder %s19_s27, %s4297_s14  ;;  %p4303_p2 = scmp.lt.s32.totalorder %s4297_s14, %s4297_s14 }
   0x5   :  { %p4304_p3 = por %p4303_p2, %p4302_p1 }
   0x7   :  { %p4305_p4 = pnand %p4304_p3, %p4298_p0 }
   0x9   :  { %4308 = shalt.err (!%p4305_p4)  }
   0xa   :  { %s4347_s15 = smov [#allocation4]   ;;  %s4309_s16 = scalar_lea.vmem %s23_s30, 16 }
   0xb   :  { %21 = dma.vmem_to_smem %s19_s27, 32, %s4347_s15, [#allocation3] }
   0xc   :  { %p4310_p5 = scmp.ne.s32.totalorder %s23_s30, %s4309_s16  ;;  %p4314_p6 = scmp.lt.s32.totalorder %s23_s30, %s23_s30 }
   0xd   :  { %p4315_p7 = scmp.lt.s32.totalorder %s4309_s16, %s4309_s16 }
   0xf   :  { %p4316_p8 = por %p4315_p7, %p4314_p6 }
  0x11   :  { %p4317_p9 = pnand %p4316_p8, %p4310_p5 }
  0x13   :  { %4320 = shalt.err (!%p4317_p9)  }
  0x14   :  { %s4348_s0 = smov [#allocation5]  }
  0x15   :  { %25 = dma.vmem_to_smem %s23_s30, 16, %s4348_s0, [#allocation3] }
  0x16   :  { %4333 = dma.done.wait [#allocation3], 48 }
  0x17   :  { %4334 = vsyncadd [#allocation3], 4294967248 }
  0x18   :  { %27 = sfence }
  0x19   :  { %s4432_s1 = smov 0   ;;  %s4434_s17 = smov 0  }
  0x1a   :  { %s4436_s18 = smov 0  }
  0x1b LB: > { %5959 = sst [smem:[#allocation7_spill]] %s4341_s17  ;;  %s45_s19 = sadd.s32 1, %s4341_s17  ;;  %s4345_s18 = sphi %s4436_s18, %s33_s18   ;;  %s4341_s17 = sphi %s4434_s17, %s6005_s17   ;;  %s4337_s1 = sphi %s4432_s1, %s6004_s1  }
  0x1c   : > { %p3282_p10 = scmp.ge.s32.totalorder %s4345_s18, 1  ;;  %p47_p11 = scmp.ge.s32.totalorder %s45_s19, 2 }
  0x1d   : > { %p447_p12 = scmp.lt.s32.totalorder %s4345_s18, 3 }
  0x1e   : > { %s6007_s19 = smov (%p47_p11, %s45_s19), 0 }
  0x1f   : > { %5960 = sst [smem:[#allocation8_spill]] %s6007_s19  ;;  %p448_p13 = pnand %p3282_p10, %p447_p12 }
  0x20   : > { %s3283_s20 = sshll.u32 (!%p448_p13), %s4337_s1, 7  ;;  %s555_s21 = smul.u32 (!%p448_p13), 13, %s4337_s1  ;;  %v5943_v0 = vmov (!%p448_p13), 0.0  }
  0x21   : > { %451 = sbr.rel (%p448_p13) target bundleno = 1898 (0x76a), region = 64  ;;  %s519_s22 = sld [smem:[#allocation4 + %s3283_s20]] (!%p448_p13)  ;;  %572 = vst [vmem:[#allocation2] sm:$0xff] (!%p448_p13), %v5943_v0  ;;  %573 = vst [vmem:[#allocation2 + $0x8] sm:$0xff] (!%p448_p13), %v5943_v0 }
  0x22   : > { %s540_s23 = sld [smem:[#allocation4 + %s3283_s20]] (!%p448_p13)  ;;  %574 = vst [vmem:[#allocation2 + $0x10] sm:$0xff] (!%p448_p13), %v5943_v0  ;;  %575 = vst [vmem:[#allocation2 + $0x18] sm:$0xff] (!%p448_p13), %v5943_v0  ;;  %p556_p0 = scmp.lt.s32.totalorder (!%p448_p13), %s555_s21, 25 }
  0x23   : > { %576 = vst [vmem:[#allocation2 + $0x20] sm:$0xff] (!%p448_p13), %v5943_v0  ;;  %577 = vst [vmem:[#allocation2 + $0x28] sm:$0xff] (!%p448_p13), %v5943_v0  ;;  %s585_s24 = sld [smem:[#allocation5 + %s4337_s1]] (!%p448_p13) }
  0x24   : > { %578 = vst [vmem:[#allocation2 + $0x30] sm:$0xff] (!%p448_p13), %v5943_v0  ;;  %579 = vst [vmem:[#allocation2 + $0x38] sm:$0xff] (!%p448_p13), %v5943_v0 }
  0x25   : > { %580 = vst [vmem:[#allocation2 + $0x40] sm:$0xff] (!%p448_p13), %v5943_v0  ;;  %581 = vst [vmem:[#allocation2 + $0x48] sm:$0xff] (!%p448_p13), %v5943_v0 }
  0x26   : > { %582 = vst [vmem:[#allocation2 + $0x50] sm:$0xff] (!%p448_p13), %v5943_v0  ;;  %583 = vst [vmem:[#allocation2 + $0x58] sm:$0xff] (!%p448_p13), %v5943_v0 }
  0x27   : > { %584 = vst [vmem:[#allocation2 + $0x60] sm:$0xff] (!%p448_p13), %v5943_v0  ;;  %s520_s27 = smul.u32 (!%p448_p13), 6, %s519_s22 }
  0x28   : > { %s6009_s21 = smov (!%p556_p0, %s555_s21), 25  ;;  %s541_s14 = smul.u32 90, %s540_s23 }
  0x29   : > { %s3286_s25 = sshll.u32 %s6009_s21, 2  ;;  %s3287_s26 = sshll.u32 %s6009_s21, 3 }
  0x2a   : > { %s4471_s30 = scalar_lea.vmem %s5931_s4, %s3286_s25  ;;  %s4476_s0 = scalar_lea.vmem %s5940_s13, %s3287_s26 }
  0x2b   : > { %p521_p1 = scmp.lt.s32.totalorder %s520_s27, 5  ;;  %p542_p2 = scmp.lt.s32.totalorder %s541_s14, 89 }
  0x2c   : > { %p3289_p3 = scmp.le.s32.totalorder %s585_s24, 0 }
  0x2d   : > { %s6011_s27 = smov (!%p521_p1, %s520_s27), 5  ;;  %s6013_s14 = smov (!%p542_p2, %s541_s14), 89 }
  0x2e   : > { %s4481_s21 = scalar_lea.vmem %s5929_s2, %s6011_s27  ;;  %s3285_s22 = sshll.u32 %s6013_s14, 2 }
  0x2f   : > { %s4486_s25 = scalar_lea.vmem %s5930_s3, %s3285_s22  ;;  %589 = sbr.rel (%p3289_p3) target bundleno = 881 (0x371), region = 72 }
  0x36   : > { %v4149_v1 = vld [vmem:[%s5932_s5] sm:$0xff]   ;;  %v5945_v2 = vmov 0.0   ;;  %v4150_v3 = vld [vmem:[%s5932_s5 + $0x8] sm:$0xff]   ;;  %vm4351_vm0 = vmmov 0   ;;  %v4151_v4 = vld [vmem:[%s5932_s5 + $0x10] sm:$0xff]   ;;  %v1504_v49 = vlaneseq }
  0x37   : > { %3800 = vmatprep.subr.bf16.mxu0 %v5945_v2  ;;  %4084 = vmatprep.subr.bf16.mxu1 %v5945_v2  ;;  %v4152_v5 = vld [vmem:[%s5932_s5 + $0x18] sm:$0xff]   ;;  %v4153_v6 = vld [vmem:[%s5932_s5 + $0x20] sm:$0xff]   ;;  %v4154_v7 = vld [vmem:[%s5932_s5 + $0x28] sm:$0xff]  }
  0x38   : > { %3801 = vmatpush3.bf16.msra.mxu0 %v4149_v1  ;;  %3816 = vmatprep.mubr.msk.bf16.mxu0 %vm4351_vm0, %v5945_v2  ;;  %v4155_v8 = vld [vmem:[%s5932_s5 + $0x30] sm:$0xff]   ;;  %v4156_v9 = vld [vmem:[%s5932_s5 + $0x38] sm:$0xff]   ;;  %v4157_v10 = vld [vmem:[%s4486_s25] sm:$0xff]   ;;  %v4653_v52 = vand.u32 127, %v1504_v49 }
  0x39   : > { %3802 = vmatprep.subr.bf16.mxu0 %v5945_v2  ;;  %4092 = vmatpush3.bf16.msra.mxu1 %v4149_v1  ;;  %v4158_v11 = vld [vmem:[%s4486_s25 + $0x8] sm:$0xff]   ;;  %v4159_v12 = vld [vmem:[%s4486_s25 + $0x10] sm:$0xff]   ;;  %v4160_v13 = vld [vmem:[%s4486_s25 + $0x18] sm:$0xff]  }
  0x3a   : > { %4085 = vmatprep.subr.bf16.mxu1 %v5945_v2  ;;  %3948 = vmatprep.mubr.msk.bf16.mxu1 %vm4351_vm0, %v5945_v2  ;;  %v4161_v14 = vld [vmem:[%s4486_s25 + $0x20] sm:$0xff]   ;;  %v4162_v15 = vld [vmem:[%s4486_s25 + $0x28] sm:$0xff]   ;;  %v4163_v16 = vld [vmem:[%s4486_s25 + $0x30] sm:$0xff]   ;;  %vm1506_vm1 = vcmp.eq.s32.totalorder %v4653_v52, 32 }
  0x3b   : > { %v4164_v17 = vld [vmem:[%s4486_s25 + $0x38] sm:$0xff]   ;;  %v4165_v18 = vld [vmem:[%s4486_s25 + $0x40] sm:$0xff]   ;;  %v4166_v19 = vld [vmem:[%s4486_s25 + $0x48] sm:$0xff]  }
  0x3c   : > { %3803 = vmatpush3.bf16.msra.mxu0 %v4150_v3  ;;  %v4167_v20 = vld [vmem:[%s4486_s25 + $0x50] sm:$0xff]   ;;  %v4168_v21 = vld [vmem:[%s4486_s25 + $0x58] sm:$0xff]   ;;  %v4185_v22 = vld [vmem:[%s4486_s25 + $0x108] sm:$0xff]  }
  0x3d   : > { %3804 = vmatprep.subr.bf16.mxu0 %v5945_v2  ;;  %4093 = vmatpush3.bf16.msra.mxu1 %v4150_v3  ;;  %v4169_v23 = vld [vmem:[%s4486_s25 + $0x60] sm:$0xff]   ;;  %v4187_v24 = vld [vmem:[%s4486_s25 + $0x110] sm:$0xff]   ;;  %v4170_v25 = vld [vmem:[%s4486_s25 + $0x68] sm:$0xff]  }
  0x3e   : > { %4086 = vmatprep.subr.bf16.mxu1 %v5945_v2  ;;  %v4189_v26 = vld [vmem:[%s4486_s25 + $0x118] sm:$0xff]   ;;  %v4171_v27 = vld [vmem:[%s4486_s25 + $0x70] sm:$0xff]   ;;  %v4191_v28 = vld [vmem:[%s4486_s25 + $0x120] sm:$0xff]  }
  0x3f   : > { %v4172_v29 = vld [vmem:[%s4486_s25 + $0x78] sm:$0xff]   ;;  %v4193_v30 = vld [vmem:[%s4486_s25 + $0x128] sm:$0xff]   ;;  %v4173_v31 = vld [vmem:[%s4486_s25 + $0x80] sm:$0xff]  }
  0x40   : > { %3805 = vmatpush3.bf16.msra.mxu0 %v4151_v4  ;;  %v4195_v32 = vld [vmem:[%s4486_s25 + $0x130] sm:$0xff]   ;;  %v4174_v33 = vld [vmem:[%s4486_s25 + $0x88] sm:$0xff]   ;;  %v4196_v34 = vld [vmem:[%s4486_s25 + $0x138] sm:$0xff]  }
  0x41   : > { %3806 = vmatprep.subr.bf16.mxu0 %v5945_v2  ;;  %4094 = vmatpush3.bf16.msra.mxu1 %v4151_v4  ;;  %v4175_v35 = vld [vmem:[%s4486_s25 + $0x90] sm:$0xff]   ;;  %v4197_v36 = vld [vmem:[%s4486_s25 + $0x140] sm:$0xff]   ;;  %v4176_v37 = vld [vmem:[%s4486_s25 + $0x98] sm:$0xff]  }
  0x42   : > { %4087 = vmatprep.subr.bf16.mxu1 %v5945_v2  ;;  %v4198_v38 = vld [vmem:[%s4486_s25 + $0x148] sm:$0xff]   ;;  %v4177_v39 = vld [vmem:[%s4486_s25 + $0xa0] sm:$0xff]   ;;  %v4199_v40 = vld [vmem:[%s4486_s25 + $0x150] sm:$0xff]  }
  0x43   : > { %v4178_v41 = vld [vmem:[%s4486_s25 + $0xa8] sm:$0xff]   ;;  %v4200_v42 = vld [vmem:[%s4486_s25 + $0x158] sm:$0xff]   ;;  %v4179_v43 = vld [vmem:[%s4486_s25 + $0xb0] sm:$0xff]  }
  0x44   : > { %3807 = vmatpush3.bf16.msra.mxu0 %v4152_v5  ;;  %v4201_v44 = vld [vmem:[%s4486_s25 + $0x160] sm:$0xff]   ;;  %v4180_v45 = vld [vmem:[%s4486_s25 + $0xb8] sm:$0xff]   ;;  %v4182_v47 = vld [vmem:[%s4486_s25 + $0xc8] sm:$0xff]  }
  0x45   : > { %3808 = vmatprep.subr.bf16.mxu0 %v5945_v2  ;;  %4095 = vmatpush3.bf16.msra.mxu1 %v4152_v5  ;;  %v4181_v46 = vld [vmem:[%s4486_s25 + $0xc0] sm:$0xff]   ;;  %v4183_v48 = vld [vmem:[%s4486_s25 + $0xd0] sm:$0xff]   ;;  %v4184_v55 = vld [vmem:[%s4486_s25 + $0xd8] sm:$0xff]  }
  0x46   : > { %4088 = vmatprep.subr.bf16.mxu1 %v5945_v2  ;;  %v4648_v50 = vld [vmem:[%s5933_s6] ss:$0 sm:$0xff] }
  0x47   : > { %v4186_v5 = vld [vmem:[%s4486_s25 + $0xe0] sm:$0xff]  }
  0x48   : > { %3809 = vmatpush3.bf16.msra.mxu0 %v4153_v6 }
  0x49   : > { %3810 = vmatprep.subr.bf16.mxu0 %v5945_v2  ;;  %4096 = vmatpush3.bf16.msra.mxu1 %v4153_v6 }
  0x4a   : > { %4089 = vmatprep.subr.bf16.mxu1 %v5945_v2 }
  0x4c   : > { %3811 = vmatpush3.bf16.msra.mxu0 %v4154_v7 }
  0x4d   : > { %3812 = vmatprep.subr.bf16.mxu0 %v5945_v2  ;;  %4097 = vmatpush3.bf16.msra.mxu1 %v4154_v7 }
  0x4e   : > { %4090 = vmatprep.subr.bf16.mxu1 %v5945_v2 }
  0x50   : > { %3813 = vmatpush3.bf16.msra.mxu0 %v4155_v8 }
  0x51   : > { %3814 = vmatprep.subr.bf16.mxu0 %v5945_v2  ;;  %4098 = vmatpush3.bf16.msra.mxu1 %v4155_v8 }
  0x52   : > { %4091 = vmatprep.subr.bf16.mxu1 %v5945_v2 }
  0x54   : > { %3815 = vmatpush3.bf16.msra.mxu0 %v4156_v9 }
  0x55   : > { %4099 = vmatpush3.bf16.msra.mxu1 %v4156_v9 }
  0x57   : > { %3817 = vmatmul.mubr.bf16.vlgmr.msra.gmra.mrb[0].mxu0 %v4157_v10 }
  0x58   : > { %3820 = vmatprep.mubr.msk.bf16.mxu0 %vm4351_vm0, %v5945_v2  ;;  %3949 = vmatmul.mubr.bf16.vlgmr.msra.gmra.mrb[0].mxu1 %v4185_v22 }
  0x59   : > { %3952 = vmatprep.mubr.msk.bf16.mxu1 %vm4351_vm0, %v5945_v2 }
  0x5f   : > { %3821 = vmatmul.mubr.bf16.gmra.mrb[4].mxu0 %v4158_v11 }
  0x60   : > { %3824 = vmatprep.mubr.msk.bf16.mxu0 %vm4351_vm0, %v5945_v2  ;;  %3953 = vmatmul.mubr.bf16.gmra.mrb[4].mxu1 %v4187_v24 }
  0x61   : > { %3956 = vmatprep.mubr.msk.bf16.mxu1 %vm4351_vm0, %v5945_v2 }
  0x67   : > { %3825 = vmatmul.mubr.bf16.gmra.mrb[8].mxu0 %v4159_v12 }
  0x68   : > { %3828 = vmatprep.mubr.msk.bf16.mxu0 %vm4351_vm0, %v5945_v2  ;;  %3957 = vmatmul.mubr.bf16.gmra.mrb[8].mxu1 %v4189_v26 }
  0x69   : > { %3960 = vmatprep.mubr.msk.bf16.mxu1 %vm4351_vm0, %v5945_v2 }
  0x6f   : > { %3829 = vmatmul.mubr.bf16.gmra.mrb[12].mxu0 %v4160_v13 }
  0x70   : > { %3832 = vmatprep.mubr.msk.bf16.mxu0 %vm4351_vm0, %v5945_v2  ;;  %3961 = vmatmul.mubr.bf16.gmra.mrb[12].mxu1 %v4191_v28 }
  0x71   : > { %3964 = vmatprep.mubr.msk.bf16.mxu1 %vm4351_vm0, %v5945_v2 }
  0x77   : > { %3833 = vmatmul.mubr.bf16.gmra.mrb[16].mxu0 %v4161_v14 }
  0x78   : > { %3836 = vmatprep.mubr.msk.bf16.mxu0 %vm4351_vm0, %v5945_v2  ;;  %3965 = vmatmul.mubr.bf16.gmra.mrb[16].mxu1 %v4193_v30 }
  0x79   : > { %3968 = vmatprep.mubr.msk.bf16.mxu1 %vm4351_vm0, %v5945_v2 }
  0x7f   : > { %3837 = vmatmul.mubr.bf16.gmra.mrb[20].mxu0 %v4162_v15 }
  0x80   : > { %3840 = vmatprep.mubr.msk.bf16.mxu0 %vm4351_vm0, %v5945_v2  ;;  %3969 = vmatmul.mubr.bf16.gmra.mrb[20].mxu1 %v4195_v32 }
  0x81   : > { %3972 = vmatprep.mubr.msk.bf16.mxu1 %vm4351_vm0, %v5945_v2 }
  0x87   : > { %3841 = vmatmul.mubr.bf16.gmra.mrb[24].mxu0 %v4163_v16 }
  0x88   : > { %3844 = vmatprep.mubr.msk.bf16.mxu0 %vm4351_vm0, %v5945_v2  ;;  %3973 = vmatmul.mubr.bf16.gmra.mrb[24].mxu1 %v4196_v34 }
  0x89   : > { %3976 = vmatprep.mubr.msk.bf16.mxu1 %vm4351_vm0, %v5945_v2 }
  0x8f   : > { %3845 = vmatmul.mubr.bf16.gmra.mrb[28].mxu0 %v4164_v17  ;;  %v4188_v17 = vld [vmem:[%s4486_s25 + $0xe8] sm:$0xff]  }
  0x90   : > { %3848 = vmatprep.mubr.msk.bf16.mxu0 %vm4351_vm0, %v5945_v2  ;;  %3977 = vmatmul.mubr.bf16.gmra.mrb[28].mxu1 %v4197_v36 }
  0x91   : > { %3980 = vmatprep.mubr.msk.bf16.mxu1 %vm4351_vm0, %v5945_v2 }
  0x97   : > { %3849 = vmatmul.mubr.bf16.gmra.mrb[32].mxu0 %v4165_v18 }
  0x98   : > { %3852 = vmatprep.mubr.msk.bf16.mxu0 %vm4351_vm0, %v5945_v2  ;;  %3981 = vmatmul.mubr.bf16.gmra.mrb[32].mxu1 %v4198_v38 }
  0x99   : > { %3984 = vmatprep.mubr.msk.bf16.mxu1 %vm4351_vm0, %v5945_v2 }
  0x9f   : > { %3853 = vmatmul.mubr.bf16.gmra.mrb[36].mxu0 %v4166_v19 }
  0xa0   : > { %3856 = vmatprep.mubr.msk.bf16.mxu0 %vm4351_vm0, %v5945_v2  ;;  %3985 = vmatmul.mubr.bf16.gmra.mrb[36].mxu1 %v4199_v40 }
  0xa1   : > { %3988 = vmatprep.mubr.msk.bf16.mxu1 %vm4351_vm0, %v5945_v2 }
  0xa7   : > { %3857 = vmatmul.mubr.bf16.gmra.mrb[40].mxu0 %v4167_v20 }
  0xa8   : > { %3860 = vmatprep.mubr.msk.bf16.mxu0 %vm4351_vm0, %v5945_v2  ;;  %3989 = vmatmul.mubr.bf16.gmra.mrb[40].mxu1 %v4200_v42 }
  0xa9   : > { %3992 = vmatprep.mubr.msk.bf16.mxu1 %vm4351_vm0, %v5945_v2 }
  0xaf   : > { %3861 = vmatmul.mubr.bf16.gmra.mrb[44].mxu0 %v4168_v21 }
  0xb0   : > { %3864 = vmatprep.mubr.msk.bf16.mxu0 %vm4351_vm0, %v5945_v2  ;;  %3993 = vmatmul.mubr.bf16.gmra.mrb[44].mxu1 %v4201_v44 }
  0xb7   : > { %3865 = vmatmul.mubr.bf16.gmra.mrb[48].mxu0 %v4169_v23 }
  0xb8   : > { %3868 = vmatprep.mubr.msk.bf16.mxu0 %vm4351_vm0, %v5945_v2 }
  0xbf   : > { %3869 = vmatmul.mubr.bf16.gmra.mrb[52].mxu0 %v4170_v25 }
  0xc0   : > { %3872 = vmatprep.mubr.msk.bf16.mxu0 %vm4351_vm0, %v5945_v2 }
  0xc7   : > { %3873 = vmatmul.mubr.bf16.gmra.mrb[56].mxu0 %v4171_v27 }
  0xc8   : > { %3876 = vmatprep.mubr.msk.bf16.mxu0 %vm4351_vm0, %v5945_v2 }
  0xcf   : > { %3877 = vmatmul.mubr.bf16.gmra.mrb[60].mxu0 %v4172_v29  ;;  %v4190_v29 = vld [vmem:[%s4486_s25 + $0xf0] sm:$0xff]  }
  0xd0   : > { %3880 = vmatprep.mubr.msk.bf16.mxu0 %vm4351_vm0, %v5945_v2 }
  0xd7   : > { %3881 = vmatmul.mubr.bf16.gmra.mrb[64].mxu0 %v4173_v31 }
  0xd8   : > { %3884 = vmatprep.mubr.msk.bf16.mxu0 %vm4351_vm0, %v5945_v2 }
  0xdf   : > { %3885 = vmatmul.mubr.bf16.gmra.mrb[68].mxu0 %v4174_v33 }
  0xe0   : > { %3888 = vmatprep.mubr.msk.bf16.mxu0 %vm4351_vm0, %v5945_v2 }
  0xe7   : > { %3889 = vmatmul.mubr.bf16.gmra.mrb[72].mxu0 %v4175_v35 }
  0xe8   : > { %3892 = vmatprep.mubr.msk.bf16.mxu0 %vm4351_vm0, %v5945_v2 }
  0xef   : > { %3893 = vmatmul.mubr.bf16.gmra.mrb[76].mxu0 %v4176_v37 }
  0xf0   : > { %3896 = vmatprep.mubr.msk.bf16.mxu0 %vm4351_vm0, %v5945_v2 }
  0xf7   : > { %3897 = vmatmul.mubr.bf16.gmra.mrb[80].mxu0 %v4177_v39 }
  0xf8   : > { %3900 = vmatprep.mubr.msk.bf16.mxu0 %vm4351_vm0, %v5945_v2 }
  0xff   : > { %3901 = vmatmul.mubr.bf16.gmra.mrb[84].mxu0 %v4178_v41  ;;  %v4192_v41 = vld [vmem:[%s4486_s25 + $0xf8] sm:$0xff]  }
 0x100   : > { %3904 = vmatprep.mubr.msk.bf16.mxu0 %vm4351_vm0, %v5945_v2 }
 0x107   : > { %3905 = vmatmul.mubr.bf16.gmra.mrb[88].mxu0 %v4179_v43 }
 0x108   : > { %3908 = vmatprep.mubr.msk.bf16.mxu0 %vm4351_vm0, %v5945_v2 }
 0x10f   : > { %3909 = vmatmul.mubr.bf16.gmra.mrb[92].mxu0 %v4180_v45 }
 0x110   : > { %3912 = vmatprep.mubr.msk.bf16.mxu0 %vm4351_vm0, %v5945_v2 }
 0x117   : > { %3913 = vmatmul.mubr.bf16.gmra.mrb[96].mxu0 %v4181_v46 }
 0x118   : > { %3916 = vmatprep.mubr.msk.bf16.mxu0 %vm4351_vm0, %v5945_v2 }
 0x11f   : > { %3917 = vmatmul.mubr.bf16.gmra.mrb[100].mxu0 %v4182_v47 }
 0x120   : > { %3920 = vmatprep.mubr.msk.bf16.mxu0 %vm4351_vm0, %v5945_v2 }
 0x127   : > { %3921 = vmatmul.mubr.bf16.gmra.mrb[104].mxu0 %v4183_v48 }
 0x128   : > { %3924 = vmatprep.mubr.msk.bf16.mxu0 %vm4351_vm0, %v5945_v2 }
 0x12a   : > { %v1055_v51 = vpop.f32.mrb[0].mxu0 }
 0x12b   : > { %v1056_v53 = vadd.f32 %v4648_v50, %v1055_v51  ;;  %v3818_v54 = vpop.f32.mrb[1].mxu0 }
 0x12c   : > { %v1058_v56 = vpop.f32.mrb[2].mxu0 }
 0x12d   : > { %v1414_v57 = vmax.f32 %v1056_v53, 0.0  ;;  %v1059_v58 = vadd.f32 %v4648_v50, %v1058_v56  ;;  %v3819_v59 = vpop.f32.mrb[3].mxu0  ;;  %v4194_v56 = vld [vmem:[%s4486_s25 + $0x100] sm:$0xff]   ;;  %s1597_s25 = smul.u32 104, %s4337_s1 }
 0x12f   : > { %v1415_v60 = vmax.f32 %v1059_v58, 0.0  ;;  %3925 = vmatmul.mubr.bf16.gmra.mrb[108].mxu0 %v4184_v55  ;;  %v4663_v61 = vsel %vm1506_vm1, 1.0, %v1414_v57 }
 0x130   : > { %3928 = vmatprep.mubr.msk.bf16.mxu0 %vm4351_vm0, %v5945_v2 }
 0x131   : > { %v4667_v62 = vsel %vm1506_vm1, 1.0, %v1415_v60 }
 0x132   : > { %v1940_v63 = vpack.c.bf16 %v4667_v62, %v4663_v61  ;;  %v1063_v1 = vpop.f32.mrb[4].mxu0  ;;  %v1319_v62 = vpop.f32.mrb[0].mxu1 }
 0x133   : > { %v1064_v3 = vadd.f32 %v4648_v50, %v1063_v1  ;;  %v3822_v4 = vpop.f32.mrb[5].mxu0 }
 0x134   : > { %v1066_v6 = vpop.f32.mrb[6].mxu0 }
 0x135   : > { %v1416_v7 = vmax.f32 %v1064_v3, 0.0  ;;  %v1067_v8 = vadd.f32 %v4648_v50, %v1066_v6  ;;  %v3823_v9 = vpop.f32.mrb[7].mxu0 }
 0x137   : > { %v1417_v10 = vmax.f32 %v1067_v8, 0.0  ;;  %3929 = vmatmul.mubr.bf16.gmra.mrb[112].mxu0 %v4186_v5  ;;  %v4678_v11 = vsel %vm1506_vm1, 1.0, %v1416_v7 }
 0x138   : > { %3932 = vmatprep.mubr.msk.bf16.mxu0 %vm4351_vm0, %v5945_v2 }
 0x139   : > { %v4682_v12 = vsel %vm1506_vm1, 1.0, %v1417_v10 }
 0x13a   : > { %v1941_v13 = vpack.c.bf16 %v4682_v12, %v4678_v11  ;;  %v1071_v14 = vpop.f32.mrb[8].mxu0  ;;  %v1320_v11 = vadd.f32 %v4648_v50, %v1319_v62 }
 0x13b   : > { %v1072_v15 = vadd.f32 %v4648_v50, %v1071_v14  ;;  %v3826_v16 = vpop.f32.mrb[9].mxu0 }
 0x13c   : > { %v1074_v18 = vpop.f32.mrb[10].mxu0 }
 0x13d   : > { %v1418_v19 = vmax.f32 %v1072_v15, 0.0  ;;  %v1075_v20 = vadd.f32 %v4648_v50, %v1074_v18  ;;  %v3827_v21 = vpop.f32.mrb[11].mxu0 }
 0x13f   : > { %v1419_v22 = vmax.f32 %v1075_v20, 0.0  ;;  %3933 = vmatmul.mubr.bf16.gmra.mrb[116].mxu0 %v4188_v17  ;;  %v4693_v23 = vsel %vm1506_vm1, 1.0, %v1418_v19 }
 0x140   : > { %3936 = vmatprep.mubr.msk.bf16.mxu0 %vm4351_vm0, %v5945_v2 }
 0x141   : > { %v4697_v24 = vsel %vm1506_vm1, 1.0, %v1419_v22 }
 0x142   : > { %v1942_v25 = vpack.c.bf16 %v4697_v24, %v4693_v23  ;;  %v1079_v26 = vpop.f32.mrb[12].mxu0 }
 0x143   : > { %v1080_v27 = vadd.f32 %v4648_v50, %v1079_v26  ;;  %v3830_v28 = vpop.f32.mrb[13].mxu0 }
 0x144   : > { %v1082_v30 = vpop.f32.mrb[14].mxu0 }
 0x145   : > { %v1420_v31 = vmax.f32 %v1080_v27, 0.0  ;;  %v1083_v32 = vadd.f32 %v4648_v50, %v1082_v30  ;;  %v3831_v33 = vpop.f32.mrb[15].mxu0 }
 0x147   : > { %v1421_v34 = vmax.f32 %v1083_v32, 0.0  ;;  %3937 = vmatmul.mubr.bf16.gmra.mrb[120].mxu0 %v4190_v29  ;;  %v4708_v35 = vsel %vm1506_vm1, 1.0, %v1420_v31 }
 0x148   : > { %3940 = vmatprep.mubr.msk.bf16.mxu0 %vm4351_vm0, %v5945_v2 }
 0x149   : > { %v4712_v36 = vsel %vm1506_vm1, 1.0, %v1421_v34 }
 0x14a   : > { %v1943_v37 = vpack.c.bf16 %v4712_v36, %v4708_v35  ;;  %v1087_v38 = vpop.f32.mrb[16].mxu0 }
 0x14b   : > { %v1088_v39 = vadd.f32 %v4648_v50, %v1087_v38  ;;  %v3834_v40 = vpop.f32.mrb[17].mxu0 }
 0x14c   : > { %v1090_v42 = vpop.f32.mrb[18].mxu0 }
 0x14d   : > { %v1422_v43 = vmax.f32 %v1088_v39, 0.0  ;;  %v1091_v44 = vadd.f32 %v4648_v50, %v1090_v42  ;;  %v3835_v45 = vpop.f32.mrb[19].mxu0 }
 0x14f   : > { %v1423_v46 = vmax.f32 %v1091_v44, 0.0  ;;  %3941 = vmatmul.mubr.bf16.gmra.mrb[124].mxu0 %v4192_v41  ;;  %v4723_v47 = vsel %vm1506_vm1, 1.0, %v1422_v43  ;;  %v4770_v41 = vshrl.u32 %v1504_v49, 7 }
 0x150   : > { %3944 = vmatprep.mubr.msk.bf16.mxu0 %vm4351_vm0, %v5945_v2 }
 0x151   : > { %v4727_v48 = vsel %vm1506_vm1, 1.0, %v1423_v46  ;;  %v1600_v45 = vadd.s32 8, %v4770_v41  ;;  %v1633_v46 = vsub.s32 1, %v4770_v41 }
 0x152   : > { %v1944_v51 = vpack.c.bf16 %v4727_v48, %v4723_v47  ;;  %v1095_v53 = vpop.f32.mrb[20].mxu0 }
 0x153   : > { %v1096_v54 = vadd.f32 %v4648_v50, %v1095_v53  ;;  %v3838_v55 = vpop.f32.mrb[21].mxu0 }
 0x154   : > { %v1098_v57 = vpop.f32.mrb[22].mxu0  ;;  %v4779_v55 = vld [vmem:[%s4481_s21] sm:$0x3f] }
 0x155   : > { %v1424_v58 = vmax.f32 %v1096_v54, 0.0  ;;  %v1099_v59 = vadd.f32 %v4648_v50, %v1098_v57  ;;  %v3839_v60 = vpop.f32.mrb[23].mxu0  ;;  %v4776_v54 = vstv %s1597_s25  ;;  %v4789_v57 = vrot.slane %v4779_v55, %v1633_v46 }
 0x156   : > { %v4786_v49 = vadd.s32 %v4776_v54, %v1600_v45 }
 0x157   : > { %v1425_v1 = vmax.f32 %v1099_v59, 0.0  ;;  %3945 = vmatmul.mubr.bf16.gmra.mrb[128].mxu0 %v4194_v56  ;;  %v4736_v3 = vsel %vm1506_vm1, 1.0, %v1424_v58  ;;  %v4783_v56 = vadd.s32 %v4776_v54, %v4770_v41 }
 0x158   : > { %vm1658_vm3 = vcmp.eq.s32.totalorder %v4786_v49, %v4789_v57 }
 0x159   : > { %v4740_v4 = vsel %vm1506_vm1, 1.0, %v1425_v1  ;;  %vm1652_vm2 = vcmp.eq.s32.totalorder %v4783_v56, %v4789_v57 }
 0x15a   : > { %v1945_v5 = vpack.c.bf16 %v4740_v4, %v4736_v3  ;;  %v1103_v6 = vpop.f32.mrb[24].mxu0  ;;  %vm3422_vm4 = vmpackc.low %vm1658_vm3, %vm1652_vm2 }
 0x15b   : > { %v1104_v7 = vadd.f32 %v4648_v50, %v1103_v6  ;;  %v3842_v8 = vpop.f32.mrb[25].mxu0 }
 0x15c   : > { %v1106_v9 = vpop.f32.mrb[26].mxu0 }
 0x15d   : > { %v1426_v10 = vmax.f32 %v1104_v7, 0.0  ;;  %v1107_v14 = vadd.f32 %v4648_v50, %v1106_v9  ;;  %v3843_v15 = vpop.f32.mrb[27].mxu0  ;;  %v5947_v9 = vmov 1.0|1.0  }
 0x15e   : > { %3423 = vmatprep.mubr.msk.bf16.mxu1 %vm3422_vm4, %v5947_v9 }
 0x15f   : > { %v1427_v16 = vmax.f32 %v1107_v14, 0.0  ;;  %v4748_v17 = vsel %vm1506_vm1, 1.0, %v1426_v10 }
 0x161   : > { %v4752_v18 = vsel %vm1506_vm1, 1.0, %v1427_v16 }
 0x162   : > { %v1946_v19 = vpack.c.bf16 %v4752_v18, %v4748_v17  ;;  %v1111_v20 = vpop.f32.mrb[28].mxu0 }
 0x163   : > { %v1112_v21 = vadd.f32 %v4648_v50, %v1111_v20  ;;  %v3846_v22 = vpop.f32.mrb[29].mxu0 }
 0x164   : > { %v1114_v26 = vpop.f32.mrb[30].mxu0 }
 0x165   : > { %v1428_v27 = vmax.f32 %v1112_v21, 0.0  ;;  %v1115_v28 = vadd.f32 %v4648_v50, %v1114_v26  ;;  %v3847_v29 = vpop.f32.mrb[31].mxu0 }
 0x167   : > { %v1429_v30 = vmax.f32 %v1115_v28, 0.0  ;;  %v4760_v31 = vsel %vm1506_vm1, 1.0, %v1428_v27 }
 0x169   : > { %v4764_v32 = vsel %vm1506_vm1, 1.0, %v1429_v30 }
 0x16a   : > { %v1947_v33 = vpack.c.bf16 %v4764_v32, %v4760_v31  ;;  %v1119_v34 = vpop.f32.mrb[32].mxu0 }
 0x16b   : > { %v1120_v38 = vadd.f32 %v4648_v50, %v1119_v34  ;;  %v3850_v39 = vpop.f32.mrb[33].mxu0 }
 0x16c   : > { %v1122_v40 = vpop.f32.mrb[34].mxu0 }
 0x16d   : > { %v1430_v42 = vmax.f32 %v1120_v38, 0.0  ;;  %v1123_v43 = vadd.f32 %v4648_v50, %v1122_v40  ;;  %v3851_v44 = vpop.f32.mrb[35].mxu0  ;;  %v3950_v40 = vpop.f32.mrb[1].mxu1 }
 0x16e   : > { %v1322_v44 = vpop.f32.mrb[2].mxu1 }
 0x16f   : > { %v1431_v53 = vmax.f32 %v1123_v43, 0.0  ;;  %v1523_v58 = vsel %vm1506_vm1, 1.0, %v1430_v42  ;;  %v1323_v12 = vadd.f32 %v4648_v50, %v1322_v44 }
 0x171   : > { %v1524_v59 = vsel %vm1506_vm1, 1.0, %v1431_v53  ;;  %v3951_v53 = vpop.f32.mrb[3].mxu1 }
 0x172   : > { %v1127_v60 = vpop.f32.mrb[36].mxu0  ;;  %v1948_v1 = vpack.c.bf16 %v1524_v59, %v1523_v58 }
 0x173   : > { %v1128_v6 = vadd.f32 %v4648_v50, %v1127_v60  ;;  %v3854_v7 = vpop.f32.mrb[37].mxu0 }
 0x174   : > { %v1130_v8 = vpop.f32.mrb[38].mxu0  ;;  %3596 = vmatprep.subr.bf16.mxu1 %v1948_v1  ;;  %v1480_v1 = vmax.f32 %v1320_v11, 0.0 }
 0x175   : > { %v1432_v10 = vmax.f32 %v1128_v6, 0.0  ;;  %v1131_v14 = vadd.f32 %v4648_v50, %v1130_v8  ;;  %v3855_v15 = vpop.f32.mrb[39].mxu0  ;;  %3597 = vmatpush3.bf16.msra.mxu1 %v1940_v63  ;;  %v1481_v6 = vmax.f32 %v1323_v12, 0.0 }
 0x176   : > { %v4827_v8 = vsel %vm1506_vm1, 1.0, %v1480_v1 }
 0x177   : > { %v1433_v16 = vmax.f32 %v1131_v14, 0.0  ;;  %v1525_v20 = vsel %vm1506_vm1, 1.0, %v1432_v10  ;;  %v4831_v10 = vsel %vm1506_vm1, 1.0, %v1481_v6  ;;  %v1327_v14 = vpop.f32.mrb[4].mxu1 }
 0x178   : > { %v3954_v24 = vpop.f32.mrb[5].mxu1  ;;  %v5980_v52 = vpack.c.bf16 %v4831_v10, %v4827_v8 }
 0x179   : > { %v1526_v21 = vsel %vm1506_vm1, 1.0, %v1433_v16 }
 0x17a   : > { %v1135_v22 = vpop.f32.mrb[40].mxu0  ;;  %v1949_v26 = vpack.c.bf16 %v1526_v21, %v1525_v20  ;;  %v1330_v21 = vpop.f32.mrb[6].mxu1 }
 0x17b   : > { %v1136_v27 = vadd.f32 %v4648_v50, %v1135_v22  ;;  %v3858_v28 = vpop.f32.mrb[41].mxu0 }
 0x17c   : > { %v1138_v29 = vpop.f32.mrb[42].mxu0  ;;  %3598 = vmatprep.subr.bf16.mxu1 %v1949_v26 }
 0x17d   : > { %v1434_v30 = vmax.f32 %v1136_v27, 0.0  ;;  %v1139_v34 = vadd.f32 %v4648_v50, %v1138_v29  ;;  %v3859_v38 = vpop.f32.mrb[43].mxu0  ;;  %3599 = vmatpush3.bf16.msra.mxu1 %v1941_v13  ;;  %v3955_v27 = vpop.f32.mrb[7].mxu1  ;;  %v1328_v29 = vadd.f32 %v4648_v50, %v1327_v14 }
 0x17f   : > { %v1435_v61 = vmax.f32 %v1139_v34, 0.0  ;;  %v1527_v63 = vsel %vm1506_vm1, 1.0, %v1434_v30  ;;  %v1331_v30 = vadd.f32 %v4648_v50, %v1330_v21  ;;  %v1482_v62 = vmax.f32 %v1328_v29, 0.0 }
 0x181   : > { %v1528_v39 = vsel %vm1506_vm1, 1.0, %v1435_v61  ;;  %v4848_v40 = vsel %vm1506_vm1, 1.0, %v1482_v62 }
 0x182   : > { %v1143_v42 = vpop.f32.mrb[44].mxu0  ;;  %v1950_v43 = vpack.c.bf16 %v1528_v39, %v1527_v63  ;;  %v1483_v63 = vmax.f32 %v1331_v30, 0.0 }
 0x183   : > { %v1144_v45 = vadd.f32 %v4648_v50, %v1143_v42  ;;  %v3862_v46 = vpop.f32.mrb[45].mxu0 }
 0x184   : > { %v1146_v58 = vpop.f32.mrb[46].mxu0  ;;  %3600 = vmatprep.subr.bf16.mxu1 %v1950_v43  ;;  %v4852_v42 = vsel %vm1506_vm1, 1.0, %v1483_v63  ;;  %v1335_v43 = vpop.f32.mrb[8].mxu1 }
 0x185   : > { %v1436_v13 = vmax.f32 %v1144_v45, 0.0  ;;  %v1147_v59 = vadd.f32 %v4648_v50, %v1146_v58  ;;  %v3863_v60 = vpop.f32.mrb[47].mxu0  ;;  %3601 = vmatpush3.bf16.msra.mxu1 %v1942_v25  ;;  %v3958_v36 = vpop.f32.mrb[9].mxu1  ;;  %v5981_v8 = vpack.c.bf16 %v4852_v42, %v4848_v40 }
 0x186   : > { %v1338_v53 = vpop.f32.mrb[10].mxu1 }
 0x187   : > { %v1437_v7 = vmax.f32 %v1147_v59, 0.0  ;;  %v1529_v15 = vsel %vm1506_vm1, 1.0, %v1436_v13  ;;  %v3959_v12 = vpop.f32.mrb[11].mxu1  ;;  %v1336_v59 = vadd.f32 %v4648_v50, %v1335_v43  ;;  %v1339_v60 = vadd.f32 %v4648_v50, %v1338_v53 }
 0x188   : > { %v1629_v12 = vsub.s32 0, %v4770_v41 }
 0x189   : > { %v1530_v16 = vsel %vm1506_vm1, 1.0, %v1437_v7  ;;  %v1484_v14 = vmax.f32 %v1336_v59, 0.0 }
 0x18a   : > { %v1151_v25 = vpop.f32.mrb[48].mxu0  ;;  %v1951_v20 = vpack.c.bf16 %v1530_v16, %v1529_v15  ;;  %v1485_v15 = vmax.f32 %v1339_v60, 0.0 }
 0x18b   : > { %v1152_v22 = vadd.f32 %v4648_v50, %v1151_v25  ;;  %v3866_v26 = vpop.f32.mrb[49].mxu0  ;;  %v4869_v24 = vsel %vm1506_vm1, 1.0, %v1484_v14 }
 0x18c   : > { %v1154_v28 = vpop.f32.mrb[50].mxu0  ;;  %3602 = vmatprep.subr.bf16.mxu1 %v1951_v20  ;;  %v4873_v25 = vsel %vm1506_vm1, 1.0, %v1485_v15  ;;  %v1343_v20 = vpop.f32.mrb[12].mxu1 }
 0x18d   : > { %v1438_v34 = vmax.f32 %v1152_v22, 0.0  ;;  %v1155_v38 = vadd.f32 %v4648_v50, %v1154_v28  ;;  %v3867_v61 = vpop.f32.mrb[51].mxu0  ;;  %3603 = vmatpush3.bf16.msra.mxu1 %v1943_v37  ;;  %v3962_v48 = vpop.f32.mrb[13].mxu1  ;;  %v5982_v10 = vpack.c.bf16 %v4873_v25, %v4869_v24  ;;  %v1649_v25 = vsub.s32 5, %v4770_v41 }
 0x18e   : > { %v1346_v27 = vpop.f32.mrb[14].mxu1  ;;  %v4913_v48 = vrot.slane %v4779_v55, %v1629_v12 }
 0x18f   : > { %v1439_v39 = vmax.f32 %v1155_v38, 0.0  ;;  %v1531_v44 = vsel %vm1506_vm1, 1.0, %v1438_v34  ;;  %v3963_v30 = vpop.f32.mrb[15].mxu1  ;;  %v1344_v38 = vadd.f32 %v4648_v50, %v1343_v20  ;;  %v1347_v61 = vadd.f32 %v4648_v50, %v1346_v27 }
 0x190   : > { %vm1651_vm5 = vcmp.eq.s32.totalorder %v4783_v56, %v4913_v48  ;;  %vm1657_vm6 = vcmp.eq.s32.totalorder %v4786_v49, %v4913_v48 }
 0x191   : > { %v1532_v45 = vsel %vm1506_vm1, 1.0, %v1439_v39  ;;  %v1486_v43 = vmax.f32 %v1344_v38, 0.0  ;;  %vm3424_vm9 = vmpackc.low %vm1657_vm6, %vm1651_vm5 }
 0x192   : > { %v1159_v37 = vpop.f32.mrb[52].mxu0  ;;  %v1952_v46 = vpack.c.bf16 %v1532_v45, %v1531_v44  ;;  %v1487_v44 = vmax.f32 %v1347_v61, 0.0 }
 0x193   : > { %v1160_v58 = vadd.f32 %v4648_v50, %v1159_v37  ;;  %v3870_v11 = vpop.f32.mrb[53].mxu0  ;;  %v4890_v36 = vsel %vm1506_vm1, 1.0, %v1486_v43 }
 0x194   : > { %v1162_v13 = vpop.f32.mrb[54].mxu0  ;;  %3604 = vmatprep.subr.bf16.mxu1 %v1952_v46  ;;  %v4894_v37 = vsel %vm1506_vm1, 1.0, %v1487_v44  ;;  %v1351_v46 = vpop.f32.mrb[16].mxu1 }
 0x195   : > { %v1440_v1 = vmax.f32 %v1160_v58, 0.0  ;;  %v1163_v6 = vadd.f32 %v4648_v50, %v1162_v13  ;;  %v3871_v7 = vpop.f32.mrb[55].mxu0  ;;  %3605 = vmatpush3.bf16.msra.mxu1 %v1944_v51  ;;  %v3966_v4 = vpop.f32.mrb[17].mxu1  ;;  %v1352_v15 = vadd.f32 %v4648_v50, %v1351_v46  ;;  %v1604_v46 = vadd.s32 40, %v4770_v41 }
 0x196   : > { %v1354_v13 = vpop.f32.mrb[18].mxu1  ;;  %v5983_v40 = vpack.c.bf16 %v4894_v37, %v4890_v36  ;;  %v4203_v37 = vld [vmem:[%s4481_s21] sm:$0x3f] }
 0x197   : > { %v1441_v16 = vmax.f32 %v1163_v6, 0.0  ;;  %v1533_v21 = vsel %vm1506_vm1, 1.0, %v1440_v1  ;;  %v1601_v1 = vadd.s32 16, %v4770_v41  ;;  %v1602_v6 = vadd.s32 24, %v4770_v41  ;;  %v3967_v7 = vpop.f32.mrb[19].mxu1 }
 0x198   : > { %v1359_v18 = vpop.f32.mrb[20].mxu1  ;;  %v4962_v7 = vadd.s32 %v4776_v54, %v1604_v46 }
 0x199   : > { %v1534_v22 = vsel %vm1506_vm1, 1.0, %v1441_v16  ;;  %v1355_v16 = vadd.f32 %v4648_v50, %v1354_v13  ;;  %v3970_v61 = vpop.f32.mrb[21].mxu1  ;;  %v1360_v4 = vadd.f32 %v4648_v50, %v1359_v18 }
 0x19a   : > { %v1167_v51 = vpop.f32.mrb[56].mxu0  ;;  %v1953_v26 = vpack.c.bf16 %v1534_v22, %v1533_v21  ;;  %v1362_v43 = vpop.f32.mrb[22].mxu1  ;;  %vm1682_vm14 = vcmp.eq.s32.totalorder %v4962_v7, %v4789_v57  ;;  %vm1681_vm3 = vcmp.eq.s32.totalorder %v4962_v7, %v4913_v48 }
 0x19b   : > { %v1168_v28 = vadd.f32 %v4648_v50, %v1167_v51  ;;  %v3874_v29 = vpop.f32.mrb[57].mxu0  ;;  %v1488_v51 = vmax.f32 %v1352_v15, 0.0 }
 0x19c   : > { %v1170_v34 = vpop.f32.mrb[58].mxu0  ;;  %3606 = vmatprep.subr.bf16.mxu1 %v1953_v26  ;;  %v1489_v26 = vmax.f32 %v1355_v16, 0.0  ;;  %v4919_v29 = vadd.s32 %v4776_v54, %v1602_v6 }
 0x19d   : > { %v1442_v62 = vmax.f32 %v1168_v28, 0.0  ;;  %v1171_v63 = vadd.f32 %v4648_v50, %v1170_v34  ;;  %v3875_v39 = vpop.f32.mrb[59].mxu0  ;;  %3607 = vmatpush3.bf16.msra.mxu1 %v1945_v5  ;;  %v4916_v28 = vadd.s32 %v4776_v54, %v1601_v1  ;;  %v4923_v30 = vsel %vm1506_vm1, 1.0, %v1488_v51 }
 0x19e   : > { %v4927_v17 = vsel %vm1506_vm1, 1.0, %v1489_v26  ;;  %v1603_v39 = vadd.s32 32, %v4770_v41  ;;  %vm1670_vm8 = vcmp.eq.s32.totalorder %v4919_v29, %v4789_v57  ;;  %vm1669_vm12 = vcmp.eq.s32.totalorder %v4919_v29, %v4913_v48 }
 0x19f   : > { %v1443_v45 = vmax.f32 %v1171_v63, 0.0  ;;  %v1535_v53 = vsel %vm1506_vm1, 1.0, %v1442_v62  ;;  %vm1664_vm7 = vcmp.eq.s32.totalorder %v4916_v28, %v4789_v57  ;;  %vm1663_vm11 = vcmp.eq.s32.totalorder %v4916_v28, %v4913_v48 }
 0x1a0   : > { %vm3426_vm10 = vmpackc.low %vm1670_vm8, %vm1664_vm7  ;;  %v5984_v42 = vpack.c.bf16 %v4927_v17, %v4923_v30  ;;  %v5438_v30 = vrot.slane %v4203_v37, %v1649_v25 }
 0x1a1   : > { %v1536_v58 = vsel %vm1506_vm1, 1.0, %v1443_v45  ;;  %vm3428_vm15 = vmpackc.low %vm1669_vm12, %vm1663_vm11 }
 0x1a2   : > { %v1175_v5 = vpop.f32.mrb[60].mxu0  ;;  %v1954_v11 = vpack.c.bf16 %v1536_v58, %v1535_v53  ;;  %v3971_v53 = vpop.f32.mrb[23].mxu1 }
 0x1a3   : > { %v1176_v59 = vadd.f32 %v4648_v50, %v1175_v5  ;;  %v3878_v60 = vpop.f32.mrb[61].mxu0  ;;  %v1363_v5 = vadd.f32 %v4648_v50, %v1362_v43 }
 0x1a4   : > { %v1178_v14 = vpop.f32.mrb[62].mxu0  ;;  %3608 = vmatprep.subr.bf16.mxu1 %v1954_v11  ;;  %v1490_v60 = vmax.f32 %v1360_v4, 0.0 }
 0x1a5   : > { %v1444_v20 = vmax.f32 %v1176_v59, 0.0  ;;  %v1179_v21 = vadd.f32 %v4648_v50, %v1178_v14  ;;  %v3879_v22 = vpop.f32.mrb[63].mxu0  ;;  %3609 = vmatpush3.bf16.msra.mxu1 %v1946_v19  ;;  %v4959_v59 = vadd.s32 %v4776_v54, %v1603_v39  ;;  %v1491_v1 = vmax.f32 %v1363_v5, 0.0 }
 0x1a6   : > { %v4967_v31 = vsel %vm1506_vm1, 1.0, %v1490_v60 }
 0x1a7   : > { %v1445_v27 = vmax.f32 %v1179_v21, 0.0  ;;  %v1537_v19 = vsel %vm1506_vm1, 1.0, %v1444_v20  ;;  %v4971_v32 = vsel %vm1506_vm1, 1.0, %v1491_v1  ;;  %vm1676_vm13 = vcmp.eq.s32.totalorder %v4959_v59, %v4789_v57 }
 0x1a8   : > { %vm3430_vm0 = vmpackc.low %vm1682_vm14, %vm1676_vm13  ;;  %vm1675_vm2 = vcmp.eq.s32.totalorder %v4959_v59, %v4913_v48  ;;  %v5985_v24 = vpack.c.bf16 %v4971_v32, %v4967_v31 }
 0x1a9   : > { %v1538_v34 = vsel %vm1506_vm1, 1.0, %v1445_v27  ;;  %vm3432_vm6 = vmpackc.low %vm1681_vm3, %vm1675_vm2 }
 0x1aa   : > { %v1183_v62 = vpop.f32.mrb[64].mxu0  ;;  %v1955_v63 = vpack.c.bf16 %v1538_v34, %v1537_v19  ;;  %v1605_v19 = vadd.s32 48, %v4770_v41  ;;  %v1606_v34 = vadd.s32 56, %v4770_v41 }
 0x1ab   : > { %v1184_v44 = vadd.f32 %v4648_v50, %v1183_v62  ;;  %v3882_v45 = vpop.f32.mrb[65].mxu0 }
 0x1ac   : > { %v1186_v58 = vpop.f32.mrb[66].mxu0  ;;  %3610 = vmatprep.subr.bf16.mxu1 %v1955_v63  ;;  %v5014_v4 = vadd.s32 %v4776_v54, %v1605_v19  ;;  %v5017_v5 = vadd.s32 %v4776_v54, %v1606_v34 }
 0x1ad   : > { %v1446_v11 = vmax.f32 %v1184_v44, 0.0  ;;  %v1187_v12 = vadd.f32 %v4648_v50, %v1186_v58  ;;  %v3883_v13 = vpop.f32.mrb[67].mxu0  ;;  %3611 = vmatpush3.bf16.msra.mxu1 %v1947_v33  ;;  %v1367_v33 = vpop.f32.mrb[24].mxu1 }
 0x1ae   : > { %v3974_v20 = vpop.f32.mrb[25].mxu1  ;;  %v1368_v51 = vadd.f32 %v4648_v50, %v1367_v33  ;;  %vm1688_vm4 = vcmp.eq.s32.totalorder %v5014_v4, %v4789_v57  ;;  %vm1694_vm5 = vcmp.eq.s32.totalorder %v5017_v5, %v4789_v57  ;;  %vm1687_vm8 = vcmp.eq.s32.totalorder %v5014_v4, %v4913_v48 }
 0x1af   : > { %v1447_v6 = vmax.f32 %v1187_v12, 0.0  ;;  %v4975_v14 = vsel %vm1506_vm1, 1.0, %v1446_v11  ;;  %v1370_v26 = vpop.f32.mrb[26].mxu1  ;;  %v1607_v20 = vadd.s32 64, %v4770_v41  ;;  %vm3434_vm7 = vmpackc.low %vm1694_vm5, %vm1688_vm4 }
 0x1b0   : > { %3425 = vmatmul.mubr.msk.bf16.vlgmr.msra.gmra.mrb[48].mxu1 %vm3424_vm9, %v5947_v9  ;;  %v3975_v61 = vpop.f32.mrb[27].mxu1  ;;  %v1492_v63 = vmax.f32 %v1368_v51, 0.0  ;;  %v1371_v39 = vadd.f32 %v4648_v50, %v1370_v26  ;;  %vm1693_vm9 = vcmp.eq.s32.totalorder %v5017_v5, %v4913_v48 }
 0x1b1   : > { %v4979_v15 = vsel %vm1506_vm1, 1.0, %v1447_v6  ;;  %3427 = vmatprep.mubr.msk.bf16.mxu1 %vm3426_vm10, %v5947_v9  ;;  %v1375_v1 = vpop.f32.mrb[28].mxu1  ;;  %vm3436_vm12 = vmpackc.low %vm1693_vm9, %vm1687_vm8 }
 0x1b2   : > { %v1191_v22 = vpop.f32.mrb[68].mxu0  ;;  %v5011_v46 = vsel %vm1506_vm1, 1.0, %v1492_v63  ;;  %v1493_v53 = vmax.f32 %v1371_v39, 0.0  ;;  %v3978_v51 = vpop.f32.mrb[29].mxu1 }
 0x1b3   : > { %v1192_v27 = vadd.f32 %v4648_v50, %v1191_v22  ;;  %v3886_v18 = vpop.f32.mrb[69].mxu0  ;;  %v1376_v22 = vadd.f32 %v4648_v50, %v1375_v1  ;;  %v1378_v19 = vpop.f32.mrb[30].mxu1 }
 0x1b4   : > { %v1194_v62 = vpop.f32.mrb[70].mxu0  ;;  %v5022_v11 = vsel %vm1506_vm1, 1.0, %v1493_v53  ;;  %v1608_v18 = vadd.s32 72, %v4770_v41 }
 0x1b5   : > { %v1448_v43 = vmax.f32 %v1192_v27, 0.0  ;;  %v1195_v44 = vadd.f32 %v4648_v50, %v1194_v62  ;;  %v3887_v45 = vpop.f32.mrb[71].mxu0  ;;  %v1494_v61 = vmax.f32 %v1376_v22, 0.0  ;;  %v3979_v62 = vpop.f32.mrb[31].mxu1  ;;  %v5986_v36 = vpack.c.bf16 %v5022_v11, %v5011_v46 }
 0x1b6   : > { %v5058_v45 = vadd.s32 %v4776_v54, %v1607_v20 }
 0x1b7   : > { %v1449_v58 = vmax.f32 %v1195_v44, 0.0  ;;  %v5026_v12 = vsel %vm1506_vm1, 1.0, %v1448_v43  ;;  %v1379_v44 = vadd.f32 %v4648_v50, %v1378_v19  ;;  %v5065_v1 = vsel %vm1506_vm1, 1.0, %v1494_v61 }
 0x1b8   : > { %3429 = vmatmul.mubr.msk.bf16.gmra.mrb[52].mxu1 %vm3428_vm15, %v5947_v9  ;;  %5961 = vst [vmem:[#allocation9_spill] sm:$0xff] %v5065_v1  ;;  %v1609_v19 = vadd.s32 80, %v4770_v41  ;;  %vm1700_vm10 = vcmp.eq.s32.totalorder %v5058_v45, %v4789_v57  ;;  %vm1699_vm14 = vcmp.eq.s32.totalorder %v5058_v45, %v4913_v48 }
 0x1b9   : > { %v5030_v13 = vsel %vm1506_vm1, 1.0, %v1449_v58  ;;  %3431 = vmatprep.mubr.msk.bf16.mxu1 %vm3430_vm0, %v5947_v9  ;;  %v5061_v58 = vadd.s32 %v4776_v54, %v1608_v18 }
 0x1ba   : > { %v1199_v33 = vpop.f32.mrb[72].mxu0 }
 0x1bb   : > { %v1200_v26 = vadd.f32 %v4648_v50, %v1199_v33  ;;  %v3890_v27 = vpop.f32.mrb[73].mxu0  ;;  %v1495_v33 = vmax.f32 %v1379_v44, 0.0  ;;  %vm1706_vm11 = vcmp.eq.s32.totalorder %v5061_v58, %v4789_v57  ;;  %vm1705_vm15 = vcmp.eq.s32.totalorder %v5061_v58, %v4913_v48 }
 0x1bc   : > { %v1202_v34 = vpop.f32.mrb[74].mxu0  ;;  %vm3438_vm13 = vmpackc.low %vm1706_vm11, %vm1700_vm10 }
 0x1bd   : > { %v1450_v63 = vmax.f32 %v1200_v26, 0.0  ;;  %v1203_v39 = vadd.f32 %v4648_v50, %v1202_v34  ;;  %v3891_v43 = vpop.f32.mrb[75].mxu0  ;;  %v5083_v51 = vsel %vm1506_vm1, 1.0, %v1495_v33  ;;  %v1383_v26 = vpop.f32.mrb[32].mxu1  ;;  %vm3440_vm3 = vmpackc.low %vm1705_vm15, %vm1699_vm14 }
 0x1be   : > { %5962 = vst [vmem:[#allocation10_spill] sm:$0xff] %v5083_v51  ;;  %v1384_v61 = vadd.f32 %v4648_v50, %v1383_v26  ;;  %v3982_v62 = vpop.f32.mrb[33].mxu1  ;;  %v1610_v43 = vadd.s32 88, %v4770_v41 }
 0x1bf   : > { %v1451_v53 = vmax.f32 %v1203_v39, 0.0  ;;  %v5072_v22 = vsel %vm1506_vm1, 1.0, %v1450_v63  ;;  %v1386_v44 = vpop.f32.mrb[34].mxu1  ;;  %v5106_v62 = vadd.s32 %v4776_v54, %v1609_v19  ;;  %v5988_v31 = vld [vmem:[#allocation9_spill] sm:$0xff] }
 0x1c0   : > { %3433 = vmatmul.mubr.msk.bf16.gmra.mrb[56].mxu1 %vm3432_vm6, %v5947_v9  ;;  %v1496_v33 = vmax.f32 %v1384_v61, 0.0  ;;  %v3983_v0 = vpop.f32.mrb[35].mxu1 }
 0x1c1   : > { %v5076_v20 = vsel %vm1506_vm1, 1.0, %v1451_v53  ;;  %3435 = vmatprep.mubr.msk.bf16.mxu1 %vm3434_vm7, %v5947_v9  ;;  %v5109_v0 = vadd.s32 %v4776_v54, %v1610_v43  ;;  %vm1712_vm0 = vcmp.eq.s32.totalorder %v5106_v62, %v4789_v57  ;;  %vm1711_vm5 = vcmp.eq.s32.totalorder %v5106_v62, %v4913_v48 }
 0x1c2   : > { %v1207_v18 = vpop.f32.mrb[76].mxu0  ;;  %v5113_v61 = vsel %vm1506_vm1, 1.0, %v1496_v33 }
 0x1c3   : > { %v1208_v63 = vadd.f32 %v4648_v50, %v1207_v18  ;;  %v3894_v39 = vpop.f32.mrb[77].mxu0  ;;  %v1387_v18 = vadd.f32 %v4648_v50, %v1386_v44  ;;  %5963 = vst [vmem:[#allocation11_spill] sm:$0xff] %v5113_v61  ;;  %vm1718_vm2 = vcmp.eq.s32.totalorder %v5109_v0, %v4789_v57  ;;  %vm1717_vm6 = vcmp.eq.s32.totalorder %v5109_v0, %v4913_v48 }
 0x1c4   : > { %v1210_v53 = vpop.f32.mrb[78].mxu0  ;;  %vm3442_vm4 = vmpackc.low %vm1718_vm2, %vm1712_vm0 }
 0x1c5   : > { %v1452_v2 = vmax.f32 %v1208_v63, 0.0  ;;  %v1211_v34 = vadd.f32 %v4648_v50, %v1210_v53  ;;  %v3895_v26 = vpop.f32.mrb[79].mxu0  ;;  %v1497_v63 = vmax.f32 %v1387_v18, 0.0  ;;  %vm3444_vm8 = vmpackc.low %vm1717_vm6, %vm1711_vm5  ;;  %v5987_v17 = vld [vmem:[#allocation10_spill] sm:$0xff] }
 0x1c6   : > { %v5989_v32 = vpack.c.bf16 %v5987_v17, %v5988_v31 }
 0x1c7   : > { %v1453_v39 = vmax.f32 %v1211_v34, 0.0  ;;  %v5118_v53 = vsel %vm1506_vm1, 1.0, %v1452_v2  ;;  %v5129_v19 = vsel %vm1506_vm1, 1.0, %v1497_v63  ;;  %v1391_v34 = vpop.f32.mrb[36].mxu1  ;;  %v1611_v63 = vadd.s32 96, %v4770_v41 }
 0x1c8   : > { %3437 = vmatmul.mubr.msk.bf16.gmra.mrb[60].mxu1 %vm3436_vm12, %v5947_v9  ;;  %5964 = vst [vmem:[#allocation12_spill] sm:$0xff] %v5129_v19  ;;  %v1392_v26 = vadd.f32 %v4648_v50, %v1391_v34  ;;  %v3986_v18 = vpop.f32.mrb[37].mxu1 }
 0x1c9   : > { %v5122_v44 = vsel %vm1506_vm1, 1.0, %v1453_v39  ;;  %3439 = vmatprep.mubr.msk.bf16.mxu1 %vm3438_vm13, %v5947_v9  ;;  %v1394_v16 = vpop.f32.mrb[38].mxu1  ;;  %v5153_v18 = vadd.s32 %v4776_v54, %v1611_v63 }
 0x1ca   : > { %v1215_v33 = vpop.f32.mrb[80].mxu0  ;;  %v1498_v3 = vmax.f32 %v1392_v26, 0.0  ;;  %v3987_v47 = vpop.f32.mrb[39].mxu1  ;;  %v5991_v11 = vld [vmem:[#allocation11_spill] sm:$0xff] }
 0x1cb   : > { %v1216_v39 = vadd.f32 %v4648_v50, %v1215_v33  ;;  %v3898_v60 = vpop.f32.mrb[81].mxu0  ;;  %vm1724_vm7 = vcmp.eq.s32.totalorder %v5153_v18, %v4789_v57  ;;  %vm1723_vm10 = vcmp.eq.s32.totalorder %v5153_v18, %v4913_v48 }
 0x1cc   : > { %v1218_v38 = vpop.f32.mrb[82].mxu0  ;;  %v1395_v60 = vadd.f32 %v4648_v50, %v1394_v16  ;;  %v5157_v47 = vsel %vm1506_vm1, 1.0, %v1498_v3  ;;  %v1399_v3 = vpop.f32.mrb[40].mxu1  ;;  %vm3446_vm9 = vmpackc.low %vm1724_vm7, %vm1724_vm7 }
 0x1cd   : > { %v1454_v35 = vmax.f32 %v1216_v39, 0.0  ;;  %v1219_v2 = vadd.f32 %v4648_v50, %v1218_v38  ;;  %v3899_v34 = vpop.f32.mrb[83].mxu0  ;;  %5965 = vst [vmem:[#allocation13_spill] sm:$0xff] %v5157_v47  ;;  %v1400_v63 = vadd.f32 %v4648_v50, %v1399_v3  ;;  %vm3448_vm13 = vmpackc.low %vm1723_vm10, %vm1723_vm10 }
 0x1ce   : > { %v1499_v38 = vmax.f32 %v1395_v60, 0.0  ;;  %v3990_v34 = vpop.f32.mrb[41].mxu1 }
 0x1cf   : > { %v1455_v33 = vmax.f32 %v1219_v2, 0.0  ;;  %v5162_v26 = vsel %vm1506_vm1, 1.0, %v1454_v35  ;;  %v1402_v23 = vpop.f32.mrb[42].mxu1  ;;  %v1500_v43 = vmax.f32 %v1400_v63, 0.0  ;;  %v5990_v46 = vld [vmem:[#allocation12_spill] sm:$0xff] }
 0x1d0   : > { %3441 = vmatmul.mubr.msk.bf16.gmra.mrb[64].mxu1 %vm3440_vm3, %v5947_v9  ;;  %v5173_v54 = vsel %vm1506_vm1, 1.0, %v1499_v38  ;;  %v1641_v38 = vsub.s32 3, %v4770_v41  ;;  %v3991_v27 = vpop.f32.mrb[43].mxu1  ;;  %v1403_v3 = vadd.f32 %v4648_v50, %v1402_v23 }
 0x1d1   : > { %v5166_v39 = vsel %vm1506_vm1, 1.0, %v1455_v33  ;;  %3443 = vmatprep.mubr.msk.bf16.mxu1 %vm3442_vm4, %v5947_v9  ;;  %5966 = vst [vmem:[#allocation14_spill] sm:$0xff] %v5173_v54  ;;  %v5199_v27 = vsel %vm1506_vm1, 1.0, %v1500_v43 }
 0x1d2   : > { %v1223_v2 = vpop.f32.mrb[84].mxu0  ;;  %5967 = vst [vmem:[#allocation15_spill] sm:$0xff] %v5199_v27 }
 0x1d3   : > { %v1224_v60 = vadd.f32 %v4648_v50, %v1223_v2  ;;  %v3902_v33 = vpop.f32.mrb[85].mxu0  ;;  %v5195_v2 = vrot.slane %v4779_v55, %v1641_v38 }
 0x1d4   : > { %v1226_v16 = vpop.f32.mrb[86].mxu0 }
 0x1d5   : > { %v1456_v6 = vmax.f32 %v1224_v60, 0.0  ;;  %v1227_v21 = vadd.f32 %v4648_v50, %v1226_v16  ;;  %v3903_v9 = vpop.f32.mrb[87].mxu0  ;;  %v1501_v16 = vmax.f32 %v1403_v3, 0.0  ;;  %vm1654_vm11 = vcmp.eq.s32.totalorder %v4783_v56, %v5195_v2 }
 0x1d6   : > { %v5968_v9 = vmov 1.0|1.0   ;;  %vm1660_vm12 = vcmp.eq.s32.totalorder %v4786_v49, %v5195_v2  ;;  %vm1666_vm2 = vcmp.eq.s32.totalorder %v4916_v28, %v5195_v2  ;;  %vm1672_vm3 = vcmp.eq.s32.totalorder %v4919_v29, %v5195_v2 }
 0x1d7   : > { %v1457_v57 = vmax.f32 %v1227_v21, 0.0  ;;  %v5204_v63 = vsel %vm1506_vm1, 1.0, %v1456_v6  ;;  %v5213_v23 = vsel %vm1506_vm1, 1.0, %v1501_v16  ;;  %v1407_v21 = vpop.f32.mrb[44].mxu1  ;;  %vm3450_vm14 = vmpackc.low %vm1660_vm12, %vm1654_vm11 }
 0x1d8   : > { %3445 = vmatmul.mubr.msk.bf16.gmra.mrb[68].mxu1 %vm3444_vm8, %v5968_v9  ;;  %5969 = vst [vmem:[#allocation16_spill] sm:$0xff] %v5213_v23  ;;  %v1408_v33 = vadd.f32 %v4648_v50, %v1407_v21  ;;  %v3994_v38 = vpop.f32.mrb[45].mxu1  ;;  %vm3454_vm5 = vmpackc.low %vm1672_vm3, %vm1666_vm2  ;;  %vm1678_vm8 = vcmp.eq.s32.totalorder %v4959_v59, %v5195_v2 }
 0x1d9   : > { %v5208_v34 = vsel %vm1506_vm1, 1.0, %v1457_v57  ;;  %3447 = vmatprep.mubr.msk.bf16.mxu1 %vm3446_vm9, %v5968_v9  ;;  %v1410_v16 = vpop.f32.mrb[46].mxu1  ;;  %vm1684_vm9 = vcmp.eq.s32.totalorder %v4962_v7, %v5195_v2 }
 0x1da   : > { %v1231_v60 = vpop.f32.mrb[88].mxu0  ;;  %v1502_v43 = vmax.f32 %v1408_v33, 0.0  ;;  %v3995_v47 = vpop.f32.mrb[47].mxu1  ;;  %v1411_v21 = vadd.f32 %v4648_v50, %v1410_v16 }
 0x1db   : > { %v1232_v3 = vadd.f32 %v4648_v50, %v1231_v60  ;;  %v3906_v57 = vpop.f32.mrb[89].mxu0 }
 0x1dc   : > { %v1234_v35 = vpop.f32.mrb[90].mxu0  ;;  %v5231_v38 = vsel %vm1506_vm1, 1.0, %v1502_v43  ;;  %v1503_v57 = vmax.f32 %v1411_v21, 0.0 }
 0x1dd   : > { %v1458_v48 = vmax.f32 %v1232_v3, 0.0  ;;  %v1235_v54 = vadd.f32 %v4648_v50, %v1234_v35  ;;  %v3907_v6 = vpop.f32.mrb[91].mxu0  ;;  %5970 = vst [vmem:[#allocation17_spill] sm:$0xff] %v5231_v38 }
 0x1de   : > { %v5245_v50 = vsel %vm1506_vm1, 1.0, %v1503_v57  ;;  %v5254_v6 = vld [vmem:[%s5933_s6] ss:$0 sm:$0xff] }
 0x1df   : > { %v1459_v60 = vmax.f32 %v1235_v54, 0.0  ;;  %v5236_v33 = vsel %vm1506_vm1, 1.0, %v1458_v48  ;;  %5971 = vst [vmem:[#allocation18_spill] sm:$0xff] %v5245_v50 }
 0x1e0   : > { %3449 = vmatmul.mubr.msk.bf16.gmra.mrb[72].mxu1 %vm3448_vm13, %v5968_v9  ;;  %vm1690_vm13 = vcmp.eq.s32.totalorder %v5014_v4, %v5195_v2 }
 0x1e1   : > { %v5240_v47 = vsel %vm1506_vm1, 1.0, %v1459_v60  ;;  %3451 = vmatprep.mubr.msk.bf16.mxu1 %vm3450_vm14, %v5968_v9  ;;  %vm1696_vm14 = vcmp.eq.s32.totalorder %v5017_v5, %v5195_v2 }
 0x1e2   : > { %v1239_v35 = vpop.f32.mrb[92].mxu0 }
 0x1e3   : > { %v1240_v3 = vadd.f32 %v5254_v6, %v1239_v35  ;;  %v3910_v16 = vpop.f32.mrb[93].mxu0 }
 0x1e4   : > { %v1242_v48 = vpop.f32.mrb[94].mxu0 }
 0x1e5   : > { %v1460_v21 = vmax.f32 %v1240_v3, 0.0  ;;  %v1243_v60 = vadd.f32 %v5254_v6, %v1242_v48  ;;  %v3911_v57 = vpop.f32.mrb[95].mxu0 }
 0x1e7   : > { %v1461_v27 = vmax.f32 %v1243_v60, 0.0  ;;  %v5260_v54 = vsel %vm1506_vm1, 1.0, %v1460_v21 }
 0x1e9   : > { %v5264_v43 = vsel %vm1506_vm1, 1.0, %v1461_v27 }
 0x1ea   : > { %v1247_v50 = vpop.f32.mrb[96].mxu0 }
 0x1eb   : > { %v1248_v35 = vadd.f32 %v5254_v6, %v1247_v50  ;;  %v3914_v16 = vpop.f32.mrb[97].mxu0 }
 0x1ec   : > { %v1250_v3 = vpop.f32.mrb[98].mxu0 }
 0x1ed   : > { %v1462_v23 = vmax.f32 %v1248_v35, 0.0  ;;  %v1251_v48 = vadd.f32 %v5254_v6, %v1250_v3  ;;  %v3915_v60 = vpop.f32.mrb[99].mxu0  ;;  %v5972_v3 = vpack.c.bf16 %v4979_v15, %v4975_v14  ;;  %v5973_v14 = vpack.c.bf16 %v5030_v13, %v5026_v12 }
 0x1ee   : > { %v5974_v12 = vpack.c.bf16 %v5076_v20, %v5072_v22  ;;  %v5975_v22 = vpack.c.bf16 %v5122_v44, %v5118_v53  ;;  %v5976_v53 = vpack.c.bf16 %v5166_v39, %v5162_v26  ;;  %v5977_v26 = vpack.c.bf16 %v5208_v34, %v5204_v63 }
 0x1ef   : > { %v1463_v57 = vmax.f32 %v1251_v48, 0.0  ;;  %v1555_v21 = vsel %vm1506_vm1, 1.0, %v1462_v23 }
 0x1f1   : > { %v1556_v27 = vsel %vm1506_vm1, 1.0, %v1463_v57 }
 0x1f2   : > { %v1255_v61 = vpop.f32.mrb[100].mxu0  ;;  %v1964_v19 = vpack.c.bf16 %v1556_v27, %v1555_v21 }
 0x1f3   : > { %v1256_v38 = vadd.f32 %v5254_v6, %v1255_v61  ;;  %v3918_v1 = vpop.f32.mrb[101].mxu0 }
 0x1f4   : > { %v1258_v51 = vpop.f32.mrb[102].mxu0  ;;  %3654 = vmatprep.subr.bf16.mxu1 %v1964_v19 }
 0x1f5   : > { %v1464_v50 = vmax.f32 %v1256_v38, 0.0  ;;  %v1259_v35 = vadd.f32 %v5254_v6, %v1258_v51  ;;  %v3919_v16 = vpop.f32.mrb[103].mxu0  ;;  %3655 = vmatpush3.bf16.msra.mxu1 %v5972_v3 }
 0x1f7   : > { %v1465_v48 = vmax.f32 %v1259_v35, 0.0  ;;  %v1557_v23 = vsel %vm1506_vm1, 1.0, %v1464_v50 }
 0x1f9   : > { %v1558_v60 = vsel %vm1506_vm1, 1.0, %v1465_v48 }
 0x1fa   : > { %v1263_v57 = vpop.f32.mrb[104].mxu0  ;;  %v1965_v61 = vpack.c.bf16 %v1558_v60, %v1557_v23 }
 0x1fb   : > { %v1264_v1 = vadd.f32 %v5254_v6, %v1263_v57  ;;  %v3922_v19 = vpop.f32.mrb[105].mxu0 }
 0x1fc   : > { %v1266_v38 = vpop.f32.mrb[106].mxu0  ;;  %3656 = vmatprep.subr.bf16.mxu1 %v1965_v61 }
 0x1fd   : > { %v1466_v51 = vmax.f32 %v1264_v1, 0.0  ;;  %v1267_v21 = vadd.f32 %v5254_v6, %v1266_v38  ;;  %v3923_v27 = vpop.f32.mrb[107].mxu0  ;;  %3657 = vmatpush3.bf16.msra.mxu1 %v5973_v14 }
 0x1ff   : > { %v1467_v15 = vmax.f32 %v1267_v21, 0.0  ;;  %v1559_v50 = vsel %vm1506_vm1, 1.0, %v1466_v51 }
 0x201   : > { %v1560_v35 = vsel %vm1506_vm1, 1.0, %v1467_v15 }
 0x202   : > { %v1271_v16 = vpop.f32.mrb[108].mxu0  ;;  %v1966_v3 = vpack.c.bf16 %v1560_v35, %v1559_v50 }
 0x203   : > { %v1272_v48 = vadd.f32 %v5254_v6, %v1271_v16  ;;  %v3926_v23 = vpop.f32.mrb[109].mxu0 }
 0x204   : > { %v1274_v60 = vpop.f32.mrb[110].mxu0  ;;  %3658 = vmatprep.subr.bf16.mxu1 %v1966_v3 }
 0x205   : > { %v1468_v57 = vmax.f32 %v1272_v48, 0.0  ;;  %v1275_v61 = vadd.f32 %v5254_v6, %v1274_v60  ;;  %v3927_v1 = vpop.f32.mrb[111].mxu0  ;;  %3659 = vmatpush3.bf16.msra.mxu1 %v5974_v12 }
 0x207   : > { %v1469_v13 = vmax.f32 %v1275_v61, 0.0  ;;  %v1561_v19 = vsel %vm1506_vm1, 1.0, %v1468_v57 }
 0x209   : > { %v1562_v38 = vsel %vm1506_vm1, 1.0, %v1469_v13 }
 0x20a   : > { %v1279_v51 = vpop.f32.mrb[112].mxu0  ;;  %v1967_v21 = vpack.c.bf16 %v1562_v38, %v1561_v19 }
 0x20b   : > { %v1280_v27 = vadd.f32 %v5254_v6, %v1279_v51  ;;  %v3930_v14 = vpop.f32.mrb[113].mxu0 }
 0x20c   : > { %v1282_v15 = vpop.f32.mrb[114].mxu0  ;;  %3660 = vmatprep.subr.bf16.mxu1 %v1967_v21 }
 0x20d   : > { %v1470_v50 = vmax.f32 %v1280_v27, 0.0  ;;  %v1283_v35 = vadd.f32 %v5254_v6, %v1282_v15  ;;  %v3931_v16 = vpop.f32.mrb[115].mxu0  ;;  %3661 = vmatpush3.bf16.msra.mxu1 %v5975_v22 }
 0x20f   : > { %v1471_v20 = vmax.f32 %v1283_v35, 0.0  ;;  %v1563_v3 = vsel %vm1506_vm1, 1.0, %v1470_v50 }
 0x211   : > { %v1564_v48 = vsel %vm1506_vm1, 1.0, %v1471_v20 }
 0x212   : > { %v1287_v23 = vpop.f32.mrb[116].mxu0  ;;  %v1968_v60 = vpack.c.bf16 %v1564_v48, %v1563_v3 }
 0x213   : > { %v1288_v57 = vadd.f32 %v5254_v6, %v1287_v23  ;;  %v3934_v61 = vpop.f32.mrb[117].mxu0 }
 0x214   : > { %v1290_v1 = vpop.f32.mrb[118].mxu0  ;;  %3662 = vmatprep.subr.bf16.mxu1 %v1968_v60  ;;  %v1637_v60 = vsub.s32 2, %v4770_v41 }
 0x215   : > { %v1472_v12 = vmax.f32 %v1288_v57, 0.0  ;;  %v1291_v13 = vadd.f32 %v5254_v6, %v1290_v1  ;;  %v3935_v19 = vpop.f32.mrb[119].mxu0  ;;  %3663 = vmatpush3.bf16.msra.mxu1 %v5976_v53 }
 0x216   : > { %v5335_v19 = vrot.slane %v4779_v55, %v1637_v60 }
 0x217   : > { %v1473_v44 = vmax.f32 %v1291_v13, 0.0  ;;  %v1565_v38 = vsel %vm1506_vm1, 1.0, %v1472_v12  ;;  %v5978_v13 = vpack.c.bf16 %v5240_v47, %v5236_v33 }
 0x218   : > { %vm1653_vm15 = vcmp.eq.s32.totalorder %v4783_v56, %v5335_v19  ;;  %vm1659_vm0 = vcmp.eq.s32.totalorder %v4786_v49, %v5335_v19  ;;  %vm1665_vm6 = vcmp.eq.s32.totalorder %v4916_v28, %v5335_v19  ;;  %vm1671_vm7 = vcmp.eq.s32.totalorder %v4919_v29, %v5335_v19 }
 0x219   : > { %v1566_v51 = vsel %vm1506_vm1, 1.0, %v1473_v44  ;;  %vm3452_vm4 = vmpackc.low %vm1659_vm0, %vm1653_vm15  ;;  %vm1677_vm11 = vcmp.eq.s32.totalorder %v4959_v59, %v5335_v19  ;;  %vm1683_vm12 = vcmp.eq.s32.totalorder %v4962_v7, %v5335_v19  ;;  %vm1689_vm2 = vcmp.eq.s32.totalorder %v5014_v4, %v5335_v19 }
 0x21a   : > { %v1295_v21 = vpop.f32.mrb[120].mxu0  ;;  %v1969_v27 = vpack.c.bf16 %v1566_v51, %v1565_v38  ;;  %vm3456_vm10 = vmpackc.low %vm1671_vm7, %vm1665_vm6  ;;  %vm1695_vm3 = vcmp.eq.s32.totalorder %v5017_v5, %v5335_v19 }
 0x21b   : > { %v1296_v14 = vadd.f32 %v5254_v6, %v1295_v21  ;;  %v3938_v15 = vpop.f32.mrb[121].mxu0  ;;  %vm3460_vm15 = vmpackc.low %vm1683_vm12, %vm1677_vm11 }
 0x21c   : > { %v1298_v50 = vpop.f32.mrb[122].mxu0  ;;  %3664 = vmatprep.subr.bf16.mxu1 %v1969_v27  ;;  %vm3462_vm0 = vmpackc.low %vm1696_vm14, %vm1690_vm13  ;;  %vm1713_vm13 = vcmp.eq.s32.totalorder %v5106_v62, %v5335_v19  ;;  %vm1719_vm14 = vcmp.eq.s32.totalorder %v5109_v0, %v5335_v19 }
 0x21d   : > { %v1474_v35 = vmax.f32 %v1296_v14, 0.0  ;;  %v1299_v16 = vadd.f32 %v5254_v6, %v1298_v50  ;;  %v3939_v22 = vpop.f32.mrb[123].mxu0  ;;  %3665 = vmatpush3.bf16.msra.mxu1 %v5977_v26  ;;  %v5979_v50 = vpack.c.bf16 %v5264_v43, %v5260_v54  ;;  %vm3464_vm6 = vmpackc.low %vm1695_vm3, %vm1689_vm2  ;;  %vm1656_vm3 = vcmp.eq.s32.totalorder %v4783_v56, %v5438_v30 }
 0x21e   : > { %v5993_v54 = vmov 0.0  }
 0x21f   : > { %v1475_v39 = vmax.f32 %v1299_v16, 0.0  ;;  %v1567_v20 = vsel %vm1506_vm1, 1.0, %v1474_v35  ;;  %v4353_v35 = vmov 0   ;;  %v3349_v43 = vsel %vm1656_vm3, 1.0, %v5993_v54 }
 0x220   : > { %vm1698_vm3 = vcmp.eq.s32.totalorder %v5017_v5, %v5438_v30 }
 0x221   : > { %v1568_v3 = vsel %vm1506_vm1, 1.0, %v1475_v39 }
 0x222   : > { %v1303_v48 = vpop.f32.mrb[124].mxu0  ;;  %v1970_v23 = vpack.c.bf16 %v1568_v3, %v1567_v20  ;;  %v1645_v20 = vsub.s32 4, %v4770_v41  ;;  %v5994_v3 = vld [vmem:[#allocation14_spill] sm:$0xff]  ;;  %v5997_v41 = vld [vmem:[#allocation16_spill] sm:$0xff] }
 0x223   : > { %v1304_v57 = vadd.f32 %v5254_v6, %v1303_v48  ;;  %v3942_v61 = vpop.f32.mrb[125].mxu0  ;;  %v5995_v48 = vld [vmem:[#allocation13_spill] sm:$0xff] }
 0x224   : > { %v1306_v1 = vpop.f32.mrb[126].mxu0  ;;  %3666 = vmatprep.subr.bf16.mxu1 %v1970_v23  ;;  %v5996_v23 = vpack.c.bf16 %v5994_v3, %v5995_v48  ;;  %v5998_v61 = vld [vmem:[#allocation15_spill] sm:$0xff] }
 0x225   : > { %v1476_v12 = vmax.f32 %v1304_v57, 0.0  ;;  %v1307_v63 = vadd.f32 %v5254_v6, %v1306_v1  ;;  %v3943_v34 = vpop.f32.mrb[127].mxu0  ;;  %3667 = vmatpush3.bf16.msra.mxu1 %v5978_v13  ;;  %v5463_v57 = vrot.slane %v4203_v37, %v1645_v20  ;;  %v5999_v1 = vpack.c.bf16 %v5997_v41, %v5998_v61  ;;  %v6001_v13 = vld [vmem:[#allocation17_spill] sm:$0xff] }
 0x226   : > { %v6000_v34 = vld [vmem:[#allocation18_spill] sm:$0xff] }
 0x227   : > { %v1477_v53 = vmax.f32 %v1307_v63, 0.0  ;;  %v1569_v44 = vsel %vm1506_vm1, 1.0, %v1476_v12 }
 0x229   : > { %v1570_v38 = vsel %vm1506_vm1, 1.0, %v1477_v53 }
 0x22a   : > { %v1311_v51 = vpop.f32.mrb[128].mxu0  ;;  %v1971_v21 = vpack.c.bf16 %v1570_v38, %v1569_v44 }
 0x22b   : > { %v1312_v33 = vadd.f32 %v5254_v6, %v1311_v51  ;;  %v3946_v47 = vpop.f32.mrb[129].mxu0 }
 0x22c   : > { %v1314_v55 = vpop.f32.mrb[130].mxu0  ;;  %3668 = vmatprep.subr.bf16.mxu1 %v1971_v21 }
 0x22d   : > { %v1478_v27 = vmax.f32 %v1312_v33, 0.0  ;;  %v1315_v14 = vadd.f32 %v5254_v6, %v1314_v55  ;;  %v3947_v15 = vpop.f32.mrb[131].mxu0  ;;  %3669 = vmatpush3.bf16.msra.mxu1 %v5979_v50 }
 0x22e   : > { %2183 = vmatprep.subr.bf16.mxu1 %v4353_v35 }
 0x22f   : > { %v1571_v16 = vsel %vm1506_vm1, 1.0, %v1478_v27  ;;  %v1479_v22 = vmax.f32 %v1315_v14, 0.0 }
 0x230   : > { %3453 = vmatmul.mubr.msk.bf16.vlgmr.msra.gmra.mrb[76].mxu1 %vm3452_vm4, %v5968_v9  ;;  %vm1702_vm4 = vcmp.eq.s32.totalorder %v5058_v45, %v5195_v2 }
 0x231   : > { %v1572_v26 = vsel %vm1506_vm1, 1.0, %v1479_v22  ;;  %3455 = vmatprep.mubr.msk.bf16.mxu1 %vm3454_vm5, %v5968_v9  ;;  %vm3458_vm1 = vmpackc.low %vm1684_vm9, %vm1678_vm8  ;;  %vm1708_vm5 = vcmp.eq.s32.totalorder %v5061_v58, %v5195_v2  ;;  %vm1701_vm8 = vcmp.eq.s32.totalorder %v5058_v45, %v5335_v19  ;;  %vm1707_vm9 = vcmp.eq.s32.totalorder %v5061_v58, %v5335_v19 }
 0x232   : > { %v1972_v6 = vpack.c.bf16 %v1572_v26, %v1571_v16  ;;  %vm3466_vm7 = vmpackc.low %vm1708_vm5, %vm1702_vm4  ;;  %vm1662_vm4 = vcmp.eq.s32.totalorder %v4786_v49, %v5438_v30  ;;  %vm1725_vm5 = vcmp.eq.s32.totalorder %v5153_v18, %v5335_v19  ;;  %v6002_v19 = vpack.c.bf16 %v6000_v34, %v6001_v13 }
 0x233   : > { %vm3468_vm11 = vmpackc.low %vm1707_vm9, %vm1701_vm8  ;;  %v3355_v39 = vsel %vm1662_vm4, 1.0, %v5993_v54  ;;  %vm1668_vm8 = vcmp.eq.s32.totalorder %v4916_v28, %v5438_v30  ;;  %vm1674_vm9 = vcmp.eq.s32.totalorder %v4919_v29, %v5438_v30  ;;  %vm1679_vm4 = vcmp.eq.s32.totalorder %v4959_v59, %v5463_v57 }
 0x234   : > { %2184 = vmatpush1.bf16.msra.mxu1 %v1972_v6  ;;  %v1890_v60 = vpack.c.bf16 %v3355_v39, %v3349_v43  ;;  %v3361_v12 = vsel %vm1668_vm8, 1.0, %v5993_v54  ;;  %v3367_v63 = vsel %vm1674_vm9, 1.0, %v5993_v54  ;;  %vm1704_vm8 = vcmp.eq.s32.totalorder %v5058_v45, %v5438_v30 }
 0x235   : > { %2185 = vmatprep.subr.bf16.mxu1 %v4353_v35  ;;  %v1896_v53 = vpack.c.bf16 %v3367_v63, %v3361_v12  ;;  %vm1710_vm9 = vcmp.eq.s32.totalorder %v5061_v58, %v5438_v30 }
 0x238   : > { %3457 = vmatmul.mubr.msk.bf16.gmra.mrb[80].mxu1 %vm3456_vm10, %v5968_v9  ;;  %vm1714_vm10 = vcmp.eq.s32.totalorder %v5106_v62, %v5195_v2 }
 0x239   : > { %2186 = vmatpush1.bf16.msra.mxu1 %v5980_v52  ;;  %3459 = vmatprep.mubr.msk.bf16.mxu1 %vm3458_vm1, %v5968_v9  ;;  %vm1720_vm1 = vcmp.eq.s32.totalorder %v5109_v0, %v5195_v2 }
 0x23a   : > { %2187 = vmatprep.subr.bf16.mxu1 %v4353_v35  ;;  %vm3470_vm12 = vmpackc.low %vm1720_vm1, %vm1714_vm10  ;;  %vm1655_vm10 = vcmp.eq.s32.totalorder %v4783_v56, %v5463_v57  ;;  %vm1661_vm1 = vcmp.eq.s32.totalorder %v4786_v49, %v5463_v57 }
 0x23d   : > { %2188 = vmatpush1.bf16.msra.mxu1 %v5981_v8 }
 0x23e   : > { %2189 = vmatprep.subr.bf16.mxu1 %v4353_v35 }
 0x240   : > { %3461 = vmatmul.mubr.msk.bf16.gmra.mrb[84].mxu1 %vm3460_vm15, %v5968_v9  ;;  %vm1726_vm15 = vcmp.eq.s32.totalorder %v5153_v18, %v5195_v2  ;;  %v5992_v2 = vpack.c.bf16 %v5990_v46, %v5991_v11 }
 0x241   : > { %2190 = vmatpush1.bf16.msra.mxu1 %v5982_v10  ;;  %3463 = vmatprep.mubr.msk.bf16.mxu1 %vm3462_vm0, %v5968_v9  ;;  %vm3472_vm0 = vmpackc.low %vm1719_vm14, %vm1713_vm13  ;;  %vm1686_vm13 = vcmp.eq.s32.totalorder %v4962_v7, %v5438_v30  ;;  %vm1667_vm14 = vcmp.eq.s32.totalorder %v4916_v28, %v5463_v57 }
 0x242   : > { %2191 = vmatprep.subr.bf16.mxu1 %v4353_v35  ;;  %vm3474_vm2 = vmpackc.low %vm1726_vm15, %vm1726_vm15  ;;  %vm1673_vm15 = vcmp.eq.s32.totalorder %v4919_v29, %v5463_v57  ;;  %v3379_v49 = vsel %vm1686_vm13, 1.0, %v5993_v54  ;;  %v3391_v29 = vsel %vm1698_vm3, 1.0, %v5993_v54  ;;  %vm1722_vm13 = vcmp.eq.s32.totalorder %v5109_v0, %v5438_v30 }
 0x243   : > { %vm1715_vm3 = vcmp.eq.s32.totalorder %v5106_v62, %v5463_v57 }
 0x245   : > { %2192 = vmatpush1.bf16.msra.mxu1 %v5983_v40 }
 0x246   : > { %2193 = vmatprep.subr.bf16.mxu1 %v4353_v35 }
 0x248   : > { %3465 = vmatmul.mubr.msk.bf16.gmra.mrb[88].mxu1 %vm3464_vm6, %v5968_v9  ;;  %vm3476_vm6 = vmpackc.low %vm1725_vm5, %vm1725_vm5  ;;  %vm1685_vm5 = vcmp.eq.s32.totalorder %v4962_v7, %v5463_v57  ;;  %v3403_v7 = vsel %vm1710_vm9, 1.0, %v5993_v54 }
 0x249   : > { %2194 = vmatpush1.bf16.msra.mxu1 %v5984_v42  ;;  %3467 = vmatprep.mubr.msk.bf16.mxu1 %vm3466_vm7, %v5968_v9  ;;  %vm1985_vm7 = vcmask 654336  }
 0x24a   : > { %2195 = vmatprep.subr.bf16.mxu1 %v4353_v35 }
 0x24d   : > { %2196 = vmatpush1.bf16.msra.mxu1 %v5985_v24 }
 0x24e   : > { %2197 = vmatprep.subr.bf16.mxu1 %v4353_v35 }
 0x250   : > { %3469 = vmatmul.mubr.msk.bf16.gmra.mrb[92].mxu1 %vm3468_vm11, %v5968_v9  ;;  %vm3479_vm11 = vmpackc.low %vm1661_vm1, %vm1655_vm10  ;;  %vm1691_vm10 = vcmp.eq.s32.totalorder %v5014_v4, %v5463_v57  ;;  %vm1697_vm1 = vcmp.eq.s32.totalorder %v5017_v5, %v5463_v57  ;;  %v3415_v5 = vsel %vm1722_vm13, 1.0, %v5993_v54 }
 0x251   : > { %2198 = vmatpush1.bf16.msra.mxu1 %v5986_v36  ;;  %3471 = vmatprep.mubr.msk.bf16.mxu1 %vm3470_vm12, %v5968_v9  ;;  %vm1680_vm12 = vcmp.eq.s32.totalorder %v4959_v59, %v5438_v30  ;;  %v3397_v59 = vsel %vm1704_vm8, 1.0, %v5993_v54 }
 0x252   : > { %2199 = vmatprep.subr.bf16.mxu1 %v4353_v35  ;;  %v3373_v56 = vsel %vm1680_vm12, 1.0, %v5993_v54  ;;  %v1914_v51 = vpack.c.bf16 %v3403_v7, %v3397_v59  ;;  %vm1716_vm12 = vcmp.eq.s32.totalorder %v5106_v62, %v5438_v30 }
 0x253   : > { %v1902_v44 = vpack.c.bf16 %v3379_v49, %v3373_v56 }
 0x255   : > { %2200 = vmatpush1.bf16.msra.mxu1 %v5989_v32 }
 0x256   : > { %2201 = vmatprep.subr.bf16.mxu1 %v4353_v35 }
 0x258   : > { %3473 = vmatmul.mubr.msk.bf16.gmra.mrb[96].mxu1 %vm3472_vm0, %v5968_v9  ;;  %vm3482_vm0 = vmpackc.low %vm1673_vm15, %vm1667_vm14  ;;  %vm1703_vm14 = vcmp.eq.s32.totalorder %v5058_v45, %v5463_v57  ;;  %vm1709_vm15 = vcmp.eq.s32.totalorder %v5061_v58, %v5463_v57 }
 0x259   : > { %2202 = vmatpush1.bf16.msra.mxu1 %v5992_v2  ;;  %3475 = vmatprep.mubr.msk.bf16.mxu1 %vm3474_vm2, %v5968_v9  ;;  %vm1692_vm2 = vcmp.eq.s32.totalorder %v5014_v4, %v5438_v30  ;;  %v3409_v4 = vsel %vm1716_vm12, 1.0, %v5993_v54 }
 0x25a   : > { %2203 = vmatprep.subr.bf16.mxu1 %v4353_v35  ;;  %v3385_v28 = vsel %vm1692_vm2, 1.0, %v5993_v54  ;;  %v1920_v47 = vpack.c.bf16 %v3415_v5, %v3409_v4  ;;  %vm1728_vm2 = vcmp.eq.s32.totalorder %v5153_v18, %v5438_v30 }
 0x25b   : > { %v1908_v38 = vpack.c.bf16 %v3391_v29, %v3385_v28  ;;  %v3421_v45 = vsel %vm1728_vm2, 1.0, %v5993_v54 }
 0x25d   : > { %2204 = vmatpush1.bf16.msra.mxu1 %v5996_v23 }
 0x25e   : > { %2205 = vmatprep.subr.bf16.mxu1 %v4353_v35 }
 0x260   : > { %3477 = vmatmul.mubr.msk.bf16.gmra.mrb[100].mxu1 %vm3476_vm6, %v5968_v9  ;;  %vm3485_vm6 = vmpackc.low %vm1685_vm5, %vm1679_vm4  ;;  %vm1721_vm4 = vcmp.eq.s32.totalorder %v5109_v0, %v5463_v57 }
 0x261   : > { %2206 = vmatpush1.bf16.msra.mxu1 %v5999_v1  ;;  %3478 = vmatprep.mubr.msk.bf16.mxu1 %vm1985_vm7, %v1890_v60  ;;  %vm3494_vm5 = vmpackc.low %vm1721_vm4, %vm1715_vm3 }
 0x262   : > { %2207 = vmatprep.subr.bf16.mxu1 %v4353_v35  ;;  %v1926_v35 = vpack.c.bf16 %v3421_v45, %v3421_v45 }
 0x265   : > { %2208 = vmatpush1.bf16.msra.mxu1 %v6002_v19 }
 0x268   : > { %3480 = vmatmul.mubr.msk.bf16.vlgmr.msra.gmra.mrb[104].mxu1 %vm3479_vm11, %v5968_v9  ;;  %vm3488_vm11 = vmpackc.low %vm1697_vm1, %vm1691_vm10 }
 0x269   : > { %3481 = vmatprep.mubr.msk.bf16.mxu1 %vm1985_vm7, %v1896_v53 }
 0x270   : > { %3483 = vmatmul.mubr.msk.bf16.gmra.mrb[108].mxu1 %vm3482_vm0, %v5968_v9  ;;  %vm3491_vm0 = vmpackc.low %vm1709_vm15, %vm1703_vm14 }
 0x271   : > { %3484 = vmatprep.mubr.msk.bf16.mxu1 %vm1985_vm7, %v1902_v44 }
 0x278   : > { %3486 = vmatmul.mubr.msk.bf16.gmra.mrb[112].mxu1 %vm3485_vm6, %v5968_v9  ;;  %vm1727_vm6 = vcmp.eq.s32.totalorder %v5153_v18, %v5463_v57 }
 0x279   : > { %3487 = vmatprep.mubr.msk.bf16.mxu1 %vm1985_vm7, %v1908_v38  ;;  %vm3497_vm8 = vmpackc.low %vm1727_vm6, %vm1727_vm6 }
 0x280   : > { %3489 = vmatmul.mubr.msk.bf16.gmra.mrb[116].mxu1 %vm3488_vm11, %v5968_v9 }
 0x281   : > { %3490 = vmatprep.mubr.msk.bf16.mxu1 %vm1985_vm7, %v1914_v51 }
 0x283   : > { %v3612_v21 = vpop.f32.mrb[48].mxu1 }
 0x284   : > { %v3613_v33 = vpop.f32.mrb[49].mxu1 }
 0x285   : > { %v3614_v55 = vadd.f32 %v3613_v33, %v3612_v21  ;;  %v3615_v27 = vpop.f32.mrb[50].mxu1 }
 0x286   : > { %v3616_v14 = vpop.f32.mrb[51].mxu1 }
 0x287   : > { %v3617_v15 = vadd.f32 %v3616_v14, %v3615_v27 }
 0x288   : > { %3492 = vmatmul.mubr.msk.bf16.gmra.mrb[120].mxu1 %vm3491_vm0, %v5968_v9 }
 0x289   : > { %3493 = vmatprep.mubr.msk.bf16.mxu1 %vm1985_vm7, %v1920_v47 }
 0x28b   : > { %v3618_v58 = vpop.f32.mrb[52].mxu1 }
 0x28c   : > { %v3619_v50 = vpop.f32.mrb[53].mxu1 }
 0x28d   : > { %v3620_v16 = vadd.f32 %v3619_v50, %v3618_v58  ;;  %v3621_v22 = vpop.f32.mrb[54].mxu1 }
 0x28e   : > { %v3622_v26 = vpop.f32.mrb[55].mxu1 }
 0x28f   : > { %v3623_v6 = vadd.f32 %v3622_v26, %v3621_v22 }
 0x290   : > { %3495 = vmatmul.mubr.msk.bf16.gmra.mrb[124].mxu1 %vm3494_vm5, %v5968_v9 }
 0x291   : > { %3496 = vmatprep.mubr.msk.bf16.mxu1 %vm1985_vm7, %v1926_v35 }
 0x293   : > { %v3624_v62 = vpop.f32.mrb[56].mxu1 }
 0x294   : > { %v3625_v52 = vpop.f32.mrb[57].mxu1 }
 0x295   : > { %v3626_v0 = vadd.f32 %v3625_v52, %v3624_v62  ;;  %v3627_v8 = vpop.f32.mrb[58].mxu1 }
 0x296   : > { %v3628_v10 = vpop.f32.mrb[59].mxu1 }
 0x297   : > { %v3629_v40 = vadd.f32 %v3628_v10, %v3627_v8 }
 0x298   : > { %3498 = vmatmul.mubr.msk.bf16.gmra.mrb[128].mxu1 %vm3497_vm8, %v5968_v9 }
 0x29b   : > { %v3630_v42 = vpop.f32.mrb[60].mxu1 }
 0x29c   : > { %v3631_v24 = vpop.f32.mrb[61].mxu1 }
 0x29d   : > { %v3632_v25 = vadd.f32 %v3631_v24, %v3630_v42  ;;  %v3633_v36 = vpop.f32.mrb[62].mxu1 }
 0x29e   : > { %v3634_v37 = vpop.f32.mrb[63].mxu1 }
 0x29f   : > { %v3635_v30 = vadd.f32 %v3634_v37, %v3633_v36 }
 0x2a3   : > { %v3636_v17 = vpop.f32.mrb[64].mxu1 }
 0x2a4   : > { %v3637_v31 = vpop.f32.mrb[65].mxu1 }
 0x2a5   : > { %v3638_v32 = vadd.f32 %v3637_v31, %v3636_v17  ;;  %v3639_v46 = vpop.f32.mrb[66].mxu1 }
 0x2a6   : > { %v3640_v18 = vpop.f32.mrb[67].mxu1 }
 0x2a7   : > { %v3641_v11 = vadd.f32 %v3640_v18, %v3639_v46 }
 0x2ab   : > { %v3642_v2 = vpop.f32.mrb[68].mxu1 }
 0x2ac   : > { %v3643_v54 = vpop.f32.mrb[69].mxu1 }
 0x2ad   : > { %v3644_v43 = vadd.f32 %v3643_v54, %v3642_v2  ;;  %v3645_v39 = vpop.f32.mrb[70].mxu1 }
 0x2ae   : > { %v3646_v20 = vpop.f32.mrb[71].mxu1 }
 0x2af   : > { %v3647_v3 = vadd.f32 %v3646_v20, %v3645_v39 }
 0x2b3   : > { %v3648_v48 = vpop.f32.mrb[72].mxu1 }
 0x2b4   : > { %v3649_v9 = vpop.f32.mrb[73].mxu1 }
 0x2b5   : > { %v3650_v23 = vadd.f32 %v3649_v9, %v3648_v48  ;;  %v3651_v60 = vpop.f32.mrb[74].mxu1  ;;  %v1928_v9 = vld [vmem:[#allocation2 + $0x8] sm:$0xff] }
 0x2b6   : > { %v3652_v57 = vpop.f32.mrb[75].mxu1 }
 0x303   : > { %v3670_v41 = vpop.f32.mrb[76].mxu1 }
 0x304   : > { %v3671_v61 = vpop.f32.mrb[77].mxu1 }
 0x305   : > { %v3672_v1 = vadd.f32 %v3671_v61, %v3670_v41  ;;  %v3673_v12 = vpop.f32.mrb[78].mxu1 }
 0x306   : > { %v3674_v63 = vpop.f32.mrb[79].mxu1 }
 0x307   : > { %v3675_v34 = vadd.f32 %v3674_v63, %v3673_v12  ;;  %v2130_v13 = vadd.f32 %v3672_v1, %v3614_v55 }
 0x309   : > { %v2133_v19 = vadd.f32 %v3675_v34, %v3617_v15  ;;  %v1930_v34 = vld [vmem:[#allocation2 + $0x18] sm:$0xff] }
 0x30b   : > { %v3676_v53 = vpop.f32.mrb[80].mxu1 }
 0x30c   : > { %v3677_v56 = vpop.f32.mrb[81].mxu1 }
 0x30d   : > { %v3678_v49 = vadd.f32 %v3677_v56, %v3676_v53  ;;  %v3679_v44 = vpop.f32.mrb[82].mxu1 }
 0x30e   : > { %v3680_v28 = vpop.f32.mrb[83].mxu1 }
 0x30f   : > { %v3681_v29 = vadd.f32 %v3680_v28, %v3679_v44  ;;  %v2138_v38 = vadd.f32 %v3678_v49, %v3620_v16  ;;  %v1931_v44 = vld [vmem:[#allocation2 + $0x20] sm:$0xff] }
 0x311   : > { %v2141_v59 = vadd.f32 %v3681_v29, %v3623_v6 }
 0x313   : > { %v3682_v7 = vpop.f32.mrb[84].mxu1 }
 0x314   : > { %v3683_v51 = vpop.f32.mrb[85].mxu1 }
 0x315   : > { %v3684_v4 = vadd.f32 %v3683_v51, %v3682_v7  ;;  %v3685_v5 = vpop.f32.mrb[86].mxu1  ;;  %v1932_v7 = vld [vmem:[#allocation2 + $0x28] sm:$0xff] }
 0x316   : > { %v3686_v21 = vpop.f32.mrb[87].mxu1 }
 0x317   : > { %v3687_v33 = vadd.f32 %v3686_v21, %v3685_v5  ;;  %v2146_v47 = vadd.f32 %v3684_v4, %v3626_v0 }
 0x319   : > { %v2149_v27 = vadd.f32 %v3687_v33, %v3629_v40  ;;  %v1933_v33 = vld [vmem:[#allocation2 + $0x30] sm:$0xff] }
 0x31b   : > { %v3688_v14 = vpop.f32.mrb[88].mxu1 }
 0x31c   : > { %v3689_v45 = vpop.f32.mrb[89].mxu1 }
 0x31d   : > { %v3690_v55 = vadd.f32 %v3689_v45, %v3688_v14  ;;  %v3691_v15 = vpop.f32.mrb[90].mxu1 }
 0x31e   : > { %v3692_v58 = vpop.f32.mrb[91].mxu1 }
 0x31f   : > { %v3693_v50 = vadd.f32 %v3692_v58, %v3691_v15  ;;  %v2154_v35 = vadd.f32 %v3690_v55, %v3632_v25  ;;  %v1934_v55 = vld [vmem:[#allocation2 + $0x38] sm:$0xff] }
 0x321   : > { %v5546_v22 = vadd.f32 %v3693_v50, %v3635_v30 }
 0x323   : > { %v3694_v26 = vpop.f32.mrb[92].mxu1 }
 0x324   : > { %v3695_v16 = vpop.f32.mrb[93].mxu1 }
 0x325   : > { %v3696_v6 = vadd.f32 %v3695_v16, %v3694_v26  ;;  %v3697_v62 = vpop.f32.mrb[94].mxu1  ;;  %v1935_v16 = vld [vmem:[#allocation2 + $0x40] sm:$0xff] }
 0x326   : > { %v3698_v52 = vpop.f32.mrb[95].mxu1 }
 0x327   : > { %v3699_v8 = vadd.f32 %v3698_v52, %v3697_v62  ;;  %v5548_v10 = vadd.f32 %v3696_v6, %v3638_v32  ;;  %v1927_v32 = vld [vmem:[#allocation2] sm:$0xff]  ;;  %v1936_v52 = vld [vmem:[#allocation2 + $0x48] sm:$0xff] }
 0x329   : > { %v5550_v42 = vadd.f32 %v3699_v8, %v3641_v11 }
 0x32b   : > { %v3700_v0 = vpop.f32.mrb[96].mxu1 }
 0x32c   : > { %v3701_v40 = vpop.f32.mrb[97].mxu1 }
 0x32d   : > { %v3702_v24 = vadd.f32 %v3701_v40, %v3700_v0  ;;  %v3703_v36 = vpop.f32.mrb[98].mxu1 }
 0x32e   : > { %v3704_v37 = vpop.f32.mrb[99].mxu1 }
 0x32f   : > { %v3705_v17 = vadd.f32 %v3704_v37, %v3703_v36  ;;  %v5552_v31 = vadd.f32 %v3702_v24, %v3644_v43  ;;  %v1937_v36 = vld [vmem:[#allocation2 + $0x50] sm:$0xff] }
 0x331   : > { %v5554_v25 = vadd.f32 %v3705_v17, %v3647_v3  ;;  %v1929_v3 = vld [vmem:[#allocation2 + $0x10] sm:$0xff] }
 0x333   : > { %v3706_v30 = vpop.f32.mrb[100].mxu1 }
 0x334   : > { %v3707_v46 = vpop.f32.mrb[101].mxu1 }
 0x335   : > { %v3708_v18 = vadd.f32 %v3707_v46, %v3706_v30  ;;  %v3709_v2 = vpop.f32.mrb[102].mxu1  ;;  %v1938_v30 = vld [vmem:[#allocation2 + $0x58] sm:$0xff] }
 0x336   : > { %v3710_v54 = vpop.f32.mrb[103].mxu1 }
 0x337   : > { %v5556_v39 = vadd.f32 %v3708_v18, %v3650_v23 }
 0x33b   : > { %v2217_v11 = vpop.f32.mrb[104].mxu1 }
 0x33c   : > { %v2218_v20 = vadd.f32 %v2217_v11, %v2130_v13  ;;  %v2219_v48 = vpop.f32.mrb[105].mxu1 }
 0x33d   : > { %v2220_v60 = vpop.f32.mrb[106].mxu1 }
 0x33e   : > { %v2271_v57 = vadd.f32 %v2218_v20, %v1927_v32  ;;  %v2221_v41 = vadd.f32 %v2220_v60, %v2133_v19  ;;  %v2222_v61 = vpop.f32.mrb[107].mxu1  ;;  %v1939_v32 = vld [vmem:[#allocation2 + $0x60] sm:$0xff] }
 0x340   : > { %2284 = vst [vmem:[#allocation2] sm:$0xff] %v2271_v57  ;;  %v2272_v43 = vadd.f32 %v2221_v41, %v1928_v9 }
 0x342   : > { %2285 = vst [vmem:[#allocation2 + $0x8] sm:$0xff] %v2272_v43 }
 0x343   : > { %v2225_v1 = vpop.f32.mrb[108].mxu1 }
 0x344   : > { %v2226_v12 = vadd.f32 %v2225_v1, %v2138_v38  ;;  %v2227_v63 = vpop.f32.mrb[109].mxu1 }
 0x345   : > { %v2228_v53 = vpop.f32.mrb[110].mxu1 }
 0x346   : > { %v2273_v23 = vadd.f32 %v2226_v12, %v1929_v3  ;;  %v2229_v56 = vadd.f32 %v2228_v53, %v2141_v59  ;;  %v2230_v49 = vpop.f32.mrb[111].mxu1 }
 0x348   : > { %2286 = vst [vmem:[#allocation2 + $0x10] sm:$0xff] %v2273_v23  ;;  %v2274_v13 = vadd.f32 %v2229_v56, %v1930_v34 }
 0x34a   : > { %2287 = vst [vmem:[#allocation2 + $0x18] sm:$0xff] %v2274_v13 }
 0x34b   : > { %v2233_v28 = vpop.f32.mrb[112].mxu1 }
 0x34c   : > { %v2234_v29 = vadd.f32 %v2233_v28, %v2146_v47  ;;  %v2235_v19 = vpop.f32.mrb[113].mxu1 }
 0x34d   : > { %v2236_v51 = vpop.f32.mrb[114].mxu1 }
 0x34e   : > { %v2275_v4 = vadd.f32 %v2234_v29, %v1931_v44  ;;  %v2237_v5 = vadd.f32 %v2236_v51, %v2149_v27  ;;  %v2238_v21 = vpop.f32.mrb[115].mxu1 }
 0x350   : > { %2288 = vst [vmem:[#allocation2 + $0x20] sm:$0xff] %v2275_v4  ;;  %v2276_v38 = vadd.f32 %v2237_v5, %v1932_v7 }
 0x352   : > { %2289 = vst [vmem:[#allocation2 + $0x28] sm:$0xff] %v2276_v38 }
 0x353   : > { %v2241_v14 = vpop.f32.mrb[116].mxu1 }
 0x354   : > { %v2242_v45 = vadd.f32 %v2241_v14, %v2154_v35  ;;  %v2243_v59 = vpop.f32.mrb[117].mxu1 }
 0x355   : > { %v2244_v15 = vpop.f32.mrb[118].mxu1 }
 0x356   : > { %v2277_v58 = vadd.f32 %v2242_v45, %v1933_v33  ;;  %v2245_v50 = vadd.f32 %v2244_v15, %v5546_v22  ;;  %v2246_v26 = vpop.f32.mrb[119].mxu1 }
 0x358   : > { %2290 = vst [vmem:[#allocation2 + $0x30] sm:$0xff] %v2277_v58  ;;  %v2278_v47 = vadd.f32 %v2245_v50, %v1934_v55 }
 0x35a   : > { %2291 = vst [vmem:[#allocation2 + $0x38] sm:$0xff] %v2278_v47 }
 0x35b   : > { %v2249_v6 = vpop.f32.mrb[120].mxu1 }
 0x35c   : > { %v2250_v27 = vadd.f32 %v2249_v6, %v5548_v10  ;;  %v2251_v62 = vpop.f32.mrb[121].mxu1 }
 0x35d   : > { %v2252_v8 = vpop.f32.mrb[122].mxu1 }
 0x35e   : > { %v2279_v0 = vadd.f32 %v2250_v27, %v1935_v16  ;;  %v2253_v35 = vadd.f32 %v2252_v8, %v5550_v42  ;;  %v2254_v40 = vpop.f32.mrb[123].mxu1 }
 0x360   : > { %2292 = vst [vmem:[#allocation2 + $0x40] sm:$0xff] %v2279_v0  ;;  %v2280_v24 = vadd.f32 %v2253_v35, %v1936_v52 }
 0x362   : > { %2293 = vst [vmem:[#allocation2 + $0x48] sm:$0xff] %v2280_v24 }
 0x363   : > { %v2257_v22 = vpop.f32.mrb[124].mxu1 }
 0x364   : > { %v2258_v37 = vadd.f32 %v2257_v22, %v5552_v31  ;;  %v2259_v17 = vpop.f32.mrb[125].mxu1 }
 0x365   : > { %v2260_v46 = vpop.f32.mrb[126].mxu1 }
 0x366   : > { %v2281_v18 = vadd.f32 %v2258_v37, %v1937_v36  ;;  %v2261_v10 = vadd.f32 %v2260_v46, %v5554_v25  ;;  %v2262_v2 = vpop.f32.mrb[127].mxu1 }
 0x368   : > { %2294 = vst [vmem:[#allocation2 + $0x50] sm:$0xff] %v2281_v18  ;;  %v2282_v54 = vadd.f32 %v2261_v10, %v1938_v30 }
 0x36a   : > { %2295 = vst [vmem:[#allocation2 + $0x58] sm:$0xff] %v2282_v54 }
 0x36b   : > { %v2265_v42 = vpop.f32.mrb[128].mxu1 }
 0x36c   : > { %v2266_v11 = vadd.f32 %v2265_v42, %v5556_v39  ;;  %v2267_v20 = vpop.f32.mrb[129].mxu1 }
 0x36d   : > { %v2268_v48 = vpop.f32.mrb[130].mxu1 }
 0x36e   : > { %v2283_v9 = vadd.f32 %v2266_v11, %v1939_v32  ;;  %v2269_v60 = vpop.f32.mrb[131].mxu1 }
 0x370   : > { %2296 = vst [vmem:[#allocation2 + $0x60] sm:$0xff] %v2283_v9 }
 0x371 PF: > { %v5564_v31 = vld [vmem:[#allocation2 + $0x10] sm:$0xff]  ;;  %v5566_v57 = vld [vmem:[#allocation2] sm:$0xff]  ;;  %v5568_v41 = vld [vmem:[#allocation2 + $0x18] sm:$0xff]  ;;  %v4354_v25 = vmov 32   ;;  %vm4355_vm5 = vmmov 0  }
 0x372   : > { %4205 = vset.pattern.permute.xlu1 %v4354_v25  ;;  %4204 = vset.pattern.permute.xlu0 %v4354_v25  ;;  %v2328_v61 = vmax.f32 %v5564_v31, 1.0  ;;  %v2326_v43 = vmax.f32 %v5566_v57, 1.0  ;;  %v5572_v39 = vld [vmem:[#allocation2 + $0x8] sm:$0xff]  ;;  %v2329_v1 = vmax.f32 %v5568_v41, 1.0  ;;  %v5578_v63 = vld [vmem:[#allocation2 + $0x20] sm:$0xff]  ;;  %v5582_v23 = vld [vmem:[#allocation2 + $0x38] sm:$0xff] }
 0x373   : > { %v5574_v3 = vld [vmem:[#allocation2 + $0x28] sm:$0xff]  ;;  %v2327_v12 = vmax.f32 %v5572_v39, 1.0  ;;  %v2330_v53 = vmax.f32 %v5578_v63, 1.0  ;;  %v5584_v56 = vld [vmem:[#allocation2 + $0x30] sm:$0xff]  ;;  %v4206_v13 = vld [vmem:[%s5934_s7 + $0x40] sm:$0xff]   ;;  %vm2315_vm7 = vcmp.gt.f32.partialorder %v5564_v31, 0.0 }
 0x374   : > { %4245 = vrcp.f32 %v2328_v61  ;;  %v2331_v34 = vmax.f32 %v5574_v3, 1.0  ;;  %v5586_v49 = vld [vmem:[#allocation2 + $0x48] sm:$0xff]  ;;  %vm2313_vm9 = vcmp.gt.f32.partialorder %v5566_v57, 0.0  ;;  %vm2316_vm10 = vcmp.gt.f32.partialorder %v5568_v41, 0.0  ;;  %v4207_v44 = vld [vmem:[%s5934_s7] sm:$0xff]   ;;  %3712 = vmatprep.subr.bf16.mxu0 %v4206_v13  ;;  %4100 = vmatprep.subr.bf16.mxu1 %v4206_v13  ;;  %v5606_v4 = vld [vmem:[#allocation2 + $0x58] sm:$0xff] }
 0x375   : > { %4247 = vrcp.f32 %v2326_v43  ;;  %vm2314_vm1 = vcmp.gt.f32.partialorder %v5572_v39, 0.0  ;;  %v2333_v28 = vmax.f32 %v5582_v23, 1.0  ;;  %v5599_v29 = vld [vmem:[#allocation2 + $0x40] sm:$0xff]  ;;  %v4208_v19 = vld [vmem:[%s5934_s7 + $0x48] sm:$0xff]   ;;  %v2332_v7 = vmax.f32 %v5584_v56, 1.0  ;;  %3713 = vmatpush3.bf16.msra.mxu0 %v4207_v44  ;;  %4108 = vmatpush3.bf16.msra.mxu1 %v4207_v44  ;;  %v5612_v21 = vld [vmem:[#allocation2 + $0x50] sm:$0xff] }
 0x376   : > { %4249 = vrcp.f32 %v2329_v1  ;;  %v2335_v51 = vmax.f32 %v5586_v49, 1.0  ;;  %v4209_v5 = vld [vmem:[%s5934_s7 + $0x8] sm:$0xff]   ;;  %vm2318_vm11 = vcmp.gt.f32.partialorder %v5574_v3, 0.0  ;;  %3714 = vmatprep.subr.bf16.mxu0 %v4208_v19  ;;  %4101 = vmatprep.subr.bf16.mxu1 %v4208_v19  ;;  %v2334_v38 = vmax.f32 %v5599_v29, 1.0  ;;  %v4210_v33 = vld [vmem:[%s5934_s7 + $0x50] sm:$0xff]   ;;  %v4212_v55 = vld [vmem:[%s5934_s7 + $0x58] sm:$0xff]  }
 0x377   : > { %4251 = vrcp.f32 %v2327_v12  ;;  %v2337_v14 = vmax.f32 %v5606_v4, 1.0  ;;  %v4211_v45 = vld [vmem:[%s5934_s7 + $0x10] sm:$0xff]   ;;  %vm2317_vm12 = vcmp.gt.f32.partialorder %v5578_v63, 0.0  ;;  %v5628_v50 = vld [vmem:[#allocation2 + $0x60] sm:$0xff]  ;;  %v2336_v16 = vmax.f32 %v5612_v21, 1.0  ;;  %v4213_v62 = vld [vmem:[%s5934_s7 + $0x18] sm:$0xff]  }
 0x378   : > { %4253 = vrcp.f32 %v2331_v34  ;;  %v4214_v0 = vld [vmem:[%s5934_s7 + $0x60] sm:$0xff]   ;;  %vm2320_vm13 = vcmp.gt.f32.partialorder %v5582_v23, 0.0  ;;  %vm2319_vm14 = vcmp.gt.f32.partialorder %v5584_v56, 0.0  ;;  %vm2322_vm15 = vcmp.gt.f32.partialorder %v5586_v49, 0.0  ;;  %v4216_v17 = vld [vmem:[%s5934_s7 + $0x68] sm:$0xff]   ;;  %v4218_v42 = vld [vmem:[%s5934_s7 + $0x70] sm:$0xff]  }
 0x379   : > { %4255 = vrcp.f32 %v2330_v53  ;;  %3715 = vmatpush3.bf16.msra.mxu0 %v4209_v5  ;;  %4109 = vmatpush3.bf16.msra.mxu1 %v4209_v5  ;;  %v2338_v40 = vmax.f32 %v5628_v50, 1.0  ;;  %v4215_v36 = vld [vmem:[%s5934_s7 + $0x20] sm:$0xff]   ;;  %vm2321_vm0 = vcmp.gt.f32.partialorder %v5599_v29, 0.0  ;;  %vm2324_vm2 = vcmp.gt.f32.partialorder %v5606_v4, 0.0  ;;  %v4217_v2 = vld [vmem:[%s5934_s7 + $0x28] sm:$0xff]   ;;  %v4219_v48 = vld [vmem:[%s5934_s7 + $0x30] sm:$0xff]  }
 0x37a   : > { %4257 = vrcp.f32 %v2333_v28  ;;  %3716 = vmatprep.subr.bf16.mxu0 %v4210_v33  ;;  %4102 = vmatprep.subr.bf16.mxu1 %v4210_v33  ;;  %vm2323_vm3 = vcmp.gt.f32.partialorder %v5612_v21, 0.0  ;;  %v4222_v18 = vld [vmem:[%s4471_s30] sm:$0xff]   ;;  %vm2325_vm4 = vcmp.gt.f32.partialorder %v5628_v50, 0.0  ;;  %v4220_v9 = vld [vmem:[%s5934_s7 + $0x78] sm:$0xff]   ;;  %v6003_v13 = vmov 0.0  }
 0x37b   : > { %4259 = vrcp.f32 %v2332_v7  ;;  %2683 = vmatprep.mubr.bf16.mxu0 %v4222_v18  ;;  %v4221_v43 = vld [vmem:[%s5934_s7 + $0x38] sm:$0xff]   ;;  %v4224_v12 = vld [vmem:[%s4471_s30 + $0x20] sm:$0xff]  }
 0x37c   : > { %4261 = vrcp.f32 %v2335_v51  ;;  %2715 = vmatprep.mubr.bf16.mxu1 %v4224_v12 }
 0x37d   : > { %4263 = vrcp.f32 %v2334_v38  ;;  %3717 = vmatpush3.bf16.msra.mxu0 %v4211_v45  ;;  %4110 = vmatpush3.bf16.msra.mxu1 %v4211_v45  ;;  %v4223_v38 = vld [vmem:[%s4471_s30 + $0x8] sm:$0xff]  }
 0x37e   : > { %v4246_v59 = vpop.eup %4245  ;;  %4265 = vrcp.f32 %v2337_v14  ;;  %3718 = vmatprep.subr.bf16.mxu0 %v4212_v55  ;;  %4103 = vmatprep.subr.bf16.mxu1 %v4212_v55 }
 0x37f   : > { %v4248_v15 = vpop.eup %4247  ;;  %v2367_v58 = vsel %vm2315_vm7, %v4246_v59, 0.0  ;;  %4267 = vrcp.f32 %v2336_v16 }
 0x380   : > { %v4250_v26 = vpop.eup %4249  ;;  %2390 = vperm.xlu1 %4205, %v2367_v58   ;;  %v2365_v47 = vsel %vm2313_vm9, %v4248_v15, 0.0  ;;  %4269 = vrcp.f32 %v2338_v40 }
 0x381   : > { %v4252_v6 = vpop.eup %4251  ;;  %2380 = vperm.xlu0 %4204, %v2365_v47   ;;  %v2368_v27 = vsel %vm2316_vm10, %v4250_v26, 0.0  ;;  %3719 = vmatpush3.bf16.msra.mxu0 %v4213_v62  ;;  %v4225_v26 = vld [vmem:[%s4471_s30 + $0x10] sm:$0xff]  }
 0x382   : > { %v4254_v52 = vpop.eup %4253  ;;  %v2366_v8 = vsel %vm2314_vm1, %v4252_v6, 0.0  ;;  %3720 = vmatprep.subr.bf16.mxu0 %v4214_v0  ;;  %4111 = vmatpush3.bf16.msra.mxu1 %v4213_v62 }
 0x383   : > { %v4256_v35 = vpop.eup %4255  ;;  %v2370_v24 = vsel %vm2318_vm11, %v4254_v52, 0.0  ;;  %4104 = vmatprep.subr.bf16.mxu1 %v4214_v0  ;;  %v4227_v0 = vld [vmem:[%s4471_s30 + $0x18] sm:$0xff]  }
 0x384   : > { %2395 = vperm.xlu1 %4205, %v2368_v27   ;;  %v4258_v22 = vpop.eup %4257  ;;  %v2369_v37 = vsel %vm2317_vm12, %v4256_v35, 0.0  ;;  %v4226_v27 = vld [vmem:[%s4471_s30 + $0x28] sm:$0xff]  }
 0x385   : > { %2385 = vperm.xlu0 %4204, %v2366_v8   ;;  %v4260_v30 = vpop.eup %4259  ;;  %v2372_v10 = vsel %vm2320_vm13, %v4258_v22, 0.0  ;;  %3721 = vmatpush3.bf16.msra.mxu0 %v4215_v36 }
 0x386   : > { %v4262_v46 = vpop.eup %4261  ;;  %v2371_v32 = vsel %vm2319_vm14, %v4260_v30, 0.0  ;;  %3722 = vmatprep.subr.bf16.mxu0 %v4216_v17  ;;  %4112 = vmatpush3.bf16.msra.mxu1 %v4215_v36 }
 0x387   : > { %v4264_v54 = vpop.eup %4263  ;;  %v2374_v20 = vsel %vm2322_vm15, %v4262_v46, 0.0  ;;  %4105 = vmatprep.subr.bf16.mxu1 %v4216_v17 }
 0x388   : > { %2405 = vperm.xlu1 %4205, %v2370_v24   ;;  %v4266_v11 = vpop.eup %4265  ;;  %v2373_v60 = vsel %vm2321_vm0, %v4264_v54, 0.0 }
 0x389   : > { %2400 = vperm.xlu0 %4204, %v2369_v37   ;;  %3723 = vmatpush3.bf16.msra.mxu0 %v4217_v2  ;;  %v2376_v25 = vsel %vm2324_vm2, %v4266_v11, 0.0  ;;  %v4268_v61 = vpop.eup %4267 }
 0x38a   : > { %3724 = vmatprep.subr.bf16.mxu0 %v4218_v42  ;;  %4113 = vmatpush3.bf16.msra.mxu1 %v4217_v2  ;;  %v2375_v1 = vsel %vm2323_vm3, %v4268_v61, 0.0  ;;  %v4270_v34 = vpop.eup %4269 }
 0x38b   : > { %4106 = vmatprep.subr.bf16.mxu1 %v4218_v42  ;;  %v2377_v53 = vsel %vm2325_vm4, %v4270_v34, 0.0 }
 0x38c   : > { %2415 = vperm.xlu1 %4205, %v2372_v10  }
 0x38d   : > { %2410 = vperm.xlu0 %4204, %v2371_v32   ;;  %3725 = vmatpush3.bf16.msra.mxu0 %v4219_v48 }
 0x38e   : > { %3726 = vmatprep.subr.bf16.mxu0 %v4220_v9  ;;  %4114 = vmatpush3.bf16.msra.mxu1 %v4219_v48 }
 0x38f   : > { %4107 = vmatprep.subr.bf16.mxu1 %v4220_v9 }
 0x390   : > { %2425 = vperm.xlu1 %4205, %v2374_v20  }
 0x391   : > { %2420 = vperm.xlu0 %4204, %v2373_v60   ;;  %3727 = vmatpush3.bf16.msra.mxu0 %v4221_v43 }
 0x392   : > { %4115 = vmatpush3.bf16.msra.mxu1 %v4221_v43  ;;  %4040 = vmatprep.subr.bf16.mxu0 %v6003_v13 }
 0x393   : > { %3996 = vmatprep.subr.bf16.mxu1 %v6003_v13 }
 0x394   : > { %2435 = vperm.xlu1 %4205, %v2376_v25  }
 0x395   : > { %2430 = vperm.xlu0 %4204, %v2375_v1  }
 0x399   : > { %2440 = vperm.xlu0 %4204, %v2377_v53  }
 0x3ff   : > { %v2391_v44 = vpop.permute.xlu1 %2390 }
 0x400   : > { %v2381_v28 = vpop.permute.xlu0 %2380  ;;  %v2445_v59 = vmul.f32 %v2391_v44, %v5564_v31 }
 0x401   : > { %v2443_v51 = vmul.f32 %v2381_v28, %v5566_v57 }
 0x403   : > { %v2396_v19 = vpop.permute.xlu1 %2395 }
 0x404   : > { %v2386_v7 = vpop.permute.xlu0 %2385  ;;  %v2446_v55 = vmul.f32 %v2396_v19, %v5568_v41 }
 0x405   : > { %v2444_v5 = vmul.f32 %v2386_v7, %v5572_v39 }
 0x406   : > { %v2457_v47 = vpack.c.bf16 %v2446_v55, %v2445_v59 }
 0x407   : > { %v2456_v33 = vpack.c.bf16 %v2444_v5, %v2443_v51  ;;  %v2406_v14 = vpop.permute.xlu1 %2405 }
 0x408   : > { %v2401_v45 = vpop.permute.xlu0 %2400  ;;  %v2448_v62 = vmul.f32 %v2406_v14, %v5574_v3 }
 0x409   : > { %2684 = vmatmul.mubr.bf16.vlgmr.msra.gmra.mrb[0].mxu0 %v2456_v33  ;;  %v2447_v31 = vmul.f32 %v2401_v45, %v5578_v63 }
 0x40a   : > { %2691 = vmatprep.mubr.bf16.mxu0 %v4223_v38 }
 0x40b   : > { %v2416_v15 = vpop.permute.xlu1 %2415  ;;  %v2458_v35 = vpack.c.bf16 %v2448_v62, %v2447_v31  ;;  %v4232_v31 = vld [vmem:[%s5936_s9 + $0x18] sm:$0xff]  }
 0x40c   : > { %v2411_v58 = vpop.permute.xlu0 %2410  ;;  %v2450_v24 = vmul.f32 %v2416_v15, %v5582_v23  ;;  %v4230_v23 = vld [vmem:[%s5936_s9 + $0x8] sm:$0xff]  }
 0x40d   : > { %v2449_v3 = vmul.f32 %v2411_v58, %v5584_v56  ;;  %v4231_v56 = vld [vmem:[%s5936_s9 + $0x10] sm:$0xff]  }
 0x40f   : > { %v2426_v16 = vpop.permute.xlu1 %2425  ;;  %v2459_v22 = vpack.c.bf16 %v2450_v24, %v2449_v3  ;;  %v4233_v3 = vld [vmem:[%s5936_s9 + $0x20] sm:$0xff]  }
 0x410   : > { %v2452_v57 = vmul.f32 %v2426_v16, %v5586_v49  ;;  %v2421_v39 = vpop.permute.xlu0 %2420 }
 0x411   : > { %v2451_v6 = vmul.f32 %v2421_v39, %v5599_v29  ;;  %2692 = vmatmul.mubr.bf16.gmra.mrb[4].mxu0 %v2457_v47  ;;  %v4228_v29 = vld [vmem:[%s4471_s30 + $0x30] ss:$0 sps:$4 sm:$0xff]  }
 0x412   : > { %2699 = vmatprep.mubr.bf16.mxu0 %v4225_v26 }
 0x413   : > { %v2460_v41 = vpack.c.bf16 %v2452_v57, %v2451_v6  ;;  %v2436_v52 = vpop.permute.xlu1 %2435 }
 0x414   : > { %v2431_v8 = vpop.permute.xlu0 %2430  ;;  %v2454_v49 = vmul.f32 %v2436_v52, %v5606_v4  ;;  %v4229_v4 = vld [vmem:[%s5936_s9] sm:$0xff]  }
 0x415   : > { %2716 = vmatmul.mubr.bf16.vlgmr.msra.gmra.mrb[0].mxu1 %v2460_v41  ;;  %v2453_v40 = vmul.f32 %v2431_v8, %v5612_v21 }
 0x416   : > { %2723 = vmatprep.mubr.bf16.mxu1 %v4226_v27  ;;  %3997 = vmatpush3.bf16.msra.mxu1 %v4229_v4 }
 0x417   : > { %v2461_v36 = vpack.c.bf16 %v2454_v49, %v2453_v40  ;;  %3998 = vmatprep.subr.bf16.mxu1 %v6003_v13 }
 0x418   : > { %v2441_v63 = vpop.permute.xlu0 %2440 }
 0x419   : > { %2700 = vmatmul.mubr.bf16.gmra.mrb[8].mxu0 %v2458_v35  ;;  %v2455_v37 = vmul.f32 %v2441_v63, %v5628_v50  ;;  %v5727_v50 = vld [vmem:[%s5935_s8] ss:$0 sm:$0xff] }
 0x41a   : > { %2707 = vmatprep.mubr.bf16.mxu0 %v4227_v0  ;;  %3999 = vmatpush3.bf16.msra.mxu1 %v4230_v23 }
 0x41b   : > { %v2462_v17 = vpack.c.bf16 %v2455_v37, %v2455_v37  ;;  %4000 = vmatprep.subr.bf16.mxu1 %v6003_v13 }
 0x41d   : > { %2724 = vmatmul.mubr.bf16.gmra.mrb[4].mxu1 %v2461_v36 }
 0x41e   : > { %2731 = vmatprep.mubr.bf16.mxu1 %v4228_v29  ;;  %4001 = vmatpush3.bf16.msra.mxu1 %v4231_v56 }
 0x41f   : > { %4002 = vmatprep.subr.bf16.mxu1 %v6003_v13 }
 0x421   : > { %2708 = vmatmul.mubr.bf16.gmra.mrb[12].mxu0 %v2459_v22 }
 0x422   : > { %4003 = vmatpush3.bf16.msra.mxu1 %v4232_v31  ;;  %4056 = vmatprep.mubr.msk.bf16.mxu0 %vm4355_vm5, %v6003_v13 }
 0x423   : > { %4004 = vmatprep.subr.bf16.mxu1 %v6003_v13 }
 0x425   : > { %2732 = vmatmul.mubr.bf16.gmra.mrb[8].mxu1 %v2462_v17 }
 0x426   : > { %4005 = vmatpush3.bf16.msra.mxu1 %v4233_v3  ;;  %4012 = vmatprep.mubr.msk.bf16.mxu1 %vm4355_vm5, %v6003_v13 }
 0x427   : > { %4006 = vmatprep.subr.bf16.mxu1 %v6003_v13 }
 0x4dc   : > { %v3728_v21 = vpop.f32.mrb[0].mxu0 }
 0x4dd   : > { %v3729_v30 = vpop.f32.mrb[1].mxu0 }
 0x4de   : > { %v3730_v46 = vadd.f32 %v3729_v30, %v3728_v21  ;;  %v3731_v18 = vpop.f32.mrb[2].mxu0 }
 0x4df   : > { %v3732_v10 = vpop.f32.mrb[3].mxu0 }
 0x4e0   : > { %v2686_v2 = vadd.f32 %v3730_v46, %v5727_v50  ;;  %v3733_v54 = vadd.f32 %v3732_v10, %v3731_v18  ;;  %v4234_v18 = vld [vmem:[%s5936_s9 + $0x28] sm:$0xff]  }
 0x4e1   : > { %4007 = vmatpush3.bf16.msra.mxu1 %v4234_v18 }
 0x4e2   : > { %v5730_v32 = vmax.f32 %v2686_v2, 0.0  ;;  %v2689_v42 = vadd.f32 %v3733_v54, %v5727_v50  ;;  %4008 = vmatprep.subr.bf16.mxu1 %v6003_v13 }
 0x4e4   : > { %v5733_v11 = vmax.f32 %v2689_v42, 0.0  ;;  %v3734_v20 = vpop.f32.mrb[4].mxu0  ;;  %v2752_v48 = vmul.f32 %v5730_v32, %v5730_v32 }
 0x4e5   : > { %v3735_v9 = vpop.f32.mrb[5].mxu0 }
 0x4e6   : > { %v3736_v60 = vadd.f32 %v3735_v9, %v3734_v20  ;;  %v3737_v25 = vpop.f32.mrb[6].mxu0  ;;  %2765 = vadd.xlane.f32.xlu1 %v2752_v48  ;;  %v2753_v61 = vmul.f32 %v5733_v11, %v5733_v11 }
 0x4e7   : > { %v3738_v43 = vpop.f32.mrb[7].mxu0 }
 0x4e8   : > { %v2694_v1 = vadd.f32 %v3736_v60, %v5727_v50  ;;  %v3739_v12 = vadd.f32 %v3738_v43, %v3737_v25  ;;  %2767 = vadd.xlane.f32.xlu0 %v2753_v61  ;;  %v3752_v34 = vpop.f32.mrb[0].mxu1  ;;  %v4235_v25 = vld [vmem:[%s5936_s9 + $0x30] sm:$0xff]  }
 0x4e9   : > { %v3753_v53 = vpop.f32.mrb[1].mxu1  ;;  %4009 = vmatpush3.bf16.msra.mxu1 %v4235_v25 }
 0x4ea   : > { %v5740_v44 = vmax.f32 %v2694_v1, 0.0  ;;  %v2697_v28 = vadd.f32 %v3739_v12, %v5727_v50  ;;  %v3754_v19 = vadd.f32 %v3753_v53, %v3752_v34  ;;  %v3755_v7 = vpop.f32.mrb[2].mxu1  ;;  %4010 = vmatprep.subr.bf16.mxu1 %v6003_v13  ;;  %v4236_v53 = vld [vmem:[%s5936_s9 + $0x38] sm:$0xff]  }
 0x4eb   : > { %v3756_v51 = vpop.f32.mrb[3].mxu1 }
 0x4ec   : > { %v5743_v5 = vmax.f32 %v2697_v28, 0.0  ;;  %v3757_v38 = vadd.f32 %v3756_v51, %v3755_v7  ;;  %v3740_v33 = vpop.f32.mrb[8].mxu0  ;;  %v2754_v14 = vmul.f32 %v5740_v44, %v5740_v44  ;;  %v2718_v63 = vadd.f32 %v3754_v19, %v5727_v50  ;;  %v4237_v51 = vld [vmem:[%s5938_s11] sm:$0xff]  }
 0x4ed   : > { %v3741_v45 = vpop.f32.mrb[9].mxu0  ;;  %4011 = vmatpush3.bf16.msra.mxu1 %v4236_v53  ;;  %4041 = vmatpush3.bf16.msra.mxu0 %v4237_v51 }
 0x4ee   : > { %v3742_v59 = vadd.f32 %v3741_v45, %v3740_v33  ;;  %2769 = vadd.xlane.f32.xlu0 %v2754_v14  ;;  %v3743_v55 = vpop.f32.mrb[10].mxu0  ;;  %v2755_v15 = vmul.f32 %v5743_v5, %v5743_v5  ;;  %v2721_v23 = vadd.f32 %v3757_v38, %v5727_v50  ;;  %v5776_v2 = vmax.f32 %v2718_v63, 0.0  ;;  %v4238_v38 = vld [vmem:[%s5938_s11 + $0x8] sm:$0xff]   ;;  %4042 = vmatprep.subr.bf16.mxu0 %v6003_v13  ;;  %v4239_v33 = vld [vmem:[%s5938_s11 + $0x10] sm:$0xff]   ;;  %v4240_v14 = vld [vmem:[%s5938_s11 + $0x18] sm:$0xff]  }
 0x4ef   : > { %v3744_v58 = vpop.f32.mrb[11].mxu0  ;;  %v4241_v45 = vld [vmem:[%s5938_s11 + $0x20] sm:$0xff]  }
 0x4f0   : > { %v2702_v26 = vadd.f32 %v3742_v59, %v5727_v50  ;;  %v3745_v47 = vadd.f32 %v3744_v58, %v3743_v55  ;;  %2771 = vadd.xlane.f32.xlu1 %v2755_v15  ;;  %v3758_v16 = vpop.f32.mrb[4].mxu1  ;;  %v5784_v48 = vmax.f32 %v2721_v23, 0.0  ;;  %v2760_v1 = vmul.f32 %v5776_v2, %v5776_v2  ;;  %v4242_v59 = vld [vmem:[%s5938_s11 + $0x28] sm:$0xff]  }
 0x4f1   : > { %v3759_v57 = vpop.f32.mrb[5].mxu1  ;;  %4043 = vmatpush3.bf16.msra.mxu0 %v4238_v38 }
 0x4f2   : > { %v5750_v39 = vmax.f32 %v2702_v26, 0.0  ;;  %v2705_v6 = vadd.f32 %v3745_v47, %v5727_v50  ;;  %v3760_v27 = vadd.f32 %v3759_v57, %v3758_v16  ;;  %v3761_v62 = vpop.f32.mrb[6].mxu1  ;;  %v2761_v34 = vmul.f32 %v5784_v48, %v5784_v48  ;;  %4044 = vmatprep.subr.bf16.mxu0 %v6003_v13 }
 0x4f3   : > { %v3762_v41 = vpop.f32.mrb[7].mxu1 }
 0x4f4   : > { %v5756_v52 = vmax.f32 %v2705_v6, 0.0  ;;  %v3763_v8 = vadd.f32 %v3762_v41, %v3761_v62  ;;  %v3746_v0 = vpop.f32.mrb[12].mxu0  ;;  %v2756_v35 = vmul.f32 %v5750_v39, %v5750_v39  ;;  %v2726_v54 = vadd.f32 %v3760_v27, %v5727_v50 }
 0x4f5   : > { %v3747_v49 = vpop.f32.mrb[13].mxu0  ;;  %4045 = vmatpush3.bf16.msra.mxu0 %v4239_v33 }
 0x4f6   : > { %v3748_v40 = vadd.f32 %v3747_v49, %v3746_v0  ;;  %2773 = vadd.xlane.f32.xlu0 %v2756_v35  ;;  %v3749_v29 = vpop.f32.mrb[14].mxu0  ;;  %v2757_v24 = vmul.f32 %v5756_v52, %v5756_v52  ;;  %v2729_v9 = vadd.f32 %v3763_v8, %v5727_v50  ;;  %v5792_v61 = vmax.f32 %v2726_v54, 0.0  ;;  %4046 = vmatprep.subr.bf16.mxu0 %v6003_v13 }
 0x4f7   : > { %v3750_v36 = vpop.f32.mrb[15].mxu0 }
 0x4f8   : > { %v2710_v22 = vadd.f32 %v3748_v40, %v5727_v50  ;;  %v3751_v37 = vadd.f32 %v3750_v36, %v3749_v29  ;;  %2775 = vadd.xlane.f32.xlu1 %v2757_v24  ;;  %v3764_v17 = vpop.f32.mrb[8].mxu1  ;;  %v5798_v12 = vmax.f32 %v2729_v9, 0.0 }
 0x4f9   : > { %v3765_v4 = vpop.f32.mrb[9].mxu1  ;;  %4047 = vmatpush3.bf16.msra.mxu0 %v4240_v14 }
 0x4fa   : > { %v5770_v56 = vmax.f32 %v2710_v22, 0.0  ;;  %v2713_v21 = vadd.f32 %v3751_v37, %v5727_v50  ;;  %v3766_v30 = vadd.f32 %v3765_v4, %v3764_v17  ;;  %v3767_v46 = vpop.f32.mrb[10].mxu1  ;;  %v2763_v19 = vmul.f32 %v5798_v12, %v5798_v12  ;;  %4048 = vmatprep.subr.bf16.mxu0 %v6003_v13 }
 0x4fb   : > { %v3768_v10 = vpop.f32.mrb[11].mxu1 }
 0x4fc   : > { %v5779_v42 = vmax.f32 %v2713_v21, 0.0  ;;  %v2758_v20 = vmul.f32 %v5770_v56, %v5770_v56  ;;  %v2734_v43 = vadd.f32 %v3766_v30, %v5727_v50  ;;  %v2762_v50 = vmul.f32 %v5792_v61, %v5792_v61 }
 0x4fd   : > { %4049 = vmatpush3.bf16.msra.mxu0 %v4241_v45 }
 0x4fe   : > { %2777 = vadd.xlane.f32.xlu0 %v2758_v20  ;;  %v2759_v60 = vmul.f32 %v5779_v42, %v5779_v42  ;;  %v5805_v28 = vmax.f32 %v2734_v43, 0.0  ;;  %4050 = vmatprep.subr.bf16.mxu0 %v6003_v13 }
 0x500   : > { %2779 = vadd.xlane.f32.xlu1 %v2759_v60  ;;  %v2764_v7 = vmul.f32 %v5805_v28, %v5805_v28 }
 0x501   : > { %4051 = vmatpush3.bf16.msra.mxu0 %v4242_v59  ;;  %v4243_v59 = vld [vmem:[%s5938_s11 + $0x30] sm:$0xff]  }
 0x502   : > { %2781 = vadd.xlane.f32.xlu0 %v2760_v1  ;;  %4052 = vmatprep.subr.bf16.mxu0 %v6003_v13 }
 0x504   : > { %2783 = vadd.xlane.f32.xlu1 %v2761_v34 }
 0x505   : > { %4053 = vmatpush3.bf16.msra.mxu0 %v4243_v59 }
 0x506   : > { %2785 = vadd.xlane.f32.xlu0 %v2762_v50  ;;  %4054 = vmatprep.subr.bf16.mxu0 %v6003_v13 }
 0x508   : > { %2787 = vadd.xlane.f32.xlu1 %v2763_v19 }
 0x50a   : > { %2789 = vadd.xlane.f32.xlu0 %v2764_v7 }
 0x573   : > { %v2766_v55 = vpop.xlane.xlu1 %2765 }
 0x574   : > { %v2791_v15 = vmax.f32 %v2766_v55, 1e-24 }
 0x575   : > { %v2768_v58 = vpop.xlane.xlu0 %2767 }
 0x576   : > { %4271 = vrsqrt.f32 %v2791_v15  ;;  %v2792_v26 = vmax.f32 %v2768_v58, 1e-24 }
 0x578   : > { %4273 = vrsqrt.f32 %v2792_v26 }
 0x57b   : > { %v2770_v47 = vpop.xlane.xlu0 %2769 }
 0x57c   : > { %v2793_v16 = vmax.f32 %v2770_v47, 1e-24 }
 0x57d   : > { %v2772_v57 = vpop.xlane.xlu1 %2771 }
 0x57e   : > { %4275 = vrsqrt.f32 %v2793_v16  ;;  %v2794_v6 = vmax.f32 %v2772_v57, 1e-24 }
 0x580   : > { %v4272_v27 = vpop.eup %4271  ;;  %4277 = vrsqrt.f32 %v2794_v6 }
 0x581   : > { %v2817_v31 = vmul.f32 %v4272_v27, %v5730_v32 }
 0x582   : > { %v4274_v62 = vpop.eup %4273 }
 0x583   : > { %v2818_v41 = vmul.f32 %v4274_v62, %v5733_v11  ;;  %v2774_v8 = vpop.xlane.xlu0 %2773 }
 0x584   : > { %v2795_v0 = vmax.f32 %v2774_v8, 1e-24 }
 0x585   : > { %v2776_v35 = vpop.xlane.xlu1 %2775  ;;  %v2830_v49 = vpack.c.bf16 %v2818_v41, %v2817_v31 }
 0x586   : > { %4279 = vrsqrt.f32 %v2795_v0  ;;  %v2796_v40 = vmax.f32 %v2776_v35, 1e-24 }
 0x587   : > { %4013 = vmatmul.mubr.bf16.vlgmr.msra.gmra.mrb[12].mxu1 %v2830_v49 }
 0x588   : > { %v4276_v29 = vpop.eup %4275  ;;  %4281 = vrsqrt.f32 %v2796_v40  ;;  %4016 = vmatprep.mubr.msk.bf16.mxu1 %vm4355_vm5, %v6003_v13 }
 0x589   : > { %v2819_v36 = vmul.f32 %v4276_v29, %v5740_v44 }
 0x58a   : > { %v4278_v24 = vpop.eup %4277 }
 0x58b   : > { %v2778_v3 = vpop.xlane.xlu0 %2777  ;;  %v2820_v32 = vmul.f32 %v4278_v24, %v5743_v5 }
 0x58c   : > { %v2797_v63 = vmax.f32 %v2778_v3, 1e-24 }
 0x58d   : > { %v2780_v11 = vpop.xlane.xlu1 %2779  ;;  %v2831_v22 = vpack.c.bf16 %v2820_v32, %v2819_v36 }
 0x58e   : > { %4283 = vrsqrt.f32 %v2797_v63  ;;  %v2798_v37 = vmax.f32 %v2780_v11, 1e-24 }
 0x58f   : > { %4017 = vmatmul.mubr.bf16.gmra.mrb[16].mxu1 %v2831_v22  ;;  %v2782_v17 = vpop.xlane.xlu0 %2781 }
 0x590   : > { %v4280_v4 = vpop.eup %4279  ;;  %4285 = vrsqrt.f32 %v2798_v37  ;;  %4020 = vmatprep.mubr.msk.bf16.mxu1 %vm4355_vm5, %v6003_v13  ;;  %v2799_v30 = vmax.f32 %v2782_v17, 1e-24 }
 0x591   : > { %v2784_v23 = vpop.xlane.xlu1 %2783  ;;  %v2821_v44 = vmul.f32 %v4280_v4, %v5750_v39 }
 0x592   : > { %v4282_v21 = vpop.eup %4281  ;;  %v2800_v46 = vmax.f32 %v2784_v23, 1e-24 }
 0x593   : > { %v2822_v5 = vmul.f32 %v4282_v21, %v5756_v52  ;;  %v2786_v54 = vpop.xlane.xlu0 %2785 }
 0x594   : > { %4287 = vrsqrt.f32 %v2800_v46  ;;  %v2801_v25 = vmax.f32 %v2786_v54, 1e-24 }
 0x595   : > { %v2788_v18 = vpop.xlane.xlu1 %2787  ;;  %v2832_v10 = vpack.c.bf16 %v2822_v5, %v2821_v44  ;;  %4289 = vrsqrt.f32 %v2799_v30 }
 0x596   : > { %v2802_v9 = vmax.f32 %v2788_v18, 1e-24 }
 0x597   : > { %4021 = vmatmul.mubr.bf16.gmra.mrb[20].mxu1 %v2832_v10  ;;  %v2790_v39 = vpop.xlane.xlu0 %2789 }
 0x598   : > { %v4284_v20 = vpop.eup %4283  ;;  %4024 = vmatprep.mubr.msk.bf16.mxu1 %vm4355_vm5, %v6003_v13  ;;  %4291 = vrsqrt.f32 %v2802_v9  ;;  %v2803_v50 = vmax.f32 %v2790_v39, 1e-24 }
 0x599   : > { %v2823_v43 = vmul.f32 %v4284_v20, %v5770_v56  ;;  %4293 = vrsqrt.f32 %v2801_v25 }
 0x59a   : > { %v4286_v60 = vpop.eup %4285  ;;  %4295 = vrsqrt.f32 %v2803_v50 }
 0x59b   : > { %v2824_v1 = vmul.f32 %v4286_v60, %v5779_v42 }
 0x59d   : > { %v2833_v52 = vpack.c.bf16 %v2824_v1, %v2823_v43 }
 0x59e   : > { %v4288_v34 = vpop.eup %4287 }
 0x59f   : > { %4025 = vmatmul.mubr.bf16.gmra.mrb[24].mxu1 %v2833_v52  ;;  %v4290_v53 = vpop.eup %4289  ;;  %v2826_v19 = vmul.f32 %v4288_v34, %v5784_v48 }
 0x5a0   : > { %4028 = vmatprep.mubr.msk.bf16.mxu1 %vm4355_vm5, %v6003_v13  ;;  %v2825_v7 = vmul.f32 %v4290_v53, %v5776_v2 }
 0x5a2   : > { %v2834_v51 = vpack.c.bf16 %v2826_v19, %v2825_v7  ;;  %v4292_v56 = vpop.eup %4291 }
 0x5a3   : > { %v4294_v42 = vpop.eup %4293  ;;  %v2828_v38 = vmul.f32 %v4292_v56, %v5798_v12  ;;  %v5876_v12 = vld [vmem:[%s5937_s10] ss:$0 sm:$0xff] }
 0x5a4   : > { %v2827_v33 = vmul.f32 %v4294_v42, %v5792_v61  ;;  %v4296_v45 = vpop.eup %4295  ;;  %v4244_v61 = vld [vmem:[%s5938_s11 + $0x38] sm:$0xff]  }
 0x5a5   : > { %v2829_v2 = vmul.f32 %v4296_v45, %v5805_v28  ;;  %4055 = vmatpush3.bf16.msra.mxu0 %v4244_v61  ;;  %v3532_v61 = vld [vmem:[%s5939_s12] ss:$0 sm:$0xff] }
 0x5a6   : > { %v2835_v14 = vpack.c.bf16 %v2828_v38, %v2827_v33 }
 0x5a7   : > { %4029 = vmatmul.mubr.bf16.gmra.mrb[28].mxu1 %v2834_v51  ;;  %v2836_v48 = vpack.c.bf16 %v2829_v2, %v2829_v2 }
 0x5a8   : > { %4032 = vmatprep.mubr.msk.bf16.mxu1 %vm4355_vm5, %v6003_v13 }
 0x5af   : > { %4033 = vmatmul.mubr.bf16.gmra.mrb[32].mxu1 %v2835_v14 }
 0x5b0   : > { %4036 = vmatprep.mubr.msk.bf16.mxu1 %vm4355_vm5, %v6003_v13 }
 0x5b7   : > { %4037 = vmatmul.mubr.bf16.gmra.mrb[36].mxu1 %v2836_v48 }
 0x65a   : > { %v2942_v28 = vpop.f32.mrb[12].mxu1 }
 0x65b   : > { %v2943_v55 = vadd.f32 %v5876_v12, %v2942_v28  ;;  %v4014_v15 = vpop.f32.mrb[13].mxu1 }
 0x65c   : > { %v2945_v58 = vpop.f32.mrb[14].mxu1 }
 0x65d   : > { %v2946_v26 = vadd.f32 %v5876_v12, %v2945_v58  ;;  %v4015_v47 = vpop.f32.mrb[15].mxu1  ;;  %v2996_v16 = vmax.f32 %v2943_v55, 0.0 }
 0x65f   : > { %v2997_v57 = vmax.f32 %v2946_v26, 0.0 }
 0x661   : > { %v3009_v6 = vpack.c.bf16 %v2997_v57, %v2996_v16 }
 0x662   : > { %v2950_v27 = vpop.f32.mrb[16].mxu1 }
 0x663   : > { %v2951_v62 = vadd.f32 %v5876_v12, %v2950_v27  ;;  %v4018_v31 = vpop.f32.mrb[17].mxu1  ;;  %4057 = vmatmul.mubr.bf16.vlgmr.msra.gmra.mrb[16].mxu0 %v3009_v6 }
 0x664   : > { %v2953_v41 = vpop.f32.mrb[18].mxu1  ;;  %4060 = vmatprep.mubr.msk.bf16.mxu0 %vm4355_vm5, %v6003_v13 }
 0x665   : > { %v2954_v8 = vadd.f32 %v5876_v12, %v2953_v41  ;;  %v4019_v0 = vpop.f32.mrb[19].mxu1  ;;  %v2998_v35 = vmax.f32 %v2951_v62, 0.0 }
 0x667   : > { %v2999_v49 = vmax.f32 %v2954_v8, 0.0 }
 0x669   : > { %v3010_v40 = vpack.c.bf16 %v2999_v49, %v2998_v35 }
 0x66a   : > { %v2958_v29 = vpop.f32.mrb[20].mxu1 }
 0x66b   : > { %v2959_v24 = vadd.f32 %v5876_v12, %v2958_v29  ;;  %v4022_v3 = vpop.f32.mrb[21].mxu1  ;;  %4061 = vmatmul.mubr.bf16.gmra.mrb[20].mxu0 %v3010_v40 }
 0x66c   : > { %v2961_v36 = vpop.f32.mrb[22].mxu1  ;;  %4064 = vmatprep.mubr.msk.bf16.mxu0 %vm4355_vm5, %v6003_v13 }
 0x66d   : > { %v2962_v32 = vadd.f32 %v5876_v12, %v2961_v36  ;;  %v4023_v63 = vpop.f32.mrb[23].mxu1  ;;  %v3000_v11 = vmax.f32 %v2959_v24, 0.0 }
 0x66f   : > { %v3001_v22 = vmax.f32 %v2962_v32, 0.0 }
 0x671   : > { %v3011_v37 = vpack.c.bf16 %v3001_v22, %v3000_v11 }
 0x672   : > { %v2966_v17 = vpop.f32.mrb[24].mxu1 }
 0x673   : > { %v2967_v4 = vadd.f32 %v5876_v12, %v2966_v17  ;;  %v4026_v23 = vpop.f32.mrb[25].mxu1  ;;  %4065 = vmatmul.mubr.bf16.gmra.mrb[24].mxu0 %v3011_v37 }
 0x674   : > { %v2969_v21 = vpop.f32.mrb[26].mxu1  ;;  %4068 = vmatprep.mubr.msk.bf16.mxu0 %vm4355_vm5, %v6003_v13 }
 0x675   : > { %v2970_v30 = vadd.f32 %v5876_v12, %v2969_v21  ;;  %v4027_v46 = vpop.f32.mrb[27].mxu1  ;;  %v3002_v44 = vmax.f32 %v2967_v4, 0.0 }
 0x677   : > { %v3003_v5 = vmax.f32 %v2970_v30, 0.0 }
 0x679   : > { %v3012_v18 = vpack.c.bf16 %v3003_v5, %v3002_v44 }
 0x67a   : > { %v2974_v10 = vpop.f32.mrb[28].mxu1 }
 0x67b   : > { %v2975_v54 = vadd.f32 %v5876_v12, %v2974_v10  ;;  %v4030_v20 = vpop.f32.mrb[29].mxu1  ;;  %4069 = vmatmul.mubr.bf16.gmra.mrb[28].mxu0 %v3012_v18 }
 0x67c   : > { %v2977_v9 = vpop.f32.mrb[30].mxu1  ;;  %4072 = vmatprep.mubr.msk.bf16.mxu0 %vm4355_vm5, %v6003_v13 }
 0x67d   : > { %v2978_v60 = vadd.f32 %v5876_v12, %v2977_v9  ;;  %v4031_v25 = vpop.f32.mrb[31].mxu1  ;;  %v3004_v43 = vmax.f32 %v2975_v54, 0.0 }
 0x67f   : > { %v3005_v1 = vmax.f32 %v2978_v60, 0.0 }
 0x681   : > { %v3013_v39 = vpack.c.bf16 %v3005_v1, %v3004_v43 }
 0x682   : > { %v2982_v52 = vpop.f32.mrb[32].mxu1 }
 0x683   : > { %v2983_v34 = vadd.f32 %v5876_v12, %v2982_v52  ;;  %v4034_v53 = vpop.f32.mrb[33].mxu1  ;;  %4073 = vmatmul.mubr.bf16.gmra.mrb[32].mxu0 %v3013_v39 }
 0x684   : > { %v2985_v50 = vpop.f32.mrb[34].mxu1  ;;  %4076 = vmatprep.mubr.msk.bf16.mxu0 %vm4355_vm5, %v6003_v13 }
 0x685   : > { %v2986_v19 = vadd.f32 %v5876_v12, %v2985_v50  ;;  %v4035_v7 = vpop.f32.mrb[35].mxu1  ;;  %v3006_v51 = vmax.f32 %v2983_v34, 0.0 }
 0x687   : > { %v3007_v56 = vmax.f32 %v2986_v19, 0.0 }
 0x689   : > { %v3014_v42 = vpack.c.bf16 %v3007_v56, %v3006_v51 }
 0x68a   : > { %v2990_v38 = vpop.f32.mrb[36].mxu1 }
 0x68b   : > { %v2991_v33 = vadd.f32 %v5876_v12, %v2990_v38  ;;  %v4038_v14 = vpop.f32.mrb[37].mxu1  ;;  %4077 = vmatmul.mubr.bf16.gmra.mrb[36].mxu0 %v3014_v42 }
 0x68c   : > { %v2993_v45 = vpop.f32.mrb[38].mxu1  ;;  %4080 = vmatprep.mubr.msk.bf16.mxu0 %vm4355_vm5, %v6003_v13 }
 0x68d   : > { %v3008_v2 = vmax.f32 %v2991_v33, 0.0  ;;  %v4039_v48 = vpop.f32.mrb[39].mxu1 }
 0x68f   : > { %v3015_v59 = vpack.c.bf16 %v3008_v2, %v3008_v2 }
 0x693   : > { %4081 = vmatmul.mubr.bf16.gmra.mrb[40].mxu0 %v3015_v59 }
 0x736   : > { %v3121_v28 = vpop.f32.mrb[16].mxu0 }
 0x737   : > { %v3122_v55 = vadd.f32 %v3532_v61, %v3121_v28  ;;  %v4058_v12 = vpop.f32.mrb[17].mxu0 }
 0x738   : > { %v3124_v15 = vpop.f32.mrb[18].mxu0 }
 0x739   : > { %3175 = vst [vmem:[%s4476_s0] sm:$0xff] %v3122_v55  ;;  %v3125_v58 = vadd.f32 %v3532_v61, %v3124_v15  ;;  %v4059_v26 = vpop.f32.mrb[19].mxu0 }
 0x73b   : > { %3176 = vst [vmem:[%s4476_s0 + $0x8] sm:$0xff] %v3125_v58 }
 0x73e   : > { %v3129_v13 = vpop.f32.mrb[20].mxu0 }
 0x73f   : > { %v3130_v47 = vadd.f32 %v3532_v61, %v3129_v13  ;;  %v4062_v16 = vpop.f32.mrb[21].mxu0 }
 0x740   : > { %v3132_v57 = vpop.f32.mrb[22].mxu0 }
 0x741   : > { %3177 = vst [vmem:[%s4476_s0 + $0x10] sm:$0xff] %v3130_v47  ;;  %v3133_v6 = vadd.f32 %v3532_v61, %v3132_v57  ;;  %v4063_v27 = vpop.f32.mrb[23].mxu0 }
 0x743   : > { %3178 = vst [vmem:[%s4476_s0 + $0x18] sm:$0xff] %v3133_v6 }
 0x746   : > { %v3137_v62 = vpop.f32.mrb[24].mxu0 }
 0x747   : > { %v3138_v31 = vadd.f32 %v3532_v61, %v3137_v62  ;;  %v4066_v41 = vpop.f32.mrb[25].mxu0 }
 0x748   : > { %v3140_v8 = vpop.f32.mrb[26].mxu0 }
 0x749   : > { %3179 = vst [vmem:[%s4476_s0 + $0x20] sm:$0xff] %v3138_v31  ;;  %v3141_v0 = vadd.f32 %v3532_v61, %v3140_v8  ;;  %v4067_v35 = vpop.f32.mrb[27].mxu0 }
 0x74b   : > { %3180 = vst [vmem:[%s4476_s0 + $0x28] sm:$0xff] %v3141_v0 }
 0x74e   : > { %v3145_v49 = vpop.f32.mrb[28].mxu0 }
 0x74f   : > { %v3146_v40 = vadd.f32 %v3532_v61, %v3145_v49  ;;  %v4070_v29 = vpop.f32.mrb[29].mxu0 }
 0x750   : > { %v3148_v24 = vpop.f32.mrb[30].mxu0 }
 0x751   : > { %3181 = vst [vmem:[%s4476_s0 + $0x30] sm:$0xff] %v3146_v40  ;;  %v3149_v3 = vadd.f32 %v3532_v61, %v3148_v24  ;;  %v4071_v36 = vpop.f32.mrb[31].mxu0 }
 0x753   : > { %3182 = vst [vmem:[%s4476_s0 + $0x38] sm:$0xff] %v3149_v3 }
 0x756   : > { %v3153_v32 = vpop.f32.mrb[32].mxu0 }
 0x757   : > { %v3154_v63 = vadd.f32 %v3532_v61, %v3153_v32  ;;  %v4074_v11 = vpop.f32.mrb[33].mxu0 }
 0x758   : > { %v3156_v22 = vpop.f32.mrb[34].mxu0 }
 0x759   : > { %3183 = vst [vmem:[%s4476_s0 + $0x40] sm:$0xff] %v3154_v63  ;;  %v3157_v37 = vadd.f32 %v3532_v61, %v3156_v22  ;;  %v4075_v17 = vpop.f32.mrb[35].mxu0 }
 0x75b   : > { %3184 = vst [vmem:[%s4476_s0 + $0x48] sm:$0xff] %v3157_v37 }
 0x75e   : > { %v3161_v4 = vpop.f32.mrb[36].mxu0 }
 0x75f   : > { %v3162_v23 = vadd.f32 %v3532_v61, %v3161_v4  ;;  %v4078_v21 = vpop.f32.mrb[37].mxu0 }
 0x760   : > { %v3164_v30 = vpop.f32.mrb[38].mxu0 }
 0x761   : > { %3185 = vst [vmem:[%s4476_s0 + $0x50] sm:$0xff] %v3162_v23  ;;  %v3165_v46 = vadd.f32 %v3532_v61, %v3164_v30  ;;  %v4079_v44 = vpop.f32.mrb[39].mxu0 }
 0x763   : > { %3186 = vst [vmem:[%s4476_s0 + $0x58] sm:$0xff] %v3165_v46 }
 0x766   : > { %v3169_v5 = vpop.f32.mrb[40].mxu0 }
 0x767   : > { %v3170_v18 = vadd.f32 %v3532_v61, %v3169_v5  ;;  %v4082_v10 = vpop.f32.mrb[41].mxu0 }
 0x768   : > { %v3172_v54 = vpop.f32.mrb[42].mxu0 }
 0x769   : > { %3187 = vst [vmem:[%s4476_s0 + $0x60] sm:$0xff] %v3170_v18  ;;  %v4083_v20 = vpop.f32.mrb[43].mxu0 }
 0x76a PF: > { %s33_s18 = sadd.s32 1, %s4345_s18   ;;  %s6004_s1 = sld [smem:[#allocation7_spill]] }
 0x76b   : > { %p30_p4 = scmp.ge.s32.totalorder %s33_s18, 4   ;;  %s6005_s17 = sld [smem:[#allocation8_spill]] }
 0x76d   :  { %32 = sbr.rel (!%p30_p4) target bundleno = 27 (0x1b), region = 112 }

</bundles_post_ra>
